<compile_context>
chip_gen: v6e
topology: v6e:2x2x1
jax: 0.10.0
libtpu: 0.0.40
codegen_flags: <defaults>
</compile_context>

<pallas_src>
import functools

import numpy as np
import jax
import jax.numpy as jnp
from jax import lax
from jax.experimental import pallas as pl
from jax.experimental.pallas import tpu as pltpu

IN_CHANNELS = 3
OUT_CHANNELS = 1
MID = 64  # hidden channel width of the UNet


# ---------------------------------------------------------------------------
# align_corners=True bilinear interpolation matrix (host-side, shape-only)
# ---------------------------------------------------------------------------
def _interp_matrix(n_out, n_in):
    m = np.zeros((n_out, n_in), np.float32)
    if n_out == 1 or n_in == 1:
        m[:, 0] = 1.0
        return jnp.asarray(m)
    scale = (n_in - 1) / (n_out - 1)
    for i in range(n_out):
        s = i * scale
        i0 = min(int(np.floor(s)), n_in - 1)
        i1 = min(i0 + 1, n_in - 1)
        t = s - i0
        m[i, i0] += 1.0 - t
        m[i, i1] += t
    return jnp.asarray(m)


# ---------------------------------------------------------------------------
# Fused UNet kernel: one grid step == one batch element, everything in VMEM.
# ---------------------------------------------------------------------------
def _unet_kernel(x_ref, w1_ref, b1_ref, w2_ref, b2_ref, w3_ref, b3_ref,
                 w4_ref, b4_ref, a_ref, bt_ref, o_ref,
                 pad_x, pad_a, pad_b, *, H, W):
    Hp, Wp = H // 2, W // 2

    def conv3x3_relu(pad_ref, w_ref, b_ref, hh, ww):
        # pad_ref: (hh+2, ww+2, Cin) zero-padded activation in VMEM scratch.
        # Accumulate 9 (hh*ww, Cin) x (Cin, MID) MXU matmuls; bias + ReLU once.
        cin = pad_ref.shape[-1]
        n = hh * ww
        acc = jnp.zeros((n, MID), jnp.float32)
        for dy in range(3):
            for dx in range(3):
                slab = pad_ref[dy:dy + hh, dx:dx + ww, :]       # (hh, ww, Cin)
                acc = acc + jnp.dot(slab.reshape(n, cin), w_ref[dy, dx],
                                    preferred_element_type=jnp.float32)
        return jnp.maximum(acc + b_ref[...], 0.0)               # (hh*ww, MID)

    # ---------------- encoder ----------------
    # conv1 (Cin=3): zero-pad the input inside VMEM, no jnp.pad in XLA.
    pad_x[...] = jnp.zeros_like(pad_x)
    pad_x[1:H + 1, 1:W + 1, :] = x_ref[0]
    a1 = conv3x3_relu(pad_x, w1_ref, b1_ref, H, W)              # (H*W, 64)

    # conv2: re-pad a1 (border of pad_a stays zero after the initial clear).
    pad_a[...] = jnp.zeros_like(pad_a)
    pad_a[1:H + 1, 1:W + 1, :] = a1.reshape(H, W, MID)
    a2 = conv3x3_relu(pad_a, w2_ref, b2_ref, H, W)              # (H*W, 64)

    # 2x2 / stride-2 max pool fused into the conv2 epilogue (flat rows = h*W+w).
    a2 = a2.reshape(Hp, 2, W, MID)
    m = jnp.maximum(a2[:, 0], a2[:, 1])                         # pool over H
    m = m.reshape(Hp, Wp, 2, MID)
    pooled = jnp.maximum(m[:, :, 0], m[:, :, 1])                # (Hp, Wp, 64)

    # ---------------- decoder ----------------
    pad_b[...] = jnp.zeros_like(pad_b)
    pad_b[1:Hp + 1, 1:Wp + 1, :] = pooled
    a3 = conv3x3_relu(pad_b, w3_ref, b3_ref, Hp, Wp)            # (Hp*Wp, 64)
    pad_b[1:Hp + 1, 1:Wp + 1, :] = a3.reshape(Hp, Wp, MID)

    # conv4 (Cout=1): per-tap channel contraction -> (Hp, Wp) plane directly
    # (avoids a 1-lane matmul output), bias + ReLU once.
    plane = jnp.zeros((Hp, Wp), jnp.float32)
    for dy in range(3):
        for dx in range(3):
            slab = pad_b[dy:dy + Hp, dx:dx + Wp, :]             # (Hp, Wp, 64)
            plane = plane + jnp.sum(slab * w4_ref[dy, dx], axis=-1)
    plane = jnp.maximum(plane + b4_ref[...], 0.0)               # (Hp, Wp)

    # Fused bilinear x2 upsample (align_corners=True): A @ plane @ Bt.
    t = jnp.dot(a_ref[...], plane, preferred_element_type=jnp.float32)
    o_ref[0] = jnp.dot(t, bt_ref[...], preferred_element_type=jnp.float32)


def unet_forward(x_nchw, params):
    """x_nchw: (N, 3, H, W) f32 -> (N, 1, H, W) f32 (same as the nn.Module)."""
    x = jnp.transpose(x_nchw, (0, 2, 3, 1)).astype(jnp.float32)   # NCHW -> NHWC
    N, H, W, Cin = x.shape
    Hp, Wp = H // 2, W // 2
    Ho, Wo = 2 * Hp, 2 * Wp

    A = _interp_matrix(Ho, Hp)            # (Ho, Hp)
    Bt = _interp_matrix(Wo, Wp).T         # (Wp, Wo)

    w1, b1 = params["w1"], params["b1"].reshape(1, MID)
    w2, b2 = params["w2"], params["b2"].reshape(1, MID)
    w3, b3 = params["w3"], params["b3"].reshape(1, MID)
    w4 = params["w4"].reshape(3, 3, MID)  # Cout == 1 folded away (lane-dense)
    b4 = params["b4"].reshape(1, 1)

    kernel = functools.partial(_unet_kernel, H=H, W=W)
    out = pl.pallas_call(
        kernel,
        out_shape=jax.ShapeDtypeStruct((N, Ho, Wo), jnp.float32),
        grid=(N,),
        in_specs=[
            pl.BlockSpec((1, H, W, Cin), lambda n: (n, 0, 0, 0)),
            pl.BlockSpec((3, 3, Cin, MID), lambda n: (0, 0, 0, 0)),
            pl.BlockSpec((1, MID), lambda n: (0, 0)),
            pl.BlockSpec((3, 3, MID, MID), lambda n: (0, 0, 0, 0)),
            pl.BlockSpec((1, MID), lambda n: (0, 0)),
            pl.BlockSpec((3, 3, MID, MID), lambda n: (0, 0, 0, 0)),
            pl.BlockSpec((1, MID), lambda n: (0, 0)),
            pl.BlockSpec((3, 3, MID), lambda n: (0, 0, 0)),
            pl.BlockSpec((1, 1), lambda n: (0, 0)),
            pl.BlockSpec((Ho, Hp), lambda n: (0, 0)),
            pl.BlockSpec((Wp, Wo), lambda n: (0, 0)),
        ],
        out_specs=pl.BlockSpec((1, Ho, Wo), lambda n: (n, 0, 0)),
        scratch_shapes=[
            pltpu.VMEM((H + 2, W + 2, Cin), jnp.float32),     # padded input
            pltpu.VMEM((H + 2, W + 2, MID), jnp.float32),     # padded 16x16 act
            pltpu.VMEM((Hp + 2, Wp + 2, MID), jnp.float32),   # padded 8x8 act
        ],
        compiler_params=pltpu.CompilerParams(
            dimension_semantics=("parallel",)),
    )(x, w1, b1, w2, b2, w3, b3, w4, b4, A, Bt)

    # TODO(synk): for v6e/v7x a bf16 matmul path (f32 accumulation) would halve
    # VMEM/MXU traffic; kept f32 here to stay bit-comparable to the reference.
    return out.reshape(N, OUT_CHANNELS, Ho, Wo)                 # C==1: free


# ---------------------------------------------------------------------------
# Parameter init (shapes match the PyTorch module, HWIO weight layout)
# ---------------------------------------------------------------------------
def init_params(key):
    def conv_init(k, cin, cout):
        kw, kb = jax.random.split(k)
        bound = 1.0 / np.sqrt(cin * 9)
        w = jax.random.uniform(kw, (3, 3, cin, cout), jnp.float32, -bound, bound)
        b = jax.random.uniform(kb, (cout,), jnp.float32, -bound, bound)
        return w, b

    k1, k2, k3, k4 = jax.random.split(key, 4)
    w1, b1 = conv_init(k1, IN_CHANNELS, MID)
    w2, b2 = conv_init(k2, MID, MID)
    w3, b3 = conv_init(k3, MID, MID)
    w4, b4 = conv_init(k4, MID, OUT_CHANNELS)
    return dict(w1=w1, b1=b1, w2=w2, b2=b2, w3=w3, b3=b3, w4=w4, b4=b4)


# ---------------------------------------------------------------------------
# Pure-JAX reference (numerical validation of the fused Pallas kernel)
# ---------------------------------------------------------------------------
def _ref_conv3x3_relu(x, w, b):
    y = lax.conv_general_dilated(
        x, w, window_strides=(1, 1), padding="SAME",
        dimension_numbers=("NHWC", "HWIO", "NHWC"),
        precision=lax.Precision.HIGHEST)
    return jnp.maximum(y + b, 0.0)


def unet_reference(x_nchw, params):
    x = jnp.transpose(x_nchw, (0, 2, 3, 1))
    x = _ref_conv3x3_relu(x, params["w1"], params["b1"])
    x = _ref_conv3x3_relu(x, params["w2"], params["b2"])
    x = lax.reduce_window(x, -jnp.inf, lax.max,
                          (1, 2, 2, 1), (1, 2, 2, 1), "VALID")
    x = _ref_conv3x3_relu(x, params["w3"], params["b3"])
    x = _ref_conv3x3_relu(x, params["w4"], params["b4"])
    N, H, W, C = x.shape
    A = _interp_matrix(2 * H, H)
    Bt = _interp_matrix(2 * W, W).T
    x = jnp.einsum("oh,nhwc,wp->nopc", A, x, Bt,
                   precision=lax.Precision.HIGHEST)
    return jnp.transpose(x, (0, 3, 1, 2))


if __name__ == "__main__":
    root = jax.random.PRNGKey(0)
    k_params, k_x = jax.random.split(root)
    params = init_params(k_params)
    x = jax.random.normal(k_x, (2, IN_CHANNELS, 16, 16), jnp.float32)  # NCHW

    out = jax.jit(unet_forward)(x, params)
    out = jax.block_until_ready(out)
    assert out.shape == (2, OUT_CHANNELS, 16, 16), out.shape

    ref = unet_reference(x, params)
    np.testing.assert_allclose(np.asarray(out), np.asarray(ref),
                               atol=1e-2, rtol=1e-2)
    print("KERNEL_OK")
</pallas_src>

<mosaic_0001>
module attributes {stable_mosaic.version = 11 : i64} {
  func.func @_unet_kernel(%arg0: i32, %arg1: memref<1x16x16x3xf32, #tpu.memory_space<vmem>>, %arg2: memref<3x3x3x64xf32, #tpu.memory_space<vmem>>, %arg3: memref<1x64xf32, #tpu.memory_space<vmem>>, %arg4: memref<3x3x64x64xf32, #tpu.memory_space<vmem>>, %arg5: memref<1x64xf32, #tpu.memory_space<vmem>>, %arg6: memref<3x3x64x64xf32, #tpu.memory_space<vmem>>, %arg7: memref<1x64xf32, #tpu.memory_space<vmem>>, %arg8: memref<3x3x64xf32, #tpu.memory_space<vmem>>, %arg9: memref<1x1xf32, #tpu.memory_space<vmem>>, %arg10: memref<16x8xf32, #tpu.memory_space<vmem>>, %arg11: memref<8x16xf32, #tpu.memory_space<vmem>>, %arg12: memref<1x16x16xf32, #tpu.memory_space<vmem>>, %arg13: memref<18x18x3xf32, #tpu.memory_space<vmem>>, %arg14: memref<18x18x64xf32, #tpu.memory_space<vmem>>, %arg15: memref<10x10x64xf32, #tpu.memory_space<vmem>>) attributes {dimension_semantics = [#tpu.dimension_semantics<parallel>], iteration_bounds = array<i64: 2>, scalar_prefetch = 0 : i64, scratch_operands = 3 : i64, tpu.core_type = #tpu.core_type<tc>, window_params = [{transform_indices = @transform_0, window_bounds = array<i64: 1, 16, 16, 3>}, {pipeline_mode = #tpu.pipeline_mode<synchronous>, transform_indices = @transform_1, window_bounds = array<i64: 3, 3, 3, 64>}, {pipeline_mode = #tpu.pipeline_mode<synchronous>, transform_indices = @transform_2, window_bounds = array<i64: 1, 64>}, {pipeline_mode = #tpu.pipeline_mode<synchronous>, transform_indices = @transform_3, window_bounds = array<i64: 3, 3, 64, 64>}, {pipeline_mode = #tpu.pipeline_mode<synchronous>, transform_indices = @transform_4, window_bounds = array<i64: 1, 64>}, {pipeline_mode = #tpu.pipeline_mode<synchronous>, transform_indices = @transform_5, window_bounds = array<i64: 3, 3, 64, 64>}, {pipeline_mode = #tpu.pipeline_mode<synchronous>, transform_indices = @transform_6, window_bounds = array<i64: 1, 64>}, {pipeline_mode = #tpu.pipeline_mode<synchronous>, transform_indices = @transform_7, window_bounds = array<i64: 3, 3, 64>}, {pipeline_mode = #tpu.pipeline_mode<synchronous>, transform_indices = @transform_8, window_bounds = array<i64: 1, 1>}, {pipeline_mode = #tpu.pipeline_mode<synchronous>, transform_indices = @transform_9, window_bounds = array<i64: 16, 8>}, {pipeline_mode = #tpu.pipeline_mode<synchronous>, transform_indices = @transform_10, window_bounds = array<i64: 8, 16>}, {transform_indices = @transform_11, window_bounds = array<i64: 1, 16, 16>}]} {
    %cst = arith.constant 0.000000e+00 : f32
    %0 = vector.broadcast %cst : f32 to vector<18x18x3xf32>
    %c0 = arith.constant 0 : index
    %c0_0 = arith.constant 0 : index
    %c0_1 = arith.constant 0 : index
    %1 = vector.load %arg13[%c0, %c0_0, %c0_1] : memref<18x18x3xf32, #tpu.memory_space<vmem>>, vector<18x18x3xf32>
    tpu.vector_store %arg13[%c0, %c0_0, %c0_1], %0 {strides = array<i32>} : memref<18x18x3xf32, #tpu.memory_space<vmem>>, vector<18x18x3xf32>,
    %c0_2 = arith.constant 0 : index
    %c0_3 = arith.constant 0 : index
    %c0_4 = arith.constant 0 : index
    %c0_5 = arith.constant 0 : index
    %2 = vector.load %arg1[%c0_2, %c0_3, %c0_4, %c0_5] : memref<1x16x16x3xf32, #tpu.memory_space<vmem>>, vector<1x16x16x3xf32>
    %3 = vector.shape_cast %2 : vector<1x16x16x3xf32> to vector<16x16x3xf32>
    %c1 = arith.constant 1 : index
    %c1_6 = arith.constant 1 : index
    %c0_7 = arith.constant 0 : index
    %4 = vector.load %arg13[%c1, %c1_6, %c0_7] : memref<18x18x3xf32, #tpu.memory_space<vmem>>, vector<16x16x3xf32>
    tpu.vector_store %arg13[%c1, %c1_6, %c0_7], %3 {strides = array<i32>} : memref<18x18x3xf32, #tpu.memory_space<vmem>>, vector<16x16x3xf32>,
    %cst_8 = arith.constant 0.000000e+00 : f32
    %5 = vector.broadcast %cst_8 : f32 to vector<256x64xf32>
    %c0_9 = arith.constant 0 : index
    %c0_10 = arith.constant 0 : index
    %c0_11 = arith.constant 0 : index
    %6 = vector.load %arg13[%c0_9, %c0_10, %c0_11] : memref<18x18x3xf32, #tpu.memory_space<vmem>>, vector<16x16x3xf32>
    %7 = vector.shape_cast %6 : vector<16x16x3xf32> to vector<256x3xf32>
    %c0_12 = arith.constant 0 : index
    %c0_13 = arith.constant 0 : index
    %c0_14 = arith.constant 0 : index
    %c0_15 = arith.constant 0 : index
    %8 = vector.load %arg2[%c0_12, %c0_13, %c0_14, %c0_15] : memref<3x3x3x64xf32, #tpu.memory_space<vmem>>, vector<1x1x3x64xf32>
    %9 = vector.shape_cast %8 : vector<1x1x3x64xf32> to vector<3x64xf32>
    %cst_16 = arith.constant dense<0.000000e+00> : vector<256x64xf32>
    %10 = tpu.matmul %7, %9, %cst_16 {dimension_numbers = #tpu.dot_dimension_numbers<[1], [0], [0], [1], [0, 0, 1, 1], [], []>} : vector<256x3xf32>, vector<3x64xf32>, vector<256x64xf32> -> vector<256x64xf32>
    %11 = arith.addf %5, %10 : vector<256x64xf32>
    %c0_17 = arith.constant 0 : index
    %c1_18 = arith.constant 1 : index
    %c0_19 = arith.constant 0 : index
    %12 = vector.load %arg13[%c0_17, %c1_18, %c0_19] : memref<18x18x3xf32, #tpu.memory_space<vmem>>, vector<16x16x3xf32>
    %13 = vector.shape_cast %12 : vector<16x16x3xf32> to vector<256x3xf32>
    %c0_20 = arith.constant 0 : index
    %c1_21 = arith.constant 1 : index
    %c0_22 = arith.constant 0 : index
    %c0_23 = arith.constant 0 : index
    %14 = vector.load %arg2[%c0_20, %c1_21, %c0_22, %c0_23] : memref<3x3x3x64xf32, #tpu.memory_space<vmem>>, vector<1x1x3x64xf32>
    %15 = vector.shape_cast %14 : vector<1x1x3x64xf32> to vector<3x64xf32>
    %cst_24 = arith.constant dense<0.000000e+00> : vector<256x64xf32>
    %16 = tpu.matmul %13, %15, %cst_24 {dimension_numbers = #tpu.dot_dimension_numbers<[1], [0], [0], [1], [0, 0, 1, 1], [], []>} : vector<256x3xf32>, vector<3x64xf32>, vector<256x64xf32> -> vector<256x64xf32>
    %17 = arith.addf %11, %16 : vector<256x64xf32>
    %c0_25 = arith.constant 0 : index
    %c2 = arith.constant 2 : index
    %c0_26 = arith.constant 0 : index
    %18 = vector.load %arg13[%c0_25, %c2, %c0_26] : memref<18x18x3xf32, #tpu.memory_space<vmem>>, vector<16x16x3xf32>
    %19 = vector.shape_cast %18 : vector<16x16x3xf32> to vector<256x3xf32>
    %c0_27 = arith.constant 0 : index
    %c2_28 = arith.constant 2 : index
    %c0_29 = arith.constant 0 : index
    %c0_30 = arith.constant 0 : index
    %20 = vector.load %arg2[%c0_27, %c2_28, %c0_29, %c0_30] : memref<3x3x3x64xf32, #tpu.memory_space<vmem>>, vector<1x1x3x64xf32>
    %21 = vector.shape_cast %20 : vector<1x1x3x64xf32> to vector<3x64xf32>
    %cst_31 = arith.constant dense<0.000000e+00> : vector<256x64xf32>
    %22 = tpu.matmul %19, %21, %cst_31 {dimension_numbers = #tpu.dot_dimension_numbers<[1], [0], [0], [1], [0, 0, 1, 1], [], []>} : vector<256x3xf32>, vector<3x64xf32>, vector<256x64xf32> -> vector<256x64xf32>
    %23 = arith.addf %17, %22 : vector<256x64xf32>
    %c1_32 = arith.constant 1 : index
    %c0_33 = arith.constant 0 : index
    %c0_34 = arith.constant 0 : index
    %24 = vector.load %arg13[%c1_32, %c0_33, %c0_34] : memref<18x18x3xf32, #tpu.memory_space<vmem>>, vector<16x16x3xf32>
    %25 = vector.shape_cast %24 : vector<16x16x3xf32> to vector<256x3xf32>
    %c1_35 = arith.constant 1 : index
    %c0_36 = arith.constant 0 : index
    %c0_37 = arith.constant 0 : index
    %c0_38 = arith.constant 0 : index
    %26 = vector.load %arg2[%c1_35, %c0_36, %c0_37, %c0_38] : memref<3x3x3x64xf32, #tpu.memory_space<vmem>>, vector<1x1x3x64xf32>
    %27 = vector.shape_cast %26 : vector<1x1x3x64xf32> to vector<3x64xf32>
    %cst_39 = arith.constant dense<0.000000e+00> : vector<256x64xf32>
    %28 = tpu.matmul %25, %27, %cst_39 {dimension_numbers = #tpu.dot_dimension_numbers<[1], [0], [0], [1], [0, 0, 1, 1], [], []>} : vector<256x3xf32>, vector<3x64xf32>, vector<256x64xf32> -> vector<256x64xf32>
    %29 = arith.addf %23, %28 : vector<256x64xf32>
    %c1_40 = arith.constant 1 : index
    %c1_41 = arith.constant 1 : index
    %c0_42 = arith.constant 0 : index
    %30 = vector.load %arg13[%c1_40, %c1_41, %c0_42] : memref<18x18x3xf32, #tpu.memory_space<vmem>>, vector<16x16x3xf32>
    %31 = vector.shape_cast %30 : vector<16x16x3xf32> to vector<256x3xf32>
    %c1_43 = arith.constant 1 : index
    %c1_44 = arith.constant 1 : index
    %c0_45 = arith.constant 0 : index
    %c0_46 = arith.constant 0 : index
    %32 = vector.load %arg2[%c1_43, %c1_44, %c0_45, %c0_46] : memref<3x3x3x64xf32, #tpu.memory_space<vmem>>, vector<1x1x3x64xf32>
    %33 = vector.shape_cast %32 : vector<1x1x3x64xf32> to vector<3x64xf32>
    %cst_47 = arith.constant dense<0.000000e+00> : vector<256x64xf32>
    %34 = tpu.matmul %31, %33, %cst_47 {dimension_numbers = #tpu.dot_dimension_numbers<[1], [0], [0], [1], [0, 0, 1, 1], [], []>} : vector<256x3xf32>, vector<3x64xf32>, vector<256x64xf32> -> vector<256x64xf32>
    %35 = arith.addf %29, %34 : vector<256x64xf32>
    %c1_48 = arith.constant 1 : index
    %c2_49 = arith.constant 2 : index
    %c0_50 = arith.constant 0 : index
    %36 = vector.load %arg13[%c1_48, %c2_49, %c0_50] : memref<18x18x3xf32, #tpu.memory_space<vmem>>, vector<16x16x3xf32>
    %37 = vector.shape_cast %36 : vector<16x16x3xf32> to vector<256x3xf32>
    %c1_51 = arith.constant 1 : index
    %c2_52 = arith.constant 2 : index
    %c0_53 = arith.constant 0 : index
    %c0_54 = arith.constant 0 : index
    %38 = vector.load %arg2[%c1_51, %c2_52, %c0_53, %c0_54] : memref<3x3x3x64xf32, #tpu.memory_space<vmem>>, vector<1x1x3x64xf32>
    %39 = vector.shape_cast %38 : vector<1x1x3x64xf32> to vector<3x64xf32>
    %cst_55 = arith.constant dense<0.000000e+00> : vector<256x64xf32>
    %40 = tpu.matmul %37, %39, %cst_55 {dimension_numbers = #tpu.dot_dimension_numbers<[1], [0], [0], [1], [0, 0, 1, 1], [], []>} : vector<256x3xf32>, vector<3x64xf32>, vector<256x64xf32> -> vector<256x64xf32>
    %41 = arith.addf %35, %40 : vector<256x64xf32>
    %c2_56 = arith.constant 2 : index
    %c0_57 = arith.constant 0 : index
    %c0_58 = arith.constant 0 : index
    %42 = vector.load %arg13[%c2_56, %c0_57, %c0_58] : memref<18x18x3xf32, #tpu.memory_space<vmem>>, vector<16x16x3xf32>
    %43 = vector.shape_cast %42 : vector<16x16x3xf32> to vector<256x3xf32>
    %c2_59 = arith.constant 2 : index
    %c0_60 = arith.constant 0 : index
    %c0_61 = arith.constant 0 : index
    %c0_62 = arith.constant 0 : index
    %44 = vector.load %arg2[%c2_59, %c0_60, %c0_61, %c0_62] : memref<3x3x3x64xf32, #tpu.memory_space<vmem>>, vector<1x1x3x64xf32>
    %45 = vector.shape_cast %44 : vector<1x1x3x64xf32> to vector<3x64xf32>
    %cst_63 = arith.constant dense<0.000000e+00> : vector<256x64xf32>
    %46 = tpu.matmul %43, %45, %cst_63 {dimension_numbers = #tpu.dot_dimension_numbers<[1], [0], [0], [1], [0, 0, 1, 1], [], []>} : vector<256x3xf32>, vector<3x64xf32>, vector<256x64xf32> -> vector<256x64xf32>
    %47 = arith.addf %41, %46 : vector<256x64xf32>
    %c2_64 = arith.constant 2 : index
    %c1_65 = arith.constant 1 : index
    %c0_66 = arith.constant 0 : index
    %48 = vector.load %arg13[%c2_64, %c1_65, %c0_66] : memref<18x18x3xf32, #tpu.memory_space<vmem>>, vector<16x16x3xf32>
    %49 = vector.shape_cast %48 : vector<16x16x3xf32> to vector<256x3xf32>
    %c2_67 = arith.constant 2 : index
    %c1_68 = arith.constant 1 : index
    %c0_69 = arith.constant 0 : index
    %c0_70 = arith.constant 0 : index
    %50 = vector.load %arg2[%c2_67, %c1_68, %c0_69, %c0_70] : memref<3x3x3x64xf32, #tpu.memory_space<vmem>>, vector<1x1x3x64xf32>
    %51 = vector.shape_cast %50 : vector<1x1x3x64xf32> to vector<3x64xf32>
    %cst_71 = arith.constant dense<0.000000e+00> : vector<256x64xf32>
    %52 = tpu.matmul %49, %51, %cst_71 {dimension_numbers = #tpu.dot_dimension_numbers<[1], [0], [0], [1], [0, 0, 1, 1], [], []>} : vector<256x3xf32>, vector<3x64xf32>, vector<256x64xf32> -> vector<256x64xf32>
    %53 = arith.addf %47, %52 : vector<256x64xf32>
    %c2_72 = arith.constant 2 : index
    %c2_73 = arith.constant 2 : index
    %c0_74 = arith.constant 0 : index
    %54 = vector.load %arg13[%c2_72, %c2_73, %c0_74] : memref<18x18x3xf32, #tpu.memory_space<vmem>>, vector<16x16x3xf32>
    %55 = vector.shape_cast %54 : vector<16x16x3xf32> to vector<256x3xf32>
    %c2_75 = arith.constant 2 : index
    %c2_76 = arith.constant 2 : index
    %c0_77 = arith.constant 0 : index
    %c0_78 = arith.constant 0 : index
    %56 = vector.load %arg2[%c2_75, %c2_76, %c0_77, %c0_78] : memref<3x3x3x64xf32, #tpu.memory_space<vmem>>, vector<1x1x3x64xf32>
    %57 = vector.shape_cast %56 : vector<1x1x3x64xf32> to vector<3x64xf32>
    %cst_79 = arith.constant dense<0.000000e+00> : vector<256x64xf32>
    %58 = tpu.matmul %55, %57, %cst_79 {dimension_numbers = #tpu.dot_dimension_numbers<[1], [0], [0], [1], [0, 0, 1, 1], [], []>} : vector<256x3xf32>, vector<3x64xf32>, vector<256x64xf32> -> vector<256x64xf32>
    %59 = arith.addf %53, %58 : vector<256x64xf32>
    %c0_80 = arith.constant 0 : index
    %c0_81 = arith.constant 0 : index
    %60 = vector.load %arg3[%c0_80, %c0_81] : memref<1x64xf32, #tpu.memory_space<vmem>>, vector<1x64xf32>
    %61 = vector.broadcast %60 : vector<1x64xf32> to vector<256x64xf32>
    %62 = arith.addf %59, %61 : vector<256x64xf32>
    %cst_82 = arith.constant 0.000000e+00 : f32
    %63 = vector.broadcast %cst_82 : f32 to vector<256x64xf32>
    %64 = arith.maximumf %62, %63 : vector<256x64xf32>
    %cst_83 = arith.constant 0.000000e+00 : f32
    %65 = vector.broadcast %cst_83 : f32 to vector<18x18x64xf32>
    %c0_84 = arith.constant 0 : index
    %c0_85 = arith.constant 0 : index
    %c0_86 = arith.constant 0 : index
    %66 = vector.load %arg14[%c0_84, %c0_85, %c0_86] : memref<18x18x64xf32, #tpu.memory_space<vmem>>, vector<18x18x64xf32>
    tpu.vector_store %arg14[%c0_84, %c0_85, %c0_86], %65 {strides = array<i32>} : memref<18x18x64xf32, #tpu.memory_space<vmem>>, vector<18x18x64xf32>,
    %67 = vector.shape_cast %64 : vector<256x64xf32> to vector<16x16x64xf32>
    %c1_87 = arith.constant 1 : index
    %c1_88 = arith.constant 1 : index
    %c0_89 = arith.constant 0 : index
    %68 = vector.load %arg14[%c1_87, %c1_88, %c0_89] : memref<18x18x64xf32, #tpu.memory_space<vmem>>, vector<16x16x64xf32>
    tpu.vector_store %arg14[%c1_87, %c1_88, %c0_89], %67 {strides = array<i32>} : memref<18x18x64xf32, #tpu.memory_space<vmem>>, vector<16x16x64xf32>,
    %cst_90 = arith.constant 0.000000e+00 : f32
    %69 = vector.broadcast %cst_90 : f32 to vector<256x64xf32>
    %c0_91 = arith.constant 0 : index
    %c0_92 = arith.constant 0 : index
    %c0_93 = arith.constant 0 : index
    %70 = vector.load %arg14[%c0_91, %c0_92, %c0_93] : memref<18x18x64xf32, #tpu.memory_space<vmem>>, vector<16x16x64xf32>
    %71 = vector.shape_cast %70 : vector<16x16x64xf32> to vector<256x64xf32>
    %c0_94 = arith.constant 0 : index
    %c0_95 = arith.constant 0 : index
    %c0_96 = arith.constant 0 : index
    %c0_97 = arith.constant 0 : index
    %72 = vector.load %arg4[%c0_94, %c0_95, %c0_96, %c0_97] : memref<3x3x64x64xf32, #tpu.memory_space<vmem>>, vector<1x1x64x64xf32>
    %73 = vector.shape_cast %72 : vector<1x1x64x64xf32> to vector<64x64xf32>
    %cst_98 = arith.constant dense<0.000000e+00> : vector<256x64xf32>
    %74 = tpu.matmul %71, %73, %cst_98 {dimension_numbers = #tpu.dot_dimension_numbers<[1], [0], [0], [1], [0, 0, 1, 1], [], []>} : vector<256x64xf32>, vector<64x64xf32>, vector<256x64xf32> -> vector<256x64xf32>
    %75 = arith.addf %69, %74 : vector<256x64xf32>
    %c0_99 = arith.constant 0 : index
    %c1_100 = arith.constant 1 : index
    %c0_101 = arith.constant 0 : index
    %76 = vector.load %arg14[%c0_99, %c1_100, %c0_101] : memref<18x18x64xf32, #tpu.memory_space<vmem>>, vector<16x16x64xf32>
    %77 = vector.shape_cast %76 : vector<16x16x64xf32> to vector<256x64xf32>
    %c0_102 = arith.constant 0 : index
    %c1_103 = arith.constant 1 : index
    %c0_104 = arith.constant 0 : index
    %c0_105 = arith.constant 0 : index
    %78 = vector.load %arg4[%c0_102, %c1_103, %c0_104, %c0_105] : memref<3x3x64x64xf32, #tpu.memory_space<vmem>>, vector<1x1x64x64xf32>
    %79 = vector.shape_cast %78 : vector<1x1x64x64xf32> to vector<64x64xf32>
    %cst_106 = arith.constant dense<0.000000e+00> : vector<256x64xf32>
    %80 = tpu.matmul %77, %79, %cst_106 {dimension_numbers = #tpu.dot_dimension_numbers<[1], [0], [0], [1], [0, 0, 1, 1], [], []>} : vector<256x64xf32>, vector<64x64xf32>, vector<256x64xf32> -> vector<256x64xf32>
    %81 = arith.addf %75, %80 : vector<256x64xf32>
    %c0_107 = arith.constant 0 : index
    %c2_108 = arith.constant 2 : index
    %c0_109 = arith.constant 0 : index
    %82 = vector.load %arg14[%c0_107, %c2_108, %c0_109] : memref<18x18x64xf32, #tpu.memory_space<vmem>>, vector<16x16x64xf32>
    %83 = vector.shape_cast %82 : vector<16x16x64xf32> to vector<256x64xf32>
    %c0_110 = arith.constant 0 : index
    %c2_111 = arith.constant 2 : index
    %c0_112 = arith.constant 0 : index
    %c0_113 = arith.constant 0 : index
    %84 = vector.load %arg4[%c0_110, %c2_111, %c0_112, %c0_113] : memref<3x3x64x64xf32, #tpu.memory_space<vmem>>, vector<1x1x64x64xf32>
    %85 = vector.shape_cast %84 : vector<1x1x64x64xf32> to vector<64x64xf32>
    %cst_114 = arith.constant dense<0.000000e+00> : vector<256x64xf32>
    %86 = tpu.matmul %83, %85, %cst_114 {dimension_numbers = #tpu.dot_dimension_numbers<[1], [0], [0], [1], [0, 0, 1, 1], [], []>} : vector<256x64xf32>, vector<64x64xf32>, vector<256x64xf32> -> vector<256x64xf32>
    %87 = arith.addf %81, %86 : vector<256x64xf32>
    %c1_115 = arith.constant 1 : index
    %c0_116 = arith.constant 0 : index
    %c0_117 = arith.constant 0 : index
    %88 = vector.load %arg14[%c1_115, %c0_116, %c0_117] : memref<18x18x64xf32, #tpu.memory_space<vmem>>, vector<16x16x64xf32>
    %89 = vector.shape_cast %88 : vector<16x16x64xf32> to vector<256x64xf32>
    %c1_118 = arith.constant 1 : index
    %c0_119 = arith.constant 0 : index
    %c0_120 = arith.constant 0 : index
    %c0_121 = arith.constant 0 : index
    %90 = vector.load %arg4[%c1_118, %c0_119, %c0_120, %c0_121] : memref<3x3x64x64xf32, #tpu.memory_space<vmem>>, vector<1x1x64x64xf32>
    %91 = vector.shape_cast %90 : vector<1x1x64x64xf32> to vector<64x64xf32>
    %cst_122 = arith.constant dense<0.000000e+00> : vector<256x64xf32>
    %92 = tpu.matmul %89, %91, %cst_122 {dimension_numbers = #tpu.dot_dimension_numbers<[1], [0], [0], [1], [0, 0, 1, 1], [], []>} : vector<256x64xf32>, vector<64x64xf32>, vector<256x64xf32> -> vector<256x64xf32>
    %93 = arith.addf %87, %92 : vector<256x64xf32>
    %c1_123 = arith.constant 1 : index
    %c1_124 = arith.constant 1 : index
    %c0_125 = arith.constant 0 : index
    %94 = vector.load %arg14[%c1_123, %c1_124, %c0_125] : memref<18x18x64xf32, #tpu.memory_space<vmem>>, vector<16x16x64xf32>
    %95 = vector.shape_cast %94 : vector<16x16x64xf32> to vector<256x64xf32>
    %c1_126 = arith.constant 1 : index
    %c1_127 = arith.constant 1 : index
    %c0_128 = arith.constant 0 : index
    %c0_129 = arith.constant 0 : index
    %96 = vector.load %arg4[%c1_126, %c1_127, %c0_128, %c0_129] : memref<3x3x64x64xf32, #tpu.memory_space<vmem>>, vector<1x1x64x64xf32>
    %97 = vector.shape_cast %96 : vector<1x1x64x64xf32> to vector<64x64xf32>
    %cst_130 = arith.constant dense<0.000000e+00> : vector<256x64xf32>
    %98 = tpu.matmul %95, %97, %cst_130 {dimension_numbers = #tpu.dot_dimension_numbers<[1], [0], [0], [1], [0, 0, 1, 1], [], []>} : vector<256x64xf32>, vector<64x64xf32>, vector<256x64xf32> -> vector<256x64xf32>
    %99 = arith.addf %93, %98 : vector<256x64xf32>
    %c1_131 = arith.constant 1 : index
    %c2_132 = arith.constant 2 : index
    %c0_133 = arith.constant 0 : index
    %100 = vector.load %arg14[%c1_131, %c2_132, %c0_133] : memref<18x18x64xf32, #tpu.memory_space<vmem>>, vector<16x16x64xf32>
    %101 = vector.shape_cast %100 : vector<16x16x64xf32> to vector<256x64xf32>
    %c1_134 = arith.constant 1 : index
    %c2_135 = arith.constant 2 : index
    %c0_136 = arith.constant 0 : index
    %c0_137 = arith.constant 0 : index
    %102 = vector.load %arg4[%c1_134, %c2_135, %c0_136, %c0_137] : memref<3x3x64x64xf32, #tpu.memory_space<vmem>>, vector<1x1x64x64xf32>
    %103 = vector.shape_cast %102 : vector<1x1x64x64xf32> to vector<64x64xf32>
    %cst_138 = arith.constant dense<0.000000e+00> : vector<256x64xf32>
    %104 = tpu.matmul %101, %103, %cst_138 {dimension_numbers = #tpu.dot_dimension_numbers<[1], [0], [0], [1], [0, 0, 1, 1], [], []>} : vector<256x64xf32>, vector<64x64xf32>, vector<256x64xf32> -> vector<256x64xf32>
    %105 = arith.addf %99, %104 : vector<256x64xf32>
    %c2_139 = arith.constant 2 : index
    %c0_140 = arith.constant 0 : index
    %c0_141 = arith.constant 0 : index
    %106 = vector.load %arg14[%c2_139, %c0_140, %c0_141] : memref<18x18x64xf32, #tpu.memory_space<vmem>>, vector<16x16x64xf32>
    %107 = vector.shape_cast %106 : vector<16x16x64xf32> to vector<256x64xf32>
    %c2_142 = arith.constant 2 : index
    %c0_143 = arith.constant 0 : index
    %c0_144 = arith.constant 0 : index
    %c0_145 = arith.constant 0 : index
    %108 = vector.load %arg4[%c2_142, %c0_143, %c0_144, %c0_145] : memref<3x3x64x64xf32, #tpu.memory_space<vmem>>, vector<1x1x64x64xf32>
    %109 = vector.shape_cast %108 : vector<1x1x64x64xf32> to vector<64x64xf32>
    %cst_146 = arith.constant dense<0.000000e+00> : vector<256x64xf32>
    %110 = tpu.matmul %107, %109, %cst_146 {dimension_numbers = #tpu.dot_dimension_numbers<[1], [0], [0], [1], [0, 0, 1, 1], [], []>} : vector<256x64xf32>, vector<64x64xf32>, vector<256x64xf32> -> vector<256x64xf32>
    %111 = arith.addf %105, %110 : vector<256x64xf32>
    %c2_147 = arith.constant 2 : index
    %c1_148 = arith.constant 1 : index
    %c0_149 = arith.constant 0 : index
    %112 = vector.load %arg14[%c2_147, %c1_148, %c0_149] : memref<18x18x64xf32, #tpu.memory_space<vmem>>, vector<16x16x64xf32>
    %113 = vector.shape_cast %112 : vector<16x16x64xf32> to vector<256x64xf32>
    %c2_150 = arith.constant 2 : index
    %c1_151 = arith.constant 1 : index
    %c0_152 = arith.constant 0 : index
    %c0_153 = arith.constant 0 : index
    %114 = vector.load %arg4[%c2_150, %c1_151, %c0_152, %c0_153] : memref<3x3x64x64xf32, #tpu.memory_space<vmem>>, vector<1x1x64x64xf32>
    %115 = vector.shape_cast %114 : vector<1x1x64x64xf32> to vector<64x64xf32>
    %cst_154 = arith.constant dense<0.000000e+00> : vector<256x64xf32>
    %116 = tpu.matmul %113, %115, %cst_154 {dimension_numbers = #tpu.dot_dimension_numbers<[1], [0], [0], [1], [0, 0, 1, 1], [], []>} : vector<256x64xf32>, vector<64x64xf32>, vector<256x64xf32> -> vector<256x64xf32>
    %117 = arith.addf %111, %116 : vector<256x64xf32>
    %c2_155 = arith.constant 2 : index
    %c2_156 = arith.constant 2 : index
    %c0_157 = arith.constant 0 : index
    %118 = vector.load %arg14[%c2_155, %c2_156, %c0_157] : memref<18x18x64xf32, #tpu.memory_space<vmem>>, vector<16x16x64xf32>
    %119 = vector.shape_cast %118 : vector<16x16x64xf32> to vector<256x64xf32>
    %c2_158 = arith.constant 2 : index
    %c2_159 = arith.constant 2 : index
    %c0_160 = arith.constant 0 : index
    %c0_161 = arith.constant 0 : index
    %120 = vector.load %arg4[%c2_158, %c2_159, %c0_160, %c0_161] : memref<3x3x64x64xf32, #tpu.memory_space<vmem>>, vector<1x1x64x64xf32>
    %121 = vector.shape_cast %120 : vector<1x1x64x64xf32> to vector<64x64xf32>
    %cst_162 = arith.constant dense<0.000000e+00> : vector<256x64xf32>
    %122 = tpu.matmul %119, %121, %cst_162 {dimension_numbers = #tpu.dot_dimension_numbers<[1], [0], [0], [1], [0, 0, 1, 1], [], []>} : vector<256x64xf32>, vector<64x64xf32>, vector<256x64xf32> -> vector<256x64xf32>
    %123 = arith.addf %117, %122 : vector<256x64xf32>
    %c0_163 = arith.constant 0 : index
    %c0_164 = arith.constant 0 : index
    %124 = vector.load %arg5[%c0_163, %c0_164] : memref<1x64xf32, #tpu.memory_space<vmem>>, vector<1x64xf32>
    %125 = vector.broadcast %124 : vector<1x64xf32> to vector<256x64xf32>
    %126 = arith.addf %123, %125 : vector<256x64xf32>
    %cst_165 = arith.constant 0.000000e+00 : f32
    %127 = vector.broadcast %cst_165 : f32 to vector<256x64xf32>
    %128 = arith.maximumf %126, %127 : vector<256x64xf32>
    %129 = vector.shape_cast %128 : vector<256x64xf32> to vector<8x2x16x64xf32>
    %130 = vector.extract_strided_slice %129 {offsets = [0, 0, 0, 0], sizes = [8, 1, 16, 64], strides = [1, 1, 1, 1]} : vector<8x2x16x64xf32> to vector<8x1x16x64xf32>
    %131 = vector.shape_cast %130 : vector<8x1x16x64xf32> to vector<8x16x64xf32>
    %132 = vector.extract_strided_slice %129 {offsets = [0, 1, 0, 0], sizes = [8, 1, 16, 64], strides = [1, 1, 1, 1]} : vector<8x2x16x64xf32> to vector<8x1x16x64xf32>
    %133 = vector.shape_cast %132 : vector<8x1x16x64xf32> to vector<8x16x64xf32>
    %134 = arith.maximumf %131, %133 : vector<8x16x64xf32>
    %135 = vector.shape_cast %134 : vector<8x16x64xf32> to vector<8x8x2x64xf32>
    %136 = vector.extract_strided_slice %135 {offsets = [0, 0, 0, 0], sizes = [8, 8, 1, 64], strides = [1, 1, 1, 1]} : vector<8x8x2x64xf32> to vector<8x8x1x64xf32>
    %137 = vector.shape_cast %136 : vector<8x8x1x64xf32> to vector<8x8x64xf32>
    %138 = vector.extract_strided_slice %135 {offsets = [0, 0, 1, 0], sizes = [8, 8, 1, 64], strides = [1, 1, 1, 1]} : vector<8x8x2x64xf32> to vector<8x8x1x64xf32>
    %139 = vector.shape_cast %138 : vector<8x8x1x64xf32> to vector<8x8x64xf32>
    %140 = arith.maximumf %137, %139 : vector<8x8x64xf32>
    %cst_166 = arith.constant 0.000000e+00 : f32
    %141 = vector.broadcast %cst_166 : f32 to vector<10x10x64xf32>
    %c0_167 = arith.constant 0 : index
    %c0_168 = arith.constant 0 : index
    %c0_169 = arith.constant 0 : index
    %142 = vector.load %arg15[%c0_167, %c0_168, %c0_169] : memref<10x10x64xf32, #tpu.memory_space<vmem>>, vector<10x10x64xf32>
    tpu.vector_store %arg15[%c0_167, %c0_168, %c0_169], %141 {strides = array<i32>} : memref<10x10x64xf32, #tpu.memory_space<vmem>>, vector<10x10x64xf32>,
    %c1_170 = arith.constant 1 : index
    %c1_171 = arith.constant 1 : index
    %c0_172 = arith.constant 0 : index
    %143 = vector.load %arg15[%c1_170, %c1_171, %c0_172] : memref<10x10x64xf32, #tpu.memory_space<vmem>>, vector<8x8x64xf32>
    tpu.vector_store %arg15[%c1_170, %c1_171, %c0_172], %140 {strides = array<i32>} : memref<10x10x64xf32, #tpu.memory_space<vmem>>, vector<8x8x64xf32>,
    %cst_173 = arith.constant 0.000000e+00 : f32
    %144 = vector.broadcast %cst_173 : f32 to vector<64x64xf32>
    %c0_174 = arith.constant 0 : index
    %c0_175 = arith.constant 0 : index
    %c0_176 = arith.constant 0 : index
    %145 = vector.load %arg15[%c0_174, %c0_175, %c0_176] : memref<10x10x64xf32, #tpu.memory_space<vmem>>, vector<8x8x64xf32>
    %146 = vector.shape_cast %145 : vector<8x8x64xf32> to vector<64x64xf32>
    %c0_177 = arith.constant 0 : index
    %c0_178 = arith.constant 0 : index
    %c0_179 = arith.constant 0 : index
    %c0_180 = arith.constant 0 : index
    %147 = vector.load %arg6[%c0_177, %c0_178, %c0_179, %c0_180] : memref<3x3x64x64xf32, #tpu.memory_space<vmem>>, vector<1x1x64x64xf32>
    %148 = vector.shape_cast %147 : vector<1x1x64x64xf32> to vector<64x64xf32>
    %cst_181 = arith.constant dense<0.000000e+00> : vector<64x64xf32>
    %149 = tpu.matmul %146, %148, %cst_181 {dimension_numbers = #tpu.dot_dimension_numbers<[1], [0], [0], [1], [0, 0, 1, 1], [], []>} : vector<64x64xf32>, vector<64x64xf32>, vector<64x64xf32> -> vector<64x64xf32>
    %150 = arith.addf %144, %149 : vector<64x64xf32>
    %c0_182 = arith.constant 0 : index
    %c1_183 = arith.constant 1 : index
    %c0_184 = arith.constant 0 : index
    %151 = vector.load %arg15[%c0_182, %c1_183, %c0_184] : memref<10x10x64xf32, #tpu.memory_space<vmem>>, vector<8x8x64xf32>
    %152 = vector.shape_cast %151 : vector<8x8x64xf32> to vector<64x64xf32>
    %c0_185 = arith.constant 0 : index
    %c1_186 = arith.constant 1 : index
    %c0_187 = arith.constant 0 : index
    %c0_188 = arith.constant 0 : index
    %153 = vector.load %arg6[%c0_185, %c1_186, %c0_187, %c0_188] : memref<3x3x64x64xf32, #tpu.memory_space<vmem>>, vector<1x1x64x64xf32>
    %154 = vector.shape_cast %153 : vector<1x1x64x64xf32> to vector<64x64xf32>
    %cst_189 = arith.constant dense<0.000000e+00> : vector<64x64xf32>
    %155 = tpu.matmul %152, %154, %cst_189 {dimension_numbers = #tpu.dot_dimension_numbers<[1], [0], [0], [1], [0, 0, 1, 1], [], []>} : vector<64x64xf32>, vector<64x64xf32>, vector<64x64xf32> -> vector<64x64xf32>
    %156 = arith.addf %150, %155 : vector<64x64xf32>
    %c0_190 = arith.constant 0 : index
    %c2_191 = arith.constant 2 : index
    %c0_192 = arith.constant 0 : index
    %157 = vector.load %arg15[%c0_190, %c2_191, %c0_192] : memref<10x10x64xf32, #tpu.memory_space<vmem>>, vector<8x8x64xf32>
    %158 = vector.shape_cast %157 : vector<8x8x64xf32> to vector<64x64xf32>
    %c0_193 = arith.constant 0 : index
    %c2_194 = arith.constant 2 : index
    %c0_195 = arith.constant 0 : index
    %c0_196 = arith.constant 0 : index
    %159 = vector.load %arg6[%c0_193, %c2_194, %c0_195, %c0_196] : memref<3x3x64x64xf32, #tpu.memory_space<vmem>>, vector<1x1x64x64xf32>
    %160 = vector.shape_cast %159 : vector<1x1x64x64xf32> to vector<64x64xf32>
    %cst_197 = arith.constant dense<0.000000e+00> : vector<64x64xf32>
    %161 = tpu.matmul %158, %160, %cst_197 {dimension_numbers = #tpu.dot_dimension_numbers<[1], [0], [0], [1], [0, 0, 1, 1], [], []>} : vector<64x64xf32>, vector<64x64xf32>, vector<64x64xf32> -> vector<64x64xf32>
    %162 = arith.addf %156, %161 : vector<64x64xf32>
    %c1_198 = arith.constant 1 : index
    %c0_199 = arith.constant 0 : index
    %c0_200 = arith.constant 0 : index
    %163 = vector.load %arg15[%c1_198, %c0_199, %c0_200] : memref<10x10x64xf32, #tpu.memory_space<vmem>>, vector<8x8x64xf32>
    %164 = vector.shape_cast %163 : vector<8x8x64xf32> to vector<64x64xf32>
    %c1_201 = arith.constant 1 : index
    %c0_202 = arith.constant 0 : index
    %c0_203 = arith.constant 0 : index
    %c0_204 = arith.constant 0 : index
    %165 = vector.load %arg6[%c1_201, %c0_202, %c0_203, %c0_204] : memref<3x3x64x64xf32, #tpu.memory_space<vmem>>, vector<1x1x64x64xf32>
    %166 = vector.shape_cast %165 : vector<1x1x64x64xf32> to vector<64x64xf32>
    %cst_205 = arith.constant dense<0.000000e+00> : vector<64x64xf32>
    %167 = tpu.matmul %164, %166, %cst_205 {dimension_numbers = #tpu.dot_dimension_numbers<[1], [0], [0], [1], [0, 0, 1, 1], [], []>} : vector<64x64xf32>, vector<64x64xf32>, vector<64x64xf32> -> vector<64x64xf32>
    %168 = arith.addf %162, %167 : vector<64x64xf32>
    %c1_206 = arith.constant 1 : index
    %c1_207 = arith.constant 1 : index
    %c0_208 = arith.constant 0 : index
    %169 = vector.load %arg15[%c1_206, %c1_207, %c0_208] : memref<10x10x64xf32, #tpu.memory_space<vmem>>, vector<8x8x64xf32>
    %170 = vector.shape_cast %169 : vector<8x8x64xf32> to vector<64x64xf32>
    %c1_209 = arith.constant 1 : index
    %c1_210 = arith.constant 1 : index
    %c0_211 = arith.constant 0 : index
    %c0_212 = arith.constant 0 : index
    %171 = vector.load %arg6[%c1_209, %c1_210, %c0_211, %c0_212] : memref<3x3x64x64xf32, #tpu.memory_space<vmem>>, vector<1x1x64x64xf32>
    %172 = vector.shape_cast %171 : vector<1x1x64x64xf32> to vector<64x64xf32>
    %cst_213 = arith.constant dense<0.000000e+00> : vector<64x64xf32>
    %173 = tpu.matmul %170, %172, %cst_213 {dimension_numbers = #tpu.dot_dimension_numbers<[1], [0], [0], [1], [0, 0, 1, 1], [], []>} : vector<64x64xf32>, vector<64x64xf32>, vector<64x64xf32> -> vector<64x64xf32>
    %174 = arith.addf %168, %173 : vector<64x64xf32>
    %c1_214 = arith.constant 1 : index
    %c2_215 = arith.constant 2 : index
    %c0_216 = arith.constant 0 : index
    %175 = vector.load %arg15[%c1_214, %c2_215, %c0_216] : memref<10x10x64xf32, #tpu.memory_space<vmem>>, vector<8x8x64xf32>
    %176 = vector.shape_cast %175 : vector<8x8x64xf32> to vector<64x64xf32>
    %c1_217 = arith.constant 1 : index
    %c2_218 = arith.constant 2 : index
    %c0_219 = arith.constant 0 : index
    %c0_220 = arith.constant 0 : index
    %177 = vector.load %arg6[%c1_217, %c2_218, %c0_219, %c0_220] : memref<3x3x64x64xf32, #tpu.memory_space<vmem>>, vector<1x1x64x64xf32>
    %178 = vector.shape_cast %177 : vector<1x1x64x64xf32> to vector<64x64xf32>
    %cst_221 = arith.constant dense<0.000000e+00> : vector<64x64xf32>
    %179 = tpu.matmul %176, %178, %cst_221 {dimension_numbers = #tpu.dot_dimension_numbers<[1], [0], [0], [1], [0, 0, 1, 1], [], []>} : vector<64x64xf32>, vector<64x64xf32>, vector<64x64xf32> -> vector<64x64xf32>
    %180 = arith.addf %174, %179 : vector<64x64xf32>
    %c2_222 = arith.constant 2 : index
    %c0_223 = arith.constant 0 : index
    %c0_224 = arith.constant 0 : index
    %181 = vector.load %arg15[%c2_222, %c0_223, %c0_224] : memref<10x10x64xf32, #tpu.memory_space<vmem>>, vector<8x8x64xf32>
    %182 = vector.shape_cast %181 : vector<8x8x64xf32> to vector<64x64xf32>
    %c2_225 = arith.constant 2 : index
    %c0_226 = arith.constant 0 : index
    %c0_227 = arith.constant 0 : index
    %c0_228 = arith.constant 0 : index
    %183 = vector.load %arg6[%c2_225, %c0_226, %c0_227, %c0_228] : memref<3x3x64x64xf32, #tpu.memory_space<vmem>>, vector<1x1x64x64xf32>
    %184 = vector.shape_cast %183 : vector<1x1x64x64xf32> to vector<64x64xf32>
    %cst_229 = arith.constant dense<0.000000e+00> : vector<64x64xf32>
    %185 = tpu.matmul %182, %184, %cst_229 {dimension_numbers = #tpu.dot_dimension_numbers<[1], [0], [0], [1], [0, 0, 1, 1], [], []>} : vector<64x64xf32>, vector<64x64xf32>, vector<64x64xf32> -> vector<64x64xf32>
    %186 = arith.addf %180, %185 : vector<64x64xf32>
    %c2_230 = arith.constant 2 : index
    %c1_231 = arith.constant 1 : index
    %c0_232 = arith.constant 0 : index
    %187 = vector.load %arg15[%c2_230, %c1_231, %c0_232] : memref<10x10x64xf32, #tpu.memory_space<vmem>>, vector<8x8x64xf32>
    %188 = vector.shape_cast %187 : vector<8x8x64xf32> to vector<64x64xf32>
    %c2_233 = arith.constant 2 : index
    %c1_234 = arith.constant 1 : index
    %c0_235 = arith.constant 0 : index
    %c0_236 = arith.constant 0 : index
    %189 = vector.load %arg6[%c2_233, %c1_234, %c0_235, %c0_236] : memref<3x3x64x64xf32, #tpu.memory_space<vmem>>, vector<1x1x64x64xf32>
    %190 = vector.shape_cast %189 : vector<1x1x64x64xf32> to vector<64x64xf32>
    %cst_237 = arith.constant dense<0.000000e+00> : vector<64x64xf32>
    %191 = tpu.matmul %188, %190, %cst_237 {dimension_numbers = #tpu.dot_dimension_numbers<[1], [0], [0], [1], [0, 0, 1, 1], [], []>} : vector<64x64xf32>, vector<64x64xf32>, vector<64x64xf32> -> vector<64x64xf32>
    %192 = arith.addf %186, %191 : vector<64x64xf32>
    %c2_238 = arith.constant 2 : index
    %c2_239 = arith.constant 2 : index
    %c0_240 = arith.constant 0 : index
    %193 = vector.load %arg15[%c2_238, %c2_239, %c0_240] : memref<10x10x64xf32, #tpu.memory_space<vmem>>, vector<8x8x64xf32>
    %194 = vector.shape_cast %193 : vector<8x8x64xf32> to vector<64x64xf32>
    %c2_241 = arith.constant 2 : index
    %c2_242 = arith.constant 2 : index
    %c0_243 = arith.constant 0 : index
    %c0_244 = arith.constant 0 : index
    %195 = vector.load %arg6[%c2_241, %c2_242, %c0_243, %c0_244] : memref<3x3x64x64xf32, #tpu.memory_space<vmem>>, vector<1x1x64x64xf32>
    %196 = vector.shape_cast %195 : vector<1x1x64x64xf32> to vector<64x64xf32>
    %cst_245 = arith.constant dense<0.000000e+00> : vector<64x64xf32>
    %197 = tpu.matmul %194, %196, %cst_245 {dimension_numbers = #tpu.dot_dimension_numbers<[1], [0], [0], [1], [0, 0, 1, 1], [], []>} : vector<64x64xf32>, vector<64x64xf32>, vector<64x64xf32> -> vector<64x64xf32>
    %198 = arith.addf %192, %197 : vector<64x64xf32>
    %c0_246 = arith.constant 0 : index
    %c0_247 = arith.constant 0 : index
    %199 = vector.load %arg7[%c0_246, %c0_247] : memref<1x64xf32, #tpu.memory_space<vmem>>, vector<1x64xf32>
    %200 = vector.broadcast %199 : vector<1x64xf32> to vector<64x64xf32>
    %201 = arith.addf %198, %200 : vector<64x64xf32>
    %cst_248 = arith.constant 0.000000e+00 : f32
    %202 = vector.broadcast %cst_248 : f32 to vector<64x64xf32>
    %203 = arith.maximumf %201, %202 : vector<64x64xf32>
    %204 = vector.shape_cast %203 : vector<64x64xf32> to vector<8x8x64xf32>
    %c1_249 = arith.constant 1 : index
    %c1_250 = arith.constant 1 : index
    %c0_251 = arith.constant 0 : index
    %205 = vector.load %arg15[%c1_249, %c1_250, %c0_251] : memref<10x10x64xf32, #tpu.memory_space<vmem>>, vector<8x8x64xf32>
    tpu.vector_store %arg15[%c1_249, %c1_250, %c0_251], %204 {strides = array<i32>} : memref<10x10x64xf32, #tpu.memory_space<vmem>>, vector<8x8x64xf32>,
    %cst_252 = arith.constant 0.000000e+00 : f32
    %206 = vector.broadcast %cst_252 : f32 to vector<8x8xf32>
    %c0_253 = arith.constant 0 : index
    %c0_254 = arith.constant 0 : index
    %c0_255 = arith.constant 0 : index
    %207 = vector.load %arg15[%c0_253, %c0_254, %c0_255] : memref<10x10x64xf32, #tpu.memory_space<vmem>>, vector<8x8x64xf32>
    %c0_256 = arith.constant 0 : index
    %c0_257 = arith.constant 0 : index
    %c0_258 = arith.constant 0 : index
    %208 = vector.load %arg8[%c0_256, %c0_257, %c0_258] : memref<3x3x64xf32, #tpu.memory_space<vmem>>, vector<1x1x64xf32>
    %209 = vector.shape_cast %208 : vector<1x1x64xf32> to vector<64xf32>
    %210 = vector.shape_cast %209 : vector<64xf32> to vector<1x1x64xf32>
    %211 = vector.broadcast %210 : vector<1x1x64xf32> to vector<8x8x64xf32>
    %212 = arith.mulf %207, %211 : vector<8x8x64xf32>
    %cst_259 = arith.constant dense<0.000000e+00> : vector<8x8xf32>
    %213 = vector.multi_reduction <add>, %212, %cst_259 [2] : vector<8x8x64xf32> to vector<8x8xf32>
    %214 = arith.addf %206, %213 : vector<8x8xf32>
    %c0_260 = arith.constant 0 : index
    %c1_261 = arith.constant 1 : index
    %c0_262 = arith.constant 0 : index
    %215 = vector.load %arg15[%c0_260, %c1_261, %c0_262] : memref<10x10x64xf32, #tpu.memory_space<vmem>>, vector<8x8x64xf32>
    %c0_263 = arith.constant 0 : index
    %c1_264 = arith.constant 1 : index
    %c0_265 = arith.constant 0 : index
    %216 = vector.load %arg8[%c0_263, %c1_264, %c0_265] : memref<3x3x64xf32, #tpu.memory_space<vmem>>, vector<1x1x64xf32>
    %217 = vector.shape_cast %216 : vector<1x1x64xf32> to vector<64xf32>
    %218 = vector.shape_cast %217 : vector<64xf32> to vector<1x1x64xf32>
    %219 = vector.broadcast %218 : vector<1x1x64xf32> to vector<8x8x64xf32>
    %220 = arith.mulf %215, %219 : vector<8x8x64xf32>
    %cst_266 = arith.constant dense<0.000000e+00> : vector<8x8xf32>
    %221 = vector.multi_reduction <add>, %220, %cst_266 [2] : vector<8x8x64xf32> to vector<8x8xf32>
    %222 = arith.addf %214, %221 : vector<8x8xf32>
    %c0_267 = arith.constant 0 : index
    %c2_268 = arith.constant 2 : index
    %c0_269 = arith.constant 0 : index
    %223 = vector.load %arg15[%c0_267, %c2_268, %c0_269] : memref<10x10x64xf32, #tpu.memory_space<vmem>>, vector<8x8x64xf32>
    %c0_270 = arith.constant 0 : index
    %c2_271 = arith.constant 2 : index
    %c0_272 = arith.constant 0 : index
    %224 = vector.load %arg8[%c0_270, %c2_271, %c0_272] : memref<3x3x64xf32, #tpu.memory_space<vmem>>, vector<1x1x64xf32>
    %225 = vector.shape_cast %224 : vector<1x1x64xf32> to vector<64xf32>
    %226 = vector.shape_cast %225 : vector<64xf32> to vector<1x1x64xf32>
    %227 = vector.broadcast %226 : vector<1x1x64xf32> to vector<8x8x64xf32>
    %228 = arith.mulf %223, %227 : vector<8x8x64xf32>
    %cst_273 = arith.constant dense<0.000000e+00> : vector<8x8xf32>
    %229 = vector.multi_reduction <add>, %228, %cst_273 [2] : vector<8x8x64xf32> to vector<8x8xf32>
    %230 = arith.addf %222, %229 : vector<8x8xf32>
    %c1_274 = arith.constant 1 : index
    %c0_275 = arith.constant 0 : index
    %c0_276 = arith.constant 0 : index
    %231 = vector.load %arg15[%c1_274, %c0_275, %c0_276] : memref<10x10x64xf32, #tpu.memory_space<vmem>>, vector<8x8x64xf32>
    %c1_277 = arith.constant 1 : index
    %c0_278 = arith.constant 0 : index
    %c0_279 = arith.constant 0 : index
    %232 = vector.load %arg8[%c1_277, %c0_278, %c0_279] : memref<3x3x64xf32, #tpu.memory_space<vmem>>, vector<1x1x64xf32>
    %233 = vector.shape_cast %232 : vector<1x1x64xf32> to vector<64xf32>
    %234 = vector.shape_cast %233 : vector<64xf32> to vector<1x1x64xf32>
    %235 = vector.broadcast %234 : vector<1x1x64xf32> to vector<8x8x64xf32>
    %236 = arith.mulf %231, %235 : vector<8x8x64xf32>
    %cst_280 = arith.constant dense<0.000000e+00> : vector<8x8xf32>
    %237 = vector.multi_reduction <add>, %236, %cst_280 [2] : vector<8x8x64xf32> to vector<8x8xf32>
    %238 = arith.addf %230, %237 : vector<8x8xf32>
    %c1_281 = arith.constant 1 : index
    %c1_282 = arith.constant 1 : index
    %c0_283 = arith.constant 0 : index
    %239 = vector.load %arg15[%c1_281, %c1_282, %c0_283] : memref<10x10x64xf32, #tpu.memory_space<vmem>>, vector<8x8x64xf32>
    %c1_284 = arith.constant 1 : index
    %c1_285 = arith.constant 1 : index
    %c0_286 = arith.constant 0 : index
    %240 = vector.load %arg8[%c1_284, %c1_285, %c0_286] : memref<3x3x64xf32, #tpu.memory_space<vmem>>, vector<1x1x64xf32>
    %241 = vector.shape_cast %240 : vector<1x1x64xf32> to vector<64xf32>
    %242 = vector.shape_cast %241 : vector<64xf32> to vector<1x1x64xf32>
    %243 = vector.broadcast %242 : vector<1x1x64xf32> to vector<8x8x64xf32>
    %244 = arith.mulf %239, %243 : vector<8x8x64xf32>
    %cst_287 = arith.constant dense<0.000000e+00> : vector<8x8xf32>
    %245 = vector.multi_reduction <add>, %244, %cst_287 [2] : vector<8x8x64xf32> to vector<8x8xf32>
    %246 = arith.addf %238, %245 : vector<8x8xf32>
    %c1_288 = arith.constant 1 : index
    %c2_289 = arith.constant 2 : index
    %c0_290 = arith.constant 0 : index
    %247 = vector.load %arg15[%c1_288, %c2_289, %c0_290] : memref<10x10x64xf32, #tpu.memory_space<vmem>>, vector<8x8x64xf32>
    %c1_291 = arith.constant 1 : index
    %c2_292 = arith.constant 2 : index
    %c0_293 = arith.constant 0 : index
    %248 = vector.load %arg8[%c1_291, %c2_292, %c0_293] : memref<3x3x64xf32, #tpu.memory_space<vmem>>, vector<1x1x64xf32>
    %249 = vector.shape_cast %248 : vector<1x1x64xf32> to vector<64xf32>
    %250 = vector.shape_cast %249 : vector<64xf32> to vector<1x1x64xf32>
    %251 = vector.broadcast %250 : vector<1x1x64xf32> to vector<8x8x64xf32>
    %252 = arith.mulf %247, %251 : vector<8x8x64xf32>
    %cst_294 = arith.constant dense<0.000000e+00> : vector<8x8xf32>
    %253 = vector.multi_reduction <add>, %252, %cst_294 [2] : vector<8x8x64xf32> to vector<8x8xf32>
    %254 = arith.addf %246, %253 : vector<8x8xf32>
    %c2_295 = arith.constant 2 : index
    %c0_296 = arith.constant 0 : index
    %c0_297 = arith.constant 0 : index
    %255 = vector.load %arg15[%c2_295, %c0_296, %c0_297] : memref<10x10x64xf32, #tpu.memory_space<vmem>>, vector<8x8x64xf32>
    %c2_298 = arith.constant 2 : index
    %c0_299 = arith.constant 0 : index
    %c0_300 = arith.constant 0 : index
    %256 = vector.load %arg8[%c2_298, %c0_299, %c0_300] : memref<3x3x64xf32, #tpu.memory_space<vmem>>, vector<1x1x64xf32>
    %257 = vector.shape_cast %256 : vector<1x1x64xf32> to vector<64xf32>
    %258 = vector.shape_cast %257 : vector<64xf32> to vector<1x1x64xf32>
    %259 = vector.broadcast %258 : vector<1x1x64xf32> to vector<8x8x64xf32>
    %260 = arith.mulf %255, %259 : vector<8x8x64xf32>
    %cst_301 = arith.constant dense<0.000000e+00> : vector<8x8xf32>
    %261 = vector.multi_reduction <add>, %260, %cst_301 [2] : vector<8x8x64xf32> to vector<8x8xf32>
    %262 = arith.addf %254, %261 : vector<8x8xf32>
    %c2_302 = arith.constant 2 : index
    %c1_303 = arith.constant 1 : index
    %c0_304 = arith.constant 0 : index
    %263 = vector.load %arg15[%c2_302, %c1_303, %c0_304] : memref<10x10x64xf32, #tpu.memory_space<vmem>>, vector<8x8x64xf32>
    %c2_305 = arith.constant 2 : index
    %c1_306 = arith.constant 1 : index
    %c0_307 = arith.constant 0 : index
    %264 = vector.load %arg8[%c2_305, %c1_306, %c0_307] : memref<3x3x64xf32, #tpu.memory_space<vmem>>, vector<1x1x64xf32>
    %265 = vector.shape_cast %264 : vector<1x1x64xf32> to vector<64xf32>
    %266 = vector.shape_cast %265 : vector<64xf32> to vector<1x1x64xf32>
    %267 = vector.broadcast %266 : vector<1x1x64xf32> to vector<8x8x64xf32>
    %268 = arith.mulf %263, %267 : vector<8x8x64xf32>
    %cst_308 = arith.constant dense<0.000000e+00> : vector<8x8xf32>
    %269 = vector.multi_reduction <add>, %268, %cst_308 [2] : vector<8x8x64xf32> to vector<8x8xf32>
    %270 = arith.addf %262, %269 : vector<8x8xf32>
    %c2_309 = arith.constant 2 : index
    %c2_310 = arith.constant 2 : index
    %c0_311 = arith.constant 0 : index
    %271 = vector.load %arg15[%c2_309, %c2_310, %c0_311] : memref<10x10x64xf32, #tpu.memory_space<vmem>>, vector<8x8x64xf32>
    %c2_312 = arith.constant 2 : index
    %c2_313 = arith.constant 2 : index
    %c0_314 = arith.constant 0 : index
    %272 = vector.load %arg8[%c2_312, %c2_313, %c0_314] : memref<3x3x64xf32, #tpu.memory_space<vmem>>, vector<1x1x64xf32>
    %273 = vector.shape_cast %272 : vector<1x1x64xf32> to vector<64xf32>
    %274 = vector.shape_cast %273 : vector<64xf32> to vector<1x1x64xf32>
    %275 = vector.broadcast %274 : vector<1x1x64xf32> to vector<8x8x64xf32>
    %276 = arith.mulf %271, %275 : vector<8x8x64xf32>
    %cst_315 = arith.constant dense<0.000000e+00> : vector<8x8xf32>
    %277 = vector.multi_reduction <add>, %276, %cst_315 [2] : vector<8x8x64xf32> to vector<8x8xf32>
    %278 = arith.addf %270, %277 : vector<8x8xf32>
    %c0_316 = arith.constant 0 : index
    %c0_317 = arith.constant 0 : index
    %279 = vector.load %arg9[%c0_316, %c0_317] : memref<1x1xf32, #tpu.memory_space<vmem>>, vector<1x1xf32>
    %280 = vector.broadcast %279 : vector<1x1xf32> to vector<8x8xf32>
    %281 = arith.addf %278, %280 : vector<8x8xf32>
    %cst_318 = arith.constant 0.000000e+00 : f32
    %282 = vector.broadcast %cst_318 : f32 to vector<8x8xf32>
    %283 = arith.maximumf %281, %282 : vector<8x8xf32>
    %c0_319 = arith.constant 0 : index
    %c0_320 = arith.constant 0 : index
    %284 = vector.load %arg10[%c0_319, %c0_320] : memref<16x8xf32, #tpu.memory_space<vmem>>, vector<16x8xf32>
    %cst_321 = arith.constant dense<0.000000e+00> : vector<16x8xf32>
    %285 = tpu.matmul %284, %283, %cst_321 {dimension_numbers = #tpu.dot_dimension_numbers<[1], [0], [0], [1], [0, 0, 1, 1], [], []>} : vector<16x8xf32>, vector<8x8xf32>, vector<16x8xf32> -> vector<16x8xf32>
    %c0_322 = arith.constant 0 : index
    %c0_323 = arith.constant 0 : index
    %286 = vector.load %arg11[%c0_322, %c0_323] : memref<8x16xf32, #tpu.memory_space<vmem>>, vector<8x16xf32>
    %cst_324 = arith.constant dense<0.000000e+00> : vector<16x16xf32>
    %287 = tpu.matmul %285, %286, %cst_324 {dimension_numbers = #tpu.dot_dimension_numbers<[1], [0], [0], [1], [0, 0, 1, 1], [], []>} : vector<16x8xf32>, vector<8x16xf32>, vector<16x16xf32> -> vector<16x16xf32>
    %c0_325 = arith.constant 0 : index
    %c0_326 = arith.constant 0 : index
    %c0_327 = arith.constant 0 : index
    %288 = vector.load %arg12[%c0_325, %c0_326, %c0_327] : memref<1x16x16xf32, #tpu.memory_space<vmem>>, vector<1x16x16xf32>
    %289 = vector.shape_cast %288 : vector<1x16x16xf32> to vector<16x16xf32>
    %290 = vector.shape_cast %287 : vector<16x16xf32> to vector<1x16x16xf32>
    tpu.vector_store %arg12[%c0_325, %c0_326, %c0_327], %290 {strides = array<i32>} : memref<1x16x16xf32, #tpu.memory_space<vmem>>, vector<1x16x16xf32>,
    return
  }
  func.func @transform_0(%arg0: i32) -> (i32, i32, i32, i32) {
    %c0_i32 = arith.constant 0 : i32
    %c0_i32_0 = arith.constant 0 : i32
    %c0_i32_1 = arith.constant 0 : i32
    %c0_i32_2 = arith.constant 0 : i32
    return %arg0, %c0_i32, %c0_i32_0, %c0_i32_1 : i32, i32, i32, i32
  }
  func.func @transform_1(%arg0: i32) -> (i32, i32, i32, i32) {
    %c0_i32 = arith.constant 0 : i32
    %c0_i32_0 = arith.constant 0 : i32
    %c0_i32_1 = arith.constant 0 : i32
    %c0_i32_2 = arith.constant 0 : i32
    %c0_i32_3 = arith.constant 0 : i32
    return %c0_i32, %c0_i32_0, %c0_i32_1, %c0_i32_2 : i32, i32, i32, i32
  }
  func.func @transform_2(%arg0: i32) -> (i32, i32) {
    %c0_i32 = arith.constant 0 : i32
    %c0_i32_0 = arith.constant 0 : i32
    %c0_i32_1 = arith.constant 0 : i32
    return %c0_i32, %c0_i32_0 : i32, i32
  }
  func.func @transform_3(%arg0: i32) -> (i32, i32, i32, i32) {
    %c0_i32 = arith.constant 0 : i32
    %c0_i32_0 = arith.constant 0 : i32
    %c0_i32_1 = arith.constant 0 : i32
    %c0_i32_2 = arith.constant 0 : i32
    %c0_i32_3 = arith.constant 0 : i32
    return %c0_i32, %c0_i32_0, %c0_i32_1, %c0_i32_2 : i32, i32, i32, i32
  }
  func.func @transform_4(%arg0: i32) -> (i32, i32) {
    %c0_i32 = arith.constant 0 : i32
    %c0_i32_0 = arith.constant 0 : i32
    %c0_i32_1 = arith.constant 0 : i32
    return %c0_i32, %c0_i32_0 : i32, i32
  }
  func.func @transform_5(%arg0: i32) -> (i32, i32, i32, i32) {
    %c0_i32 = arith.constant 0 : i32
    %c0_i32_0 = arith.constant 0 : i32
    %c0_i32_1 = arith.constant 0 : i32
    %c0_i32_2 = arith.constant 0 : i32
    %c0_i32_3 = arith.constant 0 : i32
    return %c0_i32, %c0_i32_0, %c0_i32_1, %c0_i32_2 : i32, i32, i32, i32
  }
  func.func @transform_6(%arg0: i32) -> (i32, i32) {
    %c0_i32 = arith.constant 0 : i32
    %c0_i32_0 = arith.constant 0 : i32
    %c0_i32_1 = arith.constant 0 : i32
    return %c0_i32, %c0_i32_0 : i32, i32
  }
  func.func @transform_7(%arg0: i32) -> (i32, i32, i32) {
    %c0_i32 = arith.constant 0 : i32
    %c0_i32_0 = arith.constant 0 : i32
    %c0_i32_1 = arith.constant 0 : i32
    %c0_i32_2 = arith.constant 0 : i32
    return %c0_i32, %c0_i32_0, %c0_i32_1 : i32, i32, i32
  }
  func.func @transform_8(%arg0: i32) -> (i32, i32) {
    %c0_i32 = arith.constant 0 : i32
    %c0_i32_0 = arith.constant 0 : i32
    %c0_i32_1 = arith.constant 0 : i32
    return %c0_i32, %c0_i32_0 : i32, i32
  }
  func.func @transform_9(%arg0: i32) -> (i32, i32) {
    %c0_i32 = arith.constant 0 : i32
    %c0_i32_0 = arith.constant 0 : i32
    %c0_i32_1 = arith.constant 0 : i32
    return %c0_i32, %c0_i32_0 : i32, i32
  }
  func.func @transform_10(%arg0: i32) -> (i32, i32) {
    %c0_i32 = arith.constant 0 : i32
    %c0_i32_0 = arith.constant 0 : i32
    %c0_i32_1 = arith.constant 0 : i32
    return %c0_i32, %c0_i32_0 : i32, i32
  }
  func.func @transform_11(%arg0: i32) -> (i32, i32, i32) {
    %c0_i32 = arith.constant 0 : i32
    %c0_i32_0 = arith.constant 0 : i32
    %c0_i32_1 = arith.constant 0 : i32
    return %arg0, %c0_i32, %c0_i32_0 : i32, i32, i32
  }
}

</mosaic_0001>

<bundles_post_ra>
// kernel: unet_forward.1
= control target key start
LH: loop header
LB: loop body
LE: loop exit
PB: predicated region body
PF: predicated region fallthrough
CT: control target
= control target key end

     0   :  { %s18308_s0 = inlined_call_operand.vmem [shape: f32[2,16,16,3], index: 0, kind: input, shape index: {}]   ;;  %s18309_s1 = inlined_call_operand.vmem [shape: f32[3,3,3,64], index: 1, kind: input, shape index: {}]   ;;  %s18310_s2 = inlined_call_operand.vmem [shape: f32[1,64], index: 2, kind: input, shape index: {}]   ;;  %s18311_s3 = inlined_call_operand.vmem [shape: f32[3,3,64,64], index: 3, kind: input, shape index: {}]   ;;  %s18312_s4 = inlined_call_operand.vmem [shape: f32[1,64], index: 4, kind: input, shape index: {}]   ;;  %s18313_s5 = inlined_call_operand.hbm [shape: f32[3,3,64,64], index: 5, kind: input, shape index: {}]   ;;  %s18314_s6 = inlined_call_operand.vmem [shape: f32[1,64], index: 6, kind: input, shape index: {}]   ;;  %s18315_s7 = inlined_call_operand.vmem [shape: f32[3,3,64], index: 7, kind: input, shape index: {}]   ;;  %s18316_s8 = inlined_call_operand.<no memory space> [shape: f32[1,1], index: 8, kind: input, shape index: {}]   ;;  %s18317_s9 = inlined_call_operand.vmem [shape: f32[16,8], index: 9, kind: input, shape index: {}]   ;;  %s18318_s10 = inlined_call_operand.vmem [shape: f32[8,16], index: 10, kind: input, shape index: {}]   ;;  %s18319_s11 = inlined_call_operand.hbm [shape: f32[2,16,16], index: 11, kind: output, shape index: {}]  }
   0x1   :  { %v16_v0 = vstv %s18316_s8 }
   0x2   :  { %17 = vst [vmem:[#allocation5] sm:$0x1] %v16_v0 }
   0x3   :  { %18 = vsyncpa [#allocation7], 0 }
   0x4   :  { %19 = vsyncpa [#allocation8], 0 }
   0x5   :  { %21 = vsyncpa [#allocation8 + $0x1], 0  ;;  %s14092_s19 = smov 0   ;;  %s14094_s20 = smov 0  }
   0x6   :  { %s14096_s21 = smov 0   ;;  %s14098_s22 = smov 0  }
   0x7 LB: > { %s14113_s8 = sadd.s32 4294967295, %s14018_s22   ;;  %s10940_s23 = sadd.s32 4294967294, %s14018_s22   ;;  %s14018_s22 = sphi %s14098_s22, %s18732_s22   ;;  %s14014_s21 = sphi %s14096_s21, %s18731_s21   ;;  %s14010_s20 = sphi %s14094_s20, %s18730_s20   ;;  %s14006_s19 = sphi %s14092_s19, %s18729_s19  }
   0x8   : > { %s14117_s24 = sadd.s32 1, %s14018_s22   ;;  %s270_s25 = sadd.s32 1, %s14014_s21 }
   0x9   : > { %s267_s26 = ssub.s32 %s14018_s22, %s14117_s24  ;;  %p280_p0 = scmp.ne.s32.totalorder %s14014_s21, %s14010_s20 }
   0xa   : > { %p268_p1 = scmp.eq.s32.totalorder %s267_s26, 0  ;;  %p281_p2 = scmp.eq.s32.totalorder %s14113_s8, 1 }
   0xb   : > { %p286_p3 = scmp.ne.s32.totalorder %s14010_s20, %s14006_s19  ;;  %p287_p4 = scmp.eq.s32.totalorder %s10940_s23, 1 }
   0xc   : > { %s14128_s27 = scalar_select %p268_p1, %s14014_s21, %s270_s25  }
   0xd   : > { %p14130_p5 = por %p281_p2, %p280_p0  ;;  %p14134_p6 = por %p287_p4, %p286_p3 }
   0xe   : > { %p10941_p7 = scmp.ge.s32.totalorder %s14018_s22, 1  ;;  %p294_p8 = scmp.lt.s32.totalorder %s14018_s22, 3 }
   0xf   : > { %s18382_s29 = scalar_select %p14134_p6, 1, 0 }
  0x10   : > { %p13883_p9 = scmp.eq.s32.totalorder %s14113_s8, 0  ;;  %p14141_p10 = pnand %p10941_p7, %p294_p8 }
  0x11   : > { %s14020_s12 = smov [#allocation6]  }
  0x12   : > { %s318_s13 = sshll.u32 %s14020_s12, 4  ;;  %p13875_p11 = pneg %p14141_p10  ;;  %s319_s13 = int_to_ptr.vmem [resolvable:$true] %s318_s13 }
  0x13   : > { %s13939_s14 = scalar_lea.vmem %s319_s13, 9216  ;;  %p13947_p3 = scmp.lt.s32.totalorder %s319_s13, %s319_s13 }
  0x14   : > { %p13876_p12 = pnand %p13883_p9, %p13875_p11  ;;  %p13940_p0 = scmp.ne.s32.totalorder %s319_s13, %s13939_s14 }
  0x15   : > { %p13948_p4 = scmp.lt.s32.totalorder %s13939_s14, %s13939_s14 }
  0x16   : > { %p13930_p13 = pneg %p13876_p12 }
  0x17   : > { %p13949_p6 = por %p13948_p4, %p13947_p3 }
  0x18   : > { %p13942_p1 = pnand %p13940_p0, %p13930_p13 }
  0x1a   : > { %p13943_p2 = pneg %p13942_p1 }
  0x1c   : > { %p13950_p7 = pnand %p13949_p6, %p13943_p2 }
  0x1e   : > { %13953 = shalt.err (!%p13950_p7)
}
  0x1f   : > { %s14021_s15 = smov 128   ;;  %s14022_s16 = smov 8  }
  0x20   : > { %13878 = dma.hbm_to_vmem [thread:$0]  (!%p13876_p12), %s18313_s5, 9216, %s319_s13, [#allocation7], %s14021_s15, %s14021_s15, %s14022_s16  }
  0x21   : > { %357 = sbr.rel (%p14141_p10) target bundleno = 2111 (0x83f), region = 64 }
  0x26   : > { %13997 = dma.done.wait (%p13883_p9), [#allocation7], 9216  }
  0x27   : > { %13999 = vsyncadd (%p13883_p9), [#allocation7], 4294958080  ;;  %vm402_vm0 = vcmask 23552   ;;  %vm405_vm1 = vcmask 17408   ;;  %v18320_v1 = vmov 0.0   ;;  %p397_p6 = scmp.lt.s32.totalorder %s14113_s8, 1 }
  0x28   : > { %403 = vst.msk [vmem:[#allocation2] sm:$0xff] %vm402_vm0, %v18320_v1  ;;  %404 = vst.msk [vmem:[#allocation2 + $0x8] sm:$0xff] %vm402_vm0, %v18320_v1  ;;  %vm686_vm2 = vcmask 1042432   ;;  %v10949_v2 = vld [vmem:[%s18309_s1 + $0x4] sm:$0x7]  ;;  %vm4041_vm3 = vcmask 523264  }
  0x29   : > { %407 = vst.msk [vmem:[#allocation2 + $0x18] sm:$0xff] %vm402_vm0, %v18320_v1  ;;  %408 = vst.msk [vmem:[#allocation2 + $0x20] sm:$0xff] %vm402_vm0, %v18320_v1  ;;  %s398_s23 = scalar_select %p397_p6, %s14113_s8, 1  ;;  %12579 = vmatprep.subr.msk.mxu0 %vm686_vm2, %v10949_v2  ;;  %13867 = vmatprep.subr.msk.mxu1 %vm686_vm2, %v10949_v2  ;;  %v555_v9 = vld [vmem:[%s18309_s1] sm:$0x7]  ;;  %vm4044_vm4 = vcmask 517120  }
  0x2a   : > { %410 = vst.msk [vmem:[#allocation2 + $0x30] sm:$0xff] %vm402_vm0, %v18320_v1  ;;  %411 = vst.msk [vmem:[#allocation2 + $0x38] sm:$0xff] %vm402_vm0, %v18320_v1  ;;  %12580 = vmatpush3.msk.msra.mxu0 %vm686_vm2, %v10949_v2  ;;  %13868 = vmatpush3.msk.msra.mxu1 %vm686_vm2, %v10949_v2  ;;  %v11016_v14 = vld [vmem:[%s18309_s1 + $0x8] sm:$0x7]  ;;  %v11050_v60 = vld [vmem:[%s18309_s1 + $0xc] sm:$0x7] }
  0x2b   : > { %413 = vst.msk [vmem:[#allocation2 + $0x48] sm:$0xff] %vm402_vm0, %v18320_v1  ;;  %414 = vst.msk [vmem:[#allocation2 + $0x50] sm:$0xff] %vm402_vm0, %v18320_v1  ;;  %s11770_s25 = sshll.u32 %s398_s23, 8  ;;  %12629 = vmatprep.subr.msk.mxu1 %vm686_vm2, %v555_v9  ;;  %12679 = vmatprep.subr.msk.mxu0 %vm686_vm2, %v11016_v14  ;;  %vm8647_vm5 = vcmask 1041409   ;;  %vm8649_vm6 = vcmask 1042434   ;;  %vm8651_vm7 = vcmask 1043459  }
  0x2c   : > { %416 = vst.msk [vmem:[#allocation2 + $0x60] sm:$0xff] %vm402_vm0, %v18320_v1  ;;  %417 = vst.msk [vmem:[#allocation2 + $0x68] sm:$0xff] %vm402_vm0, %v18320_v1  ;;  %s14271_s12 = scalar_lea.vmem %s18308_s0, %s11770_s25  ;;  %vm8653_vm8 = vcmask 1044484   ;;  %vm8655_vm9 = vcmask 1045509   ;;  %vm8657_vm10 = vcmask 1046534   ;;  %vm8659_vm11 = vcmask 1047559  }
  0x2d   : > { %419 = vst.msk [vmem:[#allocation2 + $0x78] sm:$0xff] %vm402_vm0, %v18320_v1  ;;  %420 = vst.msk [vmem:[#allocation2 + $0x80] sm:$0xff] %vm402_vm0, %v18320_v1  ;;  %v458_v3 = vld [vmem:[%s14271_s12] sm:$0xff]  ;;  %v459_v7 = vld [vmem:[%s14271_s12 + $0x8] sm:$0xff]  ;;  %vm10685_vm12 = vcmask 64512   ;;  %s394_s25 = sand.u32 1, %s14010_s20  }
  0x2e   : > { %422 = vst.msk [vmem:[#allocation2 + $0x90] sm:$0xff] %vm402_vm0, %v18320_v1  ;;  %423 = vst.msk [vmem:[#allocation2 + $0x98] sm:$0xff] %vm402_vm0, %v18320_v1  ;;  %v486_v4 = vld [vmem:[%s14271_s12 + $0xe0] sm:$0xff]  ;;  %v487_v8 = vld [vmem:[%s14271_s12 + $0xe8] sm:$0xff]  ;;  %s10946_s26 = sshll.u32 %s394_s25, 4  ;;  %vm10849_vm13 = vcmask 130048  }
  0x2f   : > { %425 = vst.msk [vmem:[#allocation2 + $0xa8] sm:$0xff] %vm402_vm0, %v18320_v1  ;;  %426 = vst.msk [vmem:[#allocation2 + $0xb0] sm:$0xff] %vm402_vm0, %v18320_v1  ;;  %v556_v5 = vld [vmem:[#allocation2 + $0x1] sm:$0xff]  ;;  %v460_v10 = vld [vmem:[%s14271_s12 + $0x10] sm:$0xff]  ;;  %s396_s30 = scalar_lea.vmem [#allocation9], %s10946_s26  ;;  %s11771_s14 = sshll.u32 %s14113_s8, 8 }
  0x30   : > { %428 = vst.msk [vmem:[#allocation2 + $0xc0] sm:$0xff] %vm402_vm0, %v18320_v1  ;;  %429 = vst.msk [vmem:[#allocation2 + $0xc8] sm:$0xff] %vm402_vm0, %v18320_v1  ;;  %12581 = vmatprep.mubr.msk.f32.mxu0 %vm402_vm0, %v556_v5  ;;  %v461_v11 = vld [vmem:[%s14271_s12 + $0x18] sm:$0xff]  ;;  %v462_v12 = vld [vmem:[%s14271_s12 + $0x20] sm:$0xff]  ;;  %s10866_s13 = sshll.u32 %s396_s30, 4  ;;  %s18266_s16 = scalar_lea.hbm %s18319_s11, %s11771_s14  ;;  %s18261_s13 = int_to_ptr.vmem [resolvable:$true] %s10866_s13 }
  0x31   : > { %431 = vst.msk [vmem:[#allocation2 + $0xd8] sm:$0xff] %vm402_vm0, %v18320_v1  ;;  %432 = vst.msk [vmem:[#allocation2 + $0xe0] sm:$0xff] %vm402_vm0, %v18320_v1  ;;  %v463_v13 = vld [vmem:[%s14271_s12 + $0x28] sm:$0xff]  ;;  %v464_v15 = vld [vmem:[%s14271_s12 + $0x30] sm:$0xff]  ;;  %s18268_s17 = scalar_lea.sflag [#allocation8], %s394_s25  ;;  %s13954_s18 = scalar_lea.vmem %s18261_s13, 256 }
  0x32   : > { %434 = vst.msk [vmem:[#allocation2 + $0xf0] sm:$0xff] %vm402_vm0, %v18320_v1  ;;  %435 = vst.msk [vmem:[#allocation2 + $0xf8] sm:$0xff] %vm402_vm0, %v18320_v1  ;;  %v465_v16 = vld [vmem:[%s14271_s12 + $0x38] sm:$0xff]  ;;  %v466_v17 = vld [vmem:[%s14271_s12 + $0x40] sm:$0xff]  ;;  %p13955_p8 = scmp.ne.s32.totalorder %s18261_s13, %s13954_s18  ;;  %s14026_s8 = smov [#allocation9]  }
  0x33   : > { %437 = vst.msk [vmem:[#allocation2 + $0x108] sm:$0xff] %vm402_vm0, %v18320_v1  ;;  %438 = vst.msk [vmem:[#allocation2 + $0x110] sm:$0xff] %vm402_vm0, %v18320_v1  ;;  %v467_v18 = vld [vmem:[%s14271_s12 + $0x48] sm:$0xff]  ;;  %v468_v19 = vld [vmem:[%s14271_s12 + $0x50] sm:$0xff]  ;;  %s13958_s23 = sshll.u32 %s14026_s8, 4  ;;  %s13959_s23 = int_to_ptr.vmem [resolvable:$false] %s13958_s23 }
  0x34   : > { %440 = vst.msk [vmem:[#allocation2 + $0x120] sm:$0xff] %vm402_vm0, %v18320_v1  ;;  %441 = vst.msk [vmem:[#allocation2 + $0x128] sm:$0xff] %vm402_vm0, %v18320_v1  ;;  %v469_v20 = vld [vmem:[%s14271_s12 + $0x58] sm:$0xff]  ;;  %v470_v21 = vld [vmem:[%s14271_s12 + $0x60] sm:$0xff]  ;;  %p13956_p9 = pnand %p13955_p8, %p14130_p5  ;;  %s13960_s26 = scalar_lea.vmem %s13959_s23, 512 }
  0x35   : > { %443 = vst.msk [vmem:[#allocation2 + $0x138] sm:$0xff] %vm402_vm0, %v18320_v1  ;;  %444 = vst.msk [vmem:[#allocation2 + $0x140] sm:$0xff] %vm402_vm0, %v18320_v1  ;;  %v471_v22 = vld [vmem:[%s14271_s12 + $0x68] sm:$0xff]  ;;  %v472_v23 = vld [vmem:[%s14271_s12 + $0x70] sm:$0xff]  ;;  %p13961_p11 = scmp.lt.s32.totalorder %s18261_s13, %s13959_s23  ;;  %p13962_p12 = scmp.lt.s32.totalorder %s13960_s26, %s13954_s18 }
  0x36   : > { %446 = vst.msk [vmem:[#allocation2 + $0x150] sm:$0xff] %vm402_vm0, %v18320_v1  ;;  %447 = vst.msk [vmem:[#allocation2 + $0x158] sm:$0xff] %vm402_vm0, %v18320_v1  ;;  %v523_v27 = vld [vmem:[#allocation2] sm:$0xff]  ;;  %v473_v28 = vld [vmem:[%s14271_s12 + $0x78] sm:$0xff]  ;;  %p13957_p10 = pneg %p13956_p9 }
  0x37   : > { %449 = vst.msk [vmem:[#allocation2 + $0x168] sm:$0xff] %vm402_vm0, %v18320_v1  ;;  %450 = vst.msk [vmem:[#allocation2 + $0x170] sm:$0xff] %vm402_vm0, %v18320_v1  ;;  %v474_v32 = vld [vmem:[%s14271_s12 + $0x80] sm:$0xff]  ;;  %v524_v33 = vld [vmem:[#allocation2 + $0x8] sm:$0xff]  ;;  %p13963_p13 = por %p13962_p12, %p13961_p11 }
  0x38   : > { %452 = vst.msk [vmem:[#allocation2 + $0x180] sm:$0xff] %vm402_vm0, %v18320_v1  ;;  %453 = vst.msk [vmem:[#allocation2 + $0x188] sm:$0xff] %vm402_vm0, %v18320_v1  ;;  %v475_v42 = vld [vmem:[%s14271_s12 + $0x88] sm:$0xff]  ;;  %v476_v44 = vld [vmem:[%s14271_s12 + $0x90] sm:$0xff] }
  0x39   : > { %455 = vst.msk [vmem:[#allocation2 + $0x198] sm:$0xff] %vm402_vm0, %v18320_v1  ;;  %456 = vst.msk [vmem:[#allocation2 + $0x1a0] sm:$0xff] %vm402_vm0, %v18320_v1  ;;  %v477_v45 = vld [vmem:[%s14271_s12 + $0x98] sm:$0xff]  ;;  %v478_v48 = vld [vmem:[%s14271_s12 + $0xa0] sm:$0xff]  ;;  %p13964_p0 = pnand %p13963_p13, %p13957_p10 }
  0x3a   : > { %406 = vst.msk [vmem:[#allocation2 + $0x10] sm:$0x3] %vm405_vm1, %v18320_v1  ;;  %409 = vst.msk [vmem:[#allocation2 + $0x28] sm:$0x3] %vm405_vm1, %v18320_v1  ;;  %v479_v49 = vld [vmem:[%s14271_s12 + $0xa8] sm:$0xff]  ;;  %v480_v50 = vld [vmem:[%s14271_s12 + $0xb0] sm:$0xff] }
  0x3b   : > { %412 = vst.msk [vmem:[#allocation2 + $0x40] sm:$0x3] %vm405_vm1, %v18320_v1  ;;  %415 = vst.msk [vmem:[#allocation2 + $0x58] sm:$0x3] %vm405_vm1, %v18320_v1  ;;  %v481_v51 = vld [vmem:[%s14271_s12 + $0xb8] sm:$0xff]  ;;  %v482_v52 = vld [vmem:[%s14271_s12 + $0xc0] sm:$0xff] }
  0x3c   : > { %418 = vst.msk [vmem:[#allocation2 + $0x70] sm:$0x3] %vm405_vm1, %v18320_v1  ;;  %421 = vst.msk [vmem:[#allocation2 + $0x88] sm:$0x3] %vm405_vm1, %v18320_v1  ;;  %v483_v53 = vld [vmem:[%s14271_s12 + $0xc8] sm:$0xff]  ;;  %v484_v54 = vld [vmem:[%s14271_s12 + $0xd0] sm:$0xff] }
  0x3d   : > { %424 = vst.msk [vmem:[#allocation2 + $0xa0] sm:$0x3] %vm405_vm1, %v18320_v1  ;;  %427 = vst.msk [vmem:[#allocation2 + $0xb8] sm:$0x3] %vm405_vm1, %v18320_v1  ;;  %v485_v57 = vld [vmem:[%s14271_s12 + $0xd8] sm:$0xff] }
  0x3e   : > { %430 = vst.msk [vmem:[#allocation2 + $0xd0] sm:$0x3] %vm405_vm1, %v18320_v1  ;;  %433 = vst.msk [vmem:[#allocation2 + $0xe8] sm:$0x3] %vm405_vm1, %v18320_v1 }
  0x3f   : > { %436 = vst.msk [vmem:[#allocation2 + $0x100] sm:$0x3] %vm405_vm1, %v18320_v1  ;;  %439 = vst.msk [vmem:[#allocation2 + $0x118] sm:$0x3] %vm405_vm1, %v18320_v1 }
  0x40   : > { %442 = vst.msk [vmem:[#allocation2 + $0x130] sm:$0x3] %vm405_vm1, %v18320_v1  ;;  %445 = vst.msk [vmem:[#allocation2 + $0x148] sm:$0x3] %vm405_vm1, %v18320_v1 }
  0x41   : > { %448 = vst.msk [vmem:[#allocation2 + $0x160] sm:$0x3] %vm405_vm1, %v18320_v1  ;;  %451 = vst.msk [vmem:[#allocation2 + $0x178] sm:$0x3] %vm405_vm1, %v18320_v1  ;;  %v557_v6 = vld [vmem:[#allocation2 + $0x9] sm:$0xff] }
  0x42   : > { %454 = vst.msk [vmem:[#allocation2 + $0x190] sm:$0x3] %vm405_vm1, %v18320_v1  ;;  %457 = vst.msk [vmem:[#allocation2 + $0x1a8] sm:$0x3] %vm405_vm1, %v18320_v1  ;;  %12582 = vmatmul.mubr.msk.f32.vlgmr.msra.gmra.mxu0 %vm402_vm0, %v557_v6  ;;  %v14474_v6 = vld [vmem:[%s18309_s1 + $0x10] sm:$0x7] }
  0x43   : > { %491 = vst.msk [vmem:[#allocation2 + $0x19] sm:$0xff] %vm402_vm0, %v458_v3  ;;  %519 = vst.msk [vmem:[#allocation2 + $0x169] sm:$0xff] %vm402_vm0, %v486_v4  ;;  %12680 = vmatpush3.msk.msra.mxu0 %vm686_vm2, %v11016_v14 }
  0x44   : > { %492 = vst.msk [vmem:[#allocation2 + $0x21] sm:$0xff] %vm402_vm0, %v459_v7  ;;  %520 = vst.msk [vmem:[#allocation2 + $0x171] sm:$0xff] %vm402_vm0, %v487_v8  ;;  %12779 = vmatprep.subr.msk.mxu0 %vm686_vm2, %v14474_v6 }
  0x45   : > { %493 = vst.msk [vmem:[#allocation2 + $0x31] sm:$0xff] %vm402_vm0, %v460_v10  ;;  %494 = vst.msk [vmem:[#allocation2 + $0x39] sm:$0xff] %vm402_vm0, %v461_v11 }
  0x46   : > { %495 = vst.msk [vmem:[#allocation2 + $0x49] sm:$0xff] %vm402_vm0, %v462_v12  ;;  %496 = vst.msk [vmem:[#allocation2 + $0x51] sm:$0xff] %vm402_vm0, %v463_v13 }
  0x47   : > { %497 = vst.msk [vmem:[#allocation2 + $0x61] sm:$0xff] %vm402_vm0, %v464_v15  ;;  %498 = vst.msk [vmem:[#allocation2 + $0x69] sm:$0xff] %vm402_vm0, %v465_v16  ;;  %v488_v16 = vld [vmem:[%s14271_s12 + $0xf0] sm:$0xff] }
  0x48   : > { %499 = vst.msk [vmem:[#allocation2 + $0x79] sm:$0xff] %vm402_vm0, %v466_v17  ;;  %500 = vst.msk [vmem:[#allocation2 + $0x81] sm:$0xff] %vm402_vm0, %v467_v18  ;;  %v489_v18 = vld [vmem:[%s14271_s12 + $0xf8] sm:$0xff] }
  0x49   : > { %501 = vst.msk [vmem:[#allocation2 + $0x91] sm:$0xff] %vm402_vm0, %v468_v19  ;;  %502 = vst.msk [vmem:[#allocation2 + $0x99] sm:$0xff] %vm402_vm0, %v469_v20  ;;  %v14522_v19 = vld [vmem:[%s18309_s1 + $0x14] sm:$0x7] }
  0x4a   : > { %v14322_v24 = vld [vmem:[#allocation2 + $0x19] sm:$0xff]  ;;  %v14324_v25 = vld [vmem:[#allocation2 + $0x169] sm:$0xff]  ;;  %503 = vst.msk [vmem:[#allocation2 + $0xa9] sm:$0xff] %vm402_vm0, %v470_v21  ;;  %504 = vst.msk [vmem:[#allocation2 + $0xb1] sm:$0xff] %vm402_vm0, %v471_v22 }
  0x4b   : > { %18384 = vst [vmem:[#allocation12_spill] sm:$0xff] %v14324_v25  ;;  %505 = vst.msk [vmem:[#allocation2 + $0xc1] sm:$0xff] %vm402_vm0, %v472_v23  ;;  %12584 = vmatprep.mubr.msk.f32.mxu0 %vm402_vm0, %v14322_v24  ;;  %12626 = vmatprep.mubr.msk.f32.mxu1 %vm402_vm0, %v14324_v25  ;;  %v14333_v26 = vld [vmem:[#allocation2 + $0x21] sm:$0xff]  ;;  %v14338_v29 = vld [vmem:[#allocation2 + $0x171] sm:$0xff] }
  0x4c   : > { %12585 = vmatmul.mubr.msk.f32.gmra.mxu0 %vm402_vm0, %v14333_v26  ;;  %18385 = vst [vmem:[#allocation13_spill] sm:$0xff] %v14338_v29  ;;  %v14340_v30 = vld [vmem:[#allocation2 + $0x31] sm:$0xff]  ;;  %506 = vst.msk [vmem:[#allocation2 + $0xc9] sm:$0xff] %vm402_vm0, %v473_v28  ;;  %12627 = vmatmul.mubr.msk.f32.vlgmr.msra.gmra.mxu1 %vm402_vm0, %v14338_v29  ;;  %v14347_v31 = vld [vmem:[#allocation2 + $0x39] sm:$0xff] }
  0x4d   : > { %12587 = vmatprep.mubr.msk.f32.mxu0 %vm402_vm0, %v14340_v30  ;;  %12630 = vmatpush3.msk.msra.mxu1 %vm686_vm2, %v555_v9  ;;  %v14352_v34 = vld [vmem:[#allocation2 + $0x49] sm:$0xff]  ;;  %507 = vst.msk [vmem:[#allocation2 + $0xd9] sm:$0xff] %vm402_vm0, %v474_v32  ;;  %v14355_v35 = vld [vmem:[#allocation2 + $0x18] sm:$0xff]  ;;  %v14366_v37 = vld [vmem:[#allocation2 + $0x20] sm:$0xff] }
  0x4e   : > { %12631 = vmatprep.mubr.msk.f32.mxu1 %vm402_vm0, %v523_v27  ;;  %v14362_v36 = vld [vmem:[#allocation2 + $0x51] sm:$0xff]  ;;  %v14368_v38 = vld [vmem:[#allocation2 + $0x61] sm:$0xff]  ;;  %v14378_v40 = vld [vmem:[#allocation2 + $0x69] sm:$0xff]  ;;  %508 = vst.msk [vmem:[#allocation2 + $0xe1] sm:$0xff] %vm402_vm0, %v475_v42  ;;  %12729 = vmatprep.subr.msk.mxu1 %vm686_vm2, %v11050_v60 }
  0x4f   : > { %v14370_v39 = vld [vmem:[#allocation2 + $0x30] sm:$0xff]  ;;  %v14380_v41 = vld [vmem:[#allocation2 + $0x38] sm:$0xff]  ;;  %v14390_v46 = vld [vmem:[#allocation2 + $0x48] sm:$0xff]  ;;  %509 = vst.msk [vmem:[#allocation2 + $0xf1] sm:$0xff] %vm402_vm0, %v476_v44 }
  0x50   : > { %12588 = vmatmul.mubr.msk.f32.gmra.mxu0 %vm402_vm0, %v14347_v31  ;;  %12632 = vmatmul.mubr.msk.f32.vlgmr.msra.gmra.mxu1 %vm402_vm0, %v524_v33  ;;  %18386 = vst [vmem:[#allocation14_spill] sm:$0xff] %v14370_v39  ;;  %18387 = vst [vmem:[#allocation15_spill] sm:$0xff] %v14380_v41  ;;  %v14385_v43 = vld [vmem:[#allocation2 + $0x79] sm:$0xff]  ;;  %v14392_v47 = vld [vmem:[#allocation2 + $0x81] sm:$0xff] }
  0x51   : > { %12590 = vmatprep.mubr.msk.f32.mxu0 %vm402_vm0, %v14352_v34  ;;  %12634 = vmatprep.mubr.msk.f32.mxu1 %vm402_vm0, %v14355_v35  ;;  %18388 = vst [vmem:[#allocation16_spill] sm:$0xff] %v14390_v46  ;;  %510 = vst.msk [vmem:[#allocation2 + $0xf9] sm:$0xff] %vm402_vm0, %v477_v45  ;;  %v14415_v55 = vld [vmem:[#allocation2 + $0x50] sm:$0xff]  ;;  %v14423_v58 = vld [vmem:[#allocation2 + $0x60] sm:$0xff] }
  0x52   : > { %511 = vst.msk [vmem:[#allocation2 + $0x109] sm:$0xff] %vm402_vm0, %v478_v48  ;;  %512 = vst.msk [vmem:[#allocation2 + $0x111] sm:$0xff] %vm402_vm0, %v479_v49  ;;  %v14417_v56 = vld [vmem:[#allocation2 + $0x91] sm:$0xff]  ;;  %v14432_v59 = vld [vmem:[#allocation2 + $0x99] sm:$0xff]  ;;  %12730 = vmatpush3.msk.msra.mxu1 %vm686_vm2, %v11050_v60 }
  0x53   : > { %513 = vst.msk [vmem:[#allocation2 + $0x121] sm:$0xff] %vm402_vm0, %v480_v50  ;;  %514 = vst.msk [vmem:[#allocation2 + $0x129] sm:$0xff] %vm402_vm0, %v481_v51  ;;  %v14439_v61 = vld [vmem:[#allocation2 + $0x68] sm:$0xff]  ;;  %v14444_v63 = vld [vmem:[#allocation2 + $0x78] sm:$0xff]  ;;  %12829 = vmatprep.subr.msk.mxu1 %vm686_vm2, %v14522_v19 }
  0x54   : > { %12591 = vmatmul.mubr.msk.f32.gmra.mxu0 %vm402_vm0, %v14362_v36  ;;  %12635 = vmatmul.mubr.msk.f32.gmra.mxu1 %vm402_vm0, %v14366_v37  ;;  %18389 = vst [vmem:[#allocation17_spill] sm:$0xff] %v14415_v55  ;;  %515 = vst.msk [vmem:[#allocation2 + $0x139] sm:$0xff] %vm402_vm0, %v482_v52  ;;  %v14441_v62 = vld [vmem:[#allocation2 + $0xa9] sm:$0xff]  ;;  %v14453_v0 = vld [vmem:[#allocation2 + $0xb1] sm:$0xff] }
  0x55   : > { %12593 = vmatprep.mubr.msk.f32.mxu0 %vm402_vm0, %v14368_v38  ;;  %12637 = vmatprep.mubr.msk.f32.mxu1 %vm402_vm0, %v14370_v39  ;;  %516 = vst.msk [vmem:[#allocation2 + $0x141] sm:$0xff] %vm402_vm0, %v483_v53  ;;  %517 = vst.msk [vmem:[#allocation2 + $0x151] sm:$0xff] %vm402_vm0, %v484_v54  ;;  %v14457_v2 = vld [vmem:[#allocation2 + $0x80] sm:$0xff]  ;;  %v14461_v4 = vld [vmem:[#allocation2 + $0x90] sm:$0xff] }
  0x56   : > { %18390 = vst [vmem:[#allocation18_spill] sm:$0xff] %v14423_v58  ;;  %518 = vst.msk [vmem:[#allocation2 + $0x159] sm:$0xff] %vm402_vm0, %v485_v57  ;;  %v14459_v3 = vld [vmem:[#allocation2 + $0xc1] sm:$0xff]  ;;  %v14469_v5 = vld [vmem:[#allocation2 + $0xc9] sm:$0xff] }
  0x57   : > { %18391 = vst [vmem:[#allocation19_spill] sm:$0xff] %v14439_v61  ;;  %18392 = vst [vmem:[#allocation20_spill] sm:$0xff] %v14444_v63  ;;  %v14478_v7 = vld [vmem:[#allocation2 + $0x98] sm:$0xff]  ;;  %v14484_v9 = vld [vmem:[#allocation2 + $0xa8] sm:$0xff] }
  0x58   : > { %12594 = vmatmul.mubr.msk.f32.gmra.mxu0 %vm402_vm0, %v14378_v40  ;;  %12638 = vmatmul.mubr.msk.f32.gmra.mxu1 %vm402_vm0, %v14380_v41  ;;  %18393 = vst [vmem:[#allocation21_spill] sm:$0xff] %v14457_v2  ;;  %18394 = vst [vmem:[#allocation22_spill] sm:$0xff] %v14461_v4  ;;  %v14480_v8 = vld [vmem:[#allocation2 + $0xd9] sm:$0xff]  ;;  %v14492_v10 = vld [vmem:[#allocation2 + $0xe1] sm:$0xff] }
  0x59   : > { %12596 = vmatprep.mubr.msk.f32.mxu0 %vm402_vm0, %v14385_v43  ;;  %12640 = vmatprep.mubr.msk.f32.mxu1 %vm402_vm0, %v14390_v46  ;;  %18395 = vst [vmem:[#allocation23_spill] sm:$0xff] %v14478_v7  ;;  %18396 = vst [vmem:[#allocation24_spill] sm:$0xff] %v14484_v9  ;;  %v14496_v11 = vld [vmem:[#allocation2 + $0xb0] sm:$0xff]  ;;  %v14500_v13 = vld [vmem:[#allocation2 + $0xc0] sm:$0xff] }
  0x5a   : > { %18397 = vst [vmem:[#allocation25_spill] sm:$0xff] %v14496_v11  ;;  %v14498_v12 = vld [vmem:[#allocation2 + $0xf1] sm:$0xff]  ;;  %18398 = vst [vmem:[#allocation26_spill] sm:$0xff] %v14500_v13  ;;  %v14508_v14 = vld [vmem:[#allocation2 + $0xf9] sm:$0xff] }
  0x5b   : > { %v14510_v15 = vld [vmem:[#allocation2 + $0xc8] sm:$0xff]  ;;  %521 = vst.msk [vmem:[#allocation2 + $0x181] sm:$0xff] %vm402_vm0, %v488_v16  ;;  %v14524_v20 = vld [vmem:[#allocation2 + $0xd8] sm:$0xff]  ;;  %522 = vst.msk [vmem:[#allocation2 + $0x189] sm:$0xff] %vm402_vm0, %v489_v18 }
  0x5c   : > { %12597 = vmatmul.mubr.msk.f32.gmra.mxu0 %vm402_vm0, %v14392_v47  ;;  %12641 = vmatmul.mubr.msk.f32.gmra.mxu1 %vm402_vm0, %v14415_v55  ;;  %18399 = vst [vmem:[#allocation27_spill] sm:$0xff] %v14510_v15  ;;  %v14515_v17 = vld [vmem:[#allocation2 + $0x109] sm:$0xff]  ;;  %18400 = vst [vmem:[#allocation28_spill] sm:$0xff] %v14524_v20  ;;  %v14535_v21 = vld [vmem:[#allocation2 + $0x111] sm:$0xff] }
  0x5d   : > { %12599 = vmatprep.mubr.msk.f32.mxu0 %vm402_vm0, %v14417_v56  ;;  %12643 = vmatprep.mubr.msk.f32.mxu1 %vm402_vm0, %v14423_v58  ;;  %v14539_v22 = vld [vmem:[#allocation2 + $0xe0] sm:$0xff]  ;;  %v14543_v27 = vld [vmem:[#allocation2 + $0xf0] sm:$0xff]  ;;  %v14555_v32 = vld [vmem:[#allocation2 + $0xf8] sm:$0xff] }
  0x5e   : > { %18401 = vst [vmem:[#allocation29_spill] sm:$0xff] %v14539_v22  ;;  %v14541_v23 = vld [vmem:[#allocation2 + $0x121] sm:$0xff]  ;;  %18402 = vst [vmem:[#allocation30_spill] sm:$0xff] %v14543_v27  ;;  %v14551_v28 = vld [vmem:[#allocation2 + $0x129] sm:$0xff] }
  0x5f   : > { %18403 = vst [vmem:[#allocation31_spill] sm:$0xff] %v14551_v28  ;;  %18404 = vst [vmem:[#allocation32_spill] sm:$0xff] %v14555_v32  ;;  %v14557_v33 = vld [vmem:[#allocation2 + $0x139] sm:$0xff]  ;;  %v14559_v42 = vld [vmem:[#allocation2 + $0x108] sm:$0xff] }
  0x60   : > { %12600 = vmatmul.mubr.msk.f32.gmra.mxu0 %vm402_vm0, %v14432_v59  ;;  %12644 = vmatmul.mubr.msk.f32.gmra.mxu1 %vm402_vm0, %v14439_v61  ;;  %18405 = vst [vmem:[#allocation33_spill] sm:$0xff] %v14557_v33  ;;  %v14567_v44 = vld [vmem:[#allocation2 + $0x141] sm:$0xff]  ;;  %v14571_v45 = vld [vmem:[#allocation2 + $0x110] sm:$0xff]  ;;  %v14583_v50 = vld [vmem:[#allocation2 + $0x159] sm:$0xff] }
  0x61   : > { %12602 = vmatprep.mubr.msk.f32.mxu0 %vm402_vm0, %v14441_v62  ;;  %12646 = vmatprep.mubr.msk.f32.mxu1 %vm402_vm0, %v14444_v63  ;;  %18406 = vst [vmem:[#allocation34_spill] sm:$0xff] %v14567_v44  ;;  %18407 = vst [vmem:[#allocation35_spill] sm:$0xff] %v14571_v45  ;;  %v14573_v48 = vld [vmem:[#allocation2 + $0x151] sm:$0xff]  ;;  %v14575_v49 = vld [vmem:[#allocation2 + $0x120] sm:$0xff] }
  0x62   : > { %18408 = vst [vmem:[#allocation36_spill] sm:$0xff] %v14573_v48  ;;  %18409 = vst [vmem:[#allocation37_spill] sm:$0xff] %v14583_v50  ;;  %v14587_v51 = vld [vmem:[#allocation2 + $0x128] sm:$0xff]  ;;  %v14589_v53 = vld [vmem:[#allocation2 + $0x138] sm:$0xff] }
  0x63   : > { %18410 = vst [vmem:[#allocation38_spill] sm:$0xff] %v14587_v51  ;;  %v1239_v52 = vld [vmem:[#allocation2 + $0x2] sm:$0xff]  ;;  %v1240_v54 = vld [vmem:[#allocation2 + $0xa] sm:$0xff]  ;;  %v14600_v60 = vld [vmem:[#allocation2 + $0x1a] sm:$0xff] }
  0x64   : > { %12603 = vmatmul.mubr.msk.f32.gmra.mxu0 %vm402_vm0, %v14453_v0  ;;  %12647 = vmatmul.mubr.msk.f32.gmra.mxu1 %vm402_vm0, %v14457_v2  ;;  %v14598_v57 = vld [vmem:[#allocation2 + $0x140] sm:$0xff]  ;;  %v14602_v16 = vld [vmem:[#allocation2 + $0x150] sm:$0xff]  ;;  %v14608_v18 = vld [vmem:[%s18309_s1 + $0x18] sm:$0x7] }
  0x65   : > { %12605 = vmatprep.mubr.msk.f32.mxu0 %vm402_vm0, %v14459_v3  ;;  %12649 = vmatprep.mubr.msk.f32.mxu1 %vm402_vm0, %v14461_v4  ;;  %v14618_v1 = vld [vmem:[#allocation2 + $0x158] sm:$0xff] }
  0x66   : > { %v14620_v29 = vld [vmem:[#allocation2 + $0x32] sm:$0xff]  ;;  %v14634_v25 = vld [vmem:[#allocation2 + $0x3a] sm:$0xff] }
  0x68   : > { %12606 = vmatmul.mubr.msk.f32.gmra.mxu0 %vm402_vm0, %v14469_v5  ;;  %12650 = vmatmul.mubr.msk.f32.gmra.mxu1 %vm402_vm0, %v14478_v7 }
  0x69   : > { %12608 = vmatprep.mubr.msk.f32.mxu0 %vm402_vm0, %v14480_v8  ;;  %12652 = vmatprep.mubr.msk.f32.mxu1 %vm402_vm0, %v14484_v9 }
  0x6c   : > { %12609 = vmatmul.mubr.msk.f32.gmra.mxu0 %vm402_vm0, %v14492_v10  ;;  %12653 = vmatmul.mubr.msk.f32.gmra.mxu1 %vm402_vm0, %v14496_v11 }
  0x6d   : > { %12611 = vmatprep.mubr.msk.f32.mxu0 %vm402_vm0, %v14498_v12  ;;  %12655 = vmatprep.mubr.msk.f32.mxu1 %vm402_vm0, %v14500_v13 }
  0x70   : > { %12612 = vmatmul.mubr.msk.f32.gmra.mxu0 %vm402_vm0, %v14508_v14  ;;  %12656 = vmatmul.mubr.msk.f32.gmra.mxu1 %vm402_vm0, %v14510_v15 }
  0x71   : > { %12614 = vmatprep.mubr.msk.f32.mxu0 %vm402_vm0, %v14515_v17  ;;  %12658 = vmatprep.mubr.msk.f32.mxu1 %vm402_vm0, %v14524_v20 }
  0x74   : > { %12615 = vmatmul.mubr.msk.f32.gmra.mxu0 %vm402_vm0, %v14535_v21  ;;  %12659 = vmatmul.mubr.msk.f32.gmra.mxu1 %vm402_vm0, %v14539_v22 }
  0x75   : > { %12617 = vmatprep.mubr.msk.f32.mxu0 %vm402_vm0, %v14541_v23  ;;  %12661 = vmatprep.mubr.msk.f32.mxu1 %vm402_vm0, %v14543_v27 }
  0x78   : > { %12618 = vmatmul.mubr.msk.f32.gmra.mxu0 %vm402_vm0, %v14551_v28  ;;  %12662 = vmatmul.mubr.msk.f32.gmra.mxu1 %vm402_vm0, %v14555_v32  ;;  %v14665_v28 = vld [vmem:[#allocation2 + $0x6a] sm:$0xff] }
  0x79   : > { %12620 = vmatprep.mubr.msk.f32.mxu0 %vm402_vm0, %v14557_v33  ;;  %12664 = vmatprep.mubr.msk.f32.mxu1 %vm402_vm0, %v14559_v42  ;;  %v14659_v33 = vld [vmem:[%s18309_s1 + $0x1c] sm:$0x7] }
  0x7c   : > { %12621 = vmatmul.mubr.msk.f32.gmra.mxu0 %vm402_vm0, %v14567_v44  ;;  %12665 = vmatmul.mubr.msk.f32.gmra.mxu1 %vm402_vm0, %v14571_v45  ;;  %v14652_v44 = vld [vmem:[#allocation2 + $0x62] sm:$0xff] }
  0x7d   : > { %12623 = vmatprep.mubr.msk.f32.mxu0 %vm402_vm0, %v14573_v48  ;;  %12667 = vmatprep.mubr.msk.f32.mxu1 %vm402_vm0, %v14575_v49  ;;  %v14648_v48 = vld [vmem:[#allocation2 + $0x52] sm:$0xff] }
  0x80   : > { %12624 = vmatmul.mubr.msk.f32.gmra.mxu0 %vm402_vm0, %v14583_v50  ;;  %12668 = vmatmul.mubr.msk.f32.gmra.mxu1 %vm402_vm0, %v14587_v51  ;;  %v14640_v50 = vld [vmem:[#allocation2 + $0x4a] sm:$0xff] }
  0x81   : > { %12681 = vmatprep.mubr.msk.f32.mxu0 %vm402_vm0, %v1239_v52  ;;  %12670 = vmatprep.mubr.msk.f32.mxu1 %vm402_vm0, %v14589_v53  ;;  %v14614_v52 = vld [vmem:[#allocation2 + $0x22] sm:$0xff] }
  0x84   : > { %12682 = vmatmul.mubr.msk.f32.vlgmr.msra.gmra.mxu0 %vm402_vm0, %v1240_v54  ;;  %12671 = vmatmul.mubr.msk.f32.gmra.mxu1 %vm402_vm0, %v14598_v57  ;;  %v14624_v54 = vld [vmem:[#allocation2 + $0x168] sm:$0xff] }
  0x85   : > { %12684 = vmatprep.mubr.msk.f32.mxu0 %vm402_vm0, %v14600_v60  ;;  %12673 = vmatprep.mubr.msk.f32.mxu1 %vm402_vm0, %v14602_v16 }
  0x86   : > { %12780 = vmatpush3.msk.msra.mxu0 %vm686_vm2, %v14474_v6  ;;  %v14638_v6 = vld [vmem:[#allocation2 + $0x170] sm:$0xff] }
  0x87   : > { %12879 = vmatprep.subr.msk.mxu0 %vm686_vm2, %v14608_v18 }
  0x88   : > { %12685 = vmatmul.mubr.msk.f32.gmra.mxu0 %vm402_vm0, %v14614_v52  ;;  %12674 = vmatmul.mubr.msk.f32.gmra.mxu1 %vm402_vm0, %v14618_v1 }
  0x89   : > { %12687 = vmatprep.mubr.msk.f32.mxu0 %vm402_vm0, %v14620_v29  ;;  %12676 = vmatprep.mubr.msk.f32.mxu1 %vm402_vm0, %v14624_v54 }
  0x8c   : > { %12688 = vmatmul.mubr.msk.f32.gmra.mxu0 %vm402_vm0, %v14634_v25  ;;  %12677 = vmatmul.mubr.msk.f32.gmra.mxu1 %vm402_vm0, %v14638_v6 }
  0x8d   : > { %12690 = vmatprep.mubr.msk.f32.mxu0 %vm402_vm0, %v14640_v50  ;;  %12731 = vmatprep.mubr.msk.f32.mxu1 %vm402_vm0, %v14355_v35  ;;  %v14669_v35 = vld [vmem:[#allocation2 + $0x7a] sm:$0xff] }
  0x90   : > { %12691 = vmatmul.mubr.msk.f32.gmra.mxu0 %vm402_vm0, %v14648_v48  ;;  %12732 = vmatmul.mubr.msk.f32.vlgmr.msra.gmra.mxu1 %vm402_vm0, %v14366_v37  ;;  %v14681_v37 = vld [vmem:[#allocation2 + $0x82] sm:$0xff] }
  0x91   : > { %12693 = vmatprep.mubr.msk.f32.mxu0 %vm402_vm0, %v14652_v44  ;;  %12734 = vmatprep.mubr.msk.f32.mxu1 %vm402_vm0, %v14370_v39  ;;  %v14685_v39 = vld [vmem:[#allocation2 + $0x92] sm:$0xff] }
  0x92   : > { %12830 = vmatpush3.msk.msra.mxu1 %vm686_vm2, %v14522_v19  ;;  %v14693_v19 = vld [vmem:[#allocation2 + $0x9a] sm:$0xff] }
  0x93   : > { %12929 = vmatprep.subr.msk.mxu1 %vm686_vm2, %v14659_v33 }
  0x94   : > { %12694 = vmatmul.mubr.msk.f32.gmra.mxu0 %vm402_vm0, %v14665_v28  ;;  %12735 = vmatmul.mubr.msk.f32.gmra.mxu1 %vm402_vm0, %v14380_v41  ;;  %v14697_v41 = vld [vmem:[#allocation2 + $0xaa] sm:$0xff] }
  0x95   : > { %12696 = vmatprep.mubr.msk.f32.mxu0 %vm402_vm0, %v14669_v35  ;;  %12737 = vmatprep.mubr.msk.f32.mxu1 %vm402_vm0, %v14390_v46  ;;  %v14709_v46 = vld [vmem:[#allocation2 + $0xc2] sm:$0xff] }
  0x96   : > { %18411 = vst [vmem:[#allocation39_spill] sm:$0xff] %v14709_v46 }
  0x98   : > { %12697 = vmatmul.mubr.msk.f32.gmra.mxu0 %vm402_vm0, %v14681_v37  ;;  %12738 = vmatmul.mubr.msk.f32.gmra.mxu1 %vm402_vm0, %v14415_v55  ;;  %v14705_v55 = vld [vmem:[#allocation2 + $0xb2] sm:$0xff] }
  0x99   : > { %12699 = vmatprep.mubr.msk.f32.mxu0 %vm402_vm0, %v14685_v39  ;;  %12740 = vmatprep.mubr.msk.f32.mxu1 %vm402_vm0, %v14423_v58  ;;  %v14721_v58 = vld [vmem:[#allocation2 + $0xda] sm:$0xff] }
  0x9a   : > { %18413 = vst [vmem:[#allocation41_spill] sm:$0xff] %v14721_v58 }
  0x9c   : > { %12700 = vmatmul.mubr.msk.f32.gmra.mxu0 %vm402_vm0, %v14693_v19  ;;  %12741 = vmatmul.mubr.msk.f32.gmra.mxu1 %vm402_vm0, %v14439_v61  ;;  %v14717_v61 = vld [vmem:[#allocation2 + $0xca] sm:$0xff] }
  0x9d   : > { %12702 = vmatprep.mubr.msk.f32.mxu0 %vm402_vm0, %v14697_v41  ;;  %12743 = vmatprep.mubr.msk.f32.mxu1 %vm402_vm0, %v14444_v63  ;;  %18412 = vst [vmem:[#allocation40_spill] sm:$0xff] %v14717_v61  ;;  %v14733_v63 = vld [vmem:[#allocation2 + $0xf2] sm:$0xff] }
  0x9e   : > { %18415 = vst [vmem:[#allocation43_spill] sm:$0xff] %v14733_v63 }
  0xa0   : > { %12703 = vmatmul.mubr.msk.f32.gmra.mxu0 %vm402_vm0, %v14705_v55  ;;  %12744 = vmatmul.mubr.msk.f32.gmra.mxu1 %vm402_vm0, %v14457_v2  ;;  %v14729_v2 = vld [vmem:[#allocation2 + $0xe2] sm:$0xff] }
  0xa1   : > { %12705 = vmatprep.mubr.msk.f32.mxu0 %vm402_vm0, %v14709_v46  ;;  %12746 = vmatprep.mubr.msk.f32.mxu1 %vm402_vm0, %v14461_v4  ;;  %18414 = vst [vmem:[#allocation42_spill] sm:$0xff] %v14729_v2  ;;  %v14745_v4 = vld [vmem:[#allocation2 + $0x10a] sm:$0xff] }
  0xa4   : > { %12706 = vmatmul.mubr.msk.f32.gmra.mxu0 %vm402_vm0, %v14717_v61  ;;  %12747 = vmatmul.mubr.msk.f32.gmra.mxu1 %vm402_vm0, %v14478_v7  ;;  %v14741_v7 = vld [vmem:[#allocation2 + $0xfa] sm:$0xff] }
  0xa5   : > { %12708 = vmatprep.mubr.msk.f32.mxu0 %vm402_vm0, %v14721_v58  ;;  %12749 = vmatprep.mubr.msk.f32.mxu1 %vm402_vm0, %v14484_v9  ;;  %v14757_v9 = vld [vmem:[#allocation2 + $0x122] sm:$0xff] }
  0xa8   : > { %12709 = vmatmul.mubr.msk.f32.gmra.mxu0 %vm402_vm0, %v14729_v2  ;;  %12750 = vmatmul.mubr.msk.f32.gmra.mxu1 %vm402_vm0, %v14496_v11  ;;  %v14753_v11 = vld [vmem:[#allocation2 + $0x112] sm:$0xff] }
  0xa9   : > { %12711 = vmatprep.mubr.msk.f32.mxu0 %vm402_vm0, %v14733_v63  ;;  %12752 = vmatprep.mubr.msk.f32.mxu1 %vm402_vm0, %v14500_v13  ;;  %v14769_v13 = vld [vmem:[#allocation2 + $0x13a] sm:$0xff] }
  0xac   : > { %12712 = vmatmul.mubr.msk.f32.gmra.mxu0 %vm402_vm0, %v14741_v7  ;;  %12753 = vmatmul.mubr.msk.f32.gmra.mxu1 %vm402_vm0, %v14510_v15  ;;  %v14765_v15 = vld [vmem:[#allocation2 + $0x12a] sm:$0xff] }
  0xad   : > { %12714 = vmatprep.mubr.msk.f32.mxu0 %vm402_vm0, %v14745_v4  ;;  %12755 = vmatprep.mubr.msk.f32.mxu1 %vm402_vm0, %v14524_v20  ;;  %v14781_v20 = vld [vmem:[#allocation2 + $0x152] sm:$0xff] }
  0xb0   : > { %12715 = vmatmul.mubr.msk.f32.gmra.mxu0 %vm402_vm0, %v14753_v11  ;;  %12756 = vmatmul.mubr.msk.f32.gmra.mxu1 %vm402_vm0, %v14539_v22  ;;  %v14777_v22 = vld [vmem:[#allocation2 + $0x142] sm:$0xff] }
  0xb1   : > { %12717 = vmatprep.mubr.msk.f32.mxu0 %vm402_vm0, %v14757_v9  ;;  %12758 = vmatprep.mubr.msk.f32.mxu1 %vm402_vm0, %v14543_v27  ;;  %v14793_v27 = vld [vmem:[#allocation2 + $0x16a] sm:$0xff] }
  0xb4   : > { %12718 = vmatmul.mubr.msk.f32.gmra.mxu0 %vm402_vm0, %v14765_v15  ;;  %12759 = vmatmul.mubr.msk.f32.gmra.mxu1 %vm402_vm0, %v14555_v32  ;;  %v14789_v32 = vld [vmem:[#allocation2 + $0x15a] sm:$0xff] }
  0xb5   : > { %12720 = vmatprep.mubr.msk.f32.mxu0 %vm402_vm0, %v14769_v13  ;;  %12761 = vmatprep.mubr.msk.f32.mxu1 %vm402_vm0, %v14559_v42 }
  0xb8   : > { %12721 = vmatmul.mubr.msk.f32.gmra.mxu0 %vm402_vm0, %v14777_v22  ;;  %12762 = vmatmul.mubr.msk.f32.gmra.mxu1 %vm402_vm0, %v14571_v45  ;;  %v14801_v45 = vld [vmem:[#allocation2 + $0x172] sm:$0xff] }
  0xb9   : > { %12723 = vmatprep.mubr.msk.f32.mxu0 %vm402_vm0, %v14781_v20  ;;  %12764 = vmatprep.mubr.msk.f32.mxu1 %vm402_vm0, %v14575_v49 }
  0xbc   : > { %12724 = vmatmul.mubr.msk.f32.gmra.mxu0 %vm402_vm0, %v14789_v32  ;;  %12765 = vmatmul.mubr.msk.f32.gmra.mxu1 %vm402_vm0, %v14587_v51  ;;  %v14818_v51 = vld [vmem:[%s18309_s1 + $0x20] sm:$0x7] }
  0xbd   : > { %12726 = vmatprep.mubr.msk.f32.mxu0 %vm402_vm0, %v14793_v27  ;;  %12767 = vmatprep.mubr.msk.f32.mxu1 %vm402_vm0, %v14589_v53 }
  0xc0   : > { %12727 = vmatmul.mubr.msk.f32.gmra.mxu0 %vm402_vm0, %v14801_v45  ;;  %12768 = vmatmul.mubr.msk.f32.gmra.mxu1 %vm402_vm0, %v14598_v57 }
  0xc1   : > { %12781 = vmatprep.mubr.msk.f32.mxu0 %vm402_vm0, %v14322_v24  ;;  %12770 = vmatprep.mubr.msk.f32.mxu1 %vm402_vm0, %v14602_v16  ;;  %v14828_v24 = vld [vmem:[#allocation2 + $0x180] sm:$0xff] }
  0xc4   : > { %12782 = vmatmul.mubr.msk.f32.vlgmr.msra.gmra.mxu0 %vm402_vm0, %v14333_v26  ;;  %12771 = vmatmul.mubr.msk.f32.gmra.mxu1 %vm402_vm0, %v14618_v1  ;;  %v14840_v26 = vld [vmem:[#allocation2 + $0x188] sm:$0xff] }
  0xc5   : > { %12784 = vmatprep.mubr.msk.f32.mxu0 %vm402_vm0, %v14340_v30  ;;  %12773 = vmatprep.mubr.msk.f32.mxu1 %vm402_vm0, %v14624_v54 }
  0xc6   : > { %12880 = vmatpush3.msk.msra.mxu0 %vm686_vm2, %v14608_v18  ;;  %v18418_v18 = vld [vmem:[#allocation34_spill] sm:$0xff] }
  0xc7   : > { %12979 = vmatprep.subr.msk.mxu0 %vm686_vm2, %v14818_v51 }
  0xc8   : > { %12785 = vmatmul.mubr.msk.f32.gmra.mxu0 %vm402_vm0, %v14347_v31  ;;  %12774 = vmatmul.mubr.msk.f32.gmra.mxu1 %vm402_vm0, %v14638_v6 }
  0xc9   : > { %12787 = vmatprep.mubr.msk.f32.mxu0 %vm402_vm0, %v14352_v34  ;;  %12776 = vmatprep.mubr.msk.f32.mxu1 %vm402_vm0, %v14828_v24 }
  0xcc   : > { %12788 = vmatmul.mubr.msk.f32.gmra.mxu0 %vm402_vm0, %v14362_v36  ;;  %12777 = vmatmul.mubr.msk.f32.gmra.mxu1 %vm402_vm0, %v14840_v26 }
  0xcd   : > { %12790 = vmatprep.mubr.msk.f32.mxu0 %vm402_vm0, %v14368_v38  ;;  %12831 = vmatprep.mubr.msk.f32.mxu1 %vm402_vm0, %v14600_v60  ;;  %v18417_v60 = vld [vmem:[#allocation33_spill] sm:$0xff] }
  0xd0   : > { %12791 = vmatmul.mubr.msk.f32.gmra.mxu0 %vm402_vm0, %v14378_v40  ;;  %12832 = vmatmul.mubr.msk.f32.vlgmr.msra.gmra.mxu1 %vm402_vm0, %v14614_v52  ;;  %v18419_v52 = vld [vmem:[#allocation36_spill] sm:$0xff] }
  0xd1   : > { %12793 = vmatprep.mubr.msk.f32.mxu0 %vm402_vm0, %v14385_v43  ;;  %12834 = vmatprep.mubr.msk.f32.mxu1 %vm402_vm0, %v14620_v29 }
  0xd2   : > { %12930 = vmatpush3.msk.msra.mxu1 %vm686_vm2, %v14659_v33  ;;  %v18416_v33 = vld [vmem:[#allocation31_spill] sm:$0xff] }
  0xd4   : > { %12794 = vmatmul.mubr.msk.f32.gmra.mxu0 %vm402_vm0, %v14392_v47  ;;  %12835 = vmatmul.mubr.msk.f32.gmra.mxu1 %vm402_vm0, %v14634_v25 }
  0xd5   : > { %12796 = vmatprep.mubr.msk.f32.mxu0 %vm402_vm0, %v14417_v56  ;;  %12837 = vmatprep.mubr.msk.f32.mxu1 %vm402_vm0, %v14640_v50 }
  0xd8   : > { %12797 = vmatmul.mubr.msk.f32.gmra.mxu0 %vm402_vm0, %v14432_v59  ;;  %12838 = vmatmul.mubr.msk.f32.gmra.mxu1 %vm402_vm0, %v14648_v48 }
  0xd9   : > { %12799 = vmatprep.mubr.msk.f32.mxu0 %vm402_vm0, %v14441_v62  ;;  %12840 = vmatprep.mubr.msk.f32.mxu1 %vm402_vm0, %v14652_v44 }
  0xdc   : > { %12800 = vmatmul.mubr.msk.f32.gmra.mxu0 %vm402_vm0, %v14453_v0  ;;  %12841 = vmatmul.mubr.msk.f32.gmra.mxu1 %vm402_vm0, %v14665_v28 }
  0xdd   : > { %12802 = vmatprep.mubr.msk.f32.mxu0 %vm402_vm0, %v14459_v3  ;;  %12843 = vmatprep.mubr.msk.f32.mxu1 %vm402_vm0, %v14669_v35 }
  0xe0   : > { %12803 = vmatmul.mubr.msk.f32.gmra.mxu0 %vm402_vm0, %v14469_v5  ;;  %12844 = vmatmul.mubr.msk.f32.gmra.mxu1 %vm402_vm0, %v14681_v37 }
  0xe1   : > { %12805 = vmatprep.mubr.msk.f32.mxu0 %vm402_vm0, %v14480_v8  ;;  %12846 = vmatprep.mubr.msk.f32.mxu1 %vm402_vm0, %v14685_v39 }
  0xe4   : > { %12806 = vmatmul.mubr.msk.f32.gmra.mxu0 %vm402_vm0, %v14492_v10  ;;  %12847 = vmatmul.mubr.msk.f32.gmra.mxu1 %vm402_vm0, %v14693_v19 }
  0xe5   : > { %12808 = vmatprep.mubr.msk.f32.mxu0 %vm402_vm0, %v14498_v12  ;;  %12849 = vmatprep.mubr.msk.f32.mxu1 %vm402_vm0, %v14697_v41 }
  0xe8   : > { %12809 = vmatmul.mubr.msk.f32.gmra.mxu0 %vm402_vm0, %v14508_v14  ;;  %12850 = vmatmul.mubr.msk.f32.gmra.mxu1 %vm402_vm0, %v14705_v55 }
  0xe9   : > { %12811 = vmatprep.mubr.msk.f32.mxu0 %vm402_vm0, %v14515_v17  ;;  %12852 = vmatprep.mubr.msk.f32.mxu1 %vm402_vm0, %v14709_v46  ;;  %v18435_v46 = vld [vmem:[#allocation23_spill] sm:$0xff] }
  0xec   : > { %12812 = vmatmul.mubr.msk.f32.gmra.mxu0 %vm402_vm0, %v14535_v21  ;;  %12853 = vmatmul.mubr.msk.f32.gmra.mxu1 %vm402_vm0, %v14717_v61 }
  0xed   : > { %12814 = vmatprep.mubr.msk.f32.mxu0 %vm402_vm0, %v14541_v23  ;;  %12855 = vmatprep.mubr.msk.f32.mxu1 %vm402_vm0, %v14721_v58  ;;  %v18420_v58 = vld [vmem:[#allocation37_spill] sm:$0xff] }
  0xf0   : > { %12815 = vmatmul.mubr.msk.f32.gmra.mxu0 %vm402_vm0, %v18416_v33  ;;  %12856 = vmatmul.mubr.msk.f32.gmra.mxu1 %vm402_vm0, %v14729_v2  ;;  %v18421_v2 = vld [vmem:[#allocation12_spill] sm:$0xff] }
  0xf1   : > { %12817 = vmatprep.mubr.msk.f32.mxu0 %vm402_vm0, %v18417_v60  ;;  %12858 = vmatprep.mubr.msk.f32.mxu1 %vm402_vm0, %v14733_v63  ;;  %v14940_v63 = vld [vmem:[#allocation2 + $0x181] sm:$0xff] }
  0xf4   : > { %12818 = vmatmul.mubr.msk.f32.gmra.mxu0 %vm402_vm0, %v18418_v18  ;;  %12859 = vmatmul.mubr.msk.f32.gmra.mxu1 %vm402_vm0, %v14741_v7  ;;  %v18422_v7 = vld [vmem:[#allocation13_spill] sm:$0xff] }
  0xf5   : > { %12820 = vmatprep.mubr.msk.f32.mxu0 %vm402_vm0, %v18419_v52  ;;  %12861 = vmatprep.mubr.msk.f32.mxu1 %vm402_vm0, %v14745_v4  ;;  %v14948_v4 = vld [vmem:[#allocation2 + $0x189] sm:$0xff] }
  0xf8   : > { %12821 = vmatmul.mubr.msk.f32.gmra.mxu0 %vm402_vm0, %v18420_v58  ;;  %12862 = vmatmul.mubr.msk.f32.gmra.mxu1 %vm402_vm0, %v14753_v11  ;;  %v18425_v11 = vld [vmem:[#allocation16_spill] sm:$0xff] }
  0xf9   : > { %12823 = vmatprep.mubr.msk.f32.mxu0 %vm402_vm0, %v18421_v2  ;;  %12864 = vmatprep.mubr.msk.f32.mxu1 %vm402_vm0, %v14757_v9  ;;  %v18423_v2 = vld [vmem:[#allocation14_spill] sm:$0xff]  ;;  %v18424_v9 = vld [vmem:[#allocation15_spill] sm:$0xff] }
  0xfc   : > { %12824 = vmatmul.mubr.msk.f32.gmra.mxu0 %vm402_vm0, %v18422_v7  ;;  %12865 = vmatmul.mubr.msk.f32.gmra.mxu1 %vm402_vm0, %v14765_v15  ;;  %v14970_v15 = vld [vmem:[#allocation2 + $0x182] sm:$0xff]  ;;  %v14980_v7 = vld [vmem:[#allocation2 + $0x18a] sm:$0xff] }
  0xfd   : > { %12826 = vmatprep.mubr.msk.f32.mxu0 %vm402_vm0, %v14940_v63  ;;  %12867 = vmatprep.mubr.msk.f32.mxu1 %vm402_vm0, %v14769_v13  ;;  %18426 = vst [vmem:[#allocation31_spill] sm:$0xff] %v14970_v15  ;;  %18429 = vst [vmem:[#allocation33_spill] sm:$0xff] %v14980_v7 }
 0x100   : > { %12827 = vmatmul.mubr.msk.f32.gmra.mxu0 %vm402_vm0, %v14948_v4  ;;  %12868 = vmatmul.mubr.msk.f32.gmra.mxu1 %vm402_vm0, %v14777_v22  ;;  %v18427_v22 = vld [vmem:[#allocation17_spill] sm:$0xff] }
 0x101   : > { %12881 = vmatprep.mubr.msk.f32.mxu0 %vm402_vm0, %v18423_v2  ;;  %12870 = vmatprep.mubr.msk.f32.mxu1 %vm402_vm0, %v14781_v20  ;;  %v18428_v20 = vld [vmem:[#allocation18_spill] sm:$0xff]  ;;  %v18430_v2 = vld [vmem:[#allocation19_spill] sm:$0xff] }
 0x102   : > { %v12583_v13 = vpop.f32.mrf.mxu0 }
 0x104   : > { %12882 = vmatmul.mubr.msk.f32.vlgmr.msra.gmra.mxu0 %vm402_vm0, %v18424_v9  ;;  %12871 = vmatmul.mubr.msk.f32.gmra.mxu1 %vm402_vm0, %v14789_v32  ;;  %v756_v32 = vpop.f32.mrf.mxu0  ;;  %v18431_v9 = vld [vmem:[#allocation20_spill] sm:$0xff] }
 0x105   : > { %12884 = vmatprep.mubr.msk.f32.mxu0 %vm402_vm0, %v18425_v11  ;;  %12873 = vmatprep.mubr.msk.f32.mxu1 %vm402_vm0, %v14793_v27 }
 0x106   : > { %12980 = vmatpush3.msk.msra.mxu0 %vm686_vm2, %v14818_v51 }
 0x108   : > { %12885 = vmatmul.mubr.msk.f32.gmra.mxu0 %vm402_vm0, %v18427_v22  ;;  %12874 = vmatmul.mubr.msk.f32.gmra.mxu1 %vm402_vm0, %v14801_v45 }
 0x109   : > { %12887 = vmatprep.mubr.msk.f32.mxu0 %vm402_vm0, %v18428_v20  ;;  %12876 = vmatprep.mubr.msk.f32.mxu1 %vm402_vm0, %v14970_v15  ;;  %v18433_v20 = vld [vmem:[#allocation21_spill] sm:$0xff] }
 0x10c   : > { %v12586_v27 = vpop.f32.mrf.mxu0  ;;  %12888 = vmatmul.mubr.msk.f32.gmra.mxu0 %vm402_vm0, %v18430_v2  ;;  %v14984_v51 = vpop.f32.mrf.mxu1  ;;  %12877 = vmatmul.mubr.msk.f32.gmra.mxu1 %vm402_vm0, %v14980_v7  ;;  %v18434_v2 = vld [vmem:[#allocation22_spill] sm:$0xff] }
 0x10d   : > { %12890 = vmatprep.mubr.msk.f32.mxu0 %vm402_vm0, %v18431_v9  ;;  %12931 = vmatprep.mubr.msk.f32.mxu1 %vm402_vm0, %v14340_v30 }
 0x10e   : > { %v766_v45 = vpop.f32.mrf.mxu0  ;;  %v14992_v11 = vpop.f32.mrf.mxu1 }
 0x10f   : > { %18432 = vst [vmem:[#allocation34_spill] sm:$0xff] %v14992_v11 }
 0x110   : > { %v12589_v22 = vpop.f32.mrf.mxu0  ;;  %12891 = vmatmul.mubr.msk.f32.gmra.mxu0 %vm402_vm0, %v18433_v20  ;;  %v12633_v15 = vpop.f32.mrf.mxu1  ;;  %12932 = vmatmul.mubr.msk.f32.vlgmr.msra.gmra.mxu1 %vm402_vm0, %v14347_v31  ;;  %v18436_v31 = vld [vmem:[#allocation24_spill] sm:$0xff] }
 0x111   : > { %12893 = vmatprep.mubr.msk.f32.mxu0 %vm402_vm0, %v18434_v2  ;;  %v15000_v7 = vadd.f32 %v12633_v15, %v12583_v13  ;;  %12934 = vmatprep.mubr.msk.f32.mxu1 %vm402_vm0, %v14352_v34 }
 0x112   : > { %v776_v9 = vpop.f32.mrf.mxu0  ;;  %v1080_v30 = vpop.f32.mrf.mxu1 }
 0x113   : > { %v15004_v61 = vadd.f32 %v1080_v30, %v756_v32  ;;  %v18437_v30 = vld [vmem:[#allocation25_spill] sm:$0xff] }
 0x114   : > { %v12592_v11 = vpop.f32.mrf.mxu0  ;;  %12894 = vmatmul.mubr.msk.f32.gmra.mxu0 %vm402_vm0, %v18435_v46  ;;  %v12636_v20 = vpop.f32.mrf.mxu1  ;;  %12935 = vmatmul.mubr.msk.f32.gmra.mxu1 %vm402_vm0, %v14362_v36  ;;  %v18438_v36 = vld [vmem:[#allocation26_spill] sm:$0xff] }
 0x115   : > { %12896 = vmatprep.mubr.msk.f32.mxu0 %vm402_vm0, %v18436_v31  ;;  %v15012_v13 = vadd.f32 %v12636_v20, %v12586_v27  ;;  %12937 = vmatprep.mubr.msk.f32.mxu1 %vm402_vm0, %v14368_v38 }
 0x116   : > { %v786_v15 = vpop.f32.mrf.mxu0  ;;  %v1090_v34 = vpop.f32.mrf.mxu1 }
 0x117   : > { %v15016_v32 = vadd.f32 %v1090_v34, %v766_v45  ;;  %v18439_v34 = vld [vmem:[#allocation27_spill] sm:$0xff] }
 0x118   : > { %v12595_v2 = vpop.f32.mrf.mxu0  ;;  %12897 = vmatmul.mubr.msk.f32.gmra.mxu0 %vm402_vm0, %v18437_v30  ;;  %v12639_v46 = vpop.f32.mrf.mxu1  ;;  %12938 = vmatmul.mubr.msk.f32.gmra.mxu1 %vm402_vm0, %v14378_v40  ;;  %v18440_v40 = vld [vmem:[#allocation28_spill] sm:$0xff] }
 0x119   : > { %12899 = vmatprep.mubr.msk.f32.mxu0 %vm402_vm0, %v18438_v36  ;;  %v15024_v27 = vadd.f32 %v12639_v46, %v12589_v22  ;;  %12940 = vmatprep.mubr.msk.f32.mxu1 %vm402_vm0, %v14385_v43 }
 0x11a   : > { %v796_v20 = vpop.f32.mrf.mxu0  ;;  %v1100_v38 = vpop.f32.mrf.mxu1 }
 0x11b   : > { %v15028_v45 = vadd.f32 %v1100_v38, %v776_v9  ;;  %v18441_v38 = vld [vmem:[#allocation29_spill] sm:$0xff] }
 0x11c   : > { %v12598_v31 = vpop.f32.mrf.mxu0  ;;  %12900 = vmatmul.mubr.msk.f32.gmra.mxu0 %vm402_vm0, %v18439_v34  ;;  %v12642_v30 = vpop.f32.mrf.mxu1  ;;  %12941 = vmatmul.mubr.msk.f32.gmra.mxu1 %vm402_vm0, %v14392_v47  ;;  %v18442_v47 = vld [vmem:[#allocation30_spill] sm:$0xff] }
 0x11d   : > { %12902 = vmatprep.mubr.msk.f32.mxu0 %vm402_vm0, %v18440_v40  ;;  %v15036_v22 = vadd.f32 %v12642_v30, %v12592_v11  ;;  %12943 = vmatprep.mubr.msk.f32.mxu1 %vm402_vm0, %v14417_v56 }
 0x11e   : > { %v806_v46 = vpop.f32.mrf.mxu0  ;;  %v1110_v43 = vpop.f32.mrf.mxu1 }
 0x11f   : > { %v15040_v9 = vadd.f32 %v1110_v43, %v786_v15  ;;  %v18443_v43 = vld [vmem:[#allocation32_spill] sm:$0xff] }
 0x120   : > { %v12601_v36 = vpop.f32.mrf.mxu0  ;;  %12903 = vmatmul.mubr.msk.f32.gmra.mxu0 %vm402_vm0, %v18441_v38  ;;  %v12645_v34 = vpop.f32.mrf.mxu1  ;;  %12944 = vmatmul.mubr.msk.f32.gmra.mxu1 %vm402_vm0, %v14432_v59 }
 0x121   : > { %12905 = vmatprep.mubr.msk.f32.mxu0 %vm402_vm0, %v18442_v47  ;;  %v15048_v11 = vadd.f32 %v12645_v34, %v12595_v2  ;;  %12946 = vmatprep.mubr.msk.f32.mxu1 %vm402_vm0, %v14441_v62  ;;  %v18444_v47 = vld [vmem:[#allocation35_spill] sm:$0xff] }
 0x122   : > { %v816_v30 = vpop.f32.mrf.mxu0  ;;  %v1120_v56 = vpop.f32.mrf.mxu1 }
 0x123   : > { %v15052_v15 = vadd.f32 %v1120_v56, %v796_v20 }
 0x124   : > { %v12604_v40 = vpop.f32.mrf.mxu0  ;;  %12906 = vmatmul.mubr.msk.f32.gmra.mxu0 %vm402_vm0, %v18443_v43  ;;  %v12648_v38 = vpop.f32.mrf.mxu1  ;;  %12947 = vmatmul.mubr.msk.f32.gmra.mxu1 %vm402_vm0, %v14453_v0  ;;  %v18445_v43 = vld [vmem:[#allocation38_spill] sm:$0xff] }
 0x125   : > { %12908 = vmatprep.mubr.msk.f32.mxu0 %vm402_vm0, %v14559_v42  ;;  %v15060_v59 = vadd.f32 %v12648_v38, %v12598_v31  ;;  %12949 = vmatprep.mubr.msk.f32.mxu1 %vm402_vm0, %v14459_v3 }
 0x126   : > { %v826_v2 = vpop.f32.mrf.mxu0  ;;  %v1130_v62 = vpop.f32.mrf.mxu1 }
 0x127   : > { %v15064_v20 = vadd.f32 %v1130_v62, %v806_v46 }
 0x128   : > { %v12607_v34 = vpop.f32.mrf.mxu0  ;;  %12909 = vmatmul.mubr.msk.f32.gmra.mxu0 %vm402_vm0, %v18444_v47  ;;  %v12651_v56 = vpop.f32.mrf.mxu1  ;;  %12950 = vmatmul.mubr.msk.f32.gmra.mxu1 %vm402_vm0, %v14469_v5 }
 0x129   : > { %12911 = vmatprep.mubr.msk.f32.mxu0 %vm402_vm0, %v14575_v49  ;;  %v15072_v0 = vadd.f32 %v12651_v56, %v12601_v36  ;;  %12952 = vmatprep.mubr.msk.f32.mxu1 %vm402_vm0, %v14480_v8 }
 0x12a   : > { %v15074_v42 = vpop.f32.mrf.mxu0  ;;  %v1140_v3 = vpop.f32.mrf.mxu1 }
 0x12b   : > { %v15078_v31 = vadd.f32 %v1140_v3, %v816_v30  ;;  %v3216_v3 = vld [vmem:[#allocation2 + $0x169] sm:$0xff] }
 0x12c   : > { %v12610_v46 = vpop.f32.mrf.mxu0  ;;  %12912 = vmatmul.mubr.msk.f32.gmra.mxu0 %vm402_vm0, %v18445_v43  ;;  %v12654_v38 = vpop.f32.mrf.mxu1  ;;  %12953 = vmatmul.mubr.msk.f32.gmra.mxu1 %vm402_vm0, %v14492_v10 }
 0x12d   : > { %12914 = vmatprep.mubr.msk.f32.mxu0 %vm402_vm0, %v14589_v53  ;;  %v15086_v5 = vadd.f32 %v12654_v38, %v12604_v40  ;;  %12955 = vmatprep.mubr.msk.f32.mxu1 %vm402_vm0, %v14498_v12 }
 0x12e   : > { %v15088_v49 = vpop.f32.mrf.mxu0  ;;  %v1150_v8 = vpop.f32.mrf.mxu1 }
 0x12f   : > { %v15092_v36 = vadd.f32 %v1150_v8, %v826_v2 }
 0x130   : > { %v12613_v30 = vpop.f32.mrf.mxu0  ;;  %12915 = vmatmul.mubr.msk.f32.gmra.mxu0 %vm402_vm0, %v14598_v57  ;;  %v12657_v62 = vpop.f32.mrf.mxu1  ;;  %12956 = vmatmul.mubr.msk.f32.gmra.mxu1 %vm402_vm0, %v14508_v14 }
 0x131   : > { %12917 = vmatprep.mubr.msk.f32.mxu0 %vm402_vm0, %v14602_v16  ;;  %v15100_v10 = vadd.f32 %v12657_v62, %v12607_v34  ;;  %12958 = vmatprep.mubr.msk.f32.mxu1 %vm402_vm0, %v14515_v17 }
 0x132   : > { %v15102_v53 = vpop.f32.mrf.mxu0  ;;  %v15106_v12 = vpop.f32.mrf.mxu1 }
 0x134   : > { %v12616_v40 = vpop.f32.mrf.mxu0  ;;  %12918 = vmatmul.mubr.msk.f32.gmra.mxu0 %vm402_vm0, %v14618_v1  ;;  %v12660_v57 = vpop.f32.mrf.mxu1  ;;  %12959 = vmatmul.mubr.msk.f32.gmra.mxu1 %vm402_vm0, %v14535_v21 }
 0x135   : > { %12920 = vmatprep.mubr.msk.f32.mxu0 %vm402_vm0, %v14624_v54  ;;  %v15114_v14 = vadd.f32 %v12660_v57, %v12610_v46  ;;  %12961 = vmatprep.mubr.msk.f32.mxu1 %vm402_vm0, %v14541_v23  ;;  %v2830_v23 = vld [vmem:[#allocation2 + $0x198] sm:$0xff] }
 0x136   : > { %v15116_v16 = vpop.f32.mrf.mxu0  ;;  %v15120_v17 = vpop.f32.mrf.mxu1 }
 0x138   : > { %v12619_v2 = vpop.f32.mrf.mxu0  ;;  %12921 = vmatmul.mubr.msk.f32.gmra.mxu0 %vm402_vm0, %v14638_v6  ;;  %v12663_v1 = vpop.f32.mrf.mxu1  ;;  %12962 = vmatmul.mubr.msk.f32.gmra.mxu1 %vm402_vm0, %v18416_v33 }
 0x139   : > { %12923 = vmatprep.mubr.msk.f32.mxu0 %vm402_vm0, %v14828_v24  ;;  %v15128_v21 = vadd.f32 %v12663_v1, %v12613_v30  ;;  %12964 = vmatprep.mubr.msk.f32.mxu1 %vm402_vm0, %v18417_v60  ;;  %v2831_v24 = vld [vmem:[#allocation2 + $0x1a0] sm:$0xff] }
 0x13a   : > { %v15130_v54 = vpop.f32.mrf.mxu0  ;;  %v15134_v34 = vpop.f32.mrf.mxu1 }
 0x13c   : > { %v12622_v47 = vpop.f32.mrf.mxu0  ;;  %12924 = vmatmul.mubr.msk.f32.gmra.mxu0 %vm402_vm0, %v14840_v26  ;;  %v12666_v6 = vpop.f32.mrf.mxu1  ;;  %12965 = vmatmul.mubr.msk.f32.gmra.mxu1 %vm402_vm0, %v18418_v18 }
 0x13d   : > { %12926 = vmatprep.mubr.msk.f32.mxu0 %vm402_vm0, %v2830_v23  ;;  %v15141_v33 = vadd.f32 %v12666_v6, %v12616_v40  ;;  %12967 = vmatprep.mubr.msk.f32.mxu1 %vm402_vm0, %v18419_v52  ;;  %v3217_v52 = vld [vmem:[#allocation2 + $0x171] sm:$0xff] }
 0x13e   : > { %v15143_v56 = vpop.f32.mrf.mxu0  ;;  %v15147_v60 = vpop.f32.mrf.mxu1 }
 0x13f   : > { %18446 = vst [vmem:[#allocation36_spill] sm:$0xff] %v15143_v56 }
 0x140   : > { %v12625_v46 = vpop.f32.mrf.mxu0  ;;  %12927 = vmatmul.mubr.msk.f32.gmra.mxu0 %vm402_vm0, %v2831_v24  ;;  %v12669_v26 = vpop.f32.mrf.mxu1  ;;  %12968 = vmatmul.mubr.msk.f32.gmra.mxu1 %vm402_vm0, %v18420_v58 }
 0x141   : > { %12981 = vmatprep.mubr.msk.f32.mxu0 %vm402_vm0, %v14620_v29  ;;  %v15154_v18 = vadd.f32 %v12669_v26, %v12619_v2  ;;  %12970 = vmatprep.mubr.msk.f32.mxu1 %vm402_vm0, %v3216_v3 }
 0x142   : > { %v15156_v43 = vpop.f32.mrf.mxu0  ;;  %v15159_v38 = vpop.f32.mrf.mxu1 }
 0x143   : > { %18447 = vst [vmem:[#allocation37_spill] sm:$0xff] %v15156_v43 }
 0x144   : > { %v12683_v8 = vpop.f32.mrf.mxu0  ;;  %12982 = vmatmul.mubr.msk.f32.vlgmr.msra.gmra.mxu0 %vm402_vm0, %v14634_v25  ;;  %v12672_v30 = vpop.f32.mrf.mxu1  ;;  %12971 = vmatmul.mubr.msk.f32.gmra.mxu1 %vm402_vm0, %v3217_v52  ;;  %v3220_v25 = vld [vmem:[#allocation2 + $0x199] sm:$0xff] }
 0x145   : > { %v1598_v62 = vadd.f32 %v12683_v8, %v15000_v7  ;;  %12984 = vmatprep.mubr.msk.f32.mxu0 %vm402_vm0, %v14640_v50  ;;  %v15167_v29 = vadd.f32 %v12672_v30, %v12622_v47  ;;  %12973 = vmatprep.mubr.msk.f32.mxu1 %vm402_vm0, %v14940_v63 }
 0x146   : > { %v1438_v58 = vpop.f32.mrf.mxu0  ;;  %v15171_v40 = vpop.f32.mrf.mxu1 }
 0x147   : > { %18448 = vst [vmem:[#allocation12_spill] sm:$0xff] %v15171_v40  ;;  %v15174_v57 = vadd.f32 %v1438_v58, %v15004_v61  ;;  %v3221_v61 = vld [vmem:[#allocation2 + $0x1a1] sm:$0xff] }
 0x148   : > { %v12686_v2 = vpop.f32.mrf.mxu0  ;;  %12985 = vmatmul.mubr.msk.f32.gmra.mxu0 %vm402_vm0, %v14648_v48  ;;  %v12675_v7 = vpop.f32.mrf.mxu1  ;;  %12974 = vmatmul.mubr.msk.f32.gmra.mxu1 %vm402_vm0, %v14948_v4 }
 0x149   : > { %v1600_v1 = vadd.f32 %v12686_v2, %v15012_v13  ;;  %12987 = vmatprep.mubr.msk.f32.mxu0 %vm402_vm0, %v14652_v44  ;;  %v15183_v63 = vadd.f32 %v12675_v7, %v12625_v46  ;;  %12976 = vmatprep.mubr.msk.f32.mxu1 %vm402_vm0, %v3220_v25  ;;  %v18452_v7 = vld [vmem:[#allocation40_spill] sm:$0xff] }
 0x14a   : > { %v1448_v50 = vpop.f32.mrf.mxu0  ;;  %v15186_v23 = vpop.f32.mrf.mxu1 }
 0x14b   : > { %18449 = vst [vmem:[#allocation13_spill] sm:$0xff] %v15186_v23  ;;  %v15189_v47 = vadd.f32 %v1448_v50, %v15016_v32 }
 0x14c   : > { %v12689_v48 = vpop.f32.mrf.mxu0  ;;  %12988 = vmatmul.mubr.msk.f32.gmra.mxu0 %vm402_vm0, %v14665_v28  ;;  %v12678_v13 = vpop.f32.mrf.mxu1  ;;  %12977 = vmatmul.mubr.msk.f32.gmra.mxu1 %vm402_vm0, %v3221_v61 }
 0x14d   : > { %v1602_v4 = vadd.f32 %v12689_v48, %v15024_v27  ;;  %12990 = vmatprep.mubr.msk.f32.mxu0 %vm402_vm0, %v14669_v35  ;;  %v15198_v44 = vadd.f32 %v12678_v13, %v14984_v51 }
 0x14e   : > { %v1458_v6 = vpop.f32.mrf.mxu0  ;;  %v15200_v24 = vpop.f32.mrf.mxu1 }
 0x14f   : > { %18450 = vst [vmem:[#allocation14_spill] sm:$0xff] %v15200_v24  ;;  %v15203_v32 = vadd.f32 %v1458_v6, %v15028_v45 }
 0x150   : > { %v12692_v3 = vpop.f32.mrf.mxu0  ;;  %12991 = vmatmul.mubr.msk.f32.gmra.mxu0 %vm402_vm0, %v14681_v37  ;;  %v12733_v27 = vpop.f32.mrf.mxu1 }
 0x151   : > { %v1604_v28 = vadd.f32 %v12692_v3, %v15036_v22  ;;  %12993 = vmatprep.mubr.msk.f32.mxu0 %vm402_vm0, %v14685_v39  ;;  %v15210_v35 = vadd.f32 %v12733_v27, %v1598_v62  ;;  %v3597_v27 = vld [vmem:[#allocation2 + $0xfa] sm:$0xff] }
 0x152   : > { %v1468_v51 = vpop.f32.mrf.mxu0  ;;  %v15215_v26 = vpop.f32.mrf.mxu1 }
 0x153   : > { %v15213_v46 = vadd.f32 %v1468_v51, %v15040_v9 }
 0x154   : > { %v12695_v45 = vpop.f32.mrf.mxu0  ;;  %12994 = vmatmul.mubr.msk.f32.gmra.mxu0 %vm402_vm0, %v14693_v19  ;;  %v12736_v52 = vpop.f32.mrf.mxu1 }
 0x155   : > { %v1606_v37 = vadd.f32 %v12695_v45, %v15048_v11  ;;  %12996 = vmatprep.mubr.msk.f32.mxu0 %vm402_vm0, %v14697_v41  ;;  %v15222_v22 = vadd.f32 %v12736_v52, %v1600_v1  ;;  %v18451_v11 = vld [vmem:[#allocation39_spill] sm:$0xff]  ;;  %v3598_v45 = vld [vmem:[#allocation2 + $0x10a] sm:$0xff] }
 0x156   : > { %v1478_v39 = vpop.f32.mrf.mxu0  ;;  %v15227_v9 = vpop.f32.mrf.mxu1 }
 0x157   : > { %v15225_v8 = vadd.f32 %v1478_v39, %v15052_v15 }
 0x158   : > { %v12698_v30 = vpop.f32.mrf.mxu0  ;;  %12997 = vmatmul.mubr.msk.f32.gmra.mxu0 %vm402_vm0, %v14705_v55  ;;  %v12739_v62 = vpop.f32.mrf.mxu1 }
 0x159   : > { %v1608_v19 = vadd.f32 %v12698_v30, %v15060_v59  ;;  %12999 = vmatprep.mubr.msk.f32.mxu0 %vm402_vm0, %v18451_v11  ;;  %v15234_v58 = vadd.f32 %v12739_v62, %v1602_v4  ;;  %v18453_v59 = vld [vmem:[#allocation41_spill] sm:$0xff]  ;;  %v18455_v4 = vld [vmem:[#allocation42_spill] sm:$0xff] }
 0x15a   : > { %v1488_v41 = vpop.f32.mrf.mxu0  ;;  %v15239_v15 = vpop.f32.mrf.mxu1  ;;  %v3599_v11 = vld [vmem:[#allocation2 + $0x112] sm:$0xff] }
 0x15b   : > { %v15237_v25 = vadd.f32 %v1488_v41, %v15064_v20 }
 0x15c   : > { %v12701_v2 = vpop.f32.mrf.mxu0  ;;  %13000 = vmatmul.mubr.msk.f32.gmra.mxu0 %vm402_vm0, %v18452_v7  ;;  %v12742_v1 = vpop.f32.mrf.mxu1 }
 0x15d   : > { %v1610_v55 = vadd.f32 %v12701_v2, %v15072_v0  ;;  %13002 = vmatprep.mubr.msk.f32.mxu0 %vm402_vm0, %v18453_v59  ;;  %v15246_v50 = vadd.f32 %v12742_v1, %v1604_v28  ;;  %v18456_v0 = vld [vmem:[#allocation43_spill] sm:$0xff]  ;;  %v3600_v2 = vld [vmem:[#allocation2 + $0x122] sm:$0xff] }
 0x15e   : > { %v1498_v61 = vpop.f32.mrf.mxu0  ;;  %v15251_v20 = vpop.f32.mrf.mxu1 }
 0x15f   : > { %v15249_v48 = vadd.f32 %v1498_v61, %v15078_v31  ;;  %v11262_v31 = vld [vmem:[%s18311_s3 + $0x78] sm:$0xff] }
 0x160   : > { %v12704_v13 = vpop.f32.mrf.mxu0  ;;  %13003 = vmatmul.mubr.msk.f32.gmra.mxu0 %vm402_vm0, %v18455_v4  ;;  %v12745_v3 = vpop.f32.mrf.mxu1  ;;  %13029 = vmatprep.subr.mxu1 %v11262_v31  ;;  %v11261_v4 = vld [vmem:[%s18311_s3 + $0x70] sm:$0xff] }
 0x161   : > { %18454 = vst [vmem:[#allocation15_spill] sm:$0xff] %v15249_v48  ;;  %v1612_v6 = vadd.f32 %v12704_v13, %v15086_v5  ;;  %13005 = vmatprep.mubr.msk.f32.mxu0 %vm402_vm0, %v18456_v0  ;;  %v15258_v51 = vadd.f32 %v12745_v3, %v1606_v37  ;;  %13030 = vmatpush3.msra.mxu1 %v11262_v31  ;;  %v3604_v31 = vld [vmem:[#allocation2 + $0x152] sm:$0xff] }
 0x162   : > { %v1508_v28 = vpop.f32.mrf.mxu0  ;;  %v15266_v39 = vpop.f32.mrf.mxu1  ;;  %v1161_v37 = vadd.f32 %v15106_v12, %v15074_v42  ;;  %13031 = vmatprep.subr.mxu1 %v11261_v4 }
 0x163   : > { %v15264_v52 = vadd.f32 %v1508_v28, %v15092_v36  ;;  %13032 = vmatpush3.msra.mxu1 %v11261_v4 }
 0x164   : > { %v12707_v5 = vpop.f32.mrf.mxu0  ;;  %13006 = vmatmul.mubr.msk.f32.gmra.mxu0 %vm402_vm0, %v3597_v27  ;;  %v12748_v62 = vpop.f32.mrf.mxu1 }
 0x165   : > { %18457 = vst [vmem:[#allocation16_spill] sm:$0xff] %v15264_v52  ;;  %v1614_v30 = vadd.f32 %v12707_v5, %v15100_v10  ;;  %13008 = vmatprep.mubr.msk.f32.mxu0 %vm402_vm0, %v3598_v45  ;;  %v15273_v41 = vadd.f32 %v12748_v62, %v1608_v19  ;;  %v3601_v10 = vld [vmem:[#allocation2 + $0x12a] sm:$0xff]  ;;  %v3602_v19 = vld [vmem:[#allocation2 + $0x13a] sm:$0xff] }
 0x166   : > { %v1518_v36 = vpop.f32.mrf.mxu0  ;;  %v15277_v1 = vpop.f32.mrf.mxu1 }
 0x167   : > { %v15275_v7 = vadd.f32 %v1518_v36, %v1161_v37  ;;  %18459 = vst [vmem:[#allocation18_spill] sm:$0xff] %v15277_v1 }
 0x168   : > { %v12710_v59 = vpop.f32.mrf.mxu0  ;;  %13009 = vmatmul.mubr.msk.f32.gmra.mxu0 %vm402_vm0, %v3599_v11  ;;  %v12751_v42 = vpop.f32.mrf.mxu1 }
 0x169   : > { %18458 = vst [vmem:[#allocation17_spill] sm:$0xff] %v15275_v7  ;;  %v1616_v61 = vadd.f32 %v12710_v59, %v15114_v14  ;;  %13011 = vmatprep.mubr.msk.f32.mxu0 %vm402_vm0, %v3600_v2  ;;  %v15282_v12 = vadd.f32 %v12751_v42, %v1610_v55  ;;  %v3603_v55 = vld [vmem:[#allocation2 + $0x142] sm:$0xff] }
 0x16a   : > { %v15284_v13 = vpop.f32.mrf.mxu0  ;;  %v15289_v3 = vpop.f32.mrf.mxu1  ;;  %v11260_v59 = vld [vmem:[%s18311_s3 + $0x68] sm:$0xff] }
 0x16b   : > { %18460 = vst [vmem:[#allocation19_spill] sm:$0xff] %v15284_v13  ;;  %18461 = vst [vmem:[#allocation20_spill] sm:$0xff] %v15289_v3  ;;  %13033 = vmatprep.subr.mxu1 %v11260_v59 }
 0x16c   : > { %v12713_v0 = vpop.f32.mrf.mxu0  ;;  %13012 = vmatmul.mubr.msk.f32.gmra.mxu0 %vm402_vm0, %v3601_v10  ;;  %v12754_v27 = vpop.f32.mrf.mxu1  ;;  %13034 = vmatpush3.msra.mxu1 %v11260_v59 }
 0x16d   : > { %v1618_v14 = vadd.f32 %v12713_v0, %v15128_v21  ;;  %13014 = vmatprep.mubr.msk.f32.mxu0 %vm402_vm0, %v3602_v19  ;;  %v15294_v28 = vadd.f32 %v12754_v27, %v1612_v6  ;;  %v3605_v21 = vld [vmem:[#allocation2 + $0x15a] sm:$0xff]  ;;  %v3606_v6 = vld [vmem:[#allocation2 + $0x16a] sm:$0xff] }
 0x16e   : > { %v15296_v45 = vpop.f32.mrf.mxu0  ;;  %v15298_v5 = vpop.f32.mrf.mxu1 }
 0x16f   : > { %18462 = vst [vmem:[#allocation21_spill] sm:$0xff] %v15296_v45  ;;  %18463 = vst [vmem:[#allocation22_spill] sm:$0xff] %v15298_v5 }
 0x170   : > { %v12716_v37 = vpop.f32.mrf.mxu0  ;;  %13015 = vmatmul.mubr.msk.f32.gmra.mxu0 %vm402_vm0, %v3603_v55  ;;  %v12757_v11 = vpop.f32.mrf.mxu1 }
 0x171   : > { %v1620_v62 = vadd.f32 %v12716_v37, %v15141_v33  ;;  %13017 = vmatprep.mubr.msk.f32.mxu0 %vm402_vm0, %v3604_v31  ;;  %v15303_v36 = vadd.f32 %v12757_v11, %v1614_v30  ;;  %v3607_v30 = vld [vmem:[#allocation2 + $0x172] sm:$0xff] }
 0x172   : > { %v15305_v2 = vpop.f32.mrf.mxu0  ;;  %v15310_v42 = vpop.f32.mrf.mxu1  ;;  %v18468_v11 = vld [vmem:[#allocation31_spill] sm:$0xff] }
 0x173   : > { %18464 = vst [vmem:[#allocation23_spill] sm:$0xff] %v15305_v2  ;;  %18465 = vst [vmem:[#allocation24_spill] sm:$0xff] %v15310_v42 }
 0x174   : > { %v12719_v10 = vpop.f32.mrf.mxu0  ;;  %13018 = vmatmul.mubr.msk.f32.gmra.mxu0 %vm402_vm0, %v3605_v21  ;;  %v12760_v19 = vpop.f32.mrf.mxu1 }
 0x175   : > { %v1622_v33 = vadd.f32 %v12719_v10, %v15154_v18  ;;  %13020 = vmatprep.mubr.msk.f32.mxu0 %vm402_vm0, %v3606_v6  ;;  %v15315_v4 = vadd.f32 %v12760_v19, %v1616_v61  ;;  %v3610_v6 = vld [vmem:[#allocation2 + $0x19a] sm:$0xff]  ;;  %v18471_v19 = vld [vmem:[#allocation33_spill] sm:$0xff] }
 0x176   : > { %v15317_v0 = vpop.f32.mrf.mxu0  ;;  %v15319_v27 = vpop.f32.mrf.mxu1  ;;  %v11259_v61 = vld [vmem:[%s18311_s3 + $0x60] sm:$0xff] }
 0x177   : > { %18466 = vst [vmem:[#allocation25_spill] sm:$0xff] %v15317_v0  ;;  %18467 = vst [vmem:[#allocation26_spill] sm:$0xff] %v15319_v27  ;;  %13035 = vmatprep.subr.mxu1 %v11259_v61 }
 0x178   : > { %v12722_v55 = vpop.f32.mrf.mxu0  ;;  %13021 = vmatmul.mubr.msk.f32.gmra.mxu0 %vm402_vm0, %v3607_v30  ;;  %v12763_v37 = vpop.f32.mrf.mxu1  ;;  %13036 = vmatpush3.msra.mxu1 %v11259_v61  ;;  %v3611_v30 = vld [vmem:[#allocation2 + $0x1a2] sm:$0xff]  ;;  %v4169_v61 = vld [vmem:[%s18311_s3 + $0x38] sm:$0xff] }
 0x179   : > { %v1624_v31 = vadd.f32 %v12722_v55, %v15167_v29  ;;  %13023 = vmatprep.mubr.msk.f32.mxu0 %vm402_vm0, %v18468_v11  ;;  %v15325_v18 = vadd.f32 %v12763_v37, %v1618_v14  ;;  %13093 = vmatprep.subr.mxu0 %v4169_v61 }
 0x17a   : > { %v15327_v21 = vpop.f32.mrf.mxu0  ;;  %v15332_v59 = vpop.f32.mrf.mxu1  ;;  %13094 = vmatpush3.msra.mxu0 %v4169_v61 }
 0x17b   : > { %18469 = vst [vmem:[#allocation27_spill] sm:$0xff] %v15327_v21  ;;  %18470 = vst [vmem:[#allocation28_spill] sm:$0xff] %v15332_v59 }
 0x17c   : > { %v12725_v10 = vpop.f32.mrf.mxu0  ;;  %13024 = vmatmul.mubr.msk.f32.gmra.mxu0 %vm402_vm0, %v18471_v19  ;;  %v12766_v14 = vpop.f32.mrf.mxu1  ;;  %v11258_v19 = vld [vmem:[%s18311_s3 + $0x58] sm:$0xff] }
 0x17d   : > { %v15337_v29 = vadd.f32 %v12725_v10, %v15183_v63  ;;  %13026 = vmatprep.mubr.msk.f32.mxu0 %vm402_vm0, %v3610_v6  ;;  %v15340_v55 = vadd.f32 %v12766_v14, %v1620_v62  ;;  %v4168_v14 = vld [vmem:[%s18311_s3 + $0x30] sm:$0xff]  ;;  %13037 = vmatprep.subr.mxu1 %v11258_v19 }
 0x17e   : > { %v15342_v37 = vpop.f32.mrf.mxu0  ;;  %v15344_v11 = vpop.f32.mrf.mxu1  ;;  %13095 = vmatprep.subr.mxu0 %v4168_v14  ;;  %13038 = vmatpush3.msra.mxu1 %v11258_v19 }
 0x17f   : > { %18472 = vst [vmem:[#allocation29_spill] sm:$0xff] %v15342_v37  ;;  %18473 = vst [vmem:[#allocation30_spill] sm:$0xff] %v15344_v11  ;;  %13096 = vmatpush3.msra.mxu0 %v4168_v14  ;;  %v4166_v37 = vld [vmem:[%s18311_s3 + $0x20] sm:$0xff] }
 0x180   : > { %v12728_v21 = vpop.f32.mrf.mxu0  ;;  %13027 = vmatmul.mubr.msk.f32.gmra.mxu0 %vm402_vm0, %v3611_v30  ;;  %v12769_v10 = vpop.f32.mrf.mxu1 }
 0x181   : > { %v15351_v63 = vadd.f32 %v12728_v21, %v15198_v44  ;;  %v15353_v6 = vadd.f32 %v12769_v10, %v1622_v33  ;;  %v4167_v33 = vld [vmem:[%s18311_s3 + $0x28] sm:$0xff] }
 0x182   : > { %v15355_v62 = vpop.f32.mrf.mxu0  ;;  %v15363_v30 = vpop.f32.mrf.mxu1  ;;  %13097 = vmatprep.subr.mxu0 %v4167_v33 }
 0x183   : > { %18474 = vst [vmem:[#allocation32_spill] sm:$0xff] %v15355_v62  ;;  %18475 = vst [vmem:[#allocation35_spill] sm:$0xff] %v15363_v30  ;;  %13098 = vmatpush3.msra.mxu0 %v4167_v33  ;;  %v18477_v30 = vmov 0.0   ;;  %v11257_v33 = vld [vmem:[%s18311_s3 + $0x50] sm:$0xff] }
 0x184   : > { %v12783_v44 = vpop.f32.mrf.mxu0  ;;  %v12772_v21 = vpop.f32.mrf.mxu1  ;;  %13099 = vmatprep.subr.mxu0 %v4166_v37  ;;  %4047 = vst.msk [vmem:[#allocation3 + $0x20] sm:$0xff] %vm4041_vm3, %v18477_v30  ;;  %4042 = vst.msk [vmem:[#allocation3] sm:$0xff] %vm4041_vm3, %v18477_v30  ;;  %13039 = vmatprep.subr.mxu1 %v11257_v33 }
 0x185   : > { %v15369_v10 = vadd.f32 %v12783_v44, %v15210_v35  ;;  %v15371_v61 = vadd.f32 %v12772_v21, %v1624_v31  ;;  %4043 = vst.msk [vmem:[#allocation3 + $0x8] sm:$0xff] %vm4041_vm3, %v18477_v30  ;;  %4046 = vst.msk [vmem:[#allocation3 + $0x18] sm:$0xff] %vm4041_vm3, %v18477_v30  ;;  %13100 = vmatpush3.msra.mxu0 %v4166_v37  ;;  %v4165_v35 = vld [vmem:[%s18311_s3 + $0x18] sm:$0xff]  ;;  %v4164_v21 = vld [vmem:[%s18311_s3 + $0x10] sm:$0xff]  ;;  %13040 = vmatpush3.msra.mxu1 %v11257_v33 }
 0x186   : > { %v15373_v62 = vpop.f32.mrf.mxu0  ;;  %v15378_v19 = vpop.f32.mrf.mxu1  ;;  %4049 = vst.msk [vmem:[#allocation3 + $0x30] sm:$0xff] %vm4041_vm3, %v18477_v30  ;;  %4050 = vst.msk [vmem:[#allocation3 + $0x38] sm:$0xff] %vm4041_vm3, %v18477_v30  ;;  %13101 = vmatprep.subr.mxu0 %v4165_v35  ;;  %v11255_v33 = vld [vmem:[%s18311_s3 + $0x40] sm:$0xff] }
 0x187   : > { %18476 = vst [vmem:[#allocation38_spill] sm:$0xff] %v15378_v19  ;;  %4052 = vst.msk [vmem:[#allocation3 + $0x48] sm:$0xff] %vm4041_vm3, %v18477_v30  ;;  %13102 = vmatpush3.msra.mxu0 %v4165_v35 }
 0x188   : > { %v12786_v14 = vpop.f32.mrf.mxu0  ;;  %4053 = vst.msk [vmem:[#allocation3 + $0x50] sm:$0xff] %vm4041_vm3, %v18477_v30  ;;  %4055 = vst.msk [vmem:[#allocation3 + $0x60] sm:$0xff] %vm4041_vm3, %v18477_v30  ;;  %v12775_v31 = vpop.f32.mrf.mxu1  ;;  %13103 = vmatprep.subr.mxu0 %v4164_v21 }
 0x189   : > { %4056 = vst.msk [vmem:[#allocation3 + $0x68] sm:$0xff] %vm4041_vm3, %v18477_v30  ;;  %4058 = vst.msk [vmem:[#allocation3 + $0x78] sm:$0xff] %vm4041_vm3, %v18477_v30  ;;  %v15476_v44 = vadd.f32 %v12786_v14, %v15222_v22  ;;  %v15535_v22 = vadd.f32 %v12775_v31, %v15337_v29  ;;  %13104 = vmatpush3.msra.mxu0 %v4164_v21  ;;  %v11256_v29 = vld [vmem:[%s18311_s3 + $0x48] sm:$0xff]  ;;  %v4162_v21 = vld [vmem:[%s18311_s3] sm:$0xff] }
 0x18a   : > { %4059 = vst.msk [vmem:[#allocation3 + $0x80] sm:$0xff] %vm4041_vm3, %v18477_v30  ;;  %4061 = vst.msk [vmem:[#allocation3 + $0x90] sm:$0xff] %vm4041_vm3, %v18477_v30  ;;  %v15537_v37 = vpop.f32.mrf.mxu0  ;;  %v15545_v14 = vpop.f32.mrf.mxu1  ;;  %v4163_v31 = vld [vmem:[%s18311_s3 + $0x8] sm:$0xff]  ;;  %13041 = vmatprep.subr.mxu1 %v11256_v29 }
 0x18b   : > { %4062 = vst.msk [vmem:[#allocation3 + $0x98] sm:$0xff] %vm4041_vm3, %v18477_v30  ;;  %4064 = vst.msk [vmem:[#allocation3 + $0xa8] sm:$0xff] %vm4041_vm3, %v18477_v30  ;;  %13105 = vmatprep.subr.mxu0 %v4163_v31  ;;  %13042 = vmatpush3.msra.mxu1 %v11256_v29 }
 0x18c   : > { %4065 = vst.msk [vmem:[#allocation3 + $0xb0] sm:$0xff] %vm4041_vm3, %v18477_v30  ;;  %4067 = vst.msk [vmem:[#allocation3 + $0xc0] sm:$0xff] %vm4041_vm3, %v18477_v30  ;;  %v12778_v35 = vpop.f32.mrf.mxu1  ;;  %13106 = vmatpush3.msra.mxu0 %v4163_v31  ;;  %13043 = vmatprep.subr.mxu1 %v11255_v33  ;;  %v4131_v31 = vld [vmem:[#allocation3 + $0x8] sm:$0xff] }
 0x18d   : > { %4068 = vst.msk [vmem:[#allocation3 + $0xc8] sm:$0xff] %vm4041_vm3, %v18477_v30  ;;  %4070 = vst.msk [vmem:[#allocation3 + $0xd8] sm:$0xff] %vm4041_vm3, %v18477_v30  ;;  %13107 = vmatprep.subr.mxu0 %v4162_v21  ;;  %13044 = vmatpush3.msra.mxu1 %v11255_v33 }
 0x18e   : > { %4071 = vst.msk [vmem:[#allocation3 + $0xe0] sm:$0xff] %vm4041_vm3, %v18477_v30  ;;  %4073 = vst.msk [vmem:[#allocation3 + $0xf0] sm:$0xff] %vm4041_vm3, %v18477_v30  ;;  %v15567_v0 = vpop.f32.mrf.mxu1  ;;  %13108 = vmatpush3.msra.mxu0 %v4162_v21 }
 0x18f   : > { %4074 = vst.msk [vmem:[#allocation3 + $0xf8] sm:$0xff] %vm4041_vm3, %v18477_v30  ;;  %4076 = vst.msk [vmem:[#allocation3 + $0x108] sm:$0xff] %vm4041_vm3, %v18477_v30 }
 0x190   : > { %4077 = vst.msk [vmem:[#allocation3 + $0x110] sm:$0xff] %vm4041_vm3, %v18477_v30  ;;  %4079 = vst.msk [vmem:[#allocation3 + $0x120] sm:$0xff] %vm4041_vm3, %v18477_v30  ;;  %v15573_v59 = vpop.f32.mrf.mxu1 }
 0x191   : > { %4080 = vst.msk [vmem:[#allocation3 + $0x128] sm:$0xff] %vm4041_vm3, %v18477_v30  ;;  %4082 = vst.msk [vmem:[#allocation3 + $0x138] sm:$0xff] %vm4041_vm3, %v18477_v30 }
 0x192   : > { %4083 = vst.msk [vmem:[#allocation3 + $0x140] sm:$0xff] %vm4041_vm3, %v18477_v30  ;;  %4085 = vst.msk [vmem:[#allocation3 + $0x150] sm:$0xff] %vm4041_vm3, %v18477_v30 }
 0x193   : > { %4086 = vst.msk [vmem:[#allocation3 + $0x158] sm:$0xff] %vm4041_vm3, %v18477_v30  ;;  %4088 = vst.msk [vmem:[#allocation3 + $0x168] sm:$0xff] %vm4041_vm3, %v18477_v30 }
 0x194   : > { %4089 = vst.msk [vmem:[#allocation3 + $0x170] sm:$0xff] %vm4041_vm3, %v18477_v30  ;;  %4091 = vst.msk [vmem:[#allocation3 + $0x180] sm:$0xff] %vm4041_vm3, %v18477_v30 }
 0x195   : > { %4092 = vst.msk [vmem:[#allocation3 + $0x188] sm:$0xff] %vm4041_vm3, %v18477_v30  ;;  %4094 = vst.msk [vmem:[#allocation3 + $0x198] sm:$0xff] %vm4041_vm3, %v18477_v30 }
 0x196   : > { %4095 = vst.msk [vmem:[#allocation3 + $0x1a0] sm:$0xff] %vm4041_vm3, %v18477_v30  ;;  %8307 = vst.msk [vmem:[#allocation4] sm:$0xff] %vm4041_vm3, %v18477_v30 }
 0x197   : > { %8309 = vst.msk [vmem:[#allocation4 + $0x10] sm:$0xff] %vm4041_vm3, %v18477_v30  ;;  %8311 = vst.msk [vmem:[#allocation4 + $0x20] sm:$0xff] %vm4041_vm3, %v18477_v30 }
 0x198   : > { %8313 = vst.msk [vmem:[#allocation4 + $0x30] sm:$0xff] %vm4041_vm3, %v18477_v30  ;;  %8315 = vst.msk [vmem:[#allocation4 + $0x40] sm:$0xff] %vm4041_vm3, %v18477_v30 }
 0x199   : > { %8317 = vst.msk [vmem:[#allocation4 + $0x50] sm:$0xff] %vm4041_vm3, %v18477_v30  ;;  %8319 = vst.msk [vmem:[#allocation4 + $0x60] sm:$0xff] %vm4041_vm3, %v18477_v30 }
 0x19a   : > { %8321 = vst.msk [vmem:[#allocation4 + $0x70] sm:$0xff] %vm4041_vm3, %v18477_v30  ;;  %8323 = vst.msk [vmem:[#allocation4 + $0x80] sm:$0xff] %vm4041_vm3, %v18477_v30 }
 0x19b   : > { %8325 = vst.msk [vmem:[#allocation4 + $0x90] sm:$0xff] %vm4041_vm3, %v18477_v30  ;;  %18478 = vst [vmem:[#allocation39_spill] sm:$0xff] %v15545_v14  ;;  %v15557_v14 = vadd.f32 %v12778_v35, %v15351_v63 }
 0x19c   : > { %4048 = vst.msk [vmem:[#allocation3 + $0x28] sm:$0x3] %vm4044_vm4, %v18477_v30  ;;  %4045 = vst.msk [vmem:[#allocation3 + $0x10] sm:$0x3] %vm4044_vm4, %v18477_v30 }
 0x19d   : > { %4051 = vst.msk [vmem:[#allocation3 + $0x40] sm:$0x3] %vm4044_vm4, %v18477_v30  ;;  %4054 = vst.msk [vmem:[#allocation3 + $0x58] sm:$0x3] %vm4044_vm4, %v18477_v30 }
 0x19e   : > { %4057 = vst.msk [vmem:[#allocation3 + $0x70] sm:$0x3] %vm4044_vm4, %v18477_v30  ;;  %4060 = vst.msk [vmem:[#allocation3 + $0x88] sm:$0x3] %vm4044_vm4, %v18477_v30 }
 0x19f   : > { %4063 = vst.msk [vmem:[#allocation3 + $0xa0] sm:$0x3] %vm4044_vm4, %v18477_v30  ;;  %4066 = vst.msk [vmem:[#allocation3 + $0xb8] sm:$0x3] %vm4044_vm4, %v18477_v30 }
 0x1a0   : > { %4069 = vst.msk [vmem:[#allocation3 + $0xd0] sm:$0x3] %vm4044_vm4, %v18477_v30  ;;  %4072 = vst.msk [vmem:[#allocation3 + $0xe8] sm:$0x3] %vm4044_vm4, %v18477_v30 }
 0x1a1   : > { %4075 = vst.msk [vmem:[#allocation3 + $0x100] sm:$0x3] %vm4044_vm4, %v18477_v30  ;;  %4078 = vst.msk [vmem:[#allocation3 + $0x118] sm:$0x3] %vm4044_vm4, %v18477_v30 }
 0x1a2   : > { %4081 = vst.msk [vmem:[#allocation3 + $0x130] sm:$0x3] %vm4044_vm4, %v18477_v30  ;;  %4084 = vst.msk [vmem:[#allocation3 + $0x148] sm:$0x3] %vm4044_vm4, %v18477_v30 }
 0x1a3   : > { %4087 = vst.msk [vmem:[#allocation3 + $0x160] sm:$0x3] %vm4044_vm4, %v18477_v30  ;;  %4090 = vst.msk [vmem:[#allocation3 + $0x178] sm:$0x3] %vm4044_vm4, %v18477_v30  ;;  %v4171_v29 = vld [vmem:[#allocation3 + $0x9] sm:$0xff] }
 0x1a4   : > { %4093 = vst.msk [vmem:[#allocation3 + $0x190] sm:$0x3] %vm4044_vm4, %v18477_v30  ;;  %4096 = vst.msk [vmem:[#allocation3 + $0x1a8] sm:$0x3] %vm4044_vm4, %v18477_v30 }
 0x1a5   : > { %8308 = vst.msk [vmem:[#allocation4 + $0x8] sm:$0x3] %vm4044_vm4, %v18477_v30  ;;  %8310 = vst.msk [vmem:[#allocation4 + $0x18] sm:$0x3] %vm4044_vm4, %v18477_v30 }
 0x1a6   : > { %8312 = vst.msk [vmem:[#allocation4 + $0x28] sm:$0x3] %vm4044_vm4, %v18477_v30  ;;  %8314 = vst.msk [vmem:[#allocation4 + $0x38] sm:$0x3] %vm4044_vm4, %v18477_v30 }
 0x1a7   : > { %8316 = vst.msk [vmem:[#allocation4 + $0x48] sm:$0x3] %vm4044_vm4, %v18477_v30  ;;  %8318 = vst.msk [vmem:[#allocation4 + $0x58] sm:$0x3] %vm4044_vm4, %v18477_v30 }
 0x1a8   : > { %8320 = vst.msk [vmem:[#allocation4 + $0x68] sm:$0x3] %vm4044_vm4, %v18477_v30  ;;  %8322 = vst.msk [vmem:[#allocation4 + $0x78] sm:$0x3] %vm4044_vm4, %v18477_v30 }
 0x1a9   : > { %8324 = vst.msk [vmem:[#allocation4 + $0x88] sm:$0x3] %vm4044_vm4, %v18477_v30  ;;  %8326 = vst.msk [vmem:[#allocation4 + $0x98] sm:$0x3] %vm4044_vm4, %v18477_v30  ;;  %v12789_v30 = vpop.f32.mrf.mxu0 }
 0x1aa   : > { %v15554_v19 = vadd.f32 %v12789_v30, %v15234_v58  ;;  %18479 = vst [vmem:[#allocation40_spill] sm:$0xff] %v15567_v0  ;;  %v4170_v58 = vld [vmem:[#allocation3 + $0x1] sm:$0xff]  ;;  %v15580_v0 = vpop.f32.mrf.mxu1 }
 0x1ab   : > { %v15559_v11 = vpop.f32.mrf.mxu0  ;;  %v4130_v30 = vld [vmem:[#allocation3] sm:$0xff]  ;;  %13045 = vmatprep.mubr.msk.f32.mxu1 %vm4041_vm3, %v4170_v58 }
 0x1ac   : > { %13109 = vmatprep.mubr.msk.f32.mxu0 %vm4041_vm3, %v4130_v30  ;;  %13046 = vmatmul.mubr.msk.f32.vlgmr.msra.gmra.mxu1 %vm4041_vm3, %v4171_v29  ;;  %v15585_v27 = vpop.f32.mrf.mxu1 }
 0x1ad   : > { %v12792_v63 = vpop.f32.mrf.mxu0  ;;  %13110 = vmatmul.mubr.msk.f32.vlgmr.msra.gmra.mxu0 %vm4041_vm3, %v4131_v31 }
 0x1ae   : > { %v15571_v35 = vadd.f32 %v12792_v63, %v15246_v50  ;;  %v15589_v63 = vpop.f32.mrf.mxu1 }
 0x1af   : > { %v15576_v2 = vpop.f32.mrf.mxu0 }
 0x1b0   : > { %v15594_v45 = vpop.f32.mrf.mxu1 }
 0x1b1   : > { %v12795_v33 = vpop.f32.mrf.mxu0 }
 0x1b2   : > { %v15583_v58 = vadd.f32 %v12795_v33, %v15258_v51  ;;  %v15598_v31 = vpop.f32.mrf.mxu1 }
 0x1b3   : > { %v15587_v50 = vpop.f32.mrf.mxu0 }
 0x1b4   : > { %v15603_v33 = vpop.f32.mrf.mxu1 }
 0x1b5   : > { %v12798_v21 = vpop.f32.mrf.mxu0 }
 0x1b6   : > { %v15592_v30 = vadd.f32 %v12798_v21, %v15273_v41  ;;  %v15607_v13 = vpop.f32.mrf.mxu1 }
 0x1b7   : > { %v15596_v29 = vpop.f32.mrf.mxu0 }
 0x1b8   : > { %18480 = vst [vmem:[#allocation41_spill] sm:$0xff] %v15592_v30  ;;  %18481 = vst [vmem:[#allocation42_spill] sm:$0xff] %v15596_v29  ;;  %v15612_v21 = vpop.f32.mrf.mxu1 }
 0x1b9   : > { %v12801_v42 = vpop.f32.mrf.mxu0 }
 0x1ba   : > { %v15601_v51 = vadd.f32 %v12801_v42, %v15282_v12  ;;  %v15616_v24 = vpop.f32.mrf.mxu1 }
 0x1bb   : > { %v15605_v7 = vpop.f32.mrf.mxu0  ;;  %18486 = vst [vmem:[#allocation45_spill] sm:$0xff] %v15616_v24 }
 0x1bc   : > { %18482 = vst [vmem:[#allocation43_spill] sm:$0xff] %v15601_v51  ;;  %18483 = vst [vmem:[#allocation31_spill] sm:$0xff] %v15605_v7  ;;  %v15621_v42 = vpop.f32.mrf.mxu1 }
 0x1bd   : > { %v12804_v5 = vpop.f32.mrf.mxu0  ;;  %18488 = vst [vmem:[#allocation47_spill] sm:$0xff] %v15621_v42 }
 0x1be   : > { %v15610_v41 = vadd.f32 %v12804_v5, %v15294_v28  ;;  %v15625_v7 = vpop.f32.mrf.mxu1  ;;  %v11334_v28 = vld [vmem:[%s18311_s3 + $0xb8] sm:$0xff] }
 0x1bf   : > { %v15614_v52 = vpop.f32.mrf.mxu0  ;;  %18490 = vst [vmem:[#allocation49_spill] sm:$0xff] %v15625_v7  ;;  %13157 = vmatprep.subr.mxu1 %v11334_v28 }
 0x1c0   : > { %18484 = vst [vmem:[#allocation33_spill] sm:$0xff] %v15610_v41  ;;  %18485 = vst [vmem:[#allocation44_spill] sm:$0xff] %v15614_v52  ;;  %v15633_v52 = vpop.f32.mrf.mxu1  ;;  %13158 = vmatpush3.msra.mxu1 %v11334_v28 }
 0x1c1   : > { %v12807_v3 = vpop.f32.mrf.mxu0  ;;  %18492 = vst [vmem:[#allocation51_spill] sm:$0xff] %v15633_v52 }
 0x1c2   : > { %v15619_v12 = vadd.f32 %v12807_v3, %v15303_v36  ;;  %v15637_v36 = vpop.f32.mrf.mxu1 }
 0x1c3   : > { %v15623_v51 = vpop.f32.mrf.mxu0  ;;  %18494 = vst [vmem:[#allocation53_spill] sm:$0xff] %v15637_v36 }
 0x1c4   : > { %18487 = vst [vmem:[#allocation46_spill] sm:$0xff] %v15619_v12  ;;  %18489 = vst [vmem:[#allocation48_spill] sm:$0xff] %v15623_v51  ;;  %v15642_v7 = vpop.f32.mrf.mxu1 }
 0x1c5   : > { %v12810_v5 = vpop.f32.mrf.mxu0  ;;  %18496 = vst [vmem:[#allocation55_spill] sm:$0xff] %v15642_v7 }
 0x1c6   : > { %v15631_v41 = vadd.f32 %v12810_v5, %v15315_v4  ;;  %v15646_v23 = vpop.f32.mrf.mxu1  ;;  %v11333_v4 = vld [vmem:[%s18311_s3 + $0xb0] sm:$0xff] }
 0x1c7   : > { %v15635_v3 = vpop.f32.mrf.mxu0  ;;  %18498 = vst [vmem:[#allocation57_spill] sm:$0xff] %v15646_v23  ;;  %13159 = vmatprep.subr.mxu1 %v11333_v4 }
 0x1c8   : > { %18491 = vst [vmem:[#allocation50_spill] sm:$0xff] %v15631_v41  ;;  %18493 = vst [vmem:[#allocation52_spill] sm:$0xff] %v15635_v3  ;;  %v15654_v41 = vpop.f32.mrf.mxu1  ;;  %13160 = vmatpush3.msra.mxu1 %v11333_v4 }
 0x1c9   : > { %v12813_v12 = vpop.f32.mrf.mxu0  ;;  %18500 = vst [vmem:[#allocation59_spill] sm:$0xff] %v15654_v41 }
 0x1ca   : > { %v15640_v51 = vadd.f32 %v12813_v12, %v15325_v18  ;;  %v15658_v12 = vpop.f32.mrf.mxu1 }
 0x1cb   : > { %v15644_v48 = vpop.f32.mrf.mxu0  ;;  %18502 = vst [vmem:[#allocation61_spill] sm:$0xff] %v15658_v12 }
 0x1cc   : > { %18495 = vst [vmem:[#allocation54_spill] sm:$0xff] %v15640_v51  ;;  %18497 = vst [vmem:[#allocation56_spill] sm:$0xff] %v15644_v48  ;;  %v15663_v3 = vpop.f32.mrf.mxu1 }
 0x1cd   : > { %v12816_v5 = vpop.f32.mrf.mxu0  ;;  %18504 = vst [vmem:[#allocation63_spill] sm:$0xff] %v15663_v3 }
 0x1ce   : > { %v15652_v28 = vadd.f32 %v12816_v5, %v15340_v55  ;;  %v15667_v7 = vpop.f32.mrf.mxu1  ;;  %v11332_v55 = vld [vmem:[%s18311_s3 + $0xa8] sm:$0xff] }
 0x1cf   : > { %v15656_v18 = vpop.f32.mrf.mxu0  ;;  %18506 = vst [vmem:[#allocation65_spill] sm:$0xff] %v15667_v7  ;;  %13161 = vmatprep.subr.mxu1 %v11332_v55 }
 0x1d0   : > { %18499 = vst [vmem:[#allocation58_spill] sm:$0xff] %v15652_v28  ;;  %18501 = vst [vmem:[#allocation60_spill] sm:$0xff] %v15656_v18  ;;  %v15675_v28 = vpop.f32.mrf.mxu1  ;;  %13162 = vmatpush3.msra.mxu1 %v11332_v55 }
 0x1d1   : > { %v12819_v51 = vpop.f32.mrf.mxu0  ;;  %18508 = vst [vmem:[#allocation67_spill] sm:$0xff] %v15675_v28 }
 0x1d2   : > { %v15661_v48 = vadd.f32 %v12819_v51, %v15353_v6  ;;  %v15679_v51 = vpop.f32.mrf.mxu1 }
 0x1d3   : > { %v15665_v23 = vpop.f32.mrf.mxu0  ;;  %18510 = vst [vmem:[#allocation69_spill] sm:$0xff] %v15679_v51  ;;  %v11368_v51 = vld [vmem:[%s18311_s3 + $0xc8] sm:$0xff] }
 0x1d4   : > { %18503 = vst [vmem:[#allocation62_spill] sm:$0xff] %v15661_v48  ;;  %18505 = vst [vmem:[#allocation64_spill] sm:$0xff] %v15665_v23  ;;  %v15684_v18 = vpop.f32.mrf.mxu1 }
 0x1d5   : > { %v12822_v5 = vpop.f32.mrf.mxu0  ;;  %18512 = vst [vmem:[#allocation71_spill] sm:$0xff] %v15684_v18 }
 0x1d6   : > { %v15673_v4 = vadd.f32 %v12822_v5, %v15371_v61  ;;  %v15688_v3 = vpop.f32.mrf.mxu1  ;;  %v11331_v61 = vld [vmem:[%s18311_s3 + $0xa0] sm:$0xff] }
 0x1d7   : > { %v15677_v6 = vpop.f32.mrf.mxu0  ;;  %18514 = vst [vmem:[#allocation73_spill] sm:$0xff] %v15688_v3  ;;  %13163 = vmatprep.subr.mxu1 %v11331_v61 }
 0x1d8   : > { %18507 = vst [vmem:[#allocation66_spill] sm:$0xff] %v15673_v4  ;;  %18509 = vst [vmem:[#allocation68_spill] sm:$0xff] %v15677_v6  ;;  %v15696_v4 = vpop.f32.mrf.mxu1  ;;  %13164 = vmatpush3.msra.mxu1 %v11331_v61 }
 0x1d9   : > { %v12825_v48 = vpop.f32.mrf.mxu0  ;;  %18516 = vst [vmem:[#allocation75_spill] sm:$0xff] %v15696_v4  ;;  %v11369_v4 = vld [vmem:[%s18311_s3 + $0xd0] sm:$0xff] }
 0x1da   : > { %v15682_v23 = vadd.f32 %v12825_v48, %v15535_v22  ;;  %v11374_v22 = vld [vmem:[%s18311_s3 + $0xf8] sm:$0xff] }
 0x1db   : > { %v15686_v7 = vpop.f32.mrf.mxu0  ;;  %13221 = vmatprep.subr.mxu0 %v11374_v22 }
 0x1dc   : > { %18511 = vst [vmem:[#allocation70_spill] sm:$0xff] %v15682_v23  ;;  %18513 = vst [vmem:[#allocation72_spill] sm:$0xff] %v15686_v7  ;;  %v15703_v23 = vpop.f32.mrf.mxu1  ;;  %13222 = vmatpush3.msra.mxu0 %v11374_v22  ;;  %v11330_v22 = vld [vmem:[%s18311_s3 + $0x98] sm:$0xff] }
 0x1dd   : > { %v12828_v5 = vpop.f32.mrf.mxu0  ;;  %18518 = vst [vmem:[#allocation77_spill] sm:$0xff] %v15703_v23  ;;  %13165 = vmatprep.subr.mxu1 %v11330_v22 }
 0x1de   : > { %v15694_v55 = vadd.f32 %v12828_v5, %v15557_v14  ;;  %v11373_v14 = vld [vmem:[%s18311_s3 + $0xf0] sm:$0xff]  ;;  %v15710_v5 = vpop.f32.mrf.mxu1  ;;  %13166 = vmatpush3.msra.mxu1 %v11330_v22 }
 0x1df   : > { %v15698_v48 = vpop.f32.mrf.mxu0  ;;  %18519 = vst [vmem:[#allocation78_spill] sm:$0xff] %v15710_v5  ;;  %13223 = vmatprep.subr.mxu0 %v11373_v14  ;;  %v11371_v5 = vld [vmem:[%s18311_s3 + $0xe0] sm:$0xff] }
 0x1e0   : > { %18515 = vst [vmem:[#allocation74_spill] sm:$0xff] %v15694_v55  ;;  %18517 = vst [vmem:[#allocation76_spill] sm:$0xff] %v15698_v48  ;;  %13224 = vmatpush3.msra.mxu0 %v11373_v14  ;;  %v11372_v55 = vld [vmem:[%s18311_s3 + $0xe8] sm:$0xff]  ;;  %v15717_v48 = vpop.f32.mrf.mxu1 }
 0x1e1   : > { %v15705_v7 = vpop.f32.mrf.mxu0  ;;  %18520 = vst [vmem:[#allocation79_spill] sm:$0xff] %v15717_v48  ;;  %13225 = vmatprep.subr.mxu0 %v11372_v55  ;;  %v11329_v48 = vld [vmem:[%s18311_s3 + $0x90] sm:$0xff] }
 0x1e2   : > { %13226 = vmatpush3.msra.mxu0 %v11372_v55  ;;  %v15727_v14 = vpop.f32.mrf.mxu1  ;;  %13167 = vmatprep.subr.mxu1 %v11329_v48  ;;  %v11370_v55 = vld [vmem:[%s18311_s3 + $0xd8] sm:$0xff] }
 0x1e3   : > { %v15712_v61 = vpop.f32.mrf.mxu0  ;;  %18521 = vst [vmem:[#allocation80_spill] sm:$0xff] %v15727_v14  ;;  %13227 = vmatprep.subr.mxu0 %v11371_v5  ;;  %13168 = vmatpush3.msra.mxu1 %v11329_v48  ;;  %v11327_v48 = vld [vmem:[%s18311_s3 + $0x80] sm:$0xff] }
 0x1e4   : > { %13228 = vmatpush3.msra.mxu0 %v11371_v5  ;;  %v15740_v3 = vpop.f32.mrf.mxu1  ;;  %v11328_v5 = vld [vmem:[%s18311_s3 + $0x88] sm:$0xff] }
 0x1e5   : > { %v15722_v6 = vpop.f32.mrf.mxu0  ;;  %18522 = vst [vmem:[#allocation81_spill] sm:$0xff] %v15740_v3  ;;  %13229 = vmatprep.subr.mxu0 %v11370_v55  ;;  %13169 = vmatprep.subr.mxu1 %v11328_v5 }
 0x1e6   : > { %13230 = vmatpush3.msra.mxu0 %v11370_v55  ;;  %v15744_v14 = vpop.f32.mrf.mxu1  ;;  %13170 = vmatpush3.msra.mxu1 %v11328_v5 }
 0x1e7   : > { %v15732_v23 = vpop.f32.mrf.mxu0  ;;  %18523 = vst [vmem:[#allocation82_spill] sm:$0xff] %v15744_v14  ;;  %13231 = vmatprep.subr.mxu0 %v11369_v4  ;;  %13171 = vmatprep.subr.mxu1 %v11327_v48 }
 0x1e8   : > { %13232 = vmatpush3.msra.mxu0 %v11369_v4  ;;  %v15754_v3 = vpop.f32.mrf.mxu1  ;;  %v11367_v4 = vld [vmem:[%s18311_s3 + $0xc0] sm:$0xff]  ;;  %13172 = vmatpush3.msra.mxu1 %v11327_v48 }
 0x1e9   : > { %v15742_v22 = vpop.f32.mrf.mxu0  ;;  %18524 = vst [vmem:[#allocation83_spill] sm:$0xff] %v15754_v3  ;;  %13233 = vmatprep.subr.mxu0 %v11368_v51 }
 0x1ea   : > { %13234 = vmatpush3.msra.mxu0 %v11368_v51  ;;  %v12933_v14 = vpop.f32.mrf.mxu1 }
 0x1eb   : > { %v15746_v18 = vpop.f32.mrf.mxu0  ;;  %13235 = vmatprep.subr.mxu0 %v11367_v4 }
 0x1ec   : > { %13236 = vmatpush3.msra.mxu0 %v11367_v4  ;;  %v3389_v3 = vpop.f32.mrf.mxu1 }
 0x1ed   : > { %v15762_v55 = vpop.f32.mrf.mxu0 }
 0x1ee   : > { %v15768_v41 = vpop.f32.mrf.mxu1 }
 0x1ef   : > { %v15764_v28 = vpop.f32.mrf.mxu0 }
 0x1f0   : > { %v15772_v52 = vpop.f32.mrf.mxu1 }
 0x1f1   : > { %v15766_v12 = vpop.f32.mrf.mxu0 }
 0x1f2   : > { %18525 = vst [vmem:[#allocation84_spill] sm:$0xff] %v15766_v12  ;;  %v15776_v5 = vpop.f32.mrf.mxu1 }
 0x1f3   : > { %v15770_v36 = vpop.f32.mrf.mxu0 }
 0x1f4   : > { %18526 = vst [vmem:[#allocation85_spill] sm:$0xff] %v15770_v36  ;;  %v15780_v42 = vpop.f32.mrf.mxu1  ;;  %v15793_v36 = vld [vmem:[%s18311_s3 + $0x138] sm:$0xff] }
 0x1f5   : > { %v15774_v43 = vpop.f32.mrf.mxu0  ;;  %18532 = vst [vmem:[#allocation91_spill] sm:$0xff] %v15793_v36  ;;  %13285 = vmatprep.subr.mxu1 %v15793_v36 }
 0x1f6   : > { %18527 = vst [vmem:[#allocation86_spill] sm:$0xff] %v15774_v43  ;;  %v15784_v48 = vpop.f32.mrf.mxu1 }
 0x1f7   : > { %v15778_v51 = vpop.f32.mrf.mxu0 }
 0x1f8   : > { %18528 = vst [vmem:[#allocation87_spill] sm:$0xff] %v15778_v51  ;;  %v15788_v29 = vpop.f32.mrf.mxu1 }
 0x1f9   : > { %v15782_v30 = vpop.f32.mrf.mxu0  ;;  %18531 = vst [vmem:[#allocation90_spill] sm:$0xff] %v15788_v29 }
 0x1fa   : > { %18529 = vst [vmem:[#allocation88_spill] sm:$0xff] %v15782_v30  ;;  %v15798_v51 = vpop.f32.mrf.mxu1 }
 0x1fb   : > { %v15786_v4 = vpop.f32.mrf.mxu0  ;;  %18534 = vst [vmem:[#allocation93_spill] sm:$0xff] %v15798_v51 }
 0x1fc   : > { %18530 = vst [vmem:[#allocation89_spill] sm:$0xff] %v15786_v4  ;;  %v15804_v56 = vpop.f32.mrf.mxu1 }
 0x1fd   : > { %v15795_v43 = vpop.f32.mrf.mxu0  ;;  %18537 = vst [vmem:[#allocation96_spill] sm:$0xff] %v15804_v56 }
 0x1fe   : > { %18533 = vst [vmem:[#allocation92_spill] sm:$0xff] %v15795_v43  ;;  %v15810_v12 = vpop.f32.mrf.mxu1 }
 0x1ff   : > { %v15800_v40 = vpop.f32.mrf.mxu0  ;;  %18540 = vst [vmem:[#allocation99_spill] sm:$0xff] %v15810_v12 }
 0x200   : > { %18535 = vst [vmem:[#allocation94_spill] sm:$0xff] %v15800_v40  ;;  %v15816_v43 = vpop.f32.mrf.mxu1 }
 0x201   : > { %v15802_v30 = vpop.f32.mrf.mxu0  ;;  %18543 = vst [vmem:[#allocation102_spill] sm:$0xff] %v15816_v43 }
 0x202   : > { %18536 = vst [vmem:[#allocation95_spill] sm:$0xff] %v15802_v30  ;;  %v15822_v40 = vpop.f32.mrf.mxu1 }
 0x203   : > { %v15806_v4 = vpop.f32.mrf.mxu0 }
 0x204   : > { %18538 = vst [vmem:[#allocation97_spill] sm:$0xff] %v15806_v4  ;;  %v15828_v4 = vpop.f32.mrf.mxu1 }
 0x205   : > { %v15808_v29 = vpop.f32.mrf.mxu0  ;;  %18548 = vst [vmem:[#allocation107_spill] sm:$0xff] %v15828_v4 }
 0x206   : > { %18539 = vst [vmem:[#allocation98_spill] sm:$0xff] %v15808_v29 }
 0x207   : > { %v15812_v24 = vpop.f32.mrf.mxu0 }
 0x208   : > { %18541 = vst [vmem:[#allocation100_spill] sm:$0xff] %v15812_v24  ;;  %v15834_v24 = vpop.f32.mrf.mxu1 }
 0x209   : > { %v15814_v1 = vpop.f32.mrf.mxu0  ;;  %18551 = vst [vmem:[#allocation110_spill] sm:$0xff] %v15834_v24 }
 0x20a   : > { %18542 = vst [vmem:[#allocation101_spill] sm:$0xff] %v15814_v1 }
 0x20b   : > { %v15818_v36 = vpop.f32.mrf.mxu0 }
 0x20c   : > { %18544 = vst [vmem:[#allocation103_spill] sm:$0xff] %v15818_v36  ;;  %v15842_v36 = vpop.f32.mrf.mxu1 }
 0x20d   : > { %v15820_v51 = vpop.f32.mrf.mxu0 }
 0x20e   : > { %18545 = vst [vmem:[#allocation104_spill] sm:$0xff] %v15820_v51  ;;  %v1987_v51 = vadd.f32 %v15215_v26, %v15174_v57  ;;  %v15855_v24 = vpop.f32.mrf.mxu1  ;;  %v15862_v26 = vld [vmem:[%s18311_s3 + $0x178] sm:$0xff] }
 0x20f   : > { %v15824_v30 = vpop.f32.mrf.mxu0  ;;  %13349 = vmatprep.subr.mxu0 %v15862_v26 }
 0x210   : > { %18546 = vst [vmem:[#allocation105_spill] sm:$0xff] %v15824_v30 }
 0x211   : > { %v15826_v56 = vpop.f32.mrf.mxu0 }
 0x212   : > { %18547 = vst [vmem:[#allocation106_spill] sm:$0xff] %v15826_v56  ;;  %v2377_v56 = vadd.f32 %v15373_v62, %v1987_v51  ;;  %v2770_v62 = vadd.f32 %v15585_v27, %v15476_v44  ;;  %v15881_v44 = vpop.f32.mrf.mxu1 }
 0x213   : > { %v15830_v29 = vpop.f32.mrf.mxu0 }
 0x214   : > { %18549 = vst [vmem:[#allocation108_spill] sm:$0xff] %v15830_v29  ;;  %v2768_v29 = vadd.f32 %v15573_v59, %v15369_v10 }
 0x215   : > { %v15832_v12 = vpop.f32.mrf.mxu0 }
 0x216   : > { %18550 = vst [vmem:[#allocation109_spill] sm:$0xff] %v15832_v12  ;;  %v1989_v12 = vadd.f32 %v15227_v9, %v15189_v47 }
 0x217   : > { %v15836_v1 = vpop.f32.mrf.mxu0 }
 0x218   : > { %18552 = vst [vmem:[#allocation111_spill] sm:$0xff] %v15836_v1  ;;  %v2767_v1 = vadd.f32 %v15580_v0, %v2377_v56  ;;  %v2379_v59 = vadd.f32 %v15537_v37, %v1989_v12  ;;  %v1991_v56 = vadd.f32 %v15239_v15, %v15203_v32  ;;  %v15874_v0 = vld [vmem:[%s18310_s2] ss:$0 sm:$0xff]  ;;  %v3161_v37 = vadd.f32 %v15722_v6, %v2770_v62 }
 0x219   : > { %v15838_v43 = vpop.f32.mrf.mxu0 }
 0x21a   : > { %18553 = vst [vmem:[#allocation112_spill] sm:$0xff] %v15838_v43  ;;  %v3159_v43 = vadd.f32 %v15705_v7, %v2768_v29  ;;  %v3158_v47 = vadd.f32 %v15712_v61, %v2767_v1  ;;  %v2769_v10 = vadd.f32 %v15589_v63, %v2379_v59  ;;  %v2381_v1 = vadd.f32 %v15559_v11, %v1991_v56 }
 0x21b   : > { %v15844_v30 = vpop.f32.mrf.mxu0  ;;  %v3551_v12 = vadd.f32 %v15768_v41, %v3161_v37  ;;  %v1993_v63 = vadd.f32 %v15251_v20, %v15213_v46  ;;  %v2774_v46 = vadd.f32 %v15603_v33, %v15571_v35 }
 0x21c   : > { %v3549_v9 = vadd.f32 %v12933_v14, %v3159_v43  ;;  %v3548_v29 = vadd.f32 %v3389_v3, %v3158_v47  ;;  %v2772_v43 = vadd.f32 %v15594_v45, %v15554_v19  ;;  %v3160_v15 = vadd.f32 %v15732_v23, %v2769_v10 }
 0x21d   : > { %v15849_v4 = vpop.f32.mrf.mxu0  ;;  %v2771_v3 = vadd.f32 %v15598_v31, %v2381_v1  ;;  %v15894_v23 = vadd.f32 %v15120_v17, %v15088_v49  ;;  %v2383_v41 = vadd.f32 %v15576_v2, %v1993_v63  ;;  %v15900_v31 = vpop.f32.mrf.mxu1  ;;  %v15907_v49 = vadd.f32 %v15134_v34, %v15102_v53 }
 0x21e   : > { %v3163_v11 = vadd.f32 %v15742_v22, %v2772_v43  ;;  %v3550_v45 = vadd.f32 %v15772_v52, %v3160_v15  ;;  %v1995_v17 = vadd.f32 %v15266_v39, %v15225_v8  ;;  %v3165_v35 = vadd.f32 %v15762_v55, %v2774_v46  ;;  %v18557_v43 = vld [vmem:[#allocation90_spill] sm:$0xff] }
 0x21f   : > { %v15857_v57 = vpop.f32.mrf.mxu0  ;;  %v3162_v20 = vadd.f32 %v15746_v18, %v2771_v3  ;;  %v2773_v2 = vadd.f32 %v15607_v13, %v2383_v41  ;;  %v15918_v53 = vadd.f32 %v15147_v60, %v15116_v16  ;;  %v2776_v8 = vadd.f32 %v15612_v21, %v15583_v58  ;;  %v15924_v13 = vpop.f32.mrf.mxu1  ;;  %v18554_v60 = vld [vmem:[#allocation18_spill] sm:$0xff]  ;;  %v18562_v3 = vld [vmem:[#allocation47_spill] sm:$0xff] }
 0x220   : > { %v3553_v52 = vadd.f32 %v15776_v5, %v3163_v11  ;;  %v2385_v34 = vadd.f32 %v15587_v50, %v1995_v17  ;;  %v3555_v55 = vadd.f32 %v15784_v48, %v3165_v35  ;;  %v15931_v16 = vadd.f32 %v15159_v38, %v15130_v54  ;;  %v18555_v50 = vld [vmem:[#allocation45_spill] sm:$0xff]  ;;  %v18560_v38 = vld [vmem:[#allocation42_spill] sm:$0xff]  ;;  %v18568_v17 = vld [vmem:[#allocation20_spill] sm:$0xff] }
 0x221   : > { %v12983_v7 = vpop.f32.mrf.mxu0  ;;  %v3552_v18 = vadd.f32 %v15780_v42, %v3162_v20  ;;  %v3164_v39 = vadd.f32 %v15764_v28, %v2773_v2  ;;  %v1997_v58 = vadd.f32 %v18554_v60, %v15237_v25  ;;  %v18556_v28 = vld [vmem:[#allocation84_spill] sm:$0xff]  ;;  %v18561_v25 = vld [vmem:[#allocation41_spill] sm:$0xff]  ;;  %v18572_v60 = vld [vmem:[#allocation31_spill] sm:$0xff] }
 0x222   : > { %v3939_v27 = vadd.f32 %v12983_v7, %v3549_v9  ;;  %v2775_v21 = vadd.f32 %v18555_v50, %v2385_v34  ;;  %v2778_v11 = vadd.f32 %v18562_v3, %v18561_v25  ;;  %v18569_v35 = vld [vmem:[#allocation49_spill] sm:$0xff]  ;;  %v18573_v50 = vld [vmem:[#allocation43_spill] sm:$0xff]  ;;  %v18579_v3 = vld [vmem:[#allocation16_spill] sm:$0xff] }
 0x223   : > { %v3779_v32 = vpop.f32.mrf.mxu0  ;;  %v3554_v48 = vadd.f32 %v18557_v43, %v3164_v39  ;;  %v2387_v63 = vadd.f32 %v18560_v38, %v1997_v58  ;;  %v18571_v39 = vld [vmem:[#allocation96_spill] sm:$0xff]  ;;  %v18577_v38 = vld [vmem:[#allocation34_spill] sm:$0xff] }
 0x224   : > { %v3978_v61 = vadd.f32 %v15874_v0, %v3939_v27  ;;  %v3938_v14 = vadd.f32 %v3779_v32, %v3548_v29  ;;  %v3167_v27 = vadd.f32 %v18556_v28, %v2776_v8 }
 0x225   : > { %v12986_v6 = vpop.f32.mrf.mxu0 }
 0x226   : > { %v4010_v19 = vmax.f32 %v3978_v61, 0.0  ;;  %v3977_v51 = vadd.f32 %v15874_v0, %v3938_v14  ;;  %v3941_v59 = vadd.f32 %v12986_v6, %v3551_v12  ;;  %v18558_v61 = vld [vmem:[#allocation36_spill] sm:$0xff]  ;;  %v18563_v6 = vld [vmem:[#allocation85_spill] sm:$0xff] }
 0x227   : > { %v3789_v22 = vpop.f32.mrf.mxu0  ;;  %v18559_v14 = vld [vmem:[#allocation12_spill] sm:$0xff] }
 0x228   : > { %4099 = vst.msk [vmem:[#allocation3 + $0x21] sm:$0xff] %vm4041_vm3, %v4010_v19  ;;  %v4009_v62 = vmax.f32 %v3977_v51, 0.0  ;;  %v3980_v47 = vadd.f32 %v15874_v0, %v3941_v59  ;;  %v3940_v9 = vadd.f32 %v3789_v22, %v3550_v45  ;;  %v15942_v54 = vadd.f32 %v18559_v14, %v18558_v61  ;;  %v15948_v19 = vpop.f32.mrf.mxu1  ;;  %v18564_v59 = vld [vmem:[#allocation93_spill] sm:$0xff] }
 0x229   : > { %v12989_v33 = vpop.f32.mrf.mxu0  ;;  %v3166_v45 = vadd.f32 %v18563_v6, %v2775_v21  ;;  %v3557_v41 = vadd.f32 %v18564_v59, %v3167_v27  ;;  %v18574_v21 = vld [vmem:[#allocation51_spill] sm:$0xff]  ;;  %v18582_v59 = vld [vmem:[#allocation88_spill] sm:$0xff] }
 0x22a   : > { %4098 = vst.msk [vmem:[#allocation3 + $0x19] sm:$0xff] %vm4041_vm3, %v4009_v62  ;;  %v4012_v5 = vmax.f32 %v3980_v47, 0.0  ;;  %v3979_v56 = vadd.f32 %v15874_v0, %v3940_v9  ;;  %v3943_v7 = vadd.f32 %v12989_v33, %v3553_v52  ;;  %v18565_v52 = vld [vmem:[#allocation37_spill] sm:$0xff]  ;;  %v18567_v9 = vld [vmem:[#allocation15_spill] sm:$0xff]  ;;  %v2777_v33 = vadd.f32 %v18569_v35, %v2387_v63  ;;  %v15980_v43 = vpop.f32.mrf.mxu1  ;;  %v18578_v63 = vld [vmem:[#allocation14_spill] sm:$0xff] }
 0x22b   : > { %v3799_v42 = vpop.f32.mrf.mxu0  ;;  %v18566_v62 = vld [vmem:[#allocation13_spill] sm:$0xff]  ;;  %v1999_v2 = vadd.f32 %v18568_v17, %v18567_v9  ;;  %v2780_v28 = vadd.f32 %v18574_v21, %v18573_v50  ;;  %v18575_v27 = vld [vmem:[#allocation87_spill] sm:$0xff]  ;;  %v15991_v25 = vadd.f32 %v18578_v63, %v18577_v38 }
 0x22c   : > { %4101 = vst.msk [vmem:[#allocation3 + $0x39] sm:$0xff] %vm4041_vm3, %v4012_v5  ;;  %v4011_v10 = vmax.f32 %v3979_v56, 0.0  ;;  %v3982_v37 = vadd.f32 %v15874_v0, %v3943_v7  ;;  %v3942_v29 = vadd.f32 %v3799_v42, %v3552_v18  ;;  %v15955_v47 = vadd.f32 %v18566_v62, %v18565_v52  ;;  %v18570_v18 = vld [vmem:[#allocation86_spill] sm:$0xff] }
 0x22d   : > { %v12992_v1 = vpop.f32.mrf.mxu0  ;;  %v3169_v5 = vadd.f32 %v18570_v18, %v2778_v11  ;;  %v3556_v42 = vadd.f32 %v18571_v39, %v3166_v45  ;;  %v2389_v58 = vadd.f32 %v18572_v60, %v1999_v2  ;;  %v18580_v11 = vld [vmem:[#allocation22_spill] sm:$0xff]  ;;  %v18581_v45 = vld [vmem:[#allocation53_spill] sm:$0xff]  ;;  %v18584_v18 = vld [vmem:[#allocation44_spill] sm:$0xff] }
 0x22e   : > { %4100 = vst.msk [vmem:[#allocation3 + $0x31] sm:$0xff] %vm4041_vm3, %v4011_v10  ;;  %v4014_v32 = vmax.f32 %v3982_v37, 0.0  ;;  %v3981_v15 = vadd.f32 %v15874_v0, %v3942_v29  ;;  %v3945_v12 = vadd.f32 %v12992_v1, %v3555_v55  ;;  %v3168_v1 = vadd.f32 %v18575_v27, %v2777_v33  ;;  %v18583_v62 = vld [vmem:[#allocation102_spill] sm:$0xff]  ;;  %v18586_v39 = vld [vmem:[#allocation55_spill] sm:$0xff] }
 0x22f   : > { %v3809_v51 = vpop.f32.mrf.mxu0  ;;  %v15974_v29 = vld [vmem:[#allocation3 + $0x21] sm:$0xff]  ;;  %v2001_v6 = vadd.f32 %v18580_v11, %v18579_v3  ;;  %v18588_v27 = vld [vmem:[#allocation19_spill] sm:$0xff] }
 0x230   : > { %4103 = vst.msk [vmem:[#allocation3 + $0x51] sm:$0xff] %vm4041_vm3, %v4014_v32  ;;  %v4013_v46 = vmax.f32 %v3981_v15, 0.0  ;;  %v3984_v20 = vadd.f32 %v15874_v0, %v3945_v12  ;;  %v3944_v22 = vadd.f32 %v3809_v51, %v3554_v48  ;;  %v18576_v32 = vld [vmem:[#allocation99_spill] sm:$0xff]  ;;  %v2779_v51 = vadd.f32 %v18581_v45, %v2389_v58 }
 0x231   : > { %v12995_v56 = vpop.f32.mrf.mxu0  ;;  %v15961_v7 = vld [vmem:[#allocation3 + $0x19] sm:$0xff]  ;;  %v3559_v15 = vadd.f32 %v18576_v32, %v3169_v5  ;;  %v3558_v9 = vadd.f32 %v18583_v62, %v3168_v1  ;;  %v2391_v5 = vadd.f32 %v18584_v18, %v2001_v6  ;;  %v1615_v1 = vadd.f32 %v18588_v27, %v15894_v23  ;;  %v18590_v32 = vld [vmem:[#allocation24_spill] sm:$0xff]  ;;  %v18593_v6 = vld [vmem:[#allocation107_spill] sm:$0xff] }
 0x232   : > { %v15963_v34 = vld [vmem:[#allocation3 + $0x18] sm:$0xff]  ;;  %v15965_v8 = vld [vmem:[#allocation3 + $0x20] sm:$0xff]  ;;  %4102 = vst.msk [vmem:[#allocation3 + $0x49] sm:$0xff] %vm4041_vm3, %v4013_v46  ;;  %v4016_v55 = vmax.f32 %v3984_v20, 0.0  ;;  %v3983_v10 = vadd.f32 %v15874_v0, %v3944_v22  ;;  %v3947_v37 = vadd.f32 %v12995_v56, %v3557_v41  ;;  %13048 = vmatprep.mubr.msk.f32.mxu1 %vm4041_vm3, %v15961_v7  ;;  %v3171_v41 = vadd.f32 %v18582_v59, %v2780_v28 }
 0x233   : > { %13112 = vmatprep.mubr.msk.f32.mxu0 %vm4041_vm3, %v15963_v34  ;;  %v3819_v48 = vpop.f32.mrf.mxu0  ;;  %13049 = vmatmul.mubr.msk.f32.gmra.mxu1 %vm4041_vm3, %v15974_v29  ;;  %v16010_v33 = vld [vmem:[#allocation3 + $0x39] sm:$0xff] }
 0x234   : > { %13113 = vmatmul.mubr.msk.f32.gmra.mxu0 %vm4041_vm3, %v15965_v8  ;;  %4105 = vst.msk [vmem:[#allocation3 + $0x69] sm:$0xff] %vm4041_vm3, %v4016_v55  ;;  %v4015_v12 = vmax.f32 %v3983_v10, 0.0  ;;  %v3986_v61 = vadd.f32 %v15874_v0, %v3947_v37  ;;  %v3946_v14 = vadd.f32 %v3819_v48, %v3556_v42  ;;  %v18585_v56 = vld [vmem:[#allocation33_spill] sm:$0xff]  ;;  %v16016_v37 = vpop.f32.mrf.mxu1  ;;  %v3561_v58 = vadd.f32 %v15822_v40, %v3171_v41 }
 0x235   : > { %v12998_v46 = vpop.f32.mrf.mxu0  ;;  %v15997_v20 = vld [vmem:[#allocation3 + $0x31] sm:$0xff]  ;;  %v2782_v42 = vadd.f32 %v18586_v39, %v18585_v56  ;;  %v18587_v55 = vld [vmem:[#allocation89_spill] sm:$0xff]  ;;  %v18598_v39 = vld [vmem:[#allocation110_spill] sm:$0xff] }
 0x236   : > { %v15999_v22 = vld [vmem:[#allocation3 + $0x30] sm:$0xff]  ;;  %v16001_v52 = vld [vmem:[#allocation3 + $0x38] sm:$0xff]  ;;  %4104 = vst.msk [vmem:[#allocation3 + $0x61] sm:$0xff] %vm4041_vm3, %v4015_v12  ;;  %v4018_v17 = vmax.f32 %v3986_v61, 0.0  ;;  %v3985_v2 = vadd.f32 %v15874_v0, %v3946_v14  ;;  %v3949_v35 = vadd.f32 %v12998_v46, %v3559_v15  ;;  %13051 = vmatprep.mubr.msk.f32.mxu1 %vm4041_vm3, %v15997_v20  ;;  %v3170_v10 = vadd.f32 %v18587_v55, %v2779_v51 }
 0x237   : > { %13115 = vmatprep.mubr.msk.f32.mxu0 %vm4041_vm3, %v15999_v22  ;;  %v3829_v60 = vpop.f32.mrf.mxu0  ;;  %13052 = vmatmul.mubr.msk.f32.gmra.mxu1 %vm4041_vm3, %v16010_v33  ;;  %v18589_v48 = vld [vmem:[#allocation17_spill] sm:$0xff]  ;;  %v18592_v14 = vld [vmem:[#allocation92_spill] sm:$0xff] }
 0x238   : > { %13116 = vmatmul.mubr.msk.f32.gmra.mxu0 %vm4041_vm3, %v16001_v52  ;;  %4107 = vst.msk [vmem:[#allocation3 + $0x81] sm:$0xff] %vm4041_vm3, %v4018_v17  ;;  %v4017_v50 = vmax.f32 %v3985_v2, 0.0  ;;  %v3988_v21 = vadd.f32 %v15874_v0, %v3949_v35  ;;  %v3948_v28 = vadd.f32 %v3829_v60, %v3558_v9  ;;  %v2003_v15 = vadd.f32 %v18590_v32, %v18589_v48  ;;  %v18591_v12 = vld [vmem:[#allocation57_spill] sm:$0xff]  ;;  %v16044_v41 = vld [vmem:[#allocation3 + $0x51] sm:$0xff]  ;;  %v18595_v9 = vld [vmem:[#allocation46_spill] sm:$0xff] }
 0x239   : > { %v2781_v61 = vadd.f32 %v18591_v12, %v2391_v5  ;;  %v3173_v38 = vadd.f32 %v18592_v14, %v2782_v42  ;;  %v13001_v63 = vpop.f32.mrf.mxu0  ;;  %v16031_v3 = vld [vmem:[#allocation3 + $0x49] sm:$0xff]  ;;  %v3560_v45 = vadd.f32 %v18593_v6, %v3170_v10  ;;  %v18594_v46 = vld [vmem:[#allocation48_spill] sm:$0xff]  ;;  %v18597_v35 = vld [vmem:[#allocation94_spill] sm:$0xff]  ;;  %v16050_v5 = vpop.f32.mrf.mxu1 }
 0x23a   : > { %v16033_v40 = vld [vmem:[#allocation3 + $0x48] sm:$0xff]  ;;  %v16035_v11 = vld [vmem:[#allocation3 + $0x50] sm:$0xff]  ;;  %4106 = vst.msk [vmem:[#allocation3 + $0x79] sm:$0xff] %vm4041_vm3, %v4017_v50  ;;  %v4020_v51 = vmax.f32 %v3988_v21, 0.0  ;;  %v3987_v23 = vadd.f32 %v15874_v0, %v3948_v28  ;;  %v3951_v59 = vadd.f32 %v13001_v63, %v3561_v58  ;;  %13054 = vmatprep.mubr.msk.f32.mxu1 %vm4041_vm3, %v16031_v3  ;;  %v2393_v62 = vadd.f32 %v18594_v46, %v2003_v15  ;;  %v18599_v58 = vld [vmem:[#allocation21_spill] sm:$0xff] }
 0x23b   : > { %13118 = vmatprep.mubr.msk.f32.mxu0 %vm4041_vm3, %v16033_v40  ;;  %v18596_v17 = vld [vmem:[#allocation59_spill] sm:$0xff]  ;;  %v3172_v18 = vadd.f32 %v18597_v35, %v2781_v61  ;;  %v3839_v56 = vpop.f32.mrf.mxu0  ;;  %13055 = vmatmul.mubr.msk.f32.gmra.mxu1 %vm4041_vm3, %v16044_v41  ;;  %v3563_v42 = vadd.f32 %v18598_v39, %v3173_v38  ;;  %v1617_v50 = vadd.f32 %v18599_v58, %v15907_v49  ;;  %v18600_v21 = vld [vmem:[#allocation26_spill] sm:$0xff]  ;;  %v18601_v27 = vld [vmem:[#allocation61_spill] sm:$0xff] }
 0x23c   : > { %v2784_v2 = vadd.f32 %v18596_v17, %v18595_v9  ;;  %13119 = vmatmul.mubr.msk.f32.gmra.mxu0 %vm4041_vm3, %v16035_v11  ;;  %4109 = vst.msk [vmem:[#allocation3 + $0x99] sm:$0xff] %vm4041_vm3, %v4020_v51  ;;  %v4019_v55 = vmax.f32 %v3987_v23, 0.0  ;;  %v3990_v10 = vadd.f32 %v15874_v0, %v3951_v59  ;;  %v3950_v60 = vadd.f32 %v3839_v56, %v3560_v45  ;;  %v18602_v32 = vld [vmem:[#allocation95_spill] sm:$0xff]  ;;  %v18603_v51 = vld [vmem:[#allocation52_spill] sm:$0xff]  ;;  %v18604_v59 = vld [vmem:[#allocation50_spill] sm:$0xff]  ;;  %v16083_v17 = vpop.f32.mrf.mxu1 }
 0x23d   : > { %v2005_v28 = vadd.f32 %v18600_v21, %v1615_v1  ;;  %v2783_v48 = vadd.f32 %v18601_v27, %v2393_v62  ;;  %v13004_v12 = vpop.f32.mrf.mxu0  ;;  %v16064_v61 = vld [vmem:[#allocation3 + $0x61] sm:$0xff]  ;;  %v3562_v63 = vadd.f32 %v15842_v36, %v3172_v18  ;;  %v16077_v1 = vld [vmem:[#allocation3 + $0x69] sm:$0xff]  ;;  %v18606_v36 = vld [vmem:[#allocation97_spill] sm:$0xff] }
 0x23e   : > { %v3175_v15 = vadd.f32 %v18602_v32, %v2784_v2  ;;  %v16066_v14 = vld [vmem:[#allocation3 + $0x60] sm:$0xff]  ;;  %v16068_v38 = vld [vmem:[#allocation3 + $0x68] sm:$0xff]  ;;  %4108 = vst.msk [vmem:[#allocation3 + $0x91] sm:$0xff] %vm4041_vm3, %v4019_v55  ;;  %v4022_v6 = vmax.f32 %v3990_v10, 0.0  ;;  %v3989_v49 = vadd.f32 %v15874_v0, %v3950_v60  ;;  %v3953_v45 = vadd.f32 %v13004_v12, %v3563_v42  ;;  %13057 = vmatprep.mubr.msk.f32.mxu1 %vm4041_vm3, %v16064_v61  ;;  %v18608_v10 = vld [vmem:[#allocation28_spill] sm:$0xff] }
 0x23f   : > { %13121 = vmatprep.mubr.msk.f32.mxu0 %vm4041_vm3, %v16066_v14  ;;  %v2395_v23 = vadd.f32 %v18603_v51, %v2005_v28  ;;  %v18605_v46 = vld [vmem:[#allocation63_spill] sm:$0xff]  ;;  %v3174_v9 = vadd.f32 %v18606_v36, %v2783_v48  ;;  %v3849_v2 = vpop.f32.mrf.mxu0  ;;  %13058 = vmatmul.mubr.msk.f32.gmra.mxu1 %vm4041_vm3, %v16077_v1  ;;  %v2007_v60 = vadd.f32 %v18608_v10, %v1617_v50  ;;  %v18609_v58 = vld [vmem:[#allocation65_spill] sm:$0xff]  ;;  %v18610_v28 = vld [vmem:[#allocation98_spill] sm:$0xff] }
 0x240   : > { %v2786_v62 = vadd.f32 %v18605_v46, %v18604_v59  ;;  %13122 = vmatmul.mubr.msk.f32.gmra.mxu0 %vm4041_vm3, %v16068_v38  ;;  %v3565_v35 = vadd.f32 %v15855_v24, %v3175_v15  ;;  %4111 = vst.msk [vmem:[#allocation3 + $0xb1] sm:$0xff] %vm4041_vm3, %v4022_v6  ;;  %v4021_v18 = vmax.f32 %v3989_v49, 0.0  ;;  %v3992_v56 = vadd.f32 %v15874_v0, %v3953_v45  ;;  %v18607_v42 = vld [vmem:[#allocation23_spill] sm:$0xff]  ;;  %v16110_v50 = vld [vmem:[#allocation3 + $0x81] sm:$0xff]  ;;  %v18611_v49 = vld [vmem:[#allocation56_spill] sm:$0xff] }
 0x241   : > { %v3952_v39 = vadd.f32 %v3849_v2, %v3562_v63  ;;  %v1619_v55 = vadd.f32 %v18607_v42, %v15918_v53  ;;  %v2785_v21 = vadd.f32 %v18609_v58, %v2395_v23  ;;  %v13007_v48 = vpop.f32.mrf.mxu0  ;;  %v16097_v32 = vld [vmem:[#allocation3 + $0x79] sm:$0xff]  ;;  %v3564_v15 = vadd.f32 %v15881_v44, %v3174_v9  ;;  %v18612_v51 = vld [vmem:[#allocation54_spill] sm:$0xff]  ;;  %v18613_v23 = vld [vmem:[#allocation67_spill] sm:$0xff] }
 0x242   : > { %v3177_v27 = vadd.f32 %v18610_v28, %v2786_v62  ;;  %v16099_v12 = vld [vmem:[#allocation3 + $0x78] sm:$0xff]  ;;  %v16101_v24 = vld [vmem:[#allocation3 + $0x80] sm:$0xff]  ;;  %4110 = vst.msk [vmem:[#allocation3 + $0xa9] sm:$0xff] %vm4041_vm3, %v4021_v18  ;;  %v4024_v63 = vmax.f32 %v3992_v56, 0.0  ;;  %v3955_v6 = vadd.f32 %v13007_v48, %v3565_v35  ;;  %13060 = vmatprep.mubr.msk.f32.mxu1 %vm4041_vm3, %v16097_v32  ;;  %v2397_v45 = vadd.f32 %v18611_v49, %v2007_v60  ;;  %v16116_v62 = vpop.f32.mrf.mxu1 }
 0x243   : > { %v3991_v53 = vadd.f32 %v15874_v0, %v3952_v39  ;;  %13124 = vmatprep.mubr.msk.f32.mxu0 %vm4041_vm3, %v16099_v12  ;;  %v2788_v59 = vadd.f32 %v18613_v23, %v18612_v51  ;;  %v18614_v44 = vld [vmem:[#allocation100_spill] sm:$0xff]  ;;  %v3859_v36 = vpop.f32.mrf.mxu0  ;;  %13061 = vmatmul.mubr.msk.f32.gmra.mxu1 %vm4041_vm3, %v16110_v50  ;;  %v18615_v56 = vld [vmem:[#allocation25_spill] sm:$0xff]  ;;  %v18616_v42 = vld [vmem:[#allocation30_spill] sm:$0xff] }
 0x244   : > { %v3176_v46 = vadd.f32 %v18614_v44, %v2785_v21  ;;  %13125 = vmatmul.mubr.msk.f32.gmra.mxu0 %vm4041_vm3, %v16101_v24  ;;  %v3567_v9 = vadd.f32 %v15900_v31, %v3177_v27  ;;  %4113 = vst.msk [vmem:[#allocation3 + $0xc9] sm:$0xff] %vm4041_vm3, %v4024_v63  ;;  %v3994_v35 = vadd.f32 %v15874_v0, %v3955_v6  ;;  %v18617_v60 = vld [vmem:[#allocation69_spill] sm:$0xff]  ;;  %v18621_v23 = vld [vmem:[#allocation71_spill] sm:$0xff] }
 0x245   : > { %v4023_v2 = vmax.f32 %v3991_v53, 0.0  ;;  %v3954_v18 = vadd.f32 %v3859_v36, %v3564_v15  ;;  %v1621_v39 = vadd.f32 %v18615_v56, %v15931_v16  ;;  %v2009_v10 = vadd.f32 %v18616_v42, %v1619_v55  ;;  %v18618_v21 = vld [vmem:[#allocation101_spill] sm:$0xff]  ;;  %v13010_v48 = vpop.f32.mrf.mxu0  ;;  %v16130_v49 = vld [vmem:[#allocation3 + $0x91] sm:$0xff]  ;;  %v18623_v56 = vld [vmem:[#allocation27_spill] sm:$0xff] }
 0x246   : > { %v2787_v58 = vadd.f32 %v18617_v60, %v2397_v45  ;;  %v3179_v28 = vadd.f32 %v18618_v21, %v2788_v59  ;;  %v16132_v51 = vld [vmem:[#allocation3 + $0x90] sm:$0xff]  ;;  %v16134_v31 = vld [vmem:[#allocation3 + $0x98] sm:$0xff]  ;;  %v3566_v27 = vadd.f32 %v15924_v13, %v3176_v46  ;;  %v4026_v15 = vmax.f32 %v3994_v35, 0.0  ;;  %13063 = vmatprep.mubr.msk.f32.mxu1 %vm4041_vm3, %v16130_v49  ;;  %v18620_v45 = vld [vmem:[#allocation58_spill] sm:$0xff]  ;;  %v16149_v46 = vpop.f32.mrf.mxu1 }
 0x247   : > { %4112 = vst.msk [vmem:[#allocation3 + $0xc1] sm:$0xff] %vm4041_vm3, %v4023_v2  ;;  %v3993_v16 = vadd.f32 %v15874_v0, %v3954_v18  ;;  %v3957_v63 = vadd.f32 %v13010_v48, %v3567_v9  ;;  %13127 = vmatprep.mubr.msk.f32.mxu0 %vm4041_vm3, %v16132_v51  ;;  %v16143_v55 = vld [vmem:[#allocation3 + $0x99] sm:$0xff]  ;;  %v18619_v53 = vld [vmem:[#allocation60_spill] sm:$0xff]  ;;  %v2790_v59 = vadd.f32 %v18621_v23, %v18620_v45  ;;  %v18622_v13 = vld [vmem:[#allocation103_spill] sm:$0xff]  ;;  %v3869_v36 = vpop.f32.mrf.mxu0 }
 0x248   : > { %v2399_v6 = vadd.f32 %v18619_v53, %v2009_v10  ;;  %v3178_v44 = vadd.f32 %v18622_v13, %v2787_v58  ;;  %13064 = vmatmul.mubr.msk.f32.gmra.mxu1 %vm4041_vm3, %v16143_v55  ;;  %13128 = vmatmul.mubr.msk.f32.gmra.mxu0 %vm4041_vm3, %v16134_v31  ;;  %v3569_v9 = vadd.f32 %v15948_v19, %v3179_v28  ;;  %v18624_v10 = vld [vmem:[#allocation35_spill] sm:$0xff]  ;;  %v18625_v58 = vld [vmem:[#allocation73_spill] sm:$0xff]  ;;  %v18626_v48 = vld [vmem:[#allocation104_spill] sm:$0xff] }
 0x249   : > { %4115 = vst.msk [vmem:[#allocation3 + $0xe1] sm:$0xff] %vm4041_vm3, %v4026_v15  ;;  %v4025_v2 = vmax.f32 %v3993_v16, 0.0  ;;  %v3996_v35 = vadd.f32 %v15874_v0, %v3957_v63  ;;  %v3956_v18 = vadd.f32 %v3869_v36, %v3566_v27  ;;  %v1623_v42 = vadd.f32 %v18623_v56, %v15942_v54  ;;  %v13013_v45 = vpop.f32.mrf.mxu0  ;;  %v16163_v23 = vld [vmem:[#allocation3 + $0xa9] sm:$0xff]  ;;  %v18629_v16 = vld [vmem:[#allocation64_spill] sm:$0xff] }
 0x24a   : > { %v2011_v60 = vadd.f32 %v18624_v10, %v1621_v39  ;;  %v2789_v21 = vadd.f32 %v18625_v58, %v2399_v6  ;;  %v3181_v53 = vadd.f32 %v18626_v48, %v2790_v59  ;;  %18627 = vst [vmem:[#allocation18_spill] sm:$0xff] %v16163_v23  ;;  %v16165_v13 = vld [vmem:[#allocation3 + $0xa8] sm:$0xff]  ;;  %v16167_v19 = vld [vmem:[#allocation3 + $0xb0] sm:$0xff]  ;;  %v3568_v28 = vadd.f32 %v15980_v43, %v3178_v44  ;;  %v18632_v43 = vld [vmem:[#allocation105_spill] sm:$0xff] }
 0x24b   : > { %4114 = vst.msk [vmem:[#allocation3 + $0xd9] sm:$0xff] %vm4041_vm3, %v4025_v2  ;;  %v4028_v27 = vmax.f32 %v3996_v35, 0.0  ;;  %v3995_v54 = vadd.f32 %v15874_v0, %v3956_v18  ;;  %v3959_v15 = vadd.f32 %v13013_v45, %v3569_v9  ;;  %13066 = vmatprep.mubr.msk.f32.mxu1 %vm4041_vm3, %v16163_v23  ;;  %13130 = vmatprep.mubr.msk.f32.mxu0 %vm4041_vm3, %v16165_v13  ;;  %v16176_v39 = vld [vmem:[#allocation3 + $0xb1] sm:$0xff]  ;;  %v18630_v6 = vld [vmem:[#allocation62_spill] sm:$0xff]  ;;  %v18631_v59 = vld [vmem:[#allocation75_spill] sm:$0xff]  ;;  %v16182_v2 = vpop.f32.mrf.mxu1  ;;  %v3879_v35 = vpop.f32.mrf.mxu0 }
 0x24c   : > { %18628 = vst [vmem:[#allocation45_spill] sm:$0xff] %v16176_v39  ;;  %v2401_v63 = vadd.f32 %v18629_v16, %v2011_v60  ;;  %v2792_v36 = vadd.f32 %v18631_v59, %v18630_v6  ;;  %v3180_v44 = vadd.f32 %v18632_v43, %v2789_v21  ;;  %13067 = vmatmul.mubr.msk.f32.gmra.mxu1 %vm4041_vm3, %v16176_v39  ;;  %v18633_v60 = vld [vmem:[#allocation29_spill] sm:$0xff]  ;;  %v18634_v21 = vld [vmem:[#allocation38_spill] sm:$0xff] }
 0x24d   : > { %13131 = vmatmul.mubr.msk.f32.gmra.mxu0 %vm4041_vm3, %v16167_v19  ;;  %v3571_v9 = vadd.f32 %v16016_v37, %v3181_v53  ;;  %4117 = vst.msk [vmem:[#allocation3 + $0xf9] sm:$0xff] %vm4041_vm3, %v4028_v27  ;;  %v4027_v18 = vmax.f32 %v3995_v54, 0.0  ;;  %v3998_v56 = vadd.f32 %v15874_v0, %v3959_v15  ;;  %v3958_v10 = vadd.f32 %v3879_v35, %v3568_v28  ;;  %v18635_v45 = vld [vmem:[#allocation77_spill] sm:$0xff]  ;;  %v18636_v6 = vld [vmem:[#allocation106_spill] sm:$0xff]  ;;  %v13016_v43 = vpop.f32.mrf.mxu0  ;;  %v18639_v54 = vld [vmem:[#allocation68_spill] sm:$0xff] }
 0x24e   : > { %v1625_v58 = vadd.f32 %v18633_v60, %v15955_v47  ;;  %v2013_v48 = vadd.f32 %v18634_v21, %v1623_v42  ;;  %v2791_v16 = vadd.f32 %v18635_v45, %v2401_v63  ;;  %v3183_v59 = vadd.f32 %v18636_v6, %v2792_v36  ;;  %v16196_v39 = vld [vmem:[#allocation3 + $0xc1] sm:$0xff]  ;;  %v16209_v42 = vld [vmem:[#allocation3 + $0xc9] sm:$0xff] }
 0x24f   : > { %18637 = vst [vmem:[#allocation84_spill] sm:$0xff] %v16196_v39  ;;  %v16198_v23 = vld [vmem:[#allocation3 + $0xc0] sm:$0xff]  ;;  %v16200_v37 = vld [vmem:[#allocation3 + $0xc8] sm:$0xff]  ;;  %v3570_v53 = vadd.f32 %v16050_v5, %v3180_v44  ;;  %4116 = vst.msk [vmem:[#allocation3 + $0xf1] sm:$0xff] %vm4041_vm3, %v4027_v18  ;;  %v4030_v28 = vmax.f32 %v3998_v56, 0.0  ;;  %v3997_v47 = vadd.f32 %v15874_v0, %v3958_v10  ;;  %v3961_v27 = vadd.f32 %v13016_v43, %v3571_v9  ;;  %v12975_v18 = vpop.f32.mrf.mxu1  ;;  %v3889_v56 = vpop.f32.mrf.mxu0 }
 0x250   : > { %13069 = vmatprep.mubr.msk.f32.mxu1 %vm4041_vm3, %v16196_v39  ;;  %13133 = vmatprep.mubr.msk.f32.mxu0 %vm4041_vm3, %v16198_v23  ;;  %18638 = vst [vmem:[#allocation90_spill] sm:$0xff] %v16209_v42  ;;  %v2403_v15 = vadd.f32 %v18639_v54, %v2013_v48  ;;  %v18640_v63 = vld [vmem:[#allocation66_spill] sm:$0xff]  ;;  %v18642_v5 = vld [vmem:[#allocation108_spill] sm:$0xff]  ;;  %v3573_v9 = vadd.f32 %v16083_v17, %v3183_v59  ;;  %v18645_v43 = vld [vmem:[#allocation79_spill] sm:$0xff] }
 0x251   : > { %v18641_v36 = vld [vmem:[#allocation78_spill] sm:$0xff]  ;;  %v3182_v44 = vadd.f32 %v18642_v5, %v2791_v16  ;;  %13070 = vmatmul.mubr.msk.f32.gmra.mxu1 %vm4041_vm3, %v16209_v42  ;;  %13134 = vmatmul.mubr.msk.f32.gmra.mxu0 %vm4041_vm3, %v16200_v37  ;;  %4119 = vst.msk [vmem:[#allocation3 + $0x111] sm:$0xff] %vm4041_vm3, %v4030_v28  ;;  %v4029_v10 = vmax.f32 %v3997_v47, 0.0  ;;  %v4000_v60 = vadd.f32 %v15874_v0, %v3961_v27  ;;  %v18643_v48 = vld [vmem:[#allocation32_spill] sm:$0xff]  ;;  %v18644_v16 = vld [vmem:[#allocation39_spill] sm:$0xff]  ;;  %v13019_v5 = vpop.f32.mrf.mxu0 }
 0x252   : > { %v2794_v35 = vadd.f32 %v18641_v36, %v18640_v63  ;;  %v3960_v21 = vadd.f32 %v3889_v56, %v3570_v53  ;;  %v1627_v45 = vadd.f32 %v18643_v48, %v15991_v25  ;;  %v2015_v6 = vadd.f32 %v18644_v16, %v1625_v58  ;;  %v18646_v63 = vld [vmem:[#allocation109_spill] sm:$0xff]  ;;  %v16240_v58 = vld [vmem:[#allocation3 + $0xe1] sm:$0xff]  ;;  %v18648_v47 = vld [vmem:[#allocation72_spill] sm:$0xff] }
 0x253   : > { %v2793_v54 = vadd.f32 %v18645_v43, %v2403_v15  ;;  %v16227_v42 = vld [vmem:[#allocation3 + $0xd9] sm:$0xff]  ;;  %v3572_v59 = vadd.f32 %v16116_v62, %v3182_v44  ;;  %4118 = vst.msk [vmem:[#allocation3 + $0x109] sm:$0xff] %vm4041_vm3, %v4029_v10  ;;  %v4032_v53 = vmax.f32 %v4000_v60, 0.0  ;;  %v3963_v28 = vadd.f32 %v13019_v5, %v3573_v9  ;;  %18647 = vst [vmem:[#allocation36_spill] sm:$0xff] %v16240_v58  ;;  %v18649_v15 = vld [vmem:[#allocation70_spill] sm:$0xff]  ;;  %v3529_v10 = vpop.f32.mrf.mxu1  ;;  %v3899_v60 = vpop.f32.mrf.mxu0 }
 0x254   : > { %v3185_v36 = vadd.f32 %v18646_v63, %v2794_v35  ;;  %v16229_v39 = vld [vmem:[#allocation3 + $0xd8] sm:$0xff]  ;;  %v16231_v17 = vld [vmem:[#allocation3 + $0xe0] sm:$0xff]  ;;  %v3999_v25 = vadd.f32 %v15874_v0, %v3960_v21  ;;  %13072 = vmatprep.mubr.msk.f32.mxu1 %vm4041_vm3, %v16227_v42  ;;  %v2405_v27 = vadd.f32 %v18648_v47, %v2015_v6  ;;  %v18651_v62 = vld [vmem:[#allocation111_spill] sm:$0xff] }
 0x255   : > { %13136 = vmatprep.mubr.msk.f32.mxu0 %vm4041_vm3, %v16229_v39  ;;  %v18650_v35 = vld [vmem:[#allocation80_spill] sm:$0xff]  ;;  %v3184_v44 = vadd.f32 %v18651_v62, %v2793_v54  ;;  %13073 = vmatmul.mubr.msk.f32.gmra.mxu1 %vm4041_vm3, %v16240_v58  ;;  %4121 = vst.msk [vmem:[#allocation3 + $0x129] sm:$0xff] %vm4041_vm3, %v4032_v53  ;;  %v4002_v48 = vadd.f32 %v15874_v0, %v3963_v28  ;;  %v18653_v63 = vld [vmem:[#allocation81_spill] sm:$0xff] }
 0x256   : > { %v2796_v56 = vadd.f32 %v18650_v35, %v18649_v15  ;;  %13137 = vmatmul.mubr.msk.f32.gmra.mxu0 %vm4041_vm3, %v16231_v17  ;;  %v3575_v9 = vadd.f32 %v16149_v46, %v3185_v36  ;;  %v4031_v21 = vmax.f32 %v3999_v25, 0.0  ;;  %v3962_v16 = vadd.f32 %v3899_v60, %v3572_v59  ;;  %v18652_v6 = vld [vmem:[#allocation40_spill] sm:$0xff]  ;;  %v13022_v15 = vpop.f32.mrf.mxu0 }
 0x257   : > { %v2017_v43 = vadd.f32 %v18652_v6, %v1627_v45  ;;  %v2795_v54 = vadd.f32 %v18653_v63, %v2405_v27  ;;  %v18654_v5 = vld [vmem:[#allocation112_spill] sm:$0xff]  ;;  %v3574_v46 = vadd.f32 %v16182_v2, %v3184_v44  ;;  %v4034_v36 = vmax.f32 %v4002_v48, 0.0  ;;  %v16269_v45 = vld [vmem:[#allocation3 + $0xf9] sm:$0xff]  ;;  %v18656_v27 = vld [vmem:[#allocation74_spill] sm:$0xff]  ;;  %v12978_v44 = vpop.f32.mrf.mxu1 }
 0x258   : > { %v3187_v47 = vadd.f32 %v18654_v5, %v2796_v56  ;;  %v16256_v35 = vld [vmem:[#allocation3 + $0xf1] sm:$0xff]  ;;  %4120 = vst.msk [vmem:[#allocation3 + $0x121] sm:$0xff] %vm4041_vm3, %v4031_v21  ;;  %v4001_v59 = vadd.f32 %v15874_v0, %v3962_v16  ;;  %v3965_v53 = vadd.f32 %v13022_v15, %v3575_v9  ;;  %v18657_v56 = vld [vmem:[#allocation82_spill] sm:$0xff]  ;;  %v3909_v21 = vpop.f32.mrf.mxu0 }
 0x259   : > { %v16258_v62 = vld [vmem:[#allocation3 + $0xf0] sm:$0xff]  ;;  %v16260_v58 = vld [vmem:[#allocation3 + $0xf8] sm:$0xff]  ;;  %13075 = vmatprep.mubr.msk.f32.mxu1 %vm4041_vm3, %v16256_v35  ;;  %v2798_v60 = vadd.f32 %v18657_v56, %v18656_v27  ;;  %v3186_v2 = vadd.f32 %v15844_v30, %v2795_v54  ;;  %4123 = vst.msk [vmem:[#allocation3 + $0x141] sm:$0xff] %vm4041_vm3, %v4034_v36  ;;  %v3964_v6 = vadd.f32 %v3909_v21, %v3574_v46 }
 0x25a   : > { %13139 = vmatprep.mubr.msk.f32.mxu0 %vm4041_vm3, %v16258_v62  ;;  %v18655_v25 = vld [vmem:[#allocation76_spill] sm:$0xff]  ;;  %13076 = vmatmul.mubr.msk.f32.gmra.mxu1 %vm4041_vm3, %v16269_v45  ;;  %v3577_v9 = vadd.f32 %v12975_v18, %v3187_v47  ;;  %v4033_v48 = vmax.f32 %v4001_v59, 0.0  ;;  %v4004_v16 = vadd.f32 %v15874_v0, %v3965_v53  ;;  %v13025_v30 = vpop.f32.mrf.mxu0  ;;  %v16283_v54 = vld [vmem:[#allocation3 + $0x109] sm:$0xff]  ;;  %v3539_v59 = vpop.f32.mrf.mxu1 }
 0x25b   : > { %v2407_v28 = vadd.f32 %v18655_v25, %v2017_v43  ;;  %13140 = vmatmul.mubr.msk.f32.gmra.mxu0 %vm4041_vm3, %v16260_v58  ;;  %v18658_v43 = vld [vmem:[#allocation83_spill] sm:$0xff]  ;;  %v3189_v5 = vadd.f32 %v15849_v4, %v2798_v60  ;;  %v3576_v27 = vadd.f32 %v3529_v10, %v3186_v2  ;;  %v4003_v47 = vadd.f32 %v15874_v0, %v3964_v6  ;;  %v16295_v4 = vld [vmem:[#allocation3 + $0x111] sm:$0xff] }
 0x25c   : > { %v16285_v15 = vld [vmem:[#allocation3 + $0x108] sm:$0xff]  ;;  %v16287_v25 = vld [vmem:[#allocation3 + $0x110] sm:$0xff]  ;;  %4122 = vst.msk [vmem:[#allocation3 + $0x139] sm:$0xff] %vm4041_vm3, %v4033_v48  ;;  %v4036_v18 = vmax.f32 %v4004_v16, 0.0  ;;  %v3967_v36 = vadd.f32 %v13025_v30, %v3577_v9  ;;  %13078 = vmatprep.mubr.msk.f32.mxu1 %vm4041_vm3, %v16283_v54  ;;  %v3919_v53 = vpop.f32.mrf.mxu0 }
 0x25d   : > { %v2797_v63 = vadd.f32 %v18658_v43, %v2407_v28  ;;  %13142 = vmatprep.mubr.msk.f32.mxu0 %vm4041_vm3, %v16285_v15  ;;  %v3579_v10 = vadd.f32 %v12978_v44, %v3189_v5  ;;  %v4035_v28 = vmax.f32 %v4003_v47, 0.0  ;;  %v3966_v60 = vadd.f32 %v3919_v53, %v3576_v27  ;;  %v16316_v43 = vld [vmem:[#allocation3 + $0x129] sm:$0xff] }
 0x25e   : > { %13079 = vmatmul.mubr.msk.f32.gmra.mxu1 %vm4041_vm3, %v16295_v4  ;;  %4125 = vst.msk [vmem:[#allocation3 + $0x159] sm:$0xff] %vm4041_vm3, %v4036_v18  ;;  %v4006_v56 = vadd.f32 %v15874_v0, %v3967_v36  ;;  %v13028_v2 = vpop.f32.mrf.mxu0 }
 0x25f   : > { %v3188_v46 = vadd.f32 %v15857_v57, %v2797_v63  ;;  %13143 = vmatmul.mubr.msk.f32.gmra.mxu0 %vm4041_vm3, %v16287_v25  ;;  %v16304_v21 = vld [vmem:[#allocation3 + $0x121] sm:$0xff]  ;;  %4124 = vst.msk [vmem:[#allocation3 + $0x151] sm:$0xff] %vm4041_vm3, %v4035_v28  ;;  %v4005_v6 = vadd.f32 %v15874_v0, %v3966_v60  ;;  %v3969_v44 = vadd.f32 %v13028_v2, %v3579_v10 }
 0x260   : > { %v16306_v9 = vld [vmem:[#allocation3 + $0x120] sm:$0xff]  ;;  %v16308_v57 = vld [vmem:[#allocation3 + $0x128] sm:$0xff]  ;;  %v4038_v16 = vmax.f32 %v4006_v56, 0.0  ;;  %13081 = vmatprep.mubr.msk.f32.mxu1 %vm4041_vm3, %v16304_v21  ;;  %v3929_v63 = vpop.f32.mrf.mxu0 }
 0x261   : > { %v3578_v48 = vadd.f32 %v3539_v59, %v3188_v46  ;;  %13145 = vmatprep.mubr.msk.f32.mxu0 %vm4041_vm3, %v16306_v9  ;;  %v4037_v5 = vmax.f32 %v4005_v6, 0.0  ;;  %v4008_v30 = vadd.f32 %v15874_v0, %v3969_v44  ;;  %v16336_v53 = vld [vmem:[#allocation3 + $0x141] sm:$0xff] }
 0x262   : > { %13082 = vmatmul.mubr.msk.f32.gmra.mxu1 %vm4041_vm3, %v16316_v43  ;;  %4127 = vst.msk [vmem:[#allocation3 + $0x171] sm:$0xff] %vm4041_vm3, %v4038_v16  ;;  %v4853_v2 = vld [vmem:[#allocation3 + $0x2] sm:$0xff] }
 0x263   : > { %13146 = vmatmul.mubr.msk.f32.gmra.mxu0 %vm4041_vm3, %v16308_v57  ;;  %v3968_v27 = vadd.f32 %v3929_v63, %v3578_v48  ;;  %v16324_v18 = vld [vmem:[#allocation3 + $0x139] sm:$0xff]  ;;  %4126 = vst.msk [vmem:[#allocation3 + $0x169] sm:$0xff] %vm4041_vm3, %v4037_v5  ;;  %v4040_v46 = vmax.f32 %v4008_v30, 0.0  ;;  %v4854_v63 = vld [vmem:[#allocation3 + $0xa] sm:$0xff] }
 0x264   : > { %v16326_v47 = vld [vmem:[#allocation3 + $0x138] sm:$0xff]  ;;  %v16328_v36 = vld [vmem:[#allocation3 + $0x140] sm:$0xff]  ;;  %13084 = vmatprep.mubr.msk.f32.mxu1 %vm4041_vm3, %v16324_v18 }
 0x265   : > { %v4007_v59 = vadd.f32 %v15874_v0, %v3968_v27  ;;  %13148 = vmatprep.mubr.msk.f32.mxu0 %vm4041_vm3, %v16326_v47  ;;  %4129 = vst.msk [vmem:[#allocation3 + $0x189] sm:$0xff] %vm4041_vm3, %v4040_v46  ;;  %v16354_v60 = vld [vmem:[#allocation3 + $0x159] sm:$0xff] }
 0x266   : > { %13085 = vmatmul.mubr.msk.f32.gmra.mxu1 %vm4041_vm3, %v16336_v53  ;;  %v16343_v28 = vld [vmem:[#allocation3 + $0x151] sm:$0xff]  ;;  %v16382_v5 = vld [vmem:[#allocation3 + $0x1a] sm:$0xff] }
 0x267   : > { %13149 = vmatmul.mubr.msk.f32.gmra.mxu0 %vm4041_vm3, %v16328_v36  ;;  %v4039_v10 = vmax.f32 %v4007_v59, 0.0  ;;  %v16345_v0 = vld [vmem:[#allocation3 + $0x150] sm:$0xff]  ;;  %v16347_v56 = vld [vmem:[#allocation3 + $0x158] sm:$0xff]  ;;  %13087 = vmatprep.mubr.msk.f32.mxu1 %vm4041_vm3, %v16343_v28  ;;  %v11413_v30 = vld [vmem:[%s18311_s3 + $0x130] sm:$0xff] }
 0x268   : > { %13151 = vmatprep.mubr.msk.f32.mxu0 %vm4041_vm3, %v16345_v0  ;;  %v11453_v27 = vld [vmem:[%s18311_s3 + $0x170] sm:$0xff] }
 0x269   : > { %4128 = vst.msk [vmem:[#allocation3 + $0x181] sm:$0xff] %vm4041_vm3, %v4039_v10  ;;  %v16370_v44 = vld [vmem:[#allocation3 + $0x171] sm:$0xff]  ;;  %v16398_v10 = vld [vmem:[#allocation3 + $0x22] sm:$0xff] }
 0x26a   : > { %13088 = vmatmul.mubr.msk.f32.gmra.mxu1 %vm4041_vm3, %v16354_v60  ;;  %v16360_v48 = vld [vmem:[#allocation3 + $0x169] sm:$0xff] }
 0x26b   : > { %13152 = vmatmul.mubr.msk.f32.gmra.mxu0 %vm4041_vm3, %v16347_v56  ;;  %v16362_v16 = vld [vmem:[#allocation3 + $0x168] sm:$0xff]  ;;  %v16364_v6 = vld [vmem:[#allocation3 + $0x170] sm:$0xff]  ;;  %13090 = vmatprep.mubr.msk.f32.mxu1 %vm4041_vm3, %v16360_v48 }
 0x26c   : > { %13154 = vmatprep.mubr.msk.f32.mxu0 %vm4041_vm3, %v16362_v16  ;;  %v13047_v46 = vpop.f32.mrf.mxu1 }
 0x26e   : > { %13091 = vmatmul.mubr.msk.f32.gmra.mxu1 %vm4041_vm3, %v16370_v44 }
 0x26f   : > { %13155 = vmatmul.mubr.msk.f32.gmra.mxu0 %vm4041_vm3, %v16364_v6  ;;  %13173 = vmatprep.mubr.msk.f32.mxu1 %vm4041_vm3, %v4853_v2  ;;  %v16404_v2 = vld [vmem:[#allocation3 + $0x32] sm:$0xff] }
 0x270   : > { %13237 = vmatprep.mubr.msk.f32.mxu0 %vm4041_vm3, %v15963_v34  ;;  %v13111_v34 = vpop.f32.mrf.mxu0 }
 0x271   : > { %v16394_v59 = vadd.f32 %v13111_v34, %v13047_v46  ;;  %v11411_v46 = vld [vmem:[%s18311_s3 + $0x120] sm:$0xff] }
 0x272   : > { %13174 = vmatmul.mubr.msk.f32.vlgmr.msra.gmra.mxu1 %vm4041_vm3, %v4854_v63  ;;  %v16416_v63 = vld [vmem:[#allocation3 + $0x3a] sm:$0xff]  ;;  %v16452_v34 = vld [vmem:[#allocation3 + $0x6a] sm:$0xff] }
 0x273   : > { %13238 = vmatmul.mubr.msk.f32.vlgmr.msra.gmra.mxu0 %vm4041_vm3, %v15965_v8  ;;  %13176 = vmatprep.mubr.msk.f32.mxu1 %vm4041_vm3, %v16382_v5  ;;  %v18659_v8 = vld [vmem:[#allocation91_spill] sm:$0xff] }
 0x274   : > { %13240 = vmatprep.mubr.msk.f32.mxu0 %vm4041_vm3, %v15999_v22  ;;  %13286 = vmatpush3.msra.mxu1 %v18659_v8  ;;  %v11412_v22 = vld [vmem:[%s18311_s3 + $0x128] sm:$0xff]  ;;  %v11409_v8 = vld [vmem:[%s18311_s3 + $0x110] sm:$0xff] }
 0x275   : > { %13350 = vmatpush3.msra.mxu0 %v15862_v26  ;;  %13287 = vmatprep.subr.mxu1 %v11413_v30  ;;  %v11452_v26 = vld [vmem:[%s18311_s3 + $0x168] sm:$0xff] }
 0x276   : > { %13351 = vmatprep.subr.mxu0 %v11453_v27  ;;  %13177 = vmatmul.mubr.msk.f32.gmra.mxu1 %vm4041_vm3, %v16398_v10 }
 0x277   : > { %13241 = vmatmul.mubr.msk.f32.gmra.mxu0 %vm4041_vm3, %v16001_v52  ;;  %13179 = vmatprep.mubr.msk.f32.mxu1 %vm4041_vm3, %v16404_v2  ;;  %v16422_v52 = vld [vmem:[#allocation3 + $0x4a] sm:$0xff] }
 0x278   : > { %13243 = vmatprep.mubr.msk.f32.mxu0 %vm4041_vm3, %v16033_v40  ;;  %13288 = vmatpush3.msra.mxu1 %v11413_v30  ;;  %v11451_v40 = vld [vmem:[%s18311_s3 + $0x160] sm:$0xff] }
 0x279   : > { %13352 = vmatpush3.msra.mxu0 %v11453_v27  ;;  %13289 = vmatprep.subr.mxu1 %v11412_v22  ;;  %v16434_v30 = vld [vmem:[#allocation3 + $0x52] sm:$0xff]  ;;  %v11410_v27 = vld [vmem:[%s18311_s3 + $0x118] sm:$0xff] }
 0x27a   : > { %13353 = vmatprep.subr.mxu0 %v11452_v26  ;;  %13180 = vmatmul.mubr.msk.f32.gmra.mxu1 %vm4041_vm3, %v16416_v63 }
 0x27b   : > { %13244 = vmatmul.mubr.msk.f32.gmra.mxu0 %vm4041_vm3, %v16035_v11  ;;  %13182 = vmatprep.mubr.msk.f32.mxu1 %vm4041_vm3, %v16422_v52  ;;  %v16440_v11 = vld [vmem:[#allocation3 + $0x62] sm:$0xff] }
 0x27c   : > { %13246 = vmatprep.mubr.msk.f32.mxu0 %vm4041_vm3, %v16066_v14  ;;  %13290 = vmatpush3.msra.mxu1 %v11412_v22  ;;  %v11450_v14 = vld [vmem:[%s18311_s3 + $0x158] sm:$0xff] }
 0x27d   : > { %13354 = vmatpush3.msra.mxu0 %v11452_v26  ;;  %13291 = vmatprep.subr.mxu1 %v11411_v46  ;;  %v16470_v22 = vld [vmem:[#allocation3 + $0x82] sm:$0xff]  ;;  %v11408_v26 = vld [vmem:[%s18311_s3 + $0x108] sm:$0xff] }
 0x27e   : > { %13355 = vmatprep.subr.mxu0 %v11451_v40  ;;  %13183 = vmatmul.mubr.msk.f32.gmra.mxu1 %vm4041_vm3, %v16434_v30 }
 0x27f   : > { %13247 = vmatmul.mubr.msk.f32.gmra.mxu0 %vm4041_vm3, %v16068_v38  ;;  %13185 = vmatprep.mubr.msk.f32.mxu1 %vm4041_vm3, %v16440_v11  ;;  %v16458_v38 = vld [vmem:[#allocation3 + $0x7a] sm:$0xff] }
 0x280   : > { %13249 = vmatprep.mubr.msk.f32.mxu0 %vm4041_vm3, %v16099_v12  ;;  %13292 = vmatpush3.msra.mxu1 %v11411_v46  ;;  %v11449_v12 = vld [vmem:[%s18311_s3 + $0x150] sm:$0xff] }
 0x281   : > { %13356 = vmatpush3.msra.mxu0 %v11451_v40  ;;  %13293 = vmatprep.subr.mxu1 %v11410_v27  ;;  %v16488_v46 = vld [vmem:[#allocation3 + $0x9a] sm:$0xff]  ;;  %v11407_v40 = vld [vmem:[%s18311_s3 + $0x100] sm:$0xff] }
 0x282   : > { %13357 = vmatprep.subr.mxu0 %v11450_v14  ;;  %13186 = vmatmul.mubr.msk.f32.gmra.mxu1 %vm4041_vm3, %v16452_v34 }
 0x283   : > { %13250 = vmatmul.mubr.msk.f32.gmra.mxu0 %vm4041_vm3, %v16101_v24  ;;  %13188 = vmatprep.mubr.msk.f32.mxu1 %vm4041_vm3, %v16458_v38  ;;  %v16476_v24 = vld [vmem:[#allocation3 + $0x92] sm:$0xff] }
 0x284   : > { %13252 = vmatprep.mubr.msk.f32.mxu0 %vm4041_vm3, %v16132_v51  ;;  %13294 = vmatpush3.msra.mxu1 %v11410_v27  ;;  %v11448_v51 = vld [vmem:[%s18311_s3 + $0x148] sm:$0xff] }
 0x285   : > { %13358 = vmatpush3.msra.mxu0 %v11450_v14  ;;  %13295 = vmatprep.subr.mxu1 %v11409_v8  ;;  %v16506_v27 = vld [vmem:[#allocation3 + $0xb2] sm:$0xff]  ;;  %v16517_v14 = vld [vmem:[%s18311_s3 + $0x1b8] sm:$0xff] }
 0x286   : > { %13359 = vmatprep.subr.mxu0 %v11449_v12  ;;  %13189 = vmatmul.mubr.msk.f32.gmra.mxu1 %vm4041_vm3, %v16470_v22 }
 0x287   : > { %13253 = vmatmul.mubr.msk.f32.gmra.mxu0 %vm4041_vm3, %v16134_v31  ;;  %13191 = vmatprep.mubr.msk.f32.mxu1 %vm4041_vm3, %v16476_v24  ;;  %v16494_v31 = vld [vmem:[#allocation3 + $0xaa] sm:$0xff] }
 0x288   : > { %13255 = vmatprep.mubr.msk.f32.mxu0 %vm4041_vm3, %v16165_v13  ;;  %13296 = vmatpush3.msra.mxu1 %v11409_v8  ;;  %v11447_v13 = vld [vmem:[%s18311_s3 + $0x140] sm:$0xff]  ;;  %v16533_v8 = vld [vmem:[#allocation3 + $0xda] sm:$0xff] }
 0x289   : > { %13360 = vmatpush3.msra.mxu0 %v11449_v12  ;;  %13297 = vmatprep.subr.mxu1 %v11408_v26  ;;  %v16545_v12 = vld [vmem:[#allocation3 + $0xf2] sm:$0xff] }
 0x28a   : > { %13361 = vmatprep.subr.mxu0 %v11448_v51  ;;  %13192 = vmatmul.mubr.msk.f32.gmra.mxu1 %vm4041_vm3, %v16488_v46 }
 0x28b   : > { %13256 = vmatmul.mubr.msk.f32.gmra.mxu0 %vm4041_vm3, %v16167_v19  ;;  %13194 = vmatprep.mubr.msk.f32.mxu1 %vm4041_vm3, %v16494_v31  ;;  %v16512_v19 = vld [vmem:[#allocation3 + $0xc2] sm:$0xff] }
 0x28c   : > { %13258 = vmatprep.mubr.msk.f32.mxu0 %vm4041_vm3, %v16198_v23  ;;  %13298 = vmatpush3.msra.mxu1 %v11408_v26  ;;  %v11534_v23 = vld [vmem:[%s18311_s3 + $0x1f8] sm:$0xff]  ;;  %v16607_v26 = vld [vmem:[#allocation3 + $0x180] sm:$0xff] }
 0x28d   : > { %13362 = vmatpush3.msra.mxu0 %v11448_v51  ;;  %13299 = vmatprep.subr.mxu1 %v11407_v40  ;;  %v11533_v51 = vld [vmem:[%s18311_s3 + $0x1f0] sm:$0xff] }
 0x28e   : > { %13363 = vmatprep.subr.mxu0 %v11447_v13  ;;  %13195 = vmatmul.mubr.msk.f32.gmra.mxu1 %vm4041_vm3, %v16506_v27 }
 0x28f   : > { %13259 = vmatmul.mubr.msk.f32.gmra.mxu0 %vm4041_vm3, %v16200_v37  ;;  %13197 = vmatprep.mubr.msk.f32.mxu1 %vm4041_vm3, %v16512_v19  ;;  %v16526_v37 = vld [vmem:[#allocation3 + $0xca] sm:$0xff] }
 0x290   : > { %13261 = vmatprep.mubr.msk.f32.mxu0 %vm4041_vm3, %v16229_v39  ;;  %13300 = vmatpush3.msra.mxu1 %v11407_v40  ;;  %v16539_v39 = vld [vmem:[#allocation3 + $0xe2] sm:$0xff] }
 0x291   : > { %13364 = vmatpush3.msra.mxu0 %v11447_v13  ;;  %13413 = vmatprep.subr.mxu1 %v16517_v14 }
 0x292   : > { %13477 = vmatprep.subr.mxu0 %v11534_v23  ;;  %13198 = vmatmul.mubr.msk.f32.gmra.mxu1 %vm4041_vm3, %v16526_v37 }
 0x293   : > { %13262 = vmatmul.mubr.msk.f32.gmra.mxu0 %vm4041_vm3, %v16231_v17  ;;  %13200 = vmatprep.mubr.msk.f32.mxu1 %vm4041_vm3, %v16533_v8  ;;  %v16551_v17 = vld [vmem:[#allocation3 + $0xfa] sm:$0xff] }
 0x294   : > { %13264 = vmatprep.mubr.msk.f32.mxu0 %vm4041_vm3, %v16258_v62  ;;  %v16557_v62 = vld [vmem:[#allocation3 + $0x10a] sm:$0xff] }
 0x296   : > { %13201 = vmatmul.mubr.msk.f32.gmra.mxu1 %vm4041_vm3, %v16539_v39 }
 0x297   : > { %13265 = vmatmul.mubr.msk.f32.gmra.mxu0 %vm4041_vm3, %v16260_v58  ;;  %13203 = vmatprep.mubr.msk.f32.mxu1 %vm4041_vm3, %v16545_v12  ;;  %v16563_v58 = vld [vmem:[#allocation3 + $0x112] sm:$0xff] }
 0x298   : > { %13267 = vmatprep.mubr.msk.f32.mxu0 %vm4041_vm3, %v16285_v15  ;;  %v16569_v15 = vld [vmem:[#allocation3 + $0x122] sm:$0xff] }
 0x29a   : > { %13204 = vmatmul.mubr.msk.f32.gmra.mxu1 %vm4041_vm3, %v16551_v17 }
 0x29b   : > { %13268 = vmatmul.mubr.msk.f32.gmra.mxu0 %vm4041_vm3, %v16287_v25  ;;  %13206 = vmatprep.mubr.msk.f32.mxu1 %vm4041_vm3, %v16557_v62  ;;  %v16575_v25 = vld [vmem:[#allocation3 + $0x12a] sm:$0xff] }
 0x29c   : > { %13270 = vmatprep.mubr.msk.f32.mxu0 %vm4041_vm3, %v16306_v9  ;;  %v16581_v9 = vld [vmem:[#allocation3 + $0x13a] sm:$0xff] }
 0x29e   : > { %13207 = vmatmul.mubr.msk.f32.gmra.mxu1 %vm4041_vm3, %v16563_v58 }
 0x29f   : > { %13271 = vmatmul.mubr.msk.f32.gmra.mxu0 %vm4041_vm3, %v16308_v57  ;;  %13209 = vmatprep.mubr.msk.f32.mxu1 %vm4041_vm3, %v16569_v15  ;;  %v16587_v57 = vld [vmem:[#allocation3 + $0x142] sm:$0xff] }
 0x2a0   : > { %13273 = vmatprep.mubr.msk.f32.mxu0 %vm4041_vm3, %v16326_v47  ;;  %v16593_v47 = vld [vmem:[#allocation3 + $0x152] sm:$0xff] }
 0x2a2   : > { %13210 = vmatmul.mubr.msk.f32.gmra.mxu1 %vm4041_vm3, %v16575_v25 }
 0x2a3   : > { %13274 = vmatmul.mubr.msk.f32.gmra.mxu0 %vm4041_vm3, %v16328_v36  ;;  %13212 = vmatprep.mubr.msk.f32.mxu1 %vm4041_vm3, %v16581_v9  ;;  %v16599_v36 = vld [vmem:[#allocation3 + $0x15a] sm:$0xff] }
 0x2a4   : > { %13276 = vmatprep.mubr.msk.f32.mxu0 %vm4041_vm3, %v16345_v0  ;;  %v16605_v0 = vld [vmem:[#allocation3 + $0x16a] sm:$0xff] }
 0x2a6   : > { %13213 = vmatmul.mubr.msk.f32.gmra.mxu1 %vm4041_vm3, %v16587_v57 }
 0x2a7   : > { %13277 = vmatmul.mubr.msk.f32.gmra.mxu0 %vm4041_vm3, %v16347_v56  ;;  %13215 = vmatprep.mubr.msk.f32.mxu1 %vm4041_vm3, %v16593_v47  ;;  %v16613_v56 = vld [vmem:[#allocation3 + $0x172] sm:$0xff] }
 0x2a8   : > { %13279 = vmatprep.mubr.msk.f32.mxu0 %vm4041_vm3, %v16362_v16  ;;  %v16615_v16 = vld [vmem:[#allocation3 + $0x188] sm:$0xff] }
 0x2aa   : > { %13216 = vmatmul.mubr.msk.f32.gmra.mxu1 %vm4041_vm3, %v16599_v36 }
 0x2ab   : > { %13280 = vmatmul.mubr.msk.f32.gmra.mxu0 %vm4041_vm3, %v16364_v6  ;;  %13218 = vmatprep.mubr.msk.f32.mxu1 %vm4041_vm3, %v16605_v0  ;;  %v11493_v6 = vld [vmem:[%s18311_s3 + $0x1b0] sm:$0xff] }
 0x2ac   : > { %13282 = vmatprep.mubr.msk.f32.mxu0 %vm4041_vm3, %v16607_v26 }
 0x2ae   : > { %13219 = vmatmul.mubr.msk.f32.gmra.mxu1 %vm4041_vm3, %v16613_v56 }
 0x2af   : > { %13283 = vmatmul.mubr.msk.f32.gmra.mxu0 %vm4041_vm3, %v16615_v16  ;;  %13301 = vmatprep.mubr.msk.f32.mxu1 %vm4041_vm3, %v15961_v7  ;;  %v11492_v7 = vld [vmem:[%s18311_s3 + $0x1a8] sm:$0xff] }
 0x2b0   : > { %13365 = vmatprep.mubr.msk.f32.mxu0 %vm4041_vm3, %v16382_v5  ;;  %v11487_v5 = vld [vmem:[%s18311_s3 + $0x180] sm:$0xff] }
 0x2b2   : > { %13302 = vmatmul.mubr.msk.f32.vlgmr.msra.gmra.mxu1 %vm4041_vm3, %v15974_v29  ;;  %v11532_v29 = vld [vmem:[%s18311_s3 + $0x1e8] sm:$0xff] }
 0x2b3   : > { %13366 = vmatmul.mubr.msk.f32.vlgmr.msra.gmra.mxu0 %vm4041_vm3, %v16398_v10  ;;  %13304 = vmatprep.mubr.msk.f32.mxu1 %vm4041_vm3, %v15997_v20  ;;  %v11491_v20 = vld [vmem:[%s18311_s3 + $0x1a0] sm:$0xff] }
 0x2b4   : > { %13368 = vmatprep.mubr.msk.f32.mxu0 %vm4041_vm3, %v16404_v2  ;;  %13414 = vmatpush3.msra.mxu1 %v16517_v14  ;;  %v11527_v10 = vld [vmem:[%s18311_s3 + $0x1c0] sm:$0xff]  ;;  %v6435_v14 = vld [vmem:[#allocation3 + $0x68] sm:$0xff] }
 0x2b5   : > { %13478 = vmatpush3.msra.mxu0 %v11534_v23  ;;  %13415 = vmatprep.subr.mxu1 %v11493_v6  ;;  %v18662_v2 = vld [vmem:[#allocation84_spill] sm:$0xff]  ;;  %v6829_v23 = vld [vmem:[#allocation3 + $0x69] sm:$0xff] }
 0x2b6   : > { %13479 = vmatprep.subr.mxu0 %v11533_v51  ;;  %13305 = vmatmul.mubr.msk.f32.gmra.mxu1 %vm4041_vm3, %v16010_v33  ;;  %v11531_v33 = vld [vmem:[%s18311_s3 + $0x1e0] sm:$0xff] }
 0x2b7   : > { %13369 = vmatmul.mubr.msk.f32.gmra.mxu0 %vm4041_vm3, %v16416_v63  ;;  %13307 = vmatprep.mubr.msk.f32.mxu1 %vm4041_vm3, %v16031_v3  ;;  %v11490_v3 = vld [vmem:[%s18311_s3 + $0x198] sm:$0xff] }
 0x2b8   : > { %13371 = vmatprep.mubr.msk.f32.mxu0 %vm4041_vm3, %v16422_v52  ;;  %13416 = vmatpush3.msra.mxu1 %v11493_v6  ;;  %v18663_v63 = vld [vmem:[#allocation90_spill] sm:$0xff] }
 0x2b9   : > { %13480 = vmatpush3.msra.mxu0 %v11533_v51  ;;  %13417 = vmatprep.subr.mxu1 %v11492_v7  ;;  %v11574_v52 = vld [vmem:[%s18311_s3 + $0x238] sm:$0xff] }
 0x2ba   : > { %13481 = vmatprep.subr.mxu0 %v11532_v29  ;;  %13308 = vmatmul.mubr.msk.f32.gmra.mxu1 %vm4041_vm3, %v16044_v41  ;;  %v11530_v41 = vld [vmem:[%s18311_s3 + $0x1d8] sm:$0xff] }
 0x2bb   : > { %13372 = vmatmul.mubr.msk.f32.gmra.mxu0 %vm4041_vm3, %v16434_v30  ;;  %13310 = vmatprep.mubr.msk.f32.mxu1 %vm4041_vm3, %v16064_v61  ;;  %v11489_v61 = vld [vmem:[%s18311_s3 + $0x190] sm:$0xff]  ;;  %v18664_v30 = vld [vmem:[#allocation36_spill] sm:$0xff]  ;;  %v11570_v6 = vld [vmem:[%s18311_s3 + $0x218] sm:$0xff] }
 0x2bc   : > { %13374 = vmatprep.mubr.msk.f32.mxu0 %vm4041_vm3, %v16440_v11  ;;  %13418 = vmatpush3.msra.mxu1 %v11492_v7  ;;  %v6433_v11 = vld [vmem:[#allocation3 + $0x50] sm:$0xff] }
 0x2bd   : > { %13482 = vmatpush3.msra.mxu0 %v11532_v29  ;;  %13419 = vmatprep.subr.mxu1 %v11491_v20 }
 0x2be   : > { %13483 = vmatprep.subr.mxu0 %v11531_v33  ;;  %13311 = vmatmul.mubr.msk.f32.gmra.mxu1 %vm4041_vm3, %v16077_v1  ;;  %v11529_v1 = vld [vmem:[%s18311_s3 + $0x1d0] sm:$0xff] }
 0x2bf   : > { %13375 = vmatmul.mubr.msk.f32.gmra.mxu0 %vm4041_vm3, %v16452_v34  ;;  %13313 = vmatprep.mubr.msk.f32.mxu1 %vm4041_vm3, %v16097_v32  ;;  %v11488_v32 = vld [vmem:[%s18311_s3 + $0x188] sm:$0xff] }
 0x2c0   : > { %13377 = vmatprep.mubr.msk.f32.mxu0 %vm4041_vm3, %v16458_v38  ;;  %13420 = vmatpush3.msra.mxu1 %v11491_v20  ;;  %v6827_v34 = vld [vmem:[#allocation3 + $0x51] sm:$0xff] }
 0x2c1   : > { %13484 = vmatpush3.msra.mxu0 %v11531_v33  ;;  %13421 = vmatprep.subr.mxu1 %v11490_v3  ;;  %v6439_v33 = vld [vmem:[#allocation3 + $0x98] sm:$0xff] }
 0x2c2   : > { %13485 = vmatprep.subr.mxu0 %v11530_v41  ;;  %13314 = vmatmul.mubr.msk.f32.gmra.mxu1 %vm4041_vm3, %v16110_v50  ;;  %v11528_v50 = vld [vmem:[%s18311_s3 + $0x1c8] sm:$0xff] }
 0x2c3   : > { %13378 = vmatmul.mubr.msk.f32.gmra.mxu0 %vm4041_vm3, %v16470_v22  ;;  %13316 = vmatprep.mubr.msk.f32.mxu1 %vm4041_vm3, %v16130_v49  ;;  %v18660_v49 = vld [vmem:[#allocation18_spill] sm:$0xff] }
 0x2c4   : > { %13380 = vmatprep.mubr.msk.f32.mxu0 %vm4041_vm3, %v16476_v24  ;;  %13422 = vmatpush3.msra.mxu1 %v11490_v3  ;;  %v6434_v24 = vld [vmem:[#allocation3 + $0x60] sm:$0xff] }
 0x2c5   : > { %13486 = vmatpush3.msra.mxu0 %v11530_v41  ;;  %13423 = vmatprep.subr.mxu1 %v11489_v61  ;;  %v6833_v3 = vld [vmem:[#allocation3 + $0x99] sm:$0xff] }
 0x2c6   : > { %13487 = vmatprep.subr.mxu0 %v11529_v1  ;;  %13317 = vmatmul.mubr.msk.f32.gmra.mxu1 %vm4041_vm3, %v16143_v55  ;;  %v18661_v55 = vld [vmem:[#allocation45_spill] sm:$0xff] }
 0x2c7   : > { %13381 = vmatmul.mubr.msk.f32.gmra.mxu0 %vm4041_vm3, %v16488_v46  ;;  %13319 = vmatprep.mubr.msk.f32.mxu1 %vm4041_vm3, %v18660_v49  ;;  %v6828_v46 = vld [vmem:[#allocation3 + $0x61] sm:$0xff] }
 0x2c8   : > { %13383 = vmatprep.mubr.msk.f32.mxu0 %vm4041_vm3, %v16494_v31  ;;  %13424 = vmatpush3.msra.mxu1 %v11489_v61  ;;  %v11572_v31 = vld [vmem:[%s18311_s3 + $0x228] sm:$0xff] }
 0x2c9   : > { %13488 = vmatpush3.msra.mxu0 %v11529_v1  ;;  %13425 = vmatprep.subr.mxu1 %v11488_v32  ;;  %v6440_v1 = vld [vmem:[#allocation3 + $0xa8] sm:$0xff] }
 0x2ca   : > { %13489 = vmatprep.subr.mxu0 %v11528_v50  ;;  %13320 = vmatmul.mubr.msk.f32.gmra.mxu1 %vm4041_vm3, %v18661_v55 }
 0x2cb   : > { %13384 = vmatmul.mubr.msk.f32.gmra.mxu0 %vm4041_vm3, %v16506_v27  ;;  %13322 = vmatprep.mubr.msk.f32.mxu1 %vm4041_vm3, %v18662_v2  ;;  %v6441_v2 = vld [vmem:[#allocation3 + $0xb0] sm:$0xff] }
 0x2cc   : > { %13386 = vmatprep.mubr.msk.f32.mxu0 %vm4041_vm3, %v16512_v19  ;;  %13426 = vmatpush3.msra.mxu1 %v11488_v32  ;;  %v6834_v32 = vld [vmem:[#allocation3 + $0xa9] sm:$0xff] }
 0x2cd   : > { %13490 = vmatpush3.msra.mxu0 %v11528_v50  ;;  %13427 = vmatprep.subr.mxu1 %v11487_v5  ;;  %v11569_v50 = vld [vmem:[%s18311_s3 + $0x210] sm:$0xff] }
 0x2ce   : > { %13491 = vmatprep.subr.mxu0 %v11527_v10  ;;  %13323 = vmatmul.mubr.msk.f32.gmra.mxu1 %vm4041_vm3, %v18663_v63  ;;  %v6835_v63 = vld [vmem:[#allocation3 + $0xb1] sm:$0xff] }
 0x2cf   : > { %13387 = vmatmul.mubr.msk.f32.gmra.mxu0 %vm4041_vm3, %v16526_v37  ;;  %13325 = vmatprep.mubr.msk.f32.mxu1 %vm4041_vm3, %v16227_v42  ;;  %v16787_v42 = vld [vmem:[#allocation3 + $0x181] sm:$0xff] }
 0x2d0   : > { %13389 = vmatprep.mubr.msk.f32.mxu0 %vm4041_vm3, %v16533_v8  ;;  %13428 = vmatpush3.msra.mxu1 %v11487_v5 }
 0x2d1   : > { %13492 = vmatpush3.msra.mxu0 %v11527_v10  ;;  %13541 = vmatprep.subr.mxu1 %v11574_v52 }
 0x2d2   : > { %13326 = vmatmul.mubr.msk.f32.gmra.mxu1 %vm4041_vm3, %v18664_v30 }
 0x2d3   : > { %13390 = vmatmul.mubr.msk.f32.gmra.mxu0 %vm4041_vm3, %v16539_v39  ;;  %13328 = vmatprep.mubr.msk.f32.mxu1 %vm4041_vm3, %v16256_v35  ;;  %v16789_v35 = vld [vmem:[#allocation3 + $0x182] sm:$0xff]  ;;  %v6436_v39 = vld [vmem:[#allocation3 + $0x78] sm:$0xff] }
 0x2d4   : > { %13392 = vmatprep.mubr.msk.f32.mxu0 %vm4041_vm3, %v16545_v12  ;;  %v6830_v12 = vld [vmem:[#allocation3 + $0x79] sm:$0xff] }
 0x2d6   : > { %13329 = vmatmul.mubr.msk.f32.gmra.mxu1 %vm4041_vm3, %v16269_v45  ;;  %v16795_v45 = vld [vmem:[#allocation3 + $0x189] sm:$0xff] }
 0x2d7   : > { %13393 = vmatmul.mubr.msk.f32.gmra.mxu0 %vm4041_vm3, %v16551_v17  ;;  %13331 = vmatprep.mubr.msk.f32.mxu1 %vm4041_vm3, %v16283_v54  ;;  %v16797_v54 = vld [vmem:[#allocation3 + $0x18a] sm:$0xff] }
 0x2d8   : > { %13395 = vmatprep.mubr.msk.f32.mxu0 %vm4041_vm3, %v16557_v62  ;;  %v11571_v17 = vld [vmem:[%s18311_s3 + $0x220] sm:$0xff] }
 0x2da   : > { %13332 = vmatmul.mubr.msk.f32.gmra.mxu1 %vm4041_vm3, %v16295_v4  ;;  %v6430_v4 = vld [vmem:[#allocation3 + $0x30] sm:$0xff] }
 0x2db   : > { %13396 = vmatmul.mubr.msk.f32.gmra.mxu0 %vm4041_vm3, %v16563_v58  ;;  %13334 = vmatprep.mubr.msk.f32.mxu1 %vm4041_vm3, %v16304_v21  ;;  %v6824_v21 = vld [vmem:[#allocation3 + $0x31] sm:$0xff] }
 0x2dc   : > { %13398 = vmatprep.mubr.msk.f32.mxu0 %vm4041_vm3, %v16569_v15 }
 0x2de   : > { %13335 = vmatmul.mubr.msk.f32.gmra.mxu1 %vm4041_vm3, %v16316_v43  ;;  %v6431_v43 = vld [vmem:[#allocation3 + $0x38] sm:$0xff] }
 0x2df   : > { %13399 = vmatmul.mubr.msk.f32.gmra.mxu0 %vm4041_vm3, %v16575_v25  ;;  %13337 = vmatprep.mubr.msk.f32.mxu1 %vm4041_vm3, %v16324_v18  ;;  %v6825_v18 = vld [vmem:[#allocation3 + $0x39] sm:$0xff] }
 0x2e0   : > { %13401 = vmatprep.mubr.msk.f32.mxu0 %vm4041_vm3, %v16581_v9  ;;  %v6437_v9 = vld [vmem:[#allocation3 + $0x80] sm:$0xff] }
 0x2e2   : > { %13338 = vmatmul.mubr.msk.f32.gmra.mxu1 %vm4041_vm3, %v16336_v53  ;;  %v6432_v53 = vld [vmem:[#allocation3 + $0x48] sm:$0xff] }
 0x2e3   : > { %13402 = vmatmul.mubr.msk.f32.gmra.mxu0 %vm4041_vm3, %v16587_v57  ;;  %13340 = vmatprep.mubr.msk.f32.mxu1 %vm4041_vm3, %v16343_v28  ;;  %v6826_v28 = vld [vmem:[#allocation3 + $0x49] sm:$0xff]  ;;  %v6831_v57 = vld [vmem:[#allocation3 + $0x81] sm:$0xff] }
 0x2e4   : > { %13404 = vmatprep.mubr.msk.f32.mxu0 %vm4041_vm3, %v16593_v47 }
 0x2e6   : > { %13341 = vmatmul.mubr.msk.f32.gmra.mxu1 %vm4041_vm3, %v16354_v60  ;;  %v11573_v60 = vld [vmem:[%s18311_s3 + $0x230] sm:$0xff] }
 0x2e7   : > { %13405 = vmatmul.mubr.msk.f32.gmra.mxu0 %vm4041_vm3, %v16599_v36  ;;  %13343 = vmatprep.mubr.msk.f32.mxu1 %vm4041_vm3, %v16360_v48  ;;  %v16812_v48 = vpop.f32.mrf.mxu1 }
 0x2e8   : > { %13407 = vmatprep.mubr.msk.f32.mxu0 %vm4041_vm3, %v16605_v0  ;;  %v6438_v0 = vld [vmem:[#allocation3 + $0x90] sm:$0xff] }
 0x2ea   : > { %13344 = vmatmul.mubr.msk.f32.gmra.mxu1 %vm4041_vm3, %v16370_v44  ;;  %v16814_v44 = vpop.f32.mrf.mxu0 }
 0x2eb   : > { %13408 = vmatmul.mubr.msk.f32.gmra.mxu0 %vm4041_vm3, %v16613_v56  ;;  %13346 = vmatprep.mubr.msk.f32.mxu1 %vm4041_vm3, %v16787_v42  ;;  %v6832_v56 = vld [vmem:[#allocation3 + $0x91] sm:$0xff] }
 0x2ec   : > { %13410 = vmatprep.mubr.msk.f32.mxu0 %vm4041_vm3, %v16789_v35 }
 0x2ee   : > { %13347 = vmatmul.mubr.msk.f32.gmra.mxu1 %vm4041_vm3, %v16795_v45 }
 0x2ef   : > { %13411 = vmatmul.mubr.msk.f32.gmra.mxu0 %vm4041_vm3, %v16797_v54  ;;  %13429 = vmatprep.mubr.msk.f32.mxu1 %vm4041_vm3, %v6430_v4  ;;  %v6442_v4 = vld [vmem:[#allocation3 + $0xc0] sm:$0xff] }
 0x2f0   : > { %13493 = vmatprep.mubr.msk.f32.mxu0 %vm4041_vm3, %v6824_v21  ;;  %v6836_v21 = vld [vmem:[#allocation3 + $0xc1] sm:$0xff] }
 0x2f2   : > { %13430 = vmatmul.mubr.msk.f32.vlgmr.msra.gmra.mxu1 %vm4041_vm3, %v6431_v43  ;;  %v11568_v43 = vld [vmem:[%s18311_s3 + $0x208] sm:$0xff] }
 0x2f3   : > { %13494 = vmatmul.mubr.msk.f32.vlgmr.msra.gmra.mxu0 %vm4041_vm3, %v6825_v18  ;;  %13432 = vmatprep.mubr.msk.f32.mxu1 %vm4041_vm3, %v6432_v53  ;;  %v13050_v38 = vpop.f32.mrf.mxu1 }
 0x2f4   : > { %13496 = vmatprep.mubr.msk.f32.mxu0 %vm4041_vm3, %v6826_v28  ;;  %13542 = vmatpush3.msra.mxu1 %v11574_v52  ;;  %v13114_v22 = vpop.f32.mrf.mxu0 }
 0x2f5   : > { %13543 = vmatprep.subr.mxu1 %v11573_v60  ;;  %v16821_v40 = vadd.f32 %v13114_v22, %v13050_v38  ;;  %v4383_v13 = vpop.f32.mrf.mxu1 }
 0x2f6   : > { %13433 = vmatmul.mubr.msk.f32.gmra.mxu1 %vm4041_vm3, %v6433_v11  ;;  %v4704_v27 = vpop.f32.mrf.mxu0  ;;  %v6443_v11 = vld [vmem:[#allocation3 + $0xc8] sm:$0xff] }
 0x2f7   : > { %13497 = vmatmul.mubr.msk.f32.gmra.mxu0 %vm4041_vm3, %v6827_v34  ;;  %13435 = vmatprep.mubr.msk.f32.mxu1 %vm4041_vm3, %v6434_v24  ;;  %v16825_v19 = vadd.f32 %v4704_v27, %v4383_v13  ;;  %v13053_v37 = vpop.f32.mrf.mxu1  ;;  %v6837_v34 = vld [vmem:[#allocation3 + $0xc9] sm:$0xff]  ;;  %v6444_v24 = vld [vmem:[#allocation3 + $0xd8] sm:$0xff] }
 0x2f8   : > { %13499 = vmatprep.mubr.msk.f32.mxu0 %vm4041_vm3, %v6828_v46  ;;  %13544 = vmatpush3.msra.mxu1 %v11573_v60  ;;  %v13117_v8 = vpop.f32.mrf.mxu0  ;;  %v6838_v46 = vld [vmem:[#allocation3 + $0xd9] sm:$0xff] }
 0x2f9   : > { %13545 = vmatprep.subr.mxu1 %v11572_v31  ;;  %v16832_v62 = vadd.f32 %v13117_v8, %v13053_v37  ;;  %v4393_v58 = vpop.f32.mrf.mxu1  ;;  %v6445_v37 = vld [vmem:[#allocation3 + $0xe0] sm:$0xff] }
 0x2fa   : > { %13436 = vmatmul.mubr.msk.f32.gmra.mxu1 %vm4041_vm3, %v6435_v14  ;;  %v4714_v15 = vpop.f32.mrf.mxu0  ;;  %v6839_v8 = vld [vmem:[#allocation3 + $0xe1] sm:$0xff] }
 0x2fb   : > { %13500 = vmatmul.mubr.msk.f32.gmra.mxu0 %vm4041_vm3, %v6829_v23  ;;  %13438 = vmatprep.mubr.msk.f32.mxu1 %vm4041_vm3, %v6436_v39  ;;  %v16836_v25 = vadd.f32 %v4714_v15, %v4393_v58  ;;  %v13056_v47 = vpop.f32.mrf.mxu1  ;;  %v6840_v58 = vld [vmem:[#allocation3 + $0xf1] sm:$0xff] }
 0x2fc   : > { %13502 = vmatprep.mubr.msk.f32.mxu0 %vm4041_vm3, %v6830_v12  ;;  %13546 = vmatpush3.msra.mxu1 %v11572_v31  ;;  %v13120_v36 = vpop.f32.mrf.mxu0  ;;  %v11567_v31 = vld [vmem:[%s18311_s3 + $0x200] sm:$0xff] }
 0x2fd   : > { %13547 = vmatprep.subr.mxu1 %v11571_v17  ;;  %v16843_v51 = vadd.f32 %v13120_v36, %v13056_v47  ;;  %v4403_v7 = vpop.f32.mrf.mxu1  ;;  %v6447_v36 = vld [vmem:[#allocation3 + $0xf8] sm:$0xff] }
 0x2fe   : > { %13439 = vmatmul.mubr.msk.f32.gmra.mxu1 %vm4041_vm3, %v6437_v9  ;;  %v4724_v29 = vpop.f32.mrf.mxu0 }
 0x2ff   : > { %13503 = vmatmul.mubr.msk.f32.gmra.mxu0 %vm4041_vm3, %v6831_v57  ;;  %13441 = vmatprep.mubr.msk.f32.mxu1 %vm4041_vm3, %v6438_v0  ;;  %v16847_v20 = vadd.f32 %v4724_v29, %v4403_v7  ;;  %v13059_v41 = vpop.f32.mrf.mxu1  ;;  %v6841_v0 = vld [vmem:[#allocation3 + $0xf9] sm:$0xff]  ;;  %v6448_v7 = vld [vmem:[#allocation3 + $0x108] sm:$0xff] }
 0x300   : > { %13505 = vmatprep.mubr.msk.f32.mxu0 %vm4041_vm3, %v6832_v56  ;;  %13548 = vmatpush3.msra.mxu1 %v11571_v17  ;;  %v13123_v61 = vpop.f32.mrf.mxu0  ;;  %v6446_v17 = vld [vmem:[#allocation3 + $0xf0] sm:$0xff] }
 0x301   : > { %13549 = vmatprep.subr.mxu1 %v11570_v6  ;;  %v16854_v49 = vadd.f32 %v13123_v61, %v13059_v41  ;;  %v4413_v55 = vpop.f32.mrf.mxu1  ;;  %v6842_v29 = vld [vmem:[#allocation3 + $0x109] sm:$0xff] }
 0x302   : > { %13442 = vmatmul.mubr.msk.f32.gmra.mxu1 %vm4041_vm3, %v6439_v33  ;;  %v4734_v5 = vpop.f32.mrf.mxu0  ;;  %v6449_v61 = vld [vmem:[#allocation3 + $0x110] sm:$0xff] }
 0x303   : > { %13506 = vmatmul.mubr.msk.f32.gmra.mxu0 %vm4041_vm3, %v6833_v3  ;;  %13444 = vmatprep.mubr.msk.f32.mxu1 %vm4041_vm3, %v6440_v1  ;;  %v16858_v10 = vadd.f32 %v4734_v5, %v4413_v55  ;;  %v13062_v52 = vpop.f32.mrf.mxu1  ;;  %v6843_v1 = vld [vmem:[#allocation3 + $0x111] sm:$0xff]  ;;  %v6450_v55 = vld [vmem:[#allocation3 + $0x120] sm:$0xff] }
 0x304   : > { %13508 = vmatprep.mubr.msk.f32.mxu0 %vm4041_vm3, %v6834_v32  ;;  %13550 = vmatpush3.msra.mxu1 %v11570_v6  ;;  %v13126_v30 = vpop.f32.mrf.mxu0  ;;  %v6844_v5 = vld [vmem:[#allocation3 + $0x121] sm:$0xff] }
 0x305   : > { %13551 = vmatprep.subr.mxu1 %v11569_v50  ;;  %v16865_v18 = vadd.f32 %v13126_v30, %v13062_v52  ;;  %v4423_v53 = vpop.f32.mrf.mxu1  ;;  %v6451_v30 = vld [vmem:[#allocation3 + $0x128] sm:$0xff] }
 0x306   : > { %13445 = vmatmul.mubr.msk.f32.gmra.mxu1 %vm4041_vm3, %v6441_v2  ;;  %v4744_v28 = vpop.f32.mrf.mxu0 }
 0x307   : > { %13509 = vmatmul.mubr.msk.f32.gmra.mxu0 %vm4041_vm3, %v6835_v63  ;;  %13447 = vmatprep.mubr.msk.f32.mxu1 %vm4041_vm3, %v6442_v4  ;;  %v16869_v60 = vadd.f32 %v4744_v28, %v4423_v53  ;;  %v6845_v4 = vld [vmem:[#allocation3 + $0x129] sm:$0xff]  ;;  %v6452_v53 = vld [vmem:[#allocation3 + $0x138] sm:$0xff] }
 0x308   : > { %13511 = vmatprep.mubr.msk.f32.mxu0 %vm4041_vm3, %v6836_v21  ;;  %13552 = vmatpush3.msra.mxu1 %v11569_v50  ;;  %v13065_v38 = vpop.f32.mrf.mxu1  ;;  %v13129_v22 = vpop.f32.mrf.mxu0  ;;  %v6846_v28 = vld [vmem:[#allocation3 + $0x139] sm:$0xff] }
 0x309   : > { %13553 = vmatprep.subr.mxu1 %v11568_v43  ;;  %v16876_v13 = vadd.f32 %v13129_v22, %v13065_v38  ;;  %v6453_v22 = vld [vmem:[#allocation3 + $0x140] sm:$0xff] }
 0x30a   : > { %13448 = vmatmul.mubr.msk.f32.gmra.mxu1 %vm4041_vm3, %v6443_v11  ;;  %v4433_v27 = vpop.f32.mrf.mxu1  ;;  %v4754_v14 = vpop.f32.mrf.mxu0 }
 0x30b   : > { %13512 = vmatmul.mubr.msk.f32.gmra.mxu0 %vm4041_vm3, %v6837_v34  ;;  %13450 = vmatprep.mubr.msk.f32.mxu1 %vm4041_vm3, %v6444_v24  ;;  %v16880_v23 = vadd.f32 %v4754_v14, %v4433_v27  ;;  %v6847_v24 = vld [vmem:[#allocation3 + $0x141] sm:$0xff]  ;;  %v6454_v27 = vld [vmem:[#allocation3 + $0x150] sm:$0xff] }
 0x30c   : > { %13514 = vmatprep.mubr.msk.f32.mxu0 %vm4041_vm3, %v6838_v46  ;;  %13554 = vmatpush3.msra.mxu1 %v11568_v43  ;;  %v13068_v39 = vpop.f32.mrf.mxu1  ;;  %v6848_v14 = vld [vmem:[#allocation3 + $0x151] sm:$0xff] }
 0x30d   : > { %13555 = vmatprep.subr.mxu1 %v11567_v31  ;;  %v13132_v12 = vpop.f32.mrf.mxu0 }
 0x30e   : > { %13451 = vmatmul.mubr.msk.f32.gmra.mxu1 %vm4041_vm3, %v6445_v37  ;;  %v16884_v15 = vadd.f32 %v13132_v12, %v13068_v39  ;;  %v4443_v9 = vpop.f32.mrf.mxu1  ;;  %v6455_v12 = vld [vmem:[#allocation3 + $0x158] sm:$0xff] }
 0x30f   : > { %13515 = vmatmul.mubr.msk.f32.gmra.mxu0 %vm4041_vm3, %v6839_v8  ;;  %13453 = vmatprep.mubr.msk.f32.mxu1 %vm4041_vm3, %v6446_v17  ;;  %v4764_v57 = vpop.f32.mrf.mxu0  ;;  %v6849_v17 = vld [vmem:[#allocation3 + $0x159] sm:$0xff] }
 0x310   : > { %13517 = vmatprep.mubr.msk.f32.mxu0 %vm4041_vm3, %v6840_v58  ;;  %13556 = vmatpush3.msra.mxu1 %v11567_v31  ;;  %v16888_v47 = vadd.f32 %v4764_v57, %v4443_v9  ;;  %v6456_v57 = vld [vmem:[#allocation3 + $0x168] sm:$0xff] }
 0x311   : > { %v13071_v56 = vpop.f32.mrf.mxu1  ;;  %v13135_v6 = vpop.f32.mrf.mxu0 }
 0x312   : > { %13454 = vmatmul.mubr.msk.f32.gmra.mxu1 %vm4041_vm3, %v6447_v36  ;;  %v16892_v33 = vadd.f32 %v13135_v6, %v13071_v56  ;;  %v6850_v36 = vld [vmem:[#allocation3 + $0x169] sm:$0xff] }
 0x313   : > { %13518 = vmatmul.mubr.msk.f32.gmra.mxu0 %vm4041_vm3, %v6841_v0  ;;  %13456 = vmatprep.mubr.msk.f32.mxu1 %vm4041_vm3, %v6448_v7  ;;  %v16896_v3 = vpop.f32.mrf.mxu1  ;;  %v16898_v41 = vpop.f32.mrf.mxu0  ;;  %v6457_v7 = vld [vmem:[#allocation3 + $0x170] sm:$0xff] }
 0x314   : > { %13520 = vmatprep.mubr.msk.f32.mxu0 %vm4041_vm3, %v6842_v29  ;;  %v6851_v29 = vld [vmem:[#allocation3 + $0x171] sm:$0xff] }
 0x315   : > { %v13074_v32 = vpop.f32.mrf.mxu1 }
 0x316   : > { %v13138_v50 = vpop.f32.mrf.mxu0  ;;  %13457 = vmatmul.mubr.msk.f32.gmra.mxu1 %vm4041_vm3, %v6449_v61 }
 0x317   : > { %13521 = vmatmul.mubr.msk.f32.gmra.mxu0 %vm4041_vm3, %v6843_v1  ;;  %v16902_v2 = vadd.f32 %v13138_v50, %v13074_v32  ;;  %13459 = vmatprep.mubr.msk.f32.mxu1 %vm4041_vm3, %v6450_v55  ;;  %v16906_v63 = vpop.f32.mrf.mxu1 }
 0x318   : > { %13523 = vmatprep.mubr.msk.f32.mxu0 %vm4041_vm3, %v6844_v5  ;;  %v16908_v52 = vpop.f32.mrf.mxu0  ;;  %v6460_v5 = vld [vmem:[#allocation3 + $0x198] sm:$0xff] }
 0x31a   : > { %v13077_v21 = vpop.f32.mrf.mxu1  ;;  %13460 = vmatmul.mubr.msk.f32.gmra.mxu1 %vm4041_vm3, %v6451_v30  ;;  %v6854_v30 = vld [vmem:[#allocation3 + $0x199] sm:$0xff] }
 0x31b   : > { %v13141_v43 = vpop.f32.mrf.mxu0  ;;  %13524 = vmatmul.mubr.msk.f32.gmra.mxu0 %vm4041_vm3, %v6845_v4  ;;  %13462 = vmatprep.mubr.msk.f32.mxu1 %vm4041_vm3, %v6452_v53 }
 0x31c   : > { %v16912_v11 = vadd.f32 %v13141_v43, %v13077_v21  ;;  %13526 = vmatprep.mubr.msk.f32.mxu0 %vm4041_vm3, %v6846_v28  ;;  %v16916_v34 = vpop.f32.mrf.mxu1 }
 0x31d   : > { %v16918_v38 = vpop.f32.mrf.mxu0 }
 0x31e   : > { %v13080_v46 = vpop.f32.mrf.mxu1  ;;  %13463 = vmatmul.mubr.msk.f32.gmra.mxu1 %vm4041_vm3, %v6453_v22 }
 0x31f   : > { %v13144_v31 = vpop.f32.mrf.mxu0  ;;  %13527 = vmatmul.mubr.msk.f32.gmra.mxu0 %vm4041_vm3, %v6847_v24  ;;  %13465 = vmatprep.mubr.msk.f32.mxu1 %vm4041_vm3, %v6454_v27  ;;  %v7219_v27 = vld [vmem:[#allocation3 + $0x3a] sm:$0xff] }
 0x320   : > { %v16922_v37 = vadd.f32 %v13144_v31, %v13080_v46  ;;  %13529 = vmatprep.mubr.msk.f32.mxu0 %vm4041_vm3, %v6848_v14  ;;  %v16926_v8 = vpop.f32.mrf.mxu1 }
 0x321   : > { %18665 = vst [vmem:[#allocation12_spill] sm:$0xff] %v16926_v8  ;;  %v16928_v39 = vpop.f32.mrf.mxu0 }
 0x322   : > { %18666 = vst [vmem:[#allocation42_spill] sm:$0xff] %v16928_v39  ;;  %v13083_v58 = vpop.f32.mrf.mxu1  ;;  %13466 = vmatmul.mubr.msk.f32.gmra.mxu1 %vm4041_vm3, %v6455_v12 }
 0x323   : > { %v13147_v9 = vpop.f32.mrf.mxu0  ;;  %13530 = vmatmul.mubr.msk.f32.gmra.mxu0 %vm4041_vm3, %v6849_v17  ;;  %13468 = vmatprep.mubr.msk.f32.mxu1 %vm4041_vm3, %v6456_v57  ;;  %v7220_v17 = vld [vmem:[#allocation3 + $0x4a] sm:$0xff] }
 0x324   : > { %v16932_v0 = vadd.f32 %v13147_v9, %v13083_v58  ;;  %13532 = vmatprep.mubr.msk.f32.mxu0 %vm4041_vm3, %v6850_v36  ;;  %v16936_v56 = vpop.f32.mrf.mxu1 }
 0x325   : > { %v16938_v6 = vpop.f32.mrf.mxu0 }
 0x326   : > { %v13086_v61 = vpop.f32.mrf.mxu1  ;;  %13469 = vmatmul.mubr.msk.f32.gmra.mxu1 %vm4041_vm3, %v6457_v7  ;;  %v7221_v7 = vld [vmem:[#allocation3 + $0x52] sm:$0xff] }
 0x327   : > { %v13150_v1 = vpop.f32.mrf.mxu0  ;;  %13533 = vmatmul.mubr.msk.f32.gmra.mxu0 %vm4041_vm3, %v6851_v29  ;;  %13471 = vmatprep.mubr.msk.f32.mxu1 %vm4041_vm3, %v16607_v26  ;;  %v6461_v26 = vld [vmem:[#allocation3 + $0x1a0] sm:$0xff] }
 0x328   : > { %v16942_v32 = vadd.f32 %v13150_v1, %v13086_v61  ;;  %13535 = vmatprep.mubr.msk.f32.mxu0 %vm4041_vm3, %v16787_v42  ;;  %v16948_v50 = vpop.f32.mrf.mxu1  ;;  %v6855_v42 = vld [vmem:[#allocation3 + $0x1a1] sm:$0xff] }
 0x329   : > { %v16950_v55 = vpop.f32.mrf.mxu0  ;;  %v7222_v1 = vld [vmem:[#allocation3 + $0x62] sm:$0xff] }
 0x32a   : > { %v13089_v4 = vpop.f32.mrf.mxu1  ;;  %13472 = vmatmul.mubr.msk.f32.gmra.mxu1 %vm4041_vm3, %v16615_v16  ;;  %v7218_v16 = vld [vmem:[#allocation3 + $0x32] sm:$0xff] }
 0x32b   : > { %v13153_v21 = vpop.f32.mrf.mxu0  ;;  %13536 = vmatmul.mubr.msk.f32.gmra.mxu0 %vm4041_vm3, %v16795_v45  ;;  %13474 = vmatprep.mubr.msk.f32.mxu1 %vm4041_vm3, %v6460_v5 }
 0x32c   : > { %v16956_v43 = vadd.f32 %v13153_v21, %v13089_v4  ;;  %13538 = vmatprep.mubr.msk.f32.mxu0 %vm4041_vm3, %v6854_v30  ;;  %v16960_v53 = vpop.f32.mrf.mxu1 }
 0x32d   : > { %v16962_v28 = vpop.f32.mrf.mxu0 }
 0x32e   : > { %v13092_v22 = vpop.f32.mrf.mxu1  ;;  %13475 = vmatmul.mubr.msk.f32.gmra.mxu1 %vm4041_vm3, %v6461_v26  ;;  %v7223_v26 = vld [vmem:[#allocation3 + $0x6a] sm:$0xff] }
 0x32f   : > { %v13156_v24 = vpop.f32.mrf.mxu0  ;;  %13539 = vmatmul.mubr.msk.f32.gmra.mxu0 %vm4041_vm3, %v6855_v42  ;;  %13557 = vmatprep.mubr.msk.f32.mxu1 %vm4041_vm3, %v7218_v16 }
 0x330   : > { %v16966_v45 = vadd.f32 %v13156_v24, %v13092_v22  ;;  %v16969_v46 = vpop.f32.mrf.mxu1  ;;  %v7224_v24 = vld [vmem:[#allocation3 + $0x7a] sm:$0xff] }
 0x331   : > { %v16971_v31 = vpop.f32.mrf.mxu0 }
 0x332   : > { %v13175_v14 = vpop.f32.mrf.mxu1  ;;  %13558 = vmatmul.mubr.msk.f32.vlgmr.msra.gmra.mxu1 %vm4041_vm3, %v7219_v27 }
 0x333   : > { %v13239_v12 = vpop.f32.mrf.mxu0  ;;  %v5216_v58 = vadd.f32 %v13175_v14, %v16394_v59  ;;  %13560 = vmatprep.mubr.msk.f32.mxu1 %vm4041_vm3, %v7220_v17 }
 0x334   : > { %v16976_v9 = vpop.f32.mrf.mxu1 }
 0x335   : > { %v16978_v57 = vpop.f32.mrf.mxu0  ;;  %v16980_v36 = vadd.f32 %v13239_v12, %v5216_v58 }
 0x336   : > { %v13178_v29 = vpop.f32.mrf.mxu1  ;;  %13561 = vmatmul.mubr.msk.f32.gmra.mxu1 %vm4041_vm3, %v7221_v7  ;;  %v7226_v7 = vld [vmem:[#allocation3 + $0x92] sm:$0xff] }
 0x337   : > { %v13242_v61 = vpop.f32.mrf.mxu0  ;;  %v5218_v5 = vadd.f32 %v13178_v29, %v16821_v40  ;;  %13563 = vmatprep.mubr.msk.f32.mxu1 %vm4041_vm3, %v7222_v1 }
 0x338   : > { %v5066_v30 = vpop.f32.mrf.mxu1 }
 0x339   : > { %v16985_v59 = vpop.f32.mrf.mxu0  ;;  %v16987_v4 = vadd.f32 %v13242_v61, %v5218_v5  ;;  %v16990_v21 = vadd.f32 %v5066_v30, %v16825_v19  ;;  %v7225_v19 = vld [vmem:[#allocation3 + $0x82] sm:$0xff] }
 0x33a   : > { %18667 = vst [vmem:[#allocation41_spill] sm:$0xff] %v16985_v59  ;;  %v13181_v42 = vpop.f32.mrf.mxu1  ;;  %13564 = vmatmul.mubr.msk.f32.gmra.mxu1 %vm4041_vm3, %v7223_v26 }
 0x33b   : > { %18668 = vst [vmem:[#allocation47_spill] sm:$0xff] %v16990_v21  ;;  %v13245_v22 = vpop.f32.mrf.mxu0  ;;  %v5220_v16 = vadd.f32 %v13181_v42, %v16832_v62  ;;  %13566 = vmatprep.mubr.msk.f32.mxu1 %vm4041_vm3, %v7224_v24  ;;  %v7228_v42 = vld [vmem:[#allocation3 + $0xaa] sm:$0xff] }
 0x33c   : > { %v5076_v40 = vpop.f32.mrf.mxu1 }
 0x33d   : > { %v16995_v27 = vpop.f32.mrf.mxu0  ;;  %v16997_v14 = vadd.f32 %v13245_v22, %v5220_v16  ;;  %v17000_v12 = vadd.f32 %v5076_v40, %v16836_v25  ;;  %v7227_v25 = vld [vmem:[#allocation3 + $0x9a] sm:$0xff] }
 0x33e   : > { %v13184_v17 = vpop.f32.mrf.mxu1  ;;  %13567 = vmatmul.mubr.msk.f32.gmra.mxu1 %vm4041_vm3, %v7225_v19 }
 0x33f   : > { %v13248_v58 = vpop.f32.mrf.mxu0  ;;  %v5222_v29 = vadd.f32 %v13184_v17, %v16843_v51  ;;  %13569 = vmatprep.mubr.msk.f32.mxu1 %vm4041_vm3, %v7226_v7 }
 0x340   : > { %v5086_v62 = vpop.f32.mrf.mxu1 }
 0x341   : > { %v17005_v61 = vpop.f32.mrf.mxu0  ;;  %v17007_v1 = vadd.f32 %v13248_v58, %v5222_v29  ;;  %v17010_v5 = vadd.f32 %v5086_v62, %v16847_v20  ;;  %v7229_v20 = vld [vmem:[#allocation3 + $0xb2] sm:$0xff]  ;;  %v7230_v58 = vld [vmem:[#allocation3 + $0xc2] sm:$0xff] }
 0x342   : > { %v13187_v30 = vpop.f32.mrf.mxu1  ;;  %13570 = vmatmul.mubr.msk.f32.gmra.mxu1 %vm4041_vm3, %v7227_v25 }
 0x343   : > { %v13251_v26 = vpop.f32.mrf.mxu0  ;;  %v5224_v22 = vadd.f32 %v13187_v30, %v16854_v49  ;;  %13572 = vmatprep.mubr.msk.f32.mxu1 %vm4041_vm3, %v7228_v42  ;;  %v7232_v42 = vld [vmem:[#allocation3 + $0xda] sm:$0xff] }
 0x344   : > { %v5096_v51 = vpop.f32.mrf.mxu1 }
 0x345   : > { %v17015_v24 = vpop.f32.mrf.mxu0  ;;  %v17017_v16 = vadd.f32 %v13251_v26, %v5224_v22  ;;  %v17020_v40 = vadd.f32 %v5096_v51, %v16858_v10  ;;  %v7231_v10 = vld [vmem:[#allocation3 + $0xca] sm:$0xff] }
 0x346   : > { %v13190_v19 = vpop.f32.mrf.mxu1  ;;  %13573 = vmatmul.mubr.msk.f32.gmra.mxu1 %vm4041_vm3, %v7229_v20 }
 0x347   : > { %v13254_v17 = vpop.f32.mrf.mxu0  ;;  %v5226_v7 = vadd.f32 %v13190_v19, %v16865_v18  ;;  %13575 = vmatprep.mubr.msk.f32.mxu1 %vm4041_vm3, %v7230_v58 }
 0x348   : > { %v5106_v49 = vpop.f32.mrf.mxu1 }
 0x349   : > { %v17025_v29 = vpop.f32.mrf.mxu0  ;;  %v17027_v62 = vadd.f32 %v13254_v17, %v5226_v7  ;;  %v17030_v25 = vadd.f32 %v5106_v49, %v16869_v60  ;;  %v7233_v60 = vld [vmem:[#allocation3 + $0xe2] sm:$0xff]  ;;  %v7234_v7 = vld [vmem:[#allocation3 + $0xf2] sm:$0xff] }
 0x34a   : > { %v13193_v30 = vpop.f32.mrf.mxu1  ;;  %13576 = vmatmul.mubr.msk.f32.gmra.mxu1 %vm4041_vm3, %v7231_v10 }
 0x34b   : > { %v13257_v26 = vpop.f32.mrf.mxu0  ;;  %v5228_v22 = vadd.f32 %v13193_v30, %v16876_v13  ;;  %13578 = vmatprep.mubr.msk.f32.mxu1 %vm4041_vm3, %v7232_v42 }
 0x34c   : > { %v5116_v18 = vpop.f32.mrf.mxu1 }
 0x34d   : > { %v17035_v51 = vpop.f32.mrf.mxu0  ;;  %v17037_v20 = vadd.f32 %v13257_v26, %v5228_v22  ;;  %v17040_v19 = vadd.f32 %v5116_v18, %v16880_v23  ;;  %v7235_v23 = vld [vmem:[#allocation3 + $0xfa] sm:$0xff]  ;;  %v7236_v18 = vld [vmem:[#allocation3 + $0x10a] sm:$0xff] }
 0x34e   : > { %v13196_v17 = vpop.f32.mrf.mxu1  ;;  %13579 = vmatmul.mubr.msk.f32.gmra.mxu1 %vm4041_vm3, %v7233_v60 }
 0x34f   : > { %v13260_v58 = vpop.f32.mrf.mxu0  ;;  %v5230_v49 = vadd.f32 %v13196_v17, %v16884_v15  ;;  %13581 = vmatprep.mubr.msk.f32.mxu1 %vm4041_vm3, %v7234_v7 }
 0x350   : > { %v5126_v13 = vpop.f32.mrf.mxu1 }
 0x351   : > { %v17045_v10 = vpop.f32.mrf.mxu0  ;;  %v17047_v30 = vadd.f32 %v13260_v58, %v5230_v49  ;;  %v17050_v26 = vadd.f32 %v5126_v13, %v16888_v47  ;;  %v7237_v58 = vld [vmem:[#allocation3 + $0x112] sm:$0xff]  ;;  %v7238_v13 = vld [vmem:[#allocation3 + $0x122] sm:$0xff] }
 0x352   : > { %v13199_v42 = vpop.f32.mrf.mxu1  ;;  %13582 = vmatmul.mubr.msk.f32.gmra.mxu1 %vm4041_vm3, %v7235_v23 }
 0x353   : > { %v13263_v22 = vpop.f32.mrf.mxu0  ;;  %v5232_v60 = vadd.f32 %v13199_v42, %v16892_v33  ;;  %13584 = vmatprep.mubr.msk.f32.mxu1 %vm4041_vm3, %v7236_v18  ;;  %v7239_v18 = vld [vmem:[#allocation3 + $0x12a] sm:$0xff] }
 0x354   : > { %v17055_v15 = vpop.f32.mrf.mxu1 }
 0x355   : > { %v17057_v17 = vpop.f32.mrf.mxu0  ;;  %v17059_v7 = vadd.f32 %v13263_v22, %v5232_v60  ;;  %v7240_v60 = vld [vmem:[#allocation3 + $0x13a] sm:$0xff] }
 0x356   : > { %v13202_v49 = vpop.f32.mrf.mxu1  ;;  %13585 = vmatmul.mubr.msk.f32.gmra.mxu1 %vm4041_vm3, %v7237_v58 }
 0x357   : > { %v13266_v47 = vpop.f32.mrf.mxu0  ;;  %v5234_v59 = vadd.f32 %v13202_v49, %v16902_v2  ;;  %13587 = vmatprep.mubr.msk.f32.mxu1 %vm4041_vm3, %v7238_v13  ;;  %v7241_v13 = vld [vmem:[#allocation3 + $0x142] sm:$0xff] }
 0x358   : > { %v17064_v23 = vpop.f32.mrf.mxu1 }
 0x359   : > { %v17066_v33 = vpop.f32.mrf.mxu0  ;;  %v17068_v42 = vadd.f32 %v13266_v47, %v5234_v59  ;;  %v7242_v47 = vld [vmem:[#allocation3 + $0x152] sm:$0xff] }
 0x35a   : > { %v13205_v21 = vpop.f32.mrf.mxu1  ;;  %13588 = vmatmul.mubr.msk.f32.gmra.mxu1 %vm4041_vm3, %v7239_v18 }
 0x35b   : > { %18669 = vst [vmem:[#allocation85_spill] sm:$0xff] %v17068_v42  ;;  %v13269_v22 = vpop.f32.mrf.mxu0  ;;  %v5236_v39 = vadd.f32 %v13205_v21, %v16912_v11  ;;  %13590 = vmatprep.mubr.msk.f32.mxu1 %vm4041_vm3, %v7240_v60  ;;  %v7243_v60 = vld [vmem:[#allocation3 + $0x15a] sm:$0xff] }
 0x35c   : > { %v17073_v58 = vpop.f32.mrf.mxu1 }
 0x35d   : > { %v17075_v2 = vpop.f32.mrf.mxu0  ;;  %v17077_v49 = vadd.f32 %v13269_v22, %v5236_v39  ;;  %v7244_v22 = vld [vmem:[#allocation3 + $0x16a] sm:$0xff] }
 0x35e   : > { %18670 = vst [vmem:[#allocation93_spill] sm:$0xff] %v17075_v2  ;;  %v13208_v8 = vpop.f32.mrf.mxu1  ;;  %13591 = vmatmul.mubr.msk.f32.gmra.mxu1 %vm4041_vm3, %v7241_v13  ;;  %v4815_v13 = vadd.f32 %v16938_v6, %v16936_v56 }
 0x35f   : > { %18671 = vst [vmem:[#allocation37_spill] sm:$0xff] %v17077_v49  ;;  %v13272_v59 = vpop.f32.mrf.mxu0  ;;  %v5238_v42 = vadd.f32 %v13208_v8, %v16922_v37  ;;  %13593 = vmatprep.mubr.msk.f32.mxu1 %vm4041_vm3, %v7242_v47 }
 0x360   : > { %v17082_v18 = vpop.f32.mrf.mxu1 }
 0x361   : > { %18672 = vst [vmem:[#allocation13_spill] sm:$0xff] %v17082_v18  ;;  %v17084_v11 = vpop.f32.mrf.mxu0  ;;  %v17086_v21 = vadd.f32 %v13272_v59, %v5238_v42  ;;  %v7245_v42 = vld [vmem:[#allocation3 + $0x172] sm:$0xff] }
 0x362   : > { %18673 = vst [vmem:[#allocation15_spill] sm:$0xff] %v17084_v11  ;;  %v13211_v2 = vpop.f32.mrf.mxu1  ;;  %13594 = vmatmul.mubr.msk.f32.gmra.mxu1 %vm4041_vm3, %v7243_v60  ;;  %v4825_v60 = vadd.f32 %v16950_v55, %v16948_v50  ;;  %v4835_v50 = vadd.f32 %v16962_v28, %v16960_v53  ;;  %v4845_v53 = vadd.f32 %v16971_v31, %v16969_v46 }
 0x363   : > { %18674 = vst [vmem:[#allocation20_spill] sm:$0xff] %v17086_v21  ;;  %v13275_v39 = vpop.f32.mrf.mxu0  ;;  %v5240_v49 = vadd.f32 %v13211_v2, %v16932_v0  ;;  %13596 = vmatprep.mubr.msk.f32.mxu1 %vm4041_vm3, %v7244_v22  ;;  %v7248_v2 = vld [vmem:[#allocation3 + $0x19a] sm:$0xff] }
 0x364   : > { %v5176_v37 = vpop.f32.mrf.mxu1 }
 0x365   : > { %v5570_v8 = vpop.f32.mrf.mxu0  ;;  %v17093_v47 = vadd.f32 %v13275_v39, %v5240_v49  ;;  %v5239_v11 = vadd.f32 %v5176_v37, %v4815_v13 }
 0x366   : > { %v13214_v59 = vpop.f32.mrf.mxu1  ;;  %13597 = vmatmul.mubr.msk.f32.gmra.mxu1 %vm4041_vm3, %v7245_v42 }
 0x367   : > { %v13278_v21 = vpop.f32.mrf.mxu0  ;;  %v17098_v18 = vadd.f32 %v5570_v8, %v5239_v11  ;;  %v5242_v56 = vadd.f32 %v13214_v59, %v16942_v32  ;;  %13599 = vmatprep.mubr.msk.f32.mxu1 %vm4041_vm3, %v16789_v35  ;;  %v7249_v35 = vld [vmem:[#allocation3 + $0x1a2] sm:$0xff] }
 0x368   : > { %v5186_v0 = vpop.f32.mrf.mxu1 }
 0x369   : > { %v5580_v6 = vpop.f32.mrf.mxu0  ;;  %v17103_v49 = vadd.f32 %v13278_v21, %v5242_v56  ;;  %v5241_v39 = vadd.f32 %v5186_v0, %v4825_v60  ;;  %v4695_v21 = vadd.f32 %v16814_v44, %v16812_v48 }
 0x36a   : > { %v13217_v22 = vpop.f32.mrf.mxu1  ;;  %13600 = vmatmul.mubr.msk.f32.gmra.mxu1 %vm4041_vm3, %v16797_v54 }
 0x36b   : > { %v13281_v13 = vpop.f32.mrf.mxu0  ;;  %v17109_v55 = vadd.f32 %v5580_v6, %v5241_v39  ;;  %v5244_v32 = vadd.f32 %v13217_v22, %v16956_v43  ;;  %13602 = vmatprep.mubr.msk.f32.mxu1 %vm4041_vm3, %v7248_v2  ;;  %v5215_v43 = vadd.f32 %v16976_v9, %v4695_v21 }
 0x36c   : > { %v5196_v11 = vpop.f32.mrf.mxu1 }
 0x36d   : > { %v5590_v37 = vpop.f32.mrf.mxu0  ;;  %v17115_v8 = vadd.f32 %v13281_v13, %v5244_v32  ;;  %v5243_v42 = vadd.f32 %v5196_v11, %v4835_v50  ;;  %v5609_v39 = vadd.f32 %v16978_v57, %v5215_v43 }
 0x36e   : > { %v13220_v59 = vpop.f32.mrf.mxu1  ;;  %13603 = vmatmul.mubr.msk.f32.gmra.mxu1 %vm4041_vm3, %v7249_v35 }
 0x36f   : > { %v13284_v54 = vpop.f32.mrf.mxu0  ;;  %v17121_v28 = vadd.f32 %v5590_v37, %v5243_v42  ;;  %v5246_v60 = vadd.f32 %v13220_v59, %v16966_v45 }
 0x370   : > { %v5206_v56 = vpop.f32.mrf.mxu1 }
 0x371   : > { %v5600_v0 = vpop.f32.mrf.mxu0  ;;  %v17124_v6 = vadd.f32 %v13284_v54, %v5246_v60  ;;  %v5245_v48 = vadd.f32 %v5206_v56, %v4845_v53 }
 0x372   : > { %v13303_v44 = vpop.f32.mrf.mxu1 }
 0x373   : > { %v13367_v2 = vpop.f32.mrf.mxu0  ;;  %v17127_v22 = vadd.f32 %v5600_v0, %v5245_v48  ;;  %v6004_v13 = vadd.f32 %v13303_v44, %v16980_v36  ;;  %v5613_v36 = vadd.f32 %v16995_v27, %v17000_v12  ;;  %v5615_v48 = vadd.f32 %v17005_v61, %v17010_v5 }
 0x374   : > { %v5844_v46 = vpop.f32.mrf.mxu1 }
 0x375   : > { %v6238_v31 = vpop.f32.mrf.mxu0  ;;  %v17130_v9 = vadd.f32 %v13367_v2, %v6004_v13  ;;  %v6003_v50 = vadd.f32 %v5844_v46, %v5609_v39 }
 0x376   : > { %v13306_v32 = vpop.f32.mrf.mxu1 }
 0x377   : > { %v13370_v45 = vpop.f32.mrf.mxu0  ;;  %v17132_v35 = vadd.f32 %v6238_v31, %v6003_v50  ;;  %v6006_v11 = vadd.f32 %v13306_v32, %v16987_v4  ;;  %v5617_v31 = vadd.f32 %v17015_v24, %v17020_v40 }
 0x378   : > { %v17135_v37 = vpop.f32.mrf.mxu1 }
 0x379   : > { %v17137_v21 = vpop.f32.mrf.mxu0  ;;  %v17139_v57 = vadd.f32 %v13370_v45, %v6006_v11 }
 0x37a   : > { %v13309_v42 = vpop.f32.mrf.mxu1 }
 0x37b   : > { %v13373_v59 = vpop.f32.mrf.mxu0  ;;  %v6008_v54 = vadd.f32 %v13309_v42, %v16997_v14 }
 0x37c   : > { %v5864_v53 = vpop.f32.mrf.mxu1 }
 0x37d   : > { %v6258_v43 = vpop.f32.mrf.mxu0  ;;  %v17144_v60 = vadd.f32 %v13373_v59, %v6008_v54  ;;  %v6007_v56 = vadd.f32 %v5864_v53, %v5613_v36  ;;  %v5619_v59 = vadd.f32 %v17025_v29, %v17030_v25  ;;  %v4775_v25 = vadd.f32 %v16898_v41, %v16896_v3 }
 0x37e   : > { %v13312_v0 = vpop.f32.mrf.mxu1 }
 0x37f   : > { %v13376_v4 = vpop.f32.mrf.mxu0  ;;  %v17148_v44 = vadd.f32 %v6258_v43, %v6007_v56  ;;  %v6010_v2 = vadd.f32 %v13312_v0, %v17007_v1  ;;  %v5621_v0 = vadd.f32 %v17035_v51, %v17040_v19 }
 0x380   : > { %v5874_v39 = vpop.f32.mrf.mxu1 }
 0x381   : > { %v6268_v13 = vpop.f32.mrf.mxu0  ;;  %v17151_v46 = vadd.f32 %v13376_v4, %v6010_v2  ;;  %v6009_v27 = vadd.f32 %v5874_v39, %v5615_v48 }
 0x382   : > { %v13315_v14 = vpop.f32.mrf.mxu1 }
 0x383   : > { %v13379_v12 = vpop.f32.mrf.mxu0  ;;  %v17155_v50 = vadd.f32 %v6268_v13, %v6009_v27  ;;  %v6012_v32 = vadd.f32 %v13315_v14, %v17017_v16  ;;  %v5623_v14 = vadd.f32 %v17045_v10, %v17050_v26 }
 0x384   : > { %v5884_v45 = vpop.f32.mrf.mxu1 }
 0x385   : > { %v6278_v61 = vpop.f32.mrf.mxu0  ;;  %v17158_v5 = vadd.f32 %v13379_v12, %v6012_v32  ;;  %v6011_v11 = vadd.f32 %v5884_v45, %v5617_v31  ;;  %v5231_v12 = vadd.f32 %v17055_v15, %v4775_v25  ;;  %v4785_v32 = vadd.f32 %v16908_v52, %v16906_v63  ;;  %v18678_v25 = vld [vmem:[#allocation93_spill] sm:$0xff] }
 0x386   : > { %v13318_v1 = vpop.f32.mrf.mxu1 }
 0x387   : > { %v13382_v42 = vpop.f32.mrf.mxu0  ;;  %v17162_v36 = vadd.f32 %v6278_v61, %v6011_v11  ;;  %v6014_v54 = vadd.f32 %v13318_v1, %v17027_v62  ;;  %v5625_v11 = vadd.f32 %v17057_v17, %v5231_v12  ;;  %v5233_v10 = vadd.f32 %v17064_v23, %v4785_v32  ;;  %v18675_v23 = vld [vmem:[#allocation85_spill] sm:$0xff] }
 0x388   : > { %v5894_v53 = vpop.f32.mrf.mxu1 }
 0x389   : > { %v6288_v24 = vpop.f32.mrf.mxu0  ;;  %v17165_v40 = vadd.f32 %v13382_v42, %v6014_v54  ;;  %v6013_v43 = vadd.f32 %v5894_v53, %v5619_v59  ;;  %v4795_v42 = vadd.f32 %v16918_v38, %v16916_v34  ;;  %v5627_v53 = vadd.f32 %v17066_v33, %v5233_v10  ;;  %v18682_v10 = vld [vmem:[#allocation20_spill] sm:$0xff] }
 0x38a   : > { %v13321_v16 = vpop.f32.mrf.mxu1 }
 0x38b   : > { %v13385_v56 = vpop.f32.mrf.mxu0  ;;  %v17169_v4 = vadd.f32 %v6288_v24, %v6013_v43  ;;  %v6016_v48 = vadd.f32 %v13321_v16, %v17037_v20  ;;  %v5235_v17 = vadd.f32 %v17073_v58, %v4795_v42  ;;  %v18680_v58 = vld [vmem:[#allocation37_spill] sm:$0xff] }
 0x38c   : > { %v5904_v2 = vpop.f32.mrf.mxu1 }
 0x38d   : > { %v6298_v29 = vpop.f32.mrf.mxu0  ;;  %v17174_v62 = vadd.f32 %v13385_v56, %v6016_v48  ;;  %v6015_v39 = vadd.f32 %v5904_v2, %v5621_v0  ;;  %v18676_v56 = vld [vmem:[#allocation12_spill] sm:$0xff]  ;;  %v18677_v0 = vld [vmem:[#allocation42_spill] sm:$0xff] }
 0x38e   : > { %v13324_v13 = vpop.f32.mrf.mxu1  ;;  %v4805_v48 = vadd.f32 %v18677_v0, %v18676_v56  ;;  %v8759_v56 = vld [vmem:[#allocation6 + $0x78] sm:$0xff] }
 0x38f   : > { %v13388_v27 = vpop.f32.mrf.mxu0  ;;  %v17179_v51 = vadd.f32 %v6298_v29, %v6015_v39  ;;  %v6018_v19 = vadd.f32 %v13324_v13, %v17047_v30  ;;  %v5629_v39 = vadd.f32 %v18678_v25, %v5235_v17  ;;  %v18679_v13 = vld [vmem:[#allocation13_spill] sm:$0xff]  ;;  %v8742_v0 = vld [vmem:[#allocation6 + $0x38] sm:$0xff]  ;;  %13605 = vmatprep.subr.mxu0 %v8759_v56  ;;  %v8758_v25 = vld [vmem:[#allocation6 + $0x70] sm:$0xff] }
 0x390   : > { %v5914_v20 = vpop.f32.mrf.mxu1  ;;  %v5237_v33 = vadd.f32 %v18679_v13, %v4805_v48  ;;  %13633 = vmatprep.subr.mxu1 %v8742_v0  ;;  %13606 = vmatpush3.msra.mxu0 %v8759_v56  ;;  %v8753_v56 = vld [vmem:[#allocation6 + $0x48] sm:$0xff] }
 0x391   : > { %v6308_v31 = vpop.f32.mrf.mxu0  ;;  %v17184_v3 = vadd.f32 %v13388_v27, %v6018_v19  ;;  %v6017_v41 = vadd.f32 %v5914_v20, %v5623_v14  ;;  %13634 = vmatpush3.msra.mxu1 %v8742_v0  ;;  %13607 = vmatprep.subr.mxu0 %v8758_v25  ;;  %v8736_v0 = vld [vmem:[#allocation6 + $0x8] sm:$0xff] }
 0x392   : > { %v13327_v45 = vpop.f32.mrf.mxu1  ;;  %13608 = vmatpush3.msra.mxu0 %v8758_v25  ;;  %v8752_v25 = vld [vmem:[#allocation6 + $0x40] sm:$0xff] }
 0x393   : > { %v13391_v61 = vpop.f32.mrf.mxu0  ;;  %v17188_v26 = vadd.f32 %v6308_v31, %v6017_v41  ;;  %v6020_v15 = vadd.f32 %v13327_v45, %v17059_v7  ;;  %v18681_v45 = vld [vmem:[#allocation15_spill] sm:$0xff] }
 0x394   : > { %v5924_v1 = vpop.f32.mrf.mxu1 }
 0x395   : > { %v6318_v30 = vpop.f32.mrf.mxu0  ;;  %v17193_v59 = vadd.f32 %v13391_v61, %v6020_v15  ;;  %v6019_v63 = vadd.f32 %v5924_v1, %v5625_v11  ;;  %v5631_v61 = vadd.f32 %v18681_v45, %v5237_v33 }
 0x396   : > { %v13330_v52 = vpop.f32.mrf.mxu1 }
 0x397   : > { %v13394_v54 = vpop.f32.mrf.mxu0  ;;  %v17197_v24 = vadd.f32 %v6318_v30, %v6019_v63  ;;  %v6022_v43 = vadd.f32 %v13330_v52, %v18675_v23 }
 0x398   : > { %v5934_v16 = vpop.f32.mrf.mxu1 }
 0x399   : > { %v6328_v7 = vpop.f32.mrf.mxu0  ;;  %v17202_v2 = vadd.f32 %v13394_v54, %v6022_v43  ;;  %v6021_v34 = vadd.f32 %v5934_v16, %v5627_v53 }
 0x39a   : > { %v13333_v38 = vpop.f32.mrf.mxu1 }
 0x39b   : > { %v13397_v29 = vpop.f32.mrf.mxu0  ;;  %v17206_v27 = vadd.f32 %v6328_v7, %v6021_v34  ;;  %v6024_v14 = vadd.f32 %v13333_v38, %v18680_v58  ;;  %v8757_v58 = vld [vmem:[#allocation6 + $0x68] sm:$0xff] }
 0x39c   : > { %v5944_v12 = vpop.f32.mrf.mxu1  ;;  %13609 = vmatprep.subr.mxu0 %v8757_v58 }
 0x39d   : > { %v6338_v19 = vpop.f32.mrf.mxu0  ;;  %v17209_v20 = vadd.f32 %v13397_v29, %v6024_v14  ;;  %v6023_v31 = vadd.f32 %v5944_v12, %v5629_v39  ;;  %v8740_v14 = vld [vmem:[#allocation6 + $0x28] sm:$0xff]  ;;  %13610 = vmatpush3.msra.mxu0 %v8757_v58 }
 0x39e   : > { %v13336_v32 = vpop.f32.mrf.mxu1 }
 0x39f   : > { %v13400_v41 = vpop.f32.mrf.mxu0  ;;  %v17212_v11 = vadd.f32 %v6338_v19, %v6023_v31  ;;  %v6026_v15 = vadd.f32 %v13336_v32, %v18682_v10  ;;  %v8756_v32 = vld [vmem:[#allocation6 + $0x60] sm:$0xff] }
 0x3a0   : > { %v5954_v1 = vpop.f32.mrf.mxu1  ;;  %13611 = vmatprep.subr.mxu0 %v8756_v32 }
 0x3a1   : > { %v6348_v30 = vpop.f32.mrf.mxu0  ;;  %v17215_v42 = vadd.f32 %v13400_v41, %v6026_v15  ;;  %v6025_v63 = vadd.f32 %v5954_v1, %v5631_v61  ;;  %v8739_v41 = vld [vmem:[#allocation6 + $0x20] sm:$0xff]  ;;  %13612 = vmatpush3.msra.mxu0 %v8756_v32  ;;  %v8755_v15 = vld [vmem:[#allocation6 + $0x58] sm:$0xff] }
 0x3a2   : > { %v13339_v52 = vpop.f32.mrf.mxu1  ;;  %v8738_v1 = vld [vmem:[#allocation6 + $0x18] sm:$0xff]  ;;  %13613 = vmatprep.subr.mxu0 %v8755_v15 }
 0x3a3   : > { %v13403_v54 = vpop.f32.mrf.mxu0  ;;  %v17217_v53 = vadd.f32 %v6348_v30, %v6025_v63  ;;  %v6028_v17 = vadd.f32 %v13339_v52, %v17093_v47  ;;  %v8741_v47 = vld [vmem:[#allocation6 + $0x30] sm:$0xff]  ;;  %13614 = vmatpush3.msra.mxu0 %v8755_v15 }
 0x3a4   : > { %v5964_v23 = vpop.f32.mrf.mxu1  ;;  %13635 = vmatprep.subr.mxu1 %v8741_v47 }
 0x3a5   : > { %v6358_v43 = vpop.f32.mrf.mxu0  ;;  %v17220_v16 = vadd.f32 %v13403_v54, %v6028_v17  ;;  %v6027_v7 = vadd.f32 %v5964_v23, %v17098_v18  ;;  %13636 = vmatpush3.msra.mxu1 %v8741_v47  ;;  %v8754_v54 = vld [vmem:[#allocation6 + $0x50] sm:$0xff]  ;;  %v8735_v47 = vld [vmem:[#allocation6] sm:$0xff] }
 0x3a6   : > { %v13342_v48 = vpop.f32.mrf.mxu1  ;;  %13637 = vmatprep.subr.mxu1 %v8740_v14  ;;  %v8737_v17 = vld [vmem:[#allocation6 + $0x10] sm:$0xff]  ;;  %13615 = vmatprep.subr.mxu0 %v8754_v54 }
 0x3a7   : > { %v13406_v34 = vpop.f32.mrf.mxu0  ;;  %v17223_v38 = vadd.f32 %v6358_v43, %v6027_v7  ;;  %v6030_v29 = vadd.f32 %v13342_v48, %v17103_v49  ;;  %13638 = vmatpush3.msra.mxu1 %v8740_v14  ;;  %13616 = vmatpush3.msra.mxu0 %v8754_v54 }
 0x3a8   : > { %v5974_v39 = vpop.f32.mrf.mxu1  ;;  %13639 = vmatprep.subr.mxu1 %v8739_v41  ;;  %13617 = vmatprep.subr.mxu0 %v8753_v56 }
 0x3a9   : > { %v6368_v13 = vpop.f32.mrf.mxu0  ;;  %v17226_v33 = vadd.f32 %v13406_v34, %v6030_v29  ;;  %v6029_v18 = vadd.f32 %v5974_v39, %v17109_v55  ;;  %13640 = vmatpush3.msra.mxu1 %v8739_v41  ;;  %13618 = vmatpush3.msra.mxu0 %v8753_v56 }
 0x3aa   : > { %v13345_v12 = vpop.f32.mrf.mxu1  ;;  %13641 = vmatprep.subr.mxu1 %v8738_v1  ;;  %13619 = vmatprep.subr.mxu0 %v8752_v25 }
 0x3ab   : > { %v13409_v19 = vpop.f32.mrf.mxu0  ;;  %v17229_v49 = vadd.f32 %v6368_v13, %v6029_v18  ;;  %v6032_v31 = vadd.f32 %v13345_v12, %v17115_v8  ;;  %13642 = vmatpush3.msra.mxu1 %v8738_v1  ;;  %v8743_v13 = vld [vmem:[#allocation4 + $0x1] sm:$0xff]  ;;  %13620 = vmatpush3.msra.mxu0 %v8752_v25 }
 0x3ac   : > { %v5984_v45 = vpop.f32.mrf.mxu1  ;;  %13643 = vmatprep.subr.mxu1 %v8737_v17  ;;  %v8727_v18 = vld [vmem:[#allocation4] sm:$0xff]  ;;  %13621 = vmatprep.mubr.msk.f32.mxu0 %vm4041_vm3, %v8743_v13 }
 0x3ad   : > { %v6378_v61 = vpop.f32.mrf.mxu0  ;;  %v17232_v55 = vadd.f32 %v13409_v19, %v6032_v31  ;;  %v6031_v10 = vadd.f32 %v5984_v45, %v17121_v28  ;;  %13644 = vmatpush3.msra.mxu1 %v8737_v17  ;;  %13649 = vmatprep.mubr.msk.f32.mxu1 %vm4041_vm3, %v8727_v18 }
 0x3ae   : > { %v13348_v30 = vpop.f32.mrf.mxu1  ;;  %13645 = vmatprep.subr.mxu1 %v8736_v0 }
 0x3af   : > { %v13412_v63 = vpop.f32.mrf.mxu0  ;;  %v17235_v8 = vadd.f32 %v6378_v61, %v6031_v10  ;;  %v6034_v52 = vadd.f32 %v13348_v30, %v17124_v6  ;;  %13646 = vmatpush3.msra.mxu1 %v8736_v0 }
 0x3b0   : > { %v5994_v23 = vpop.f32.mrf.mxu1  ;;  %13647 = vmatprep.subr.mxu1 %v8735_v47 }
 0x3b1   : > { %v6388_v43 = vpop.f32.mrf.mxu0  ;;  %v17238_v28 = vadd.f32 %v13412_v63, %v6034_v52  ;;  %v6033_v7 = vadd.f32 %v5994_v23, %v17127_v22  ;;  %13648 = vmatpush3.msra.mxu1 %v8735_v47 }
 0x3b2   : > { %v13431_v48 = vpop.f32.mrf.mxu1 }
 0x3b3   : > { %v17241_v34 = vpop.f32.mrf.mxu0  ;;  %v17243_v6 = vadd.f32 %v6388_v43, %v6033_v7  ;;  %v17246_v29 = vadd.f32 %v13431_v48, %v17130_v9 }
 0x3b4   : > { %v6633_v39 = vpop.f32.mrf.mxu1 }
 0x3b5   : > { %v17248_v22 = vpop.f32.mrf.mxu0  ;;  %v17251_v58 = vadd.f32 %v6633_v39, %v17132_v35 }
 0x3b6   : > { %v13434_v14 = vpop.f32.mrf.mxu1 }
 0x3b7   : > { %v17254_v9 = vpop.f32.mrf.mxu0  ;;  %v17258_v12 = vadd.f32 %v13434_v14, %v17139_v57 }
 0x3b8   : > { %v17260_v19 = vpop.f32.mrf.mxu1 }
 0x3b9   : > { %v17262_v31 = vpop.f32.mrf.mxu0 }
 0x3ba   : > { %v13437_v32 = vpop.f32.mrf.mxu1 }
 0x3bb   : > { %v17264_v41 = vpop.f32.mrf.mxu0  ;;  %v17267_v35 = vadd.f32 %v13437_v32, %v17144_v60 }
 0x3bc   : > { %v6653_v45 = vpop.f32.mrf.mxu1 }
 0x3bd   : > { %v17269_v61 = vpop.f32.mrf.mxu0  ;;  %v17272_v10 = vadd.f32 %v6653_v45, %v17148_v44 }
 0x3be   : > { %v13440_v15 = vpop.f32.mrf.mxu1 }
 0x3bf   : > { %v17274_v1 = vpop.f32.mrf.mxu0  ;;  %v17277_v57 = vadd.f32 %v13440_v15, %v17151_v46 }
 0x3c0   : > { %v6663_v30 = vpop.f32.mrf.mxu1 }
 0x3c1   : > { %v17279_v63 = vpop.f32.mrf.mxu0  ;;  %v17282_v52 = vadd.f32 %v6663_v30, %v17155_v50 }
 0x3c2   : > { %v13443_v60 = vpop.f32.mrf.mxu1 }
 0x3c3   : > { %v17284_v54 = vpop.f32.mrf.mxu0  ;;  %v17287_v17 = vadd.f32 %v13443_v60, %v17158_v5 }
 0x3c4   : > { %v6673_v44 = vpop.f32.mrf.mxu1 }
 0x3c5   : > { %v17289_v23 = vpop.f32.mrf.mxu0  ;;  %v17292_v43 = vadd.f32 %v6673_v44, %v17162_v36 }
 0x3c6   : > { %v13446_v46 = vpop.f32.mrf.mxu1 }
 0x3c7   : > { %v17294_v7 = vpop.f32.mrf.mxu0  ;;  %v17297_v56 = vadd.f32 %v13446_v46, %v17165_v40 }
 0x3c8   : > { %v6683_v50 = vpop.f32.mrf.mxu1 }
 0x3c9   : > { %v17299_v0 = vpop.f32.mrf.mxu0  ;;  %v17302_v48 = vadd.f32 %v6683_v50, %v17169_v4 }
 0x3ca   : > { %v13449_v5 = vpop.f32.mrf.mxu1 }
 0x3cb   : > { %v17304_v25 = vpop.f32.mrf.mxu0  ;;  %v17307_v47 = vadd.f32 %v13449_v5, %v17174_v62 }
 0x3cc   : > { %v6693_v36 = vpop.f32.mrf.mxu1 }
 0x3cd   : > { %v17309_v39 = vpop.f32.mrf.mxu0  ;;  %v17312_v13 = vadd.f32 %v6693_v36, %v17179_v51 }
 0x3ce   : > { %v13452_v40 = vpop.f32.mrf.mxu1 }
 0x3cf   : > { %v17314_v18 = vpop.f32.mrf.mxu0  ;;  %v17317_v14 = vadd.f32 %v13452_v40, %v17184_v3 }
 0x3d0   : > { %v6703_v4 = vpop.f32.mrf.mxu1 }
 0x3d1   : > { %v17319_v32 = vpop.f32.mrf.mxu0  ;;  %v17322_v45 = vadd.f32 %v6703_v4, %v17188_v26 }
 0x3d2   : > { %v13455_v62 = vpop.f32.mrf.mxu1 }
 0x3d3   : > { %v17324_v15 = vpop.f32.mrf.mxu0  ;;  %v17327_v30 = vadd.f32 %v13455_v62, %v17193_v59 }
 0x3d4   : > { %v6713_v51 = vpop.f32.mrf.mxu1 }
 0x3d5   : > { %v17329_v60 = vpop.f32.mrf.mxu0  ;;  %v17332_v44 = vadd.f32 %v6713_v51, %v17197_v24 }
 0x3d6   : > { %v13458_v3 = vpop.f32.mrf.mxu1 }
 0x3d7   : > { %v17335_v46 = vadd.f32 %v13458_v3, %v17202_v2  ;;  %v17337_v50 = vpop.f32.mrf.mxu0 }
 0x3d8   : > { %v6723_v26 = vpop.f32.mrf.mxu1 }
 0x3d9   : > { %v17340_v5 = vadd.f32 %v6723_v26, %v17206_v27  ;;  %v17342_v40 = vpop.f32.mrf.mxu0 }
 0x3da   : > { %v13461_v36 = vpop.f32.mrf.mxu1 }
 0x3db   : > { %18683 = vst [vmem:[#allocation49_spill] sm:$0xff] %v17340_v5  ;;  %v17345_v59 = vadd.f32 %v13461_v36, %v17209_v20  ;;  %v17350_v51 = vpop.f32.mrf.mxu0 }
 0x3dc   : > { %v6733_v4 = vpop.f32.mrf.mxu1 }
 0x3dd   : > { %v17348_v24 = vadd.f32 %v6733_v4, %v17212_v11  ;;  %v17358_v5 = vpop.f32.mrf.mxu0 }
 0x3de   : > { %v13464_v62 = vpop.f32.mrf.mxu1  ;;  %18687 = vst [vmem:[#allocation43_spill] sm:$0xff] %v17358_v5 }
 0x3df   : > { %18684 = vst [vmem:[#allocation86_spill] sm:$0xff] %v17348_v24  ;;  %v17353_v2 = vadd.f32 %v13464_v62, %v17215_v42  ;;  %v17366_v24 = vpop.f32.mrf.mxu0 }
 0x3e0   : > { %v6743_v3 = vpop.f32.mrf.mxu1 }
 0x3e1   : > { %18685 = vst [vmem:[#allocation96_spill] sm:$0xff] %v17353_v2  ;;  %v17356_v27 = vadd.f32 %v6743_v3, %v17217_v53  ;;  %v17371_v2 = vld [vmem:[#allocation6 + $0xb8] sm:$0xff] }
 0x3e2   : > { %v13467_v26 = vpop.f32.mrf.mxu1  ;;  %18691 = vst [vmem:[#allocation34_spill] sm:$0xff] %v17371_v2  ;;  %v17373_v53 = vld [vmem:[#allocation6 + $0xf8] sm:$0xff]  ;;  %13661 = vmatprep.subr.mxu0 %v17371_v2 }
 0x3e3   : > { %18686 = vst [vmem:[#allocation31_spill] sm:$0xff] %v17356_v27  ;;  %v17361_v20 = vadd.f32 %v13467_v26, %v17220_v16  ;;  %18692 = vst [vmem:[#allocation14_spill] sm:$0xff] %v17373_v53  ;;  %v18693_v3 = vld [vmem:[#allocation47_spill] sm:$0xff]  ;;  %v18694_v27 = vld [vmem:[#allocation41_spill] sm:$0xff]  ;;  %13689 = vmatprep.subr.mxu1 %v17373_v53 }
 0x3e4   : > { %v6753_v36 = vpop.f32.mrf.mxu1  ;;  %v5611_v5 = vadd.f32 %v18694_v27, %v18693_v3 }
 0x3e5   : > { %18688 = vst [vmem:[#allocation51_spill] sm:$0xff] %v17361_v20  ;;  %v17364_v11 = vadd.f32 %v6753_v36, %v17223_v38  ;;  %v18369_v20 = vlaneseq }
 0x3e6   : > { %v13470_v4 = vpop.f32.mrf.mxu1  ;;  %v6005_v26 = vadd.f32 %v17135_v37, %v5611_v5 }
 0x3e7   : > { %18689 = vst [vmem:[#allocation87_spill] sm:$0xff] %v17364_v11  ;;  %v17369_v42 = vadd.f32 %v13470_v4, %v17226_v33  ;;  %v17383_v33 = vpop.f32.mrf.mxu0  ;;  %v17396_v2 = vshrl.u32 %v18369_v20, 7 }
 0x3e8   : > { %v6763_v62 = vpop.f32.mrf.mxu1 }
 0x3e9   : > { %18690 = vst [vmem:[#allocation99_spill] sm:$0xff] %v17369_v42  ;;  %v17378_v16 = vadd.f32 %v6763_v62, %v17229_v49  ;;  %v14024_v42 = vmov 1983009808   ;;  %v6399_v62 = vadd.f32 %v17137_v21, %v6005_v26  ;;  %v13531_v3 = vpop.f32.mrf.mxu0  ;;  %18695 = vst [vmem:[#allocation16_spill] sm:$0xff] %v17396_v2  ;;  %v7186_v21 = vadd.f32 %v17248_v22, %v17251_v58 }
 0x3ea   : > { %v13473_v38 = vpop.f32.mrf.mxu1  ;;  %v7717_v11 = vunpack.c.l.s4 %v14024_v42  ;;  %v7191_v22 = vadd.f32 %v17264_v41, %v17267_v35  ;;  %v7190_v58 = vadd.f32 %v17269_v61, %v17272_v10  ;;  %v17441_v10 = vadd.f32 %v17294_v7, %v17297_v56 }
 0x3eb   : > { %v17386_v36 = vadd.f32 %v13473_v38, %v17232_v55  ;;  %v7187_v55 = vadd.f32 %v17241_v34, %v17246_v29  ;;  %v6794_v42 = vadd.f32 %v17260_v19, %v6399_v62  ;;  %v7147_v26 = vpop.f32.mrf.mxu0  ;;  %v7189_v34 = vadd.f32 %v17254_v9, %v17258_v12 }
 0x3ec   : > { %v6773_v4 = vpop.f32.mrf.mxu1  ;;  %v7718_v5 = vunpack.c.0.s8 %v7717_v11  ;;  %v17409_v11 = vld [vmem:[%s18312_s4] ss:$0 sm:$0xff]  ;;  %v17418_v19 = vsub.s32 0, %v17396_v2  ;;  %v7193_v62 = vadd.f32 %v17274_v1, %v17277_v57  ;;  %v17432_v12 = vadd.f32 %v17284_v54, %v17287_v17 }
 0x3ed   : > { %v17389_v27 = vadd.f32 %v6773_v4, %v17235_v8  ;;  %v13534_v41 = vpop.f32.mrf.mxu0  ;;  %v17445_v1 = vadd.f32 %v17299_v0, %v17302_v48  ;;  %v17449_v57 = vadd.f32 %v17304_v25, %v17307_v47  ;;  %v17457_v54 = vadd.f32 %v17314_v18, %v17317_v14 }
 0x3ee   : > { %v13476_v49 = vpop.f32.mrf.mxu1  ;;  %v17463_v7 = vadd.f32 %v17319_v32, %v17322_v45  ;;  %v17467_v56 = vadd.f32 %v17324_v15, %v17327_v30  ;;  %v17471_v0 = vadd.f32 %v17329_v60, %v17332_v44  ;;  %v17475_v48 = vadd.f32 %v17337_v50, %v17335_v46  ;;  %v18696_v32 = vld [vmem:[#allocation49_spill] sm:$0xff]  ;;  %v18697_v30 = vld [vmem:[#allocation86_spill] sm:$0xff]  ;;  %v18698_v60 = vld [vmem:[#allocation43_spill] sm:$0xff] }
 0x3ef   : > { %v17393_v53 = vadd.f32 %v13476_v49, %v17238_v28  ;;  %v17412_v49 = vsub.s32 %v7718_v5, %v17396_v2  ;;  %v7157_v47 = vpop.f32.mrf.mxu0  ;;  %v17480_v45 = vadd.f32 %v17342_v40, %v18696_v32  ;;  %v17484_v15 = vadd.f32 %v17350_v51, %v17345_v59  ;;  %v18699_v46 = vld [vmem:[#allocation96_spill] sm:$0xff]  ;;  %v18702_v51 = vld [vmem:[#allocation87_spill] sm:$0xff] }
 0x3f0   : > { %v6783_v37 = vpop.f32.mrf.mxu1  ;;  %v17488_v44 = vadd.f32 %v18698_v60, %v18697_v30  ;;  %v17492_v50 = vadd.f32 %v17366_v24, %v18699_v46  ;;  %v18703_v24 = vld [vmem:[#allocation99_spill] sm:$0xff] }
 0x3f1   : > { %v17402_v8 = vadd.f32 %v6783_v37, %v17243_v6  ;;  %v7188_v6 = vadd.f32 %v17262_v31, %v6794_v42  ;;  %v17428_v37 = vadd.f32 %v17279_v63, %v17282_v52  ;;  %v17436_v31 = vadd.f32 %v17289_v23, %v17292_v43 }
 0x3f2   : > { %v13559_v38 = vpop.f32.mrf.mxu1  ;;  %v17453_v63 = vadd.f32 %v17309_v39, %v17312_v13 }
 0x3f3   : > { %v7581_v28 = vadd.f32 %v13559_v38, %v7187_v55 }
 0x3f4   : > { %v7421_v4 = vpop.f32.mrf.mxu1 }
 0x3f5   : > { %v7580_v29 = vadd.f32 %v7421_v4, %v7186_v21  ;;  %v7620_v35 = vadd.f32 %v17409_v11, %v7581_v28  ;;  %v18700_v28 = vld [vmem:[#allocation31_spill] sm:$0xff] }
 0x3f6   : > { %v13562_v9 = vpop.f32.mrf.mxu1  ;;  %v17496_v40 = vadd.f32 %v17383_v33, %v18700_v28  ;;  %v18701_v4 = vld [vmem:[#allocation51_spill] sm:$0xff]  ;;  %v17510_v33 = vadd.f32 %v7157_v47, %v17378_v16 }
 0x3f7   : > { %v7583_v61 = vadd.f32 %v13562_v9, %v7189_v34  ;;  %v7619_v17 = vadd.f32 %v17409_v11, %v7580_v29  ;;  %v7652_v39 = vmax.f32 %v7620_v35, 0.0  ;;  %v17499_v59 = vadd.f32 %v13531_v3, %v18701_v4  ;;  %v13537_v9 = vpop.f32.mrf.mxu0 }
 0x3f8   : > { %v7431_v52 = vpop.f32.mrf.mxu1  ;;  %v17502_v34 = vadd.f32 %v7147_v26, %v18702_v51  ;;  %v17513_v3 = vadd.f32 %v13537_v9, %v17386_v36 }
 0x3f9   : > { %v7622_v23 = vadd.f32 %v17409_v11, %v7583_v61  ;;  %v7582_v43 = vadd.f32 %v7431_v52, %v7188_v6  ;;  %v7651_v55 = vmax.f32 %v7619_v17, 0.0 }
 0x3fa   : > { %v13565_v25 = vpop.f32.mrf.mxu1 }
 0x3fb   : > { %v7654_v13 = vmax.f32 %v7622_v23, 0.0  ;;  %v7621_v18 = vadd.f32 %v17409_v11, %v7582_v43  ;;  %v7585_v14 = vadd.f32 %v13565_v25, %v7191_v22  ;;  %v17506_v22 = vadd.f32 %v13534_v41, %v18703_v24 }
 0x3fc   : > { %v7441_v5 = vpop.f32.mrf.mxu1 }
 0x3fd   : > { %v7684_v42 = vmax.f32 %v7652_v39, %v7654_v13  ;;  %v7653_v38 = vmax.f32 %v7621_v18, 0.0  ;;  %v7584_v21 = vadd.f32 %v7441_v5, %v7190_v58  ;;  %v7624_v6 = vadd.f32 %v17409_v11, %v7585_v14 }
 0x3fe   : > { %v13568_v29 = vpop.f32.mrf.mxu1 }
 0x3ff   : > { %v7732_v35 = vcombine.high %v7684_v42, %v7684_v42  ;;  %v7739_v58 = vrot.slane %v7684_v42, %v17412_v49  ;;  %v7683_v61 = vmax.f32 %v7651_v55, %v7653_v38  ;;  %v17516_v26 = vadd.f32 %v17409_v11, %v7584_v21 }
 0x400   : > { %v7587_v52 = vadd.f32 %v13568_v29, %v7193_v62  ;;  %v7451_v17 = vpop.f32.mrf.mxu1  ;;  %v7656_v13 = vmax.f32 %v7624_v6, 0.0 }
 0x401   : > { %v7746_v23 = vrot.slane %v7732_v35, %v17412_v49  ;;  %v7747_v41 = vcombine.high %v7739_v58, %v7739_v58  ;;  %v11612_v43 = vrot.slane %v7739_v58, 9  ;;  %v7715_v25 = vcombine.high %v7683_v61, %v7683_v61 }
 0x402   : > { %v7722_v39 = vrot.slane %v7683_v61, %v17412_v49  ;;  %v7655_v16 = vmax.f32 %v17516_v26, 0.0  ;;  %v7626_v36 = vadd.f32 %v17409_v11, %v7587_v52  ;;  %v13571_v47 = vpop.f32.mrf.mxu1  ;;  %v7586_v28 = vadd.f32 %v7451_v17, %v17428_v37 }
 0x403   : > { %v7748_v18 = vcombine.high %v7746_v23, %v7746_v23  ;;  %v11613_v14 = vrot.slane %v7747_v41, 9  ;;  %v11614_v32 = vrot.slane %v7746_v23, 9  ;;  %v8247_v62 = vmax.f32 %v7739_v58, %v11612_v43 }
 0x404   : > { %v7729_v30 = vrot.slane %v7715_v25, %v17412_v49  ;;  %v7730_v60 = vcombine.high %v7722_v39, %v7722_v39  ;;  %v11608_v46 = vrot.slane %v7722_v39, 9  ;;  %v7658_v5 = vmax.f32 %v7626_v36, 0.0  ;;  %v7461_v55 = vpop.f32.mrf.mxu1 }
 0x405   : > { %v11615_v42 = vrot.slane %v7748_v18, 9  ;;  %v8248_v38 = vmax.f32 %v7747_v41, %v11613_v14  ;;  %v8249_v21 = vmax.f32 %v7746_v23, %v11614_v32  ;;  %v8410_v35 = vrot.slane %v8247_v62, %v17418_v19 }
 0x406   : > { %v7731_v4 = vcombine.high %v7729_v30, %v7729_v30  ;;  %v11609_v51 = vrot.slane %v7730_v60, 9  ;;  %v11610_v6 = vrot.slane %v7729_v30, 9  ;;  %v8243_v29 = vmax.f32 %v7722_v39, %v11608_v46  ;;  %v13574_v24 = vpop.f32.mrf.mxu1 }
 0x407   : > { %v8250_v9 = vmax.f32 %v7748_v18, %v11615_v42  ;;  %v8414_v58 = vrot.slane %v8248_v38, %v17418_v19  ;;  %v7686_v61 = vmax.f32 %v7656_v13, %v7658_v5  ;;  %v8418_v26 = vrot.slane %v8249_v21, %v17418_v19 }
 0x408   : > { %v11611_v52 = vrot.slane %v7731_v4, 9  ;;  %v8244_v23 = vmax.f32 %v7730_v60, %v11609_v51  ;;  %v8245_v41 = vmax.f32 %v7729_v30, %v11610_v6  ;;  %v7471_v43 = vpop.f32.mrf.mxu1  ;;  %v8394_v37 = vrot.slane %v8243_v29, %v17418_v19 }
 0x409   : > { %v7766_v17 = vcombine.high %v7686_v61, %v7686_v61  ;;  %v7773_v25 = vrot.slane %v7686_v61, %v17412_v49  ;;  %v7625_v39 = vadd.f32 %v17409_v11, %v7586_v28  ;;  %v7589_v13 = vadd.f32 %v13571_v47, %v17432_v12 }
 0x40a   : > { %v8246_v36 = vmax.f32 %v7731_v4, %v11611_v52  ;;  %v8398_v18 = vrot.slane %v8244_v23, %v17418_v19  ;;  %v8402_v14 = vrot.slane %v8245_v41, %v17418_v19  ;;  %v13577_v32 = vpop.f32.mrf.mxu1  ;;  %v8422_v5 = vrot.slane %v8250_v9, %v17418_v19 }
 0x40b   : > { %v7780_v62 = vrot.slane %v7766_v17, %v17412_v49  ;;  %v7781_v60 = vcombine.high %v7773_v25, %v7773_v25  ;;  %v11620_v30 = vrot.slane %v7773_v25, 9  ;;  %v7657_v46 = vmax.f32 %v7625_v39, 0.0 }
 0x40c   : > { %v8406_v42 = vrot.slane %v8246_v36, %v17418_v19  ;;  %v8648_v38 = vsel %vm8647_vm5, %v8398_v18, %v8394_v37  ;;  %v7628_v21 = vadd.f32 %v17409_v11, %v7589_v13  ;;  %v7481_v28 = vpop.f32.mrf.mxu1  ;;  %v7588_v52 = vadd.f32 %v7461_v55, %v17436_v31 }
 0x40d   : > { %v8650_v4 = vsel %vm8649_vm6, %v8402_v14, %v8648_v38  ;;  %v7782_v51 = vcombine.high %v7780_v62, %v7780_v62  ;;  %v11621_v6 = vrot.slane %v7781_v60, 9  ;;  %v11622_v12 = vrot.slane %v7780_v62, 9 }
 0x40e   : > { %v8652_v47 = vsel %vm8651_vm7, %v8406_v42, %v8650_v4  ;;  %v17540_v29 = vmax.f32 %v7773_v25, %v11620_v30  ;;  %v7685_v61 = vmax.f32 %v7655_v16, %v7657_v46  ;;  %v13580_v9 = vpop.f32.mrf.mxu1  ;;  %v7660_v14 = vmax.f32 %v7628_v21, 0.0 }
 0x40f   : > { %v8654_v23 = vsel %vm8653_vm8, %v8410_v35, %v8652_v47  ;;  %v11623_v41 = vrot.slane %v7782_v51, 9  ;;  %v17544_v37 = vmax.f32 %v7781_v60, %v11621_v6  ;;  %v17546_v17 = vmax.f32 %v7780_v62, %v11622_v12 }
 0x410   : > { %v8656_v39 = vsel %vm8655_vm9, %v8414_v58, %v8654_v23  ;;  %v7749_v36 = vcombine.high %v7685_v61, %v7685_v61  ;;  %v7756_v18 = vrot.slane %v7685_v61, %v17412_v49  ;;  %v8442_v31 = vrot.slane %v17540_v29, %v17418_v19  ;;  %v7491_v55 = vpop.f32.mrf.mxu1 }
 0x411   : > { %v8658_v25 = vsel %vm8657_vm10, %v8418_v26, %v8656_v39  ;;  %v17551_v13 = vmax.f32 %v7782_v51, %v11623_v41  ;;  %v8446_v16 = vrot.slane %v17544_v37, %v17418_v19  ;;  %v8450_v26 = vrot.slane %v17546_v17, %v17418_v19  ;;  %v9185_v37 = vld [vmem:[#allocation6 + $0xe0] sm:$0xff] }
 0x412   : > { %v8660_v35 = vsel %vm8659_vm11, %v8422_v5, %v8658_v25  ;;  %v7763_v62 = vrot.slane %v7749_v36, %v17412_v49  ;;  %v7764_v58 = vcombine.high %v7756_v18, %v7756_v18  ;;  %v11616_v60 = vrot.slane %v7756_v18, 9  ;;  %v17568_v29 = vpop.f32.mrf.mxu1 }
 0x413   : > { %8719 = vst.msk [vmem:[#allocation4 + $0x11] sm:$0xff] %vm4041_vm3, %v8660_v35  ;;  %v7627_v30 = vadd.f32 %v17409_v11, %v7588_v52  ;;  %v7591_v46 = vadd.f32 %v13574_v24, %v17441_v10  ;;  %v7590_v42 = vadd.f32 %v7471_v43, %v17445_v1  ;;  %v7593_v47 = vadd.f32 %v13577_v32, %v17449_v57 }
 0x414   : > { %v7765_v38 = vcombine.high %v7763_v62, %v7763_v62  ;;  %v11617_v21 = vrot.slane %v7764_v58, 9  ;;  %v11618_v4 = vrot.slane %v7763_v62, 9  ;;  %v8251_v51 = vmax.f32 %v7756_v18, %v11616_v60 }
 0x415   : > { %v7659_v5 = vmax.f32 %v7627_v30, 0.0  ;;  %v7630_v6 = vadd.f32 %v17409_v11, %v7591_v46  ;;  %v7629_v12 = vadd.f32 %v17409_v11, %v7590_v42  ;;  %v17572_v43 = vadd.f32 %v17409_v11, %v7593_v47  ;;  %v9032_v47 = vld [vmem:[#allocation6 + $0xa8] sm:$0xff] }
 0x416   : > { %v11619_v61 = vrot.slane %v7765_v38, 9  ;;  %v8252_v23 = vmax.f32 %v7764_v58, %v11617_v21  ;;  %v8253_v52 = vmax.f32 %v7763_v62, %v11618_v4  ;;  %v8426_v10 = vrot.slane %v8251_v51, %v17418_v19  ;;  %v17581_v58 = vpop.f32.mrf.mxu1  ;;  %v9187_v21 = vld [vmem:[#allocation6 + $0xf0] sm:$0xff] }
 0x417   : > { %v7662_v24 = vmax.f32 %v7630_v6, 0.0  ;;  %v7661_v1 = vmax.f32 %v7629_v12, 0.0  ;;  %v7592_v41 = vadd.f32 %v7481_v28, %v17453_v63  ;;  %v7595_v57 = vadd.f32 %v13580_v9, %v17457_v54  ;;  %v18704_v12 = vld [vmem:[#allocation34_spill] sm:$0xff] }
 0x418   : > { %v8254_v39 = vmax.f32 %v7765_v38, %v11619_v61  ;;  %v8430_v36 = vrot.slane %v8252_v23, %v17418_v19  ;;  %v8434_v18 = vrot.slane %v8253_v52, %v17418_v19  ;;  %v8454_v32 = vrot.slane %v17551_v13, %v17418_v19 }
 0x419   : > { %v7688_v25 = vmax.f32 %v7660_v14, %v7662_v24  ;;  %v7687_v35 = vmax.f32 %v7659_v5, %v7661_v1  ;;  %v7664_v62 = vmax.f32 %v17572_v43, 0.0  ;;  %v17586_v28 = vadd.f32 %v17409_v11, %v7592_v41  ;;  %v9033_v14 = vld [vmem:[#allocation6 + $0xb0] sm:$0xff]  ;;  %v17608_v24 = vpop.f32.mrf.mxu1  ;;  %v9186_v41 = vld [vmem:[#allocation6 + $0xe8] sm:$0xff] }
 0x41a   : > { %v8438_v60 = vrot.slane %v8254_v39, %v17418_v19  ;;  %v8661_v63 = vsel %vm8647_vm5, %v8430_v36, %v8426_v10  ;;  %v17589_v30 = vadd.f32 %v17409_v11, %v7595_v57  ;;  %v17591_v54 = vld [vmem:[#allocation4 + $0x11] sm:$0xff]  ;;  %v7594_v6 = vadd.f32 %v7491_v55, %v17463_v7 }
 0x41b   : > { %v17593_v9 = vld [vmem:[#allocation4 + $0x10] sm:$0xff]  ;;  %v8662_v13 = vsel %vm8649_vm6, %v8434_v18, %v8661_v63  ;;  %v7800_v46 = vcombine.high %v7688_v25, %v7688_v25  ;;  %v7807_v42 = vrot.slane %v7688_v25, %v17412_v49  ;;  %v7783_v38 = vcombine.high %v7687_v35, %v7687_v35  ;;  %13622 = vmatmul.mubr.msk.f32.vlgmr.msra.gmra.mxu0 %vm4041_vm3, %v17591_v54 }
 0x41c   : > { %v8663_v4 = vsel %vm8651_vm7, %v8438_v60, %v8662_v13  ;;  %v7790_v51 = vrot.slane %v7687_v35, %v17412_v49  ;;  %v7666_v5 = vmax.f32 %v17589_v30, 0.0  ;;  %13650 = vmatmul.mubr.msk.f32.vlgmr.msra.gmra.mxu1 %vm4041_vm3, %v17593_v9  ;;  %13662 = vmatpush3.msra.mxu0 %v18704_v12  ;;  %v18705_v1 = vld [vmem:[#allocation14_spill] sm:$0xff]  ;;  %v9184_v12 = vld [vmem:[#allocation6 + $0xd8] sm:$0xff] }
 0x41d   : > { %v8664_v61 = vsel %vm8653_vm8, %v8442_v31, %v8663_v4  ;;  %v7814_v23 = vrot.slane %v7800_v46, %v17412_v49  ;;  %v7815_v52 = vcombine.high %v7807_v42, %v7807_v42  ;;  %v11628_v10 = vrot.slane %v7807_v42, 9  ;;  %13690 = vmatpush3.msra.mxu1 %v18705_v1  ;;  %13663 = vmatprep.subr.mxu0 %v9033_v14  ;;  %v9031_v31 = vld [vmem:[#allocation6 + $0xa0] sm:$0xff]  ;;  %v17624_v46 = vpop.f32.mrf.mxu1 }
 0x41e   : > { %v8665_v7 = vsel %vm8655_vm9, %v8446_v16, %v8664_v61  ;;  %v7797_v55 = vrot.slane %v7783_v38, %v17412_v49  ;;  %v7798_v39 = vcombine.high %v7790_v51, %v7790_v51  ;;  %v11624_v36 = vrot.slane %v7790_v51, 9  ;;  %13691 = vmatprep.subr.mxu1 %v9187_v21  ;;  %13664 = vmatpush3.msra.mxu0 %v9033_v14  ;;  %v9030_v38 = vld [vmem:[#allocation6 + $0x98] sm:$0xff] }
 0x41f   : > { %v8666_v18 = vsel %vm8657_vm10, %v8450_v26, %v8665_v7  ;;  %v7816_v57 = vcombine.high %v7814_v23, %v7814_v23  ;;  %v11629_v25 = vrot.slane %v7815_v52, 9  ;;  %v11630_v35 = vrot.slane %v7814_v23, 9  ;;  %13692 = vmatpush3.msra.mxu1 %v9187_v21  ;;  %13665 = vmatprep.subr.mxu0 %v9032_v47 }
 0x420   : > { %v8667_v16 = vsel %vm8659_vm11, %v8454_v32, %v8666_v18  ;;  %v8263_v60 = vmax.f32 %v7807_v42, %v11628_v10  ;;  %v7799_v63 = vcombine.high %v7797_v55, %v7797_v55  ;;  %v11625_v30 = vrot.slane %v7798_v39, 9  ;;  %13693 = vmatprep.subr.mxu1 %v9186_v41  ;;  %13666 = vmatpush3.msra.mxu0 %v9032_v47  ;;  %v9183_v18 = vld [vmem:[#allocation6 + $0xd0] sm:$0xff] }
 0x421   : > { %8720 = vst.msk [vmem:[#allocation4 + $0x21] sm:$0xff] %vm4041_vm3, %v8667_v16  ;;  %v11631_v14 = vrot.slane %v7816_v57, 9  ;;  %v8264_v13 = vmax.f32 %v7815_v52, %v11629_v25  ;;  %v17622_v17 = vmax.f32 %v7814_v23, %v11630_v35  ;;  %v11626_v26 = vrot.slane %v7797_v55, 9  ;;  %13694 = vmatpush3.msra.mxu1 %v9186_v41  ;;  %13667 = vmatprep.subr.mxu0 %v9031_v31 }
 0x422   : > { %v11627_v21 = vrot.slane %v7799_v63, 9  ;;  %v8259_v4 = vmax.f32 %v7790_v51, %v11624_v36  ;;  %v8260_v32 = vmax.f32 %v7798_v39, %v11625_v30  ;;  %v7663_v42 = vmax.f32 %v17586_v28, 0.0  ;;  %13695 = vmatprep.subr.mxu1 %v9185_v37  ;;  %13668 = vmatpush3.msra.mxu0 %v9031_v31  ;;  %v9029_v28 = vld [vmem:[#allocation6 + $0x90] sm:$0xff]  ;;  %v17639_v31 = vpop.f32.mrf.mxu1 }
 0x423   : > { %v8266_v47 = vmax.f32 %v7816_v57, %v11631_v14  ;;  %v8474_v61 = vrot.slane %v8263_v60, %v17418_v19  ;;  %v8478_v23 = vrot.slane %v8264_v13, %v17418_v19  ;;  %v8261_v52 = vmax.f32 %v7797_v55, %v11626_v26  ;;  %13696 = vmatpush3.msra.mxu1 %v9185_v37  ;;  %v9182_v13 = vld [vmem:[#allocation6 + $0xc8] sm:$0xff] }
 0x424   : > { %v8262_v10 = vmax.f32 %v7799_v63, %v11627_v21  ;;  %v8458_v1 = vrot.slane %v8259_v4, %v17418_v19  ;;  %v8462_v41 = vrot.slane %v8260_v32, %v17418_v19  ;;  %v7690_v51 = vmax.f32 %v7664_v62, %v7666_v5  ;;  %13669 = vmatprep.subr.mxu0 %v9030_v38  ;;  %v7521_v21 = vpop.f32.mrf.mxu1 }
 0x425   : > { %v8482_v7 = vrot.slane %v17622_v17, %v17418_v19  ;;  %v8466_v39 = vrot.slane %v8261_v52, %v17418_v19  ;;  %v7633_v36 = vadd.f32 %v17409_v11, %v7594_v6  ;;  %v7597_v55 = vadd.f32 %v17568_v29, %v17467_v56  ;;  %13697 = vmatprep.subr.mxu1 %v9184_v12  ;;  %v9028_v56 = vld [vmem:[#allocation6 + $0x88] sm:$0xff]  ;;  %v9027_v52 = vld [vmem:[#allocation6 + $0x80] sm:$0xff] }
 0x426   : > { %v8470_v57 = vrot.slane %v8262_v10, %v17418_v19  ;;  %v8668_v43 = vsel %vm8647_vm5, %v8462_v41, %v8458_v1  ;;  %v7834_v62 = vcombine.high %v7690_v51, %v7690_v51  ;;  %v7841_v5 = vrot.slane %v7690_v51, %v17412_v49  ;;  %13670 = vmatpush3.msra.mxu0 %v9030_v38 }
 0x427   : > { %v8486_v25 = vrot.slane %v8266_v47, %v17418_v19  ;;  %v8669_v35 = vsel %vm8649_vm6, %v8466_v39, %v8668_v43  ;;  %v7665_v6 = vmax.f32 %v7633_v36, 0.0  ;;  %v17647_v37 = vadd.f32 %v17409_v11, %v7597_v55  ;;  %13698 = vmatpush3.msra.mxu1 %v9184_v12  ;;  %13671 = vmatprep.subr.mxu0 %v9029_v28  ;;  %v17673_v39 = vld [vmem:[#allocation6 + $0x138] sm:$0xff] }
 0x428   : > { %v8670_v29 = vsel %vm8651_vm7, %v8470_v57, %v8669_v35  ;;  %v7848_v16 = vrot.slane %v7834_v62, %v17412_v49  ;;  %v7849_v60 = vcombine.high %v7841_v5, %v7841_v5  ;;  %v11636_v63 = vrot.slane %v7841_v5, 9  ;;  %v17651_v30 = vld [vmem:[#allocation4 + $0x21] sm:$0xff]  ;;  %13699 = vmatprep.subr.mxu1 %v9183_v18  ;;  %13672 = vmatpush3.msra.mxu0 %v9029_v28  ;;  %v17675_v36 = vld [vmem:[#allocation6 + $0x178] sm:$0xff]  ;;  %v13592_v57 = vpop.f32.mrf.mxu1 }
 0x429   : > { %v17653_v14 = vld [vmem:[#allocation4 + $0x20] sm:$0xff]  ;;  %v8671_v17 = vsel %vm8653_vm8, %v8474_v61, %v8670_v29  ;;  %v7689_v26 = vmax.f32 %v7663_v42, %v7665_v6  ;;  %v7596_v38 = vadd.f32 %v17581_v58, %v17471_v0  ;;  %13624 = vmatprep.mubr.msk.f32.mxu0 %vm4041_vm3, %v17651_v30  ;;  %13700 = vmatpush3.msra.mxu1 %v9183_v18  ;;  %v7167_v42 = vpop.f32.mrf.mxu0 }
 0x42a   : > { %13652 = vmatprep.mubr.msk.f32.mxu1 %vm4041_vm3, %v17653_v14  ;;  %v8672_v4 = vsel %vm8655_vm9, %v8478_v23, %v8671_v17  ;;  %v7850_v32 = vcombine.high %v7848_v16, %v7848_v16  ;;  %v11637_v12 = vrot.slane %v7849_v60, 9  ;;  %v11638_v47 = vrot.slane %v7848_v16, 9  ;;  %13673 = vmatprep.subr.mxu0 %v9028_v56  ;;  %v9181_v61 = vld [vmem:[#allocation6 + $0xc0] sm:$0xff] }
 0x42b   : > { %v8673_v10 = vsel %vm8657_vm10, %v8482_v7, %v8672_v4  ;;  %v17664_v0 = vmax.f32 %v7841_v5, %v11636_v63  ;;  %v7817_v58 = vcombine.high %v7689_v26, %v7689_v26  ;;  %v7824_v1 = vrot.slane %v7689_v26, %v17412_v49  ;;  %13701 = vmatprep.subr.mxu1 %v9182_v13  ;;  %v7531_v4 = vpop.f32.mrf.mxu1 }
 0x42c   : > { %v17668_v41 = vadd.f32 %v7167_v42, %v17389_v27  ;;  %v8674_v23 = vsel %vm8659_vm11, %v8486_v25, %v8673_v10  ;;  %v11639_v51 = vrot.slane %v7850_v32, 9  ;;  %v17671_v28 = vmax.f32 %v7849_v60, %v11637_v12  ;;  %13674 = vmatpush3.msra.mxu0 %v9028_v56  ;;  %13702 = vmatpush3.msra.mxu1 %v9182_v13 }
 0x42d   : > { %8721 = vst.msk [vmem:[#allocation4 + $0x31] sm:$0xff] %vm4041_vm3, %v8674_v23  ;;  %v7831_v7 = vrot.slane %v7817_v58, %v17412_v49  ;;  %v7832_v55 = vcombine.high %v7824_v1, %v7824_v1  ;;  %v11632_v18 = vrot.slane %v7824_v1, 9  ;;  %v7635_v27 = vadd.f32 %v17409_v11, %v7596_v38  ;;  %13675 = vmatprep.subr.mxu0 %v9027_v52  ;;  %v13595_v23 = vpop.f32.mrf.mxu1 }
 0x42e   : > { %13703 = vmatprep.subr.mxu1 %v9181_v61  ;;  %v8273_v43 = vmax.f32 %v7848_v16, %v11638_v47  ;;  %v17680_v62 = vmax.f32 %v7850_v32, %v11639_v51  ;;  %v8506_v5 = vrot.slane %v17664_v0, %v17418_v19  ;;  %v7668_v25 = vmax.f32 %v17647_v37, 0.0  ;;  %13676 = vmatpush3.msra.mxu0 %v9027_v52 }
 0x42f   : > { %13704 = vmatpush3.msra.mxu1 %v9181_v61  ;;  %v7833_v35 = vcombine.high %v7831_v7, %v7831_v7  ;;  %v11633_v6 = vrot.slane %v7832_v55, 9  ;;  %v11634_v56 = vrot.slane %v7831_v7, 9  ;;  %v8267_v29 = vmax.f32 %v7824_v1, %v11632_v18  ;;  %13717 = vmatprep.subr.mxu0 %v17673_v39 }
 0x430   : > { %13745 = vmatprep.subr.mxu1 %v17675_v36  ;;  %v8510_v16 = vrot.slane %v17671_v28, %v17418_v19  ;;  %v7599_v60 = vadd.f32 %v17608_v24, %v17475_v48  ;;  %v7598_v63 = vadd.f32 %v17624_v46, %v17480_v45  ;;  %v7601_v37 = vadd.f32 %v17639_v31, %v17484_v15 }
 0x431   : > { %v11635_v13 = vrot.slane %v7833_v35, 9  ;;  %v8268_v17 = vmax.f32 %v7832_v55, %v11633_v6  ;;  %v8269_v26 = vmax.f32 %v7831_v7, %v11634_v56  ;;  %v8490_v38 = vrot.slane %v8267_v29, %v17418_v19 }
 0x432   : > { %v7638_v32 = vadd.f32 %v17409_v11, %v7599_v60  ;;  %v7637_v12 = vadd.f32 %v17409_v11, %v7598_v63  ;;  %v7640_v47 = vadd.f32 %v17409_v11, %v7601_v37  ;;  %v7600_v48 = vadd.f32 %v7521_v21, %v17488_v44  ;;  %v17726_v60 = vpop.f32.mrf.mxu1 }
 0x433   : > { %v8270_v24 = vmax.f32 %v7833_v35, %v11635_v13  ;;  %v8494_v45 = vrot.slane %v8268_v17, %v17418_v19  ;;  %v8498_v46 = vrot.slane %v8269_v26, %v17418_v19  ;;  %v7603_v15 = vadd.f32 %v13592_v57, %v17492_v50 }
 0x434   : > { %v8514_v31 = vrot.slane %v8273_v43, %v17418_v19  ;;  %v7667_v52 = vmax.f32 %v7635_v27, 0.0  ;;  %v7670_v61 = vmax.f32 %v7638_v32, 0.0  ;;  %v7669_v42 = vmax.f32 %v7637_v12, 0.0  ;;  %v17704_v10 = vld [vmem:[#allocation4 + $0x31] sm:$0xff] }
 0x435   : > { %v17706_v0 = vld [vmem:[#allocation4 + $0x30] sm:$0xff]  ;;  %v8502_v58 = vrot.slane %v8270_v24, %v17418_v19  ;;  %v8675_v44 = vsel %vm8647_vm5, %v8494_v45, %v8490_v38  ;;  %v7642_v21 = vadd.f32 %v17409_v11, %v7603_v15  ;;  %v7602_v1 = vadd.f32 %v7531_v4, %v17496_v40  ;;  %13625 = vmatmul.mubr.msk.f32.gmra.mxu0 %vm4041_vm3, %v17704_v10  ;;  %v17733_v15 = vpop.f32.mrf.mxu1 }
 0x436   : > { %v8518_v50 = vrot.slane %v17680_v62, %v17418_v19  ;;  %v8676_v51 = vsel %vm8649_vm6, %v8498_v46, %v8675_v44  ;;  %v7692_v28 = vmax.f32 %v7668_v25, %v7670_v61  ;;  %v7691_v7 = vmax.f32 %v7667_v52, %v7669_v42  ;;  %13653 = vmatmul.mubr.msk.f32.gmra.mxu1 %vm4041_vm3, %v17706_v0 }
 0x437   : > { %v8677_v55 = vsel %vm8651_vm7, %v8502_v58, %v8676_v51  ;;  %v7672_v18 = vmax.f32 %v7640_v47, 0.0  ;;  %v7639_v27 = vadd.f32 %v17409_v11, %v7600_v48  ;;  %v7674_v40 = vmax.f32 %v7642_v21, 0.0 }
 0x438   : > { %v8678_v57 = vsel %vm8653_vm8, %v8506_v5, %v8677_v55  ;;  %v7868_v43 = vcombine.high %v7692_v28, %v7692_v28  ;;  %v7875_v35 = vrot.slane %v7692_v28, %v17412_v49  ;;  %v7851_v6 = vcombine.high %v7691_v7, %v7691_v7 }
 0x439   : > { %v8679_v62 = vsel %vm8655_vm9, %v8510_v16, %v8678_v57  ;;  %v7858_v25 = vrot.slane %v7691_v7, %v17412_v49  ;;  %v7694_v56 = vmax.f32 %v7672_v18, %v7674_v40  ;;  %v7641_v29 = vadd.f32 %v17409_v11, %v7602_v1 }
 0x43a   : > { %v8680_v63 = vsel %vm8657_vm10, %v8514_v31, %v8679_v62  ;;  %v7882_v37 = vrot.slane %v7868_v43, %v17412_v49  ;;  %v7883_v13 = vcombine.high %v7875_v35, %v7875_v35  ;;  %v11644_v17 = vrot.slane %v7875_v35, 9 }
 0x43b   : > { %v8681_v5 = vsel %vm8659_vm11, %v8518_v50, %v8680_v63  ;;  %v7865_v26 = vrot.slane %v7851_v6, %v17412_v49  ;;  %v7866_v38 = vcombine.high %v7858_v25, %v7858_v25  ;;  %v11640_v4 = vrot.slane %v7858_v25, 9 }
 0x43c   : > { %8722 = vst.msk [vmem:[#allocation4 + $0x41] sm:$0xff] %vm4041_vm3, %v8681_v5  ;;  %v7884_v16 = vcombine.high %v7882_v37, %v7882_v37  ;;  %v11645_v32 = vrot.slane %v7883_v13, 9  ;;  %v11646_v12 = vrot.slane %v7882_v37, 9  ;;  %v8279_v47 = vmax.f32 %v7875_v35, %v11644_v17 }
 0x43d   : > { %v7867_v48 = vcombine.high %v7865_v26, %v7865_v26  ;;  %v11641_v24 = vrot.slane %v7866_v38, 9  ;;  %v11642_v45 = vrot.slane %v7865_v26, 9  ;;  %v8275_v46 = vmax.f32 %v7858_v25, %v11640_v4 }
 0x43e   : > { %v11647_v31 = vrot.slane %v7884_v16, 9  ;;  %v8280_v52 = vmax.f32 %v7883_v13, %v11645_v32  ;;  %v7671_v61 = vmax.f32 %v7639_v27, 0.0  ;;  %v7673_v42 = vmax.f32 %v7641_v29, 0.0  ;;  %v7551_v27 = vpop.f32.mrf.mxu1  ;;  %v13540_v13 = vpop.f32.mrf.mxu0 }
 0x43f   : > { %v11643_v58 = vrot.slane %v7867_v48, 9  ;;  %v8276_v44 = vmax.f32 %v7866_v38, %v11641_v24  ;;  %v8277_v21 = vmax.f32 %v7865_v26, %v11642_v45  ;;  %v7605_v1 = vadd.f32 %v13595_v23, %v17499_v59 }
 0x440   : > { %v8281_v50 = vmax.f32 %v7882_v37, %v11646_v12  ;;  %v8538_v51 = vrot.slane %v8279_v47, %v17418_v19  ;;  %v8522_v28 = vrot.slane %v8275_v46, %v17418_v19  ;;  %v7902_v7 = vcombine.high %v7694_v56, %v7694_v56  ;;  %v13601_v12 = vpop.f32.mrf.mxu1 }
 0x441   : > { %v8278_v55 = vmax.f32 %v7867_v48, %v11643_v58  ;;  %v8526_v18 = vrot.slane %v8276_v44, %v17418_v19  ;;  %v8530_v40 = vrot.slane %v8277_v21, %v17418_v19  ;;  %v7909_v57 = vrot.slane %v7694_v56, %v17412_v49 }
 0x442   : > { %v8282_v43 = vmax.f32 %v7884_v16, %v11647_v31  ;;  %v8542_v35 = vrot.slane %v8280_v52, %v17418_v19  ;;  %v7916_v6 = vrot.slane %v7902_v7, %v17412_v49  ;;  %v7693_v59 = vmax.f32 %v7671_v61, %v7673_v42 }
 0x443   : > { %v8534_v23 = vrot.slane %v8278_v55, %v17418_v19  ;;  %v8682_v62 = vsel %vm8647_vm5, %v8526_v18, %v8522_v28  ;;  %v7917_v25 = vcombine.high %v7909_v57, %v7909_v57  ;;  %v11652_v29 = vrot.slane %v7909_v57, 9  ;;  %v17745_v63 = vld [vmem:[#allocation4 + $0x41] sm:$0xff]  ;;  %v17765_v55 = vpop.f32.mrf.mxu1 }
 0x444   : > { %v17747_v37 = vld [vmem:[#allocation4 + $0x40] sm:$0xff]  ;;  %v8683_v56 = vsel %vm8649_vm6, %v8530_v40, %v8682_v62  ;;  %v7918_v17 = vcombine.high %v7916_v6, %v7916_v6  ;;  %v11654_v5 = vrot.slane %v7916_v6, 9  ;;  %v7885_v26 = vcombine.high %v7693_v59, %v7693_v59  ;;  %13627 = vmatprep.mubr.msk.f32.mxu0 %vm4041_vm3, %v17745_v63 }
 0x445   : > { %13655 = vmatprep.mubr.msk.f32.mxu1 %vm4041_vm3, %v17747_v37  ;;  %v8546_v38 = vrot.slane %v8281_v50, %v17418_v19  ;;  %v8684_v4 = vsel %vm8651_vm7, %v8534_v23, %v8683_v56  ;;  %v11653_v16 = vrot.slane %v7917_v25, 9  ;;  %v7892_v32 = vrot.slane %v7693_v59, %v17412_v49 }
 0x446   : > { %v8685_v47 = vsel %vm8653_vm8, %v8538_v51, %v8684_v4  ;;  %v11655_v48 = vrot.slane %v7918_v17, 9  ;;  %v8287_v24 = vmax.f32 %v7909_v57, %v11652_v29  ;;  %v7899_v45 = vrot.slane %v7885_v26, %v17412_v49 }
 0x447   : > { %v7217_v46 = vadd.f32 %v13540_v13, %v17393_v53  ;;  %v8550_v31 = vrot.slane %v8282_v43, %v17418_v19  ;;  %v8686_v52 = vsel %vm8655_vm9, %v8542_v35, %v8685_v47  ;;  %v7900_v61 = vcombine.high %v7892_v32, %v7892_v32 }
 0x448   : > { %v8687_v42 = vsel %vm8657_vm10, %v8546_v38, %v8686_v52  ;;  %v8289_v58 = vmax.f32 %v7916_v6, %v11654_v5  ;;  %v7901_v44 = vcombine.high %v7899_v45, %v7899_v45  ;;  %v7644_v21 = vadd.f32 %v17409_v11, %v7605_v1  ;;  %v13604_v5 = vpop.f32.mrf.mxu1  ;;  %v7177_v52 = vpop.f32.mrf.mxu0 }
 0x449   : > { %v8688_v50 = vsel %vm8659_vm11, %v8550_v31, %v8687_v42  ;;  %v8288_v51 = vmax.f32 %v7917_v25, %v11653_v16  ;;  %v11648_v28 = vrot.slane %v7892_v32, 9  ;;  %v11649_v7 = vrot.slane %v7900_v61, 9 }
 0x44a   : > { %8723 = vst.msk [vmem:[#allocation4 + $0x51] sm:$0xff] %vm4041_vm3, %v8688_v50  ;;  %v8290_v53 = vmax.f32 %v7918_v17, %v11655_v48  ;;  %v8570_v18 = vrot.slane %v8287_v24, %v17418_v19  ;;  %v11650_v40 = vrot.slane %v7899_v45, 9  ;;  %v11651_v57 = vrot.slane %v7901_v44, 9 }
 0x44b   : > { %v8283_v43 = vmax.f32 %v7892_v32, %v11648_v28  ;;  %v8284_v35 = vmax.f32 %v7900_v61, %v11649_v7  ;;  %v7604_v6 = vadd.f32 %v17726_v60, %v17502_v34  ;;  %v7607_v1 = vadd.f32 %v17733_v15, %v17506_v22 }
 0x44c   : > { %v8285_v59 = vmax.f32 %v7899_v45, %v11650_v40  ;;  %v8286_v23 = vmax.f32 %v7901_v44, %v11651_v57  ;;  %v7606_v62 = vadd.f32 %v7551_v27, %v17510_v33  ;;  %v7609_v25 = vadd.f32 %v13601_v12, %v17513_v3 }
 0x44d   : > { %v8554_v29 = vrot.slane %v8283_v43, %v17418_v19  ;;  %v8558_v13 = vrot.slane %v8284_v35, %v17418_v19  ;;  %v7643_v56 = vadd.f32 %v17409_v11, %v7604_v6  ;;  %v7646_v17 = vadd.f32 %v17409_v11, %v7607_v1 }
 0x44e   : > { %v8578_v34 = vrot.slane %v8289_v58, %v17418_v19  ;;  %v8562_v60 = vrot.slane %v8285_v59, %v17418_v19  ;;  %v8566_v22 = vrot.slane %v8286_v23, %v17418_v19  ;;  %v7645_v15 = vadd.f32 %v17409_v11, %v7606_v62  ;;  %v7571_v59 = vpop.f32.mrf.mxu1 }
 0x44f   : > { %v8689_v33 = vsel %vm8647_vm5, %v8558_v13, %v8554_v29  ;;  %v7676_v3 = vmax.f32 %v7644_v21, 0.0  ;;  %v7678_v27 = vmax.f32 %v7646_v17, 0.0  ;;  %v7648_v26 = vadd.f32 %v17409_v11, %v7609_v25 }
 0x450   : > { %v8690_v38 = vsel %vm8649_vm6, %v8562_v60, %v8689_v33  ;;  %v7675_v4 = vmax.f32 %v7643_v56, 0.0  ;;  %v7677_v16 = vmax.f32 %v7645_v15, 0.0  ;;  %v7611_v32 = vadd.f32 %v13604_v5, %v7217_v46 }
 0x451   : > { %v8574_v12 = vrot.slane %v8288_v51, %v17418_v19  ;;  %v8582_v47 = vrot.slane %v8290_v53, %v17418_v19  ;;  %v8691_v48 = vsel %vm8651_vm7, %v8566_v22, %v8690_v38  ;;  %v7696_v24 = vmax.f32 %v7676_v3, %v7678_v27  ;;  %v17789_v45 = vld [vmem:[#allocation4 + $0x51] sm:$0xff] }
 0x452   : > { %v17791_v31 = vld [vmem:[#allocation4 + $0x50] sm:$0xff]  ;;  %v8692_v61 = vsel %vm8653_vm8, %v8570_v18, %v8691_v48  ;;  %v7695_v42 = vmax.f32 %v7675_v4, %v7677_v16  ;;  %v7650_v58 = vadd.f32 %v17409_v11, %v7611_v32  ;;  %13628 = vmatmul.mubr.msk.f32.gmra.mxu0 %vm4041_vm3, %v17789_v45  ;;  %v7680_v50 = vmax.f32 %v7648_v26, 0.0  ;;  %v13927_v26 = vld [vmem:[%s18312_s4] ss:$0 sm:$0xff] }
 0x453   : > { %13656 = vmatmul.mubr.msk.f32.gmra.mxu1 %vm4041_vm3, %v17791_v31  ;;  %v8693_v46 = vsel %vm8655_vm9, %v8574_v12, %v8692_v61  ;;  %v7936_v44 = vcombine.high %v7696_v24, %v7696_v24  ;;  %v7943_v21 = vrot.slane %v7696_v24, %v17412_v49  ;;  %v7216_v11 = vadd.f32 %v7177_v52, %v17402_v8 }
 0x454   : > { %v8694_v51 = vsel %vm8657_vm10, %v8578_v34, %v8693_v46  ;;  %v7919_v28 = vcombine.high %v7695_v42, %v7695_v42  ;;  %v7926_v7 = vrot.slane %v7695_v42, %v17412_v49  ;;  %v7682_v53 = vmax.f32 %v7650_v58, 0.0 }
 0x455   : > { %v8695_v18 = vsel %vm8659_vm11, %v8582_v47, %v8694_v51  ;;  %v7950_v40 = vrot.slane %v7936_v44, %v17412_v49  ;;  %v7951_v57 = vcombine.high %v7943_v21, %v7943_v21  ;;  %v11660_v62 = vrot.slane %v7943_v21, 9 }
 0x456   : > { %8724 = vst.msk [vmem:[#allocation4 + $0x61] sm:$0xff] %vm4041_vm3, %v8695_v18  ;;  %v7933_v43 = vrot.slane %v7919_v28, %v17412_v49  ;;  %v7934_v35 = vcombine.high %v7926_v7, %v7926_v7  ;;  %v11656_v6 = vrot.slane %v7926_v7, 9  ;;  %v7698_v1 = vmax.f32 %v7680_v50, %v7682_v53 }
 0x457   : > { %v7952_v23 = vcombine.high %v7950_v40, %v7950_v40  ;;  %v11661_v25 = vrot.slane %v7951_v57, 9  ;;  %v7608_v29 = vadd.f32 %v17765_v55, %v17668_v41  ;;  %v11662_v5 = vrot.slane %v7950_v40, 9 }
 0x458   : > { %v7935_v8 = vcombine.high %v7933_v43, %v7933_v43  ;;  %v11657_v13 = vrot.slane %v7934_v35, 9  ;;  %v11658_v56 = vrot.slane %v7933_v43, 9  ;;  %v8291_v17 = vmax.f32 %v7926_v7, %v11656_v6 }
 0x459   : > { %v11663_v34 = vrot.slane %v7952_v23, 9  ;;  %v7610_v60 = vadd.f32 %v7571_v59, %v7216_v11  ;;  %v8295_v3 = vmax.f32 %v7943_v21, %v11660_v62  ;;  %v8296_v27 = vmax.f32 %v7951_v57, %v11661_v25 }
 0x45a   : > { %v11659_v22 = vrot.slane %v7935_v8, 9  ;;  %v8292_v15 = vmax.f32 %v7934_v35, %v11657_v13  ;;  %v8293_v33 = vmax.f32 %v7933_v43, %v11658_v56  ;;  %v7647_v38 = vadd.f32 %v13927_v26, %v7608_v29 }
 0x45b   : > { %v8586_v41 = vrot.slane %v8291_v17, %v17418_v19  ;;  %v8297_v32 = vmax.f32 %v7950_v40, %v11662_v5  ;;  %v8298_v12 = vmax.f32 %v7952_v23, %v11663_v34  ;;  %v7649_v47 = vadd.f32 %v13927_v26, %v7610_v60 }
 0x45c   : > { %v8294_v4 = vmax.f32 %v7935_v8, %v11659_v22  ;;  %v8590_v55 = vrot.slane %v8292_v15, %v17418_v19  ;;  %v8594_v16 = vrot.slane %v8293_v33, %v17418_v19  ;;  %v7970_v42 = vcombine.high %v7698_v1, %v7698_v1 }
 0x45d   : > { %v17816_v48 = vld [vmem:[#allocation4 + $0x61] sm:$0xff]  ;;  %v8602_v58 = vrot.slane %v8295_v3, %v17418_v19  ;;  %v7679_v44 = vmax.f32 %v7647_v38, 0.0  ;;  %v7681_v21 = vmax.f32 %v7649_v47, 0.0  ;;  %v8606_v50 = vrot.slane %v8296_v27, %v17418_v19 }
 0x45e   : > { %v17818_v24 = vld [vmem:[#allocation4 + $0x60] sm:$0xff]  ;;  %v8598_v52 = vrot.slane %v8294_v4, %v17418_v19  ;;  %v8696_v61 = vsel %vm8647_vm5, %v8590_v55, %v8586_v41  ;;  %13630 = vmatprep.mubr.msk.f32.mxu0 %vm4041_vm3, %v17816_v48  ;;  %v7977_v28 = vrot.slane %v7698_v1, %v17412_v49  ;;  %v8610_v7 = vrot.slane %v8297_v32, %v17418_v19 }
 0x45f   : > { %13658 = vmatprep.mubr.msk.f32.mxu1 %vm4041_vm3, %v17818_v24  ;;  %v8697_v46 = vsel %vm8649_vm6, %v8594_v16, %v8696_v61  ;;  %v7697_v11 = vmax.f32 %v7679_v44, %v7681_v21  ;;  %v8614_v18 = vrot.slane %v8298_v12, %v17418_v19  ;;  %v7984_v57 = vrot.slane %v7970_v42, %v17412_v49  ;;  %v17842_v4 = vld [vmem:[#allocation4 + $0x2] sm:$0xff]  ;;  %v17864_v21 = vld [vmem:[#allocation4 + $0x12] sm:$0xff] }
 0x460   : > { %v8698_v51 = vsel %vm8651_vm7, %v8598_v52, %v8697_v46  ;;  %v7985_v59 = vcombine.high %v7977_v28, %v7977_v28  ;;  %v11668_v8 = vrot.slane %v7977_v28, 9 }
 0x461   : > { %v8699_v53 = vsel %vm8653_vm8, %v8602_v58, %v8698_v51  ;;  %v7953_v35 = vcombine.high %v7697_v11, %v7697_v11  ;;  %v7960_v23 = vrot.slane %v7697_v11, %v17412_v49  ;;  %v7986_v62 = vcombine.high %v7984_v57, %v7984_v57 }
 0x462   : > { %v8700_v40 = vsel %vm8655_vm9, %v8606_v50, %v8699_v53  ;;  %v11669_v17 = vrot.slane %v7985_v59, 9  ;;  %v11670_v60 = vrot.slane %v7984_v57, 9  ;;  %v8303_v27 = vmax.f32 %v7977_v28, %v11668_v8  ;;  %v9341_v28 = vld [vmem:[#allocation6 + $0x130] sm:$0xff]  ;;  %v9490_v8 = vld [vmem:[#allocation6 + $0x148] sm:$0xff] }
 0x463   : > { %v8701_v43 = vsel %vm8657_vm10, %v8610_v7, %v8700_v40  ;;  %v7967_v1 = vrot.slane %v7953_v35, %v17412_v49  ;;  %v7968_v25 = vcombine.high %v7960_v23, %v7960_v23  ;;  %v11664_v29 = vrot.slane %v7960_v23, 9  ;;  %v9495_v7 = vld [vmem:[#allocation6 + $0x170] sm:$0xff]  ;;  %v9493_v35 = vld [vmem:[#allocation6 + $0x160] sm:$0xff] }
 0x464   : > { %v8702_v6 = vsel %vm8659_vm11, %v8614_v18, %v8701_v43  ;;  %v11671_v33 = vrot.slane %v7986_v62, 9  ;;  %v8304_v49 = vmax.f32 %v7985_v59, %v11669_v17  ;;  %v8305_v12 = vmax.f32 %v7984_v57, %v11670_v60  ;;  %v9340_v57 = vld [vmem:[#allocation6 + $0x128] sm:$0xff]  ;;  %v17885_v43 = vld [vmem:[#allocation4 + $0x32] sm:$0xff]  ;;  %v9335_v17 = vld [vmem:[#allocation6 + $0x100] sm:$0xff] }
 0x465   : > { %8725 = vst.msk [vmem:[#allocation4 + $0x71] sm:$0xff] %vm4041_vm3, %v8702_v6  ;;  %v7969_v13 = vcombine.high %v7967_v1, %v7967_v1  ;;  %v11666_v56 = vrot.slane %v7967_v1, 9  ;;  %v11665_v5 = vrot.slane %v7968_v25, 9  ;;  %v8299_v34 = vmax.f32 %v7960_v23, %v11664_v29  ;;  %v9338_v6 = vld [vmem:[#allocation6 + $0x118] sm:$0xff]  ;;  %v9336_v29 = vld [vmem:[#allocation6 + $0x108] sm:$0xff] }
 0x466   : > { %v8306_v52 = vmax.f32 %v7986_v62, %v11671_v33  ;;  %v8634_v42 = vrot.slane %v8303_v27, %v17418_v19  ;;  %v8638_v46 = vrot.slane %v8304_v49, %v17418_v19  ;;  %v8642_v50 = vrot.slane %v8305_v12, %v17418_v19  ;;  %v9492_v59 = vld [vmem:[#allocation6 + $0x158] sm:$0xff]  ;;  %v9337_v62 = vld [vmem:[#allocation6 + $0x110] sm:$0xff]  ;;  %v9803_v33 = vld [vmem:[#allocation6 + $0x1e8] sm:$0xff] }
 0x467   : > { %v11667_v22 = vrot.slane %v7969_v13, 9  ;;  %v8301_v15 = vmax.f32 %v7967_v1, %v11666_v56  ;;  %v8300_v3 = vmax.f32 %v7968_v25, %v11665_v5  ;;  %v8618_v41 = vrot.slane %v8299_v34, %v17418_v19  ;;  %v17897_v23 = vld [vmem:[#allocation4 + $0x52] sm:$0xff]  ;;  %v17903_v1 = vld [vmem:[#allocation4 + $0x62] sm:$0xff] }
 0x468   : > { %v8646_v53 = vrot.slane %v8306_v52, %v17418_v19  ;;  %v9491_v25 = vld [vmem:[#allocation6 + $0x150] sm:$0xff]  ;;  %v9489_v5 = vld [vmem:[#allocation6 + $0x140] sm:$0xff]  ;;  %v9651_v34 = vld [vmem:[#allocation6 + $0x1b8] sm:$0xff] }
 0x469   : > { %v8302_v26 = vmax.f32 %v7969_v13, %v11667_v22  ;;  %v8626_v38 = vrot.slane %v8301_v15, %v17418_v19  ;;  %v8622_v55 = vrot.slane %v8300_v3, %v17418_v19  ;;  %v9805_v60 = vld [vmem:[#allocation6 + $0x1f8] sm:$0xff]  ;;  %v9650_v22 = vld [vmem:[#allocation6 + $0x1b0] sm:$0xff]  ;;  %v9649_v15 = vld [vmem:[#allocation6 + $0x1a8] sm:$0xff] }
 0x46a   : > { %v9648_v3 = vld [vmem:[#allocation6 + $0x1a0] sm:$0xff]  ;;  %v9646_v49 = vld [vmem:[#allocation6 + $0x190] sm:$0xff]  ;;  %v9799_v12 = vld [vmem:[#allocation6 + $0x1c8] sm:$0xff] }
 0x46b   : > { %v8630_v47 = vrot.slane %v8302_v26, %v17418_v19  ;;  %v8703_v61 = vsel %vm8647_vm5, %v8622_v55, %v8618_v41  ;;  %v9494_v19 = vld [vmem:[#allocation6 + $0x168] sm:$0xff]  ;;  %v9802_v27 = vld [vmem:[#allocation6 + $0x1e0] sm:$0xff]  ;;  %v9647_v26 = vld [vmem:[#allocation6 + $0x198] sm:$0xff] }
 0x46c   : > { %v17846_v16 = vld [vmem:[#allocation4 + $0x71] sm:$0xff]  ;;  %v8704_v58 = vsel %vm8649_vm6, %v8626_v38, %v8703_v61  ;;  %v9801_v38 = vld [vmem:[#allocation6 + $0x1d8] sm:$0xff]  ;;  %v9645_v55 = vld [vmem:[#allocation6 + $0x188] sm:$0xff] }
 0x46d   : > { %v17848_v32 = vld [vmem:[#allocation4 + $0x70] sm:$0xff]  ;;  %13631 = vmatmul.mubr.msk.f32.gmra.mxu0 %vm4041_vm3, %v17846_v16  ;;  %v8705_v44 = vsel %vm8651_vm7, %v8630_v47, %v8704_v58  ;;  %v9644_v61 = vld [vmem:[#allocation6 + $0x180] sm:$0xff]  ;;  %v9959_v58 = vld [vmem:[#allocation6 + $0x238] sm:$0xff] }
 0x46e   : > { %13659 = vmatmul.mubr.msk.f32.gmra.mxu1 %vm4041_vm3, %v17848_v32  ;;  %13677 = vmatprep.mubr.msk.f32.mxu0 %vm4041_vm3, %v17842_v4  ;;  %v8706_v51 = vsel %vm8653_vm8, %v8634_v42, %v8705_v44  ;;  %v17909_v13 = vld [vmem:[#allocation4 + $0x72] sm:$0xff]  ;;  %v9798_v42 = vld [vmem:[#allocation6 + $0x1c0] sm:$0xff] }
 0x46f   : > { %13705 = vmatprep.mubr.msk.f32.mxu1 %vm4041_vm3, %v17593_v9  ;;  %v17872_v9 = vld [vmem:[#allocation4 + $0x22] sm:$0xff]  ;;  %v8707_v11 = vsel %vm8655_vm9, %v8638_v46, %v8706_v51  ;;  %v9800_v41 = vld [vmem:[#allocation6 + $0x1d0] sm:$0xff] }
 0x470   : > { %v8708_v18 = vsel %vm8657_vm10, %v8642_v50, %v8707_v11  ;;  %v9958_v46 = vld [vmem:[#allocation6 + $0x230] sm:$0xff]  ;;  %v10181_v44 = vld [vmem:[#allocation4 + $0x1] sm:$0xff] }
 0x471   : > { %13678 = vmatmul.mubr.msk.f32.vlgmr.msra.gmra.mxu0 %vm4041_vm3, %v17864_v21  ;;  %v8709_v40 = vsel %vm8659_vm11, %v8646_v53, %v8708_v18  ;;  %v18020_v53 = vld [vmem:[%s18315_s7 + $0x8] ss:$0 sm:$0xff] }
 0x472   : > { %13706 = vmatmul.mubr.msk.f32.vlgmr.msra.gmra.mxu1 %vm4041_vm3, %v17653_v14  ;;  %13680 = vmatprep.mubr.msk.f32.mxu0 %vm4041_vm3, %v17872_v9  ;;  %8726 = vst.msk [vmem:[#allocation4 + $0x81] sm:$0xff] %vm4041_vm3, %v8709_v40  ;;  %18711 = vst [vmem:[#allocation33_spill] sm:$0xff] %v18020_v53 }
 0x473   : > { %13708 = vmatprep.mubr.msk.f32.mxu1 %vm4041_vm3, %v17706_v0  ;;  %13718 = vmatpush3.msra.mxu0 %v17673_v39  ;;  %v17891_v39 = vld [vmem:[#allocation4 + $0x42] sm:$0xff] }
 0x474   : > { %13746 = vmatpush3.msra.mxu1 %v17675_v36  ;;  %13719 = vmatprep.subr.mxu0 %v9341_v28  ;;  %v9339_v36 = vld [vmem:[#allocation6 + $0x120] sm:$0xff] }
 0x475   : > { %13747 = vmatprep.subr.mxu1 %v9495_v7  ;;  %13720 = vmatpush3.msra.mxu0 %v9341_v28 }
 0x476   : > { %13748 = vmatpush3.msra.mxu1 %v9495_v7  ;;  %13681 = vmatmul.mubr.msk.f32.gmra.mxu0 %vm4041_vm3, %v17885_v43 }
 0x477   : > { %13709 = vmatmul.mubr.msk.f32.gmra.mxu1 %vm4041_vm3, %v17747_v37  ;;  %13721 = vmatprep.subr.mxu0 %v9340_v57 }
 0x478   : > { %13749 = vmatprep.subr.mxu1 %v9494_v19  ;;  %13683 = vmatprep.mubr.msk.f32.mxu0 %vm4041_vm3, %v17891_v39 }
 0x479   : > { %13711 = vmatprep.mubr.msk.f32.mxu1 %vm4041_vm3, %v17791_v31  ;;  %13722 = vmatpush3.msra.mxu0 %v9340_v57  ;;  %v17911_v56 = vld [vmem:[#allocation4 + $0x80] sm:$0xff] }
 0x47a   : > { %13750 = vmatpush3.msra.mxu1 %v9494_v19  ;;  %13723 = vmatprep.subr.mxu0 %v9339_v36  ;;  %v9333_v47 = vld [vmem:[#allocation4 + $0x81] sm:$0xff] }
 0x47b   : > { %13751 = vmatprep.subr.mxu1 %v9493_v35  ;;  %13724 = vmatpush3.msra.mxu0 %v9339_v36  ;;  %v9487_v52 = vld [vmem:[#allocation4 + $0x82] sm:$0xff] }
 0x47c   : > { %13752 = vmatpush3.msra.mxu1 %v9493_v35  ;;  %13684 = vmatmul.mubr.msk.f32.gmra.mxu0 %vm4041_vm3, %v17897_v23 }
 0x47d   : > { %13712 = vmatmul.mubr.msk.f32.gmra.mxu1 %vm4041_vm3, %v17818_v24  ;;  %13725 = vmatprep.subr.mxu0 %v9338_v6 }
 0x47e   : > { %13753 = vmatprep.subr.mxu1 %v9492_v59  ;;  %13686 = vmatprep.mubr.msk.f32.mxu0 %vm4041_vm3, %v17903_v1 }
 0x47f   : > { %13714 = vmatprep.mubr.msk.f32.mxu1 %vm4041_vm3, %v17848_v32  ;;  %13726 = vmatpush3.msra.mxu0 %v9338_v6 }
 0x480   : > { %13754 = vmatpush3.msra.mxu1 %v9492_v59  ;;  %13727 = vmatprep.subr.mxu0 %v9337_v62 }
 0x481   : > { %13755 = vmatprep.subr.mxu1 %v9491_v25  ;;  %13728 = vmatpush3.msra.mxu0 %v9337_v62 }
 0x482   : > { %13756 = vmatpush3.msra.mxu1 %v9491_v25  ;;  %13687 = vmatmul.mubr.msk.f32.gmra.mxu0 %vm4041_vm3, %v17909_v13 }
 0x483   : > { %13715 = vmatmul.mubr.msk.f32.gmra.mxu1 %vm4041_vm3, %v17911_v56  ;;  %13729 = vmatprep.subr.mxu0 %v9336_v29 }
 0x484   : > { %13757 = vmatprep.subr.mxu1 %v9490_v8  ;;  %13730 = vmatpush3.msra.mxu0 %v9336_v29 }
 0x485   : > { %13733 = vmatprep.mubr.msk.f32.mxu0 %vm4041_vm3, %v17591_v54  ;;  %13758 = vmatpush3.msra.mxu1 %v9490_v8  ;;  %v9804_v54 = vld [vmem:[#allocation6 + $0x1f0] sm:$0xff] }
 0x486   : > { %13761 = vmatprep.mubr.msk.f32.mxu1 %vm4041_vm3, %v17864_v21  ;;  %13731 = vmatprep.subr.mxu0 %v9335_v17  ;;  %v18005_v21 = vld [vmem:[%s18315_s7 + $0x1] ss:$0 sm:$0xff] }
 0x487   : > { %13759 = vmatprep.subr.mxu1 %v9489_v5  ;;  %13732 = vmatpush3.msra.mxu0 %v9335_v17  ;;  %18709 = vst [vmem:[#allocation102_spill] sm:$0xff] %v18005_v21  ;;  %v10194_v51 = vmul.f32 %v18005_v21, %v10181_v44 }
 0x488   : > { %13760 = vmatpush3.msra.mxu1 %v9489_v5  ;;  %13734 = vmatmul.mubr.msk.f32.vlgmr.msra.gmra.mxu0 %vm4041_vm3, %v17651_v30 }
 0x489   : > { %13762 = vmatmul.mubr.msk.f32.vlgmr.msra.gmra.mxu1 %vm4041_vm3, %v17872_v9  ;;  %13773 = vmatprep.subr.mxu0 %v9651_v34  ;;  %v10202_v28 = vsel %vm4041_vm3, %v10194_v51, 0.0 }
 0x48a   : > { %13801 = vmatprep.subr.mxu1 %v9805_v60  ;;  %13736 = vmatprep.mubr.msk.f32.mxu0 %vm4041_vm3, %v17704_v10 }
 0x48b   : > { %13764 = vmatprep.mubr.msk.f32.mxu1 %vm4041_vm3, %v17885_v43  ;;  %13774 = vmatpush3.msra.mxu0 %v9651_v34 }
 0x48c   : > { %13802 = vmatpush3.msra.mxu1 %v9805_v60  ;;  %13775 = vmatprep.subr.mxu0 %v9650_v22 }
 0x48d   : > { %13803 = vmatprep.subr.mxu1 %v9804_v54  ;;  %13776 = vmatpush3.msra.mxu0 %v9650_v22 }
 0x48e   : > { %13804 = vmatpush3.msra.mxu1 %v9804_v54  ;;  %13737 = vmatmul.mubr.msk.f32.gmra.mxu0 %vm4041_vm3, %v17745_v63 }
 0x48f   : > { %13765 = vmatmul.mubr.msk.f32.gmra.mxu1 %vm4041_vm3, %v17891_v39  ;;  %13777 = vmatprep.subr.mxu0 %v9649_v15 }
 0x490   : > { %13805 = vmatprep.subr.mxu1 %v9803_v33  ;;  %13739 = vmatprep.mubr.msk.f32.mxu0 %vm4041_vm3, %v17789_v45 }
 0x491   : > { %13767 = vmatprep.mubr.msk.f32.mxu1 %vm4041_vm3, %v17897_v23  ;;  %13778 = vmatpush3.msra.mxu0 %v9649_v15 }
 0x492   : > { %13806 = vmatpush3.msra.mxu1 %v9803_v33  ;;  %13779 = vmatprep.subr.mxu0 %v9648_v3 }
 0x493   : > { %13807 = vmatprep.subr.mxu1 %v9802_v27  ;;  %13780 = vmatpush3.msra.mxu0 %v9648_v3 }
 0x494   : > { %13808 = vmatpush3.msra.mxu1 %v9802_v27  ;;  %13740 = vmatmul.mubr.msk.f32.gmra.mxu0 %vm4041_vm3, %v17816_v48 }
 0x495   : > { %13768 = vmatmul.mubr.msk.f32.gmra.mxu1 %vm4041_vm3, %v17903_v1  ;;  %13781 = vmatprep.subr.mxu0 %v9647_v26 }
 0x496   : > { %13809 = vmatprep.subr.mxu1 %v9801_v38  ;;  %13742 = vmatprep.mubr.msk.f32.mxu0 %vm4041_vm3, %v17846_v16 }
 0x497   : > { %13770 = vmatprep.mubr.msk.f32.mxu1 %vm4041_vm3, %v17909_v13  ;;  %13782 = vmatpush3.msra.mxu0 %v9647_v26 }
 0x498   : > { %13810 = vmatpush3.msra.mxu1 %v9801_v38  ;;  %13783 = vmatprep.subr.mxu0 %v9646_v49 }
 0x499   : > { %13811 = vmatprep.subr.mxu1 %v9800_v41  ;;  %13784 = vmatpush3.msra.mxu0 %v9646_v49 }
 0x49a   : > { %13812 = vmatpush3.msra.mxu1 %v9800_v41  ;;  %13743 = vmatmul.mubr.msk.f32.gmra.mxu0 %vm4041_vm3, %v9333_v47 }
 0x49b   : > { %13771 = vmatmul.mubr.msk.f32.gmra.mxu1 %vm4041_vm3, %v9487_v52  ;;  %13785 = vmatprep.subr.mxu0 %v9645_v55 }
 0x49c   : > { %13813 = vmatprep.subr.mxu1 %v9799_v12  ;;  %13786 = vmatpush3.msra.mxu0 %v9645_v55 }
 0x49d   : > { %13789 = vmatprep.mubr.msk.f32.mxu0 %vm4041_vm3, %v17653_v14  ;;  %13814 = vmatpush3.msra.mxu1 %v9799_v12  ;;  %v9956_v14 = vld [vmem:[#allocation6 + $0x220] sm:$0xff] }
 0x49e   : > { %13817 = vmatprep.mubr.msk.f32.mxu1 %vm4041_vm3, %v17651_v30  ;;  %13787 = vmatprep.subr.mxu0 %v9644_v61  ;;  %v9957_v30 = vld [vmem:[#allocation6 + $0x228] sm:$0xff] }
 0x49f   : > { %13815 = vmatprep.subr.mxu1 %v9798_v42  ;;  %13788 = vmatpush3.msra.mxu0 %v9644_v61 }
 0x4a0   : > { %13816 = vmatpush3.msra.mxu1 %v9798_v42  ;;  %13790 = vmatmul.mubr.msk.f32.vlgmr.msra.gmra.mxu0 %vm4041_vm3, %v17706_v0  ;;  %v9954_v0 = vld [vmem:[#allocation6 + $0x210] sm:$0xff] }
 0x4a1   : > { %13818 = vmatmul.mubr.msk.f32.vlgmr.msra.gmra.mxu1 %vm4041_vm3, %v17704_v10  ;;  %13829 = vmatprep.subr.mxu0 %v9959_v58  ;;  %v9955_v10 = vld [vmem:[#allocation6 + $0x218] sm:$0xff] }
 0x4a2   : > { %13792 = vmatprep.mubr.msk.f32.mxu0 %vm4041_vm3, %v17747_v37  ;;  %13820 = vmatprep.mubr.msk.f32.mxu1 %vm4041_vm3, %v17745_v63  ;;  %v17970_v63 = vld [vmem:[#allocation4 + $0x91] sm:$0xff] }
 0x4a3   : > { %13830 = vmatpush3.msra.mxu0 %v9959_v58  ;;  %18706 = vst [vmem:[#allocation22_spill] sm:$0xff] %v17970_v63  ;;  %v9642_v37 = vld [vmem:[#allocation4 + $0x90] sm:$0xff]  ;;  %10203 = vadd.xlane.f32.xlu1 %v10202_v28 }
 0x4a4   : > { %13831 = vmatprep.subr.mxu0 %v9958_v46  ;;  %13793 = vmatmul.mubr.msk.f32.gmra.mxu0 %vm4041_vm3, %v17791_v31  ;;  %v9952_v31 = vld [vmem:[#allocation6 + $0x200] sm:$0xff]  ;;  %v10468_v18 = vmul.f32 %v18020_v53, %v9642_v37 }
 0x4a5   : > { %13832 = vmatpush3.msra.mxu0 %v9958_v46  ;;  %13821 = vmatmul.mubr.msk.f32.gmra.mxu1 %vm4041_vm3, %v17789_v45  ;;  %v9953_v45 = vld [vmem:[#allocation6 + $0x208] sm:$0xff] }
 0x4a6   : > { %13833 = vmatprep.subr.mxu0 %v9957_v30  ;;  %13795 = vmatprep.mubr.msk.f32.mxu0 %vm4041_vm3, %v17818_v24  ;;  %v10128_v24 = vld [vmem:[#allocation4] sm:$0xff]  ;;  %v10490_v40 = vsel %vm4041_vm3, %v10468_v18, 0.0 }
 0x4a7   : > { %13823 = vmatprep.mubr.msk.f32.mxu1 %vm4041_vm3, %v17816_v48  ;;  %13834 = vmatpush3.msra.mxu0 %v9957_v30  ;;  %v17992_v48 = vld [vmem:[#allocation4 + $0x92] sm:$0xff] }
 0x4a8   : > { %13835 = vmatprep.subr.mxu0 %v9956_v14  ;;  %13796 = vmatmul.mubr.msk.f32.gmra.mxu0 %vm4041_vm3, %v17848_v32  ;;  %18707 = vst [vmem:[#allocation53_spill] sm:$0xff] %v17992_v48 }
 0x4a9   : > { %13824 = vmatmul.mubr.msk.f32.gmra.mxu1 %vm4041_vm3, %v17846_v16  ;;  %13836 = vmatpush3.msra.mxu0 %v9956_v14  ;;  %v17999_v16 = vld [vmem:[%s18315_s7] ss:$0 sm:$0xff] }
 0x4aa   : > { %13826 = vmatprep.mubr.msk.f32.mxu1 %vm4041_vm3, %v9333_v47  ;;  %13837 = vmatprep.subr.mxu0 %v9955_v10  ;;  %18708 = vst [vmem:[#allocation88_spill] sm:$0xff] %v17999_v16  ;;  %v10141_v32 = vmul.f32 %v17999_v16, %v10128_v24 }
 0x4ab   : > { %13798 = vmatprep.mubr.msk.f32.mxu0 %vm4041_vm3, %v17911_v56  ;;  %13838 = vmatpush3.msra.mxu0 %v9955_v10 }
 0x4ac   : > { %13839 = vmatprep.subr.mxu0 %v9954_v0  ;;  %13799 = vmatmul.mubr.msk.f32.gmra.mxu0 %vm4041_vm3, %v9642_v37  ;;  %v10149_v50 = vsel %vm4041_vm3, %v10141_v32, 0.0 }
 0x4ad   : > { %13827 = vmatmul.mubr.msk.f32.gmra.mxu1 %vm4041_vm3, %v17970_v63  ;;  %13840 = vmatpush3.msra.mxu0 %v9954_v0 }
 0x4ae   : > { %13841 = vmatprep.subr.mxu0 %v9953_v45  ;;  %13845 = vmatprep.mubr.msk.f32.mxu0 %vm4041_vm3, %v17872_v9  ;;  %v18012_v9 = vld [vmem:[%s18315_s7 + $0x2] ss:$0 sm:$0xff] }
 0x4af   : > { %13842 = vmatpush3.msra.mxu0 %v9953_v45  ;;  %10150 = vadd.xlane.f32.xlu0 %v10149_v50  ;;  %18710 = vst [vmem:[#allocation44_spill] sm:$0xff] %v18012_v9  ;;  %v10247_v7 = vmul.f32 %v18012_v9, %v17842_v4 }
 0x4b0   : > { %13843 = vmatprep.subr.mxu0 %v9952_v31  ;;  %10491 = vadd.xlane.f32.xlu1 %v10490_v40 }
 0x4b1   : > { %13844 = vmatpush3.msra.mxu0 %v9952_v31  ;;  %v10255_v11 = vsel %vm4041_vm3, %v10247_v7, 0.0 }
 0x4b2   : > { %13846 = vmatmul.mubr.msk.f32.vlgmr.msra.gmra.mxu0 %vm4041_vm3, %v17885_v43 }
 0x4b3   : > { %13848 = vmatprep.mubr.msk.f32.mxu0 %vm4041_vm3, %v17891_v39  ;;  %10256 = vadd.xlane.f32.xlu0 %v10255_v11 }
 0x4b6   : > { %13849 = vmatmul.mubr.msk.f32.gmra.mxu0 %vm4041_vm3, %v17897_v23 }
 0x4b7   : > { %13851 = vmatprep.mubr.msk.f32.mxu0 %vm4041_vm3, %v17903_v1 }
 0x4ba   : > { %13852 = vmatmul.mubr.msk.f32.gmra.mxu0 %vm4041_vm3, %v17909_v13 }
 0x4bb   : > { %13854 = vmatprep.mubr.msk.f32.mxu0 %vm4041_vm3, %v9487_v52 }
 0x4be   : > { %13855 = vmatmul.mubr.msk.f32.gmra.mxu0 %vm4041_vm3, %v17992_v48 }
 0x4db   : > { %v13623_v57 = vpop.f32.mrf.mxu0 }
 0x4dc   : > { %v13651_v19 = vpop.f32.mrf.mxu1 }
 0x4dd   : > { %v8850_v43 = vpop.f32.mrf.mxu0  ;;  %v8985_v44 = vadd.f32 %v13651_v19, %v13623_v57 }
 0x4de   : > { %v8979_v39 = vpop.f32.mrf.mxu1 }
 0x4df   : > { %v8980_v51 = vadd.f32 %v8979_v39, %v8850_v43 }
 0x4f5   : > { %v13626_v36 = vpop.f32.mrf.mxu0 }
 0x4f6   : > { %v13654_v4 = vpop.f32.mrf.mxu1 }
 0x4f7   : > { %v8860_v35 = vpop.f32.mrf.mxu0  ;;  %v8995_v18 = vadd.f32 %v13654_v4, %v13626_v36 }
 0x4f8   : > { %v8989_v6 = vpop.f32.mrf.mxu1 }
 0x4f9   : > { %v8990_v20 = vadd.f32 %v8989_v6, %v8860_v35 }
 0x512   : > { %v13629_v59 = vpop.f32.mrf.mxu0 }
 0x513   : > { %v13657_v23 = vpop.f32.mrf.mxu1 }
 0x514   : > { %v8870_v1 = vpop.f32.mrf.mxu0  ;;  %v9005_v53 = vadd.f32 %v13657_v23, %v13629_v59 }
 0x515   : > { %v8999_v62 = vpop.f32.mrf.mxu1 }
 0x52d   : > { %v13632_v25 = vpop.f32.mrf.mxu0 }
 0x52e   : > { %v13660_v29 = vpop.f32.mrf.mxu1 }
 0x52f   : > { %v18025_v8 = vpop.f32.mrf.mxu0  ;;  %v9015_v43 = vadd.f32 %v13660_v29, %v13632_v25 }
 0x530   : > { %v9009_v13 = vpop.f32.mrf.mxu1 }
 0x531   : > { %v13679_v56 = vpop.f32.mrf.mxu0  ;;  %v9010_v6 = vadd.f32 %v9009_v13, %v18025_v8 }
 0x532   : > { %v13707_v17 = vpop.f32.mrf.mxu1  ;;  %v9165_v28 = vadd.f32 %v13679_v56, %v8985_v44 }
 0x533   : > { %v9125_v5 = vpop.f32.mrf.mxu0 }
 0x534   : > { %v9279_v34 = vpop.f32.mrf.mxu1  ;;  %v9164_v40 = vadd.f32 %v9125_v5, %v8980_v51  ;;  %v9319_v2 = vadd.f32 %v13707_v17, %v9165_v28 }
 0x536   : > { %v13682_v60 = vpop.f32.mrf.mxu0  ;;  %v9318_v16 = vadd.f32 %v9279_v34, %v9164_v40 }
 0x537   : > { %v13710_v22 = vpop.f32.mrf.mxu1  ;;  %v9167_v48 = vadd.f32 %v13682_v60, %v8995_v18 }
 0x538   : > { %v9135_v54 = vpop.f32.mrf.mxu0 }
 0x539   : > { %v9289_v15 = vpop.f32.mrf.mxu1  ;;  %v9166_v21 = vadd.f32 %v9135_v54, %v8990_v20  ;;  %v9321_v57 = vadd.f32 %v13710_v22, %v9167_v48 }
 0x53b   : > { %v9320_v36 = vadd.f32 %v9289_v15, %v9166_v21 }
 0x53c   : > { %v13685_v33 = vpop.f32.mrf.mxu0 }
 0x53d   : > { %v13713_v3 = vpop.f32.mrf.mxu1 }
 0x53e   : > { %v9145_v27 = vpop.f32.mrf.mxu0 }
 0x53f   : > { %v9299_v26 = vpop.f32.mrf.mxu1 }
 0x542   : > { %v13688_v38 = vpop.f32.mrf.mxu0 }
 0x543   : > { %v13716_v49 = vpop.f32.mrf.mxu1  ;;  %v9171_v59 = vadd.f32 %v13688_v38, %v9015_v43 }
 0x544   : > { %v9155_v41 = vpop.f32.mrf.mxu0 }
 0x545   : > { %v18027_v55 = vpop.f32.mrf.mxu1  ;;  %v9325_v29 = vadd.f32 %v13716_v49, %v9171_v59 }
 0x546   : > { %18712 = vst [vmem:[#allocation55_spill] sm:$0xff] %v18027_v55  ;;  %v9000_v55 = vadd.f32 %v8999_v62, %v8870_v1  ;;  %v9170_v1 = vadd.f32 %v9155_v41, %v9010_v6 }
 0x548   : > { %v13735_v12 = vpop.f32.mrf.mxu0  ;;  %v9168_v39 = vadd.f32 %v9145_v27, %v9000_v55 }
 0x549   : > { %v13763_v47 = vpop.f32.mrf.mxu1 }
 0x54a   : > { %v9433_v52 = vpop.f32.mrf.mxu0  ;;  %v9322_v34 = vadd.f32 %v9299_v26, %v9168_v39  ;;  %v11744_v26 = vld [vmem:[%s18314_s6] ss:$0 sm:$0xff] }
 0x54b   : > { %v9587_v61 = vpop.f32.mrf.mxu1  ;;  %v9472_v19 = vadd.f32 %v9433_v52, %v9318_v16 }
 0x54d   : > { %v9626_v5 = vadd.f32 %v9587_v61, %v9472_v19  ;;  %v18716_v8 = vld [vmem:[#allocation55_spill] sm:$0xff] }
 0x54e   : > { %v13738_v42 = vpop.f32.mrf.mxu0  ;;  %v9324_v13 = vadd.f32 %v18716_v8, %v9170_v1 }
 0x54f   : > { %v13766_v58 = vpop.f32.mrf.mxu1  ;;  %v9475_v35 = vadd.f32 %v13738_v42, %v9321_v57 }
 0x550   : > { %v9443_v46 = vpop.f32.mrf.mxu0 }
 0x551   : > { %v9597_v30 = vpop.f32.mrf.mxu1  ;;  %v9474_v20 = vadd.f32 %v9443_v46, %v9320_v36  ;;  %v9629_v62 = vadd.f32 %v13766_v58, %v9475_v35 }
 0x553   : > { %v9628_v22 = vadd.f32 %v9597_v30, %v9474_v20 }
 0x554   : > { %v13741_v14 = vpop.f32.mrf.mxu0 }
 0x555   : > { %v13769_v10 = vpop.f32.mrf.mxu1 }
 0x556   : > { %v9453_v0 = vpop.f32.mrf.mxu0 }
 0x557   : > { %v18029_v37 = vpop.f32.mrf.mxu1  ;;  %v9476_v60 = vadd.f32 %v9453_v0, %v9322_v34 }
 0x558   : > { %18713 = vst [vmem:[#allocation89_spill] sm:$0xff] %v18029_v37 }
 0x55a   : > { %v13744_v45 = vpop.f32.mrf.mxu0 }
 0x55b   : > { %v18031_v31 = vpop.f32.mrf.mxu1 }
 0x55c   : > { %18714 = vst [vmem:[#allocation19_spill] sm:$0xff] %v18031_v31  ;;  %v9463_v24 = vpop.f32.mrf.mxu0  ;;  %v9473_v31 = vadd.f32 %v13735_v12, %v9319_v2 }
 0x55d   : > { %v18033_v32 = vpop.f32.mrf.mxu1  ;;  %v9478_v52 = vadd.f32 %v9463_v24, %v9324_v13 }
 0x55e   : > { %18715 = vst [vmem:[#allocation17_spill] sm:$0xff] %v18033_v32  ;;  %v9169_v32 = vadd.f32 %v13685_v33, %v9005_v53  ;;  %v9627_v4 = vadd.f32 %v13763_v47, %v9473_v31 }
 0x55f   : > { %v18717_v47 = vld [vmem:[#allocation89_spill] sm:$0xff] }
 0x560   : > { %v13791_v50 = vpop.f32.mrf.mxu0  ;;  %v9323_v17 = vadd.f32 %v13713_v3, %v9169_v32  ;;  %v9479_v3 = vadd.f32 %v13744_v45, %v9325_v29  ;;  %v9630_v49 = vadd.f32 %v18717_v47, %v9476_v60 }
 0x561   : > { %v13819_v7 = vpop.f32.mrf.mxu1  ;;  %v9782_v2 = vadd.f32 %v13791_v50, %v9627_v4 }
 0x562   : > { %v9742_v11 = vpop.f32.mrf.mxu0  ;;  %v9477_v53 = vadd.f32 %v13741_v14, %v9323_v17 }
 0x563   : > { %v9896_v9 = vpop.f32.mrf.mxu1  ;;  %v9781_v25 = vadd.f32 %v9742_v11, %v9626_v5  ;;  %v9936_v54 = vadd.f32 %v13819_v7, %v9782_v2  ;;  %v18718_v30 = vld [vmem:[#allocation19_spill] sm:$0xff] }
 0x564   : > { %v13794_v63 = vpop.f32.mrf.mxu0  ;;  %v9631_v33 = vadd.f32 %v13769_v10, %v9477_v53  ;;  %v9633_v14 = vadd.f32 %v18718_v30, %v9479_v3 }
 0x565   : > { %v13822_v56 = vpop.f32.mrf.mxu1  ;;  %v9784_v15 = vadd.f32 %v13794_v63, %v9629_v62  ;;  %v9935_v41 = vadd.f32 %v9896_v9, %v9781_v25  ;;  %v18719_v9 = vld [vmem:[#allocation17_spill] sm:$0xff]  ;;  %v18050_v62 = vld [vmem:[%s18315_s7 + $0x4] ss:$0 sm:$0xff] }
 0x566   : > { %v9752_v37 = vpop.f32.mrf.mxu0 }
 0x567   : > { %v9906_v48 = vpop.f32.mrf.mxu1  ;;  %v9783_v55 = vadd.f32 %v9752_v37, %v9628_v22  ;;  %v9938_v58 = vadd.f32 %v13822_v56, %v9784_v15  ;;  %v9632_v37 = vadd.f32 %v18719_v9, %v9478_v52  ;;  %v18721_v15 = vld [vmem:[#allocation88_spill] sm:$0xff] }
 0x568   : > { %v13797_v44 = vpop.f32.mrf.mxu0 }
 0x569   : > { %v13825_v27 = vpop.f32.mrf.mxu1  ;;  %v9786_v61 = vadd.f32 %v13797_v44, %v9631_v33  ;;  %v9937_v31 = vadd.f32 %v9906_v48, %v9783_v55 }
 0x56a   : > { %v9762_v23 = vpop.f32.mrf.mxu0 }
 0x56b   : > { %v9785_v10 = vadd.f32 %v9762_v23, %v9630_v49  ;;  %v9916_v0 = vpop.f32.mrf.mxu1  ;;  %v9940_v28 = vadd.f32 %v13825_v27, %v9786_v61  ;;  %v18723_v61 = vld [vmem:[#allocation33_spill] sm:$0xff] }
 0x56c   : > { %v13800_v16 = vpop.f32.mrf.mxu0 }
 0x56d   : > { %v13828_v7 = vpop.f32.mrf.mxu1  ;;  %v9788_v24 = vadd.f32 %v13800_v16, %v9633_v14  ;;  %v9939_v19 = vadd.f32 %v9916_v0, %v9785_v10 }
 0x56e   : > { %v9772_v21 = vpop.f32.mrf.mxu0 }
 0x56f   : > { %v9787_v39 = vadd.f32 %v9772_v21, %v9632_v37  ;;  %v9926_v4 = vpop.f32.mrf.mxu1  ;;  %v9942_v6 = vadd.f32 %v13828_v7, %v9788_v24  ;;  %v18720_v21 = vld [vmem:[#allocation102_spill] sm:$0xff] }
 0x571   : > { %v9941_v20 = vadd.f32 %v9926_v4, %v9787_v39 }
 0x572   : > { %v13847_v38 = vpop.f32.mrf.mxu0 }
 0x573   : > { %v10090_v12 = vadd.f32 %v13847_v38, %v9936_v54 }
 0x574   : > { %v10050_v42 = vpop.f32.mrf.mxu0 }
 0x575   : > { %v10105_v63 = vadd.f32 %v11744_v26, %v10090_v12  ;;  %v10089_v46 = vadd.f32 %v10050_v42, %v9935_v41  ;;  %v18722_v41 = vld [vmem:[#allocation44_spill] sm:$0xff] }
 0x576   : > { %v13850_v45 = vpop.f32.mrf.mxu0  ;;  %v18063_v12 = vld [vmem:[%s18315_s7 + $0x5] ss:$0 sm:$0xff] }
 0x577   : > { %v10113_v32 = vmax.f32 %v10105_v63, 0.0  ;;  %v10104_v50 = vadd.f32 %v11744_v26, %v10089_v46  ;;  %v10092_v51 = vadd.f32 %v13850_v45, %v9938_v58  ;;  %v18074_v58 = vld [vmem:[%s18315_s7 + $0x6] ss:$0 sm:$0xff]  ;;  %v18079_v63 = vld [vmem:[%s18315_s7 + $0x9] ss:$0 sm:$0xff] }
 0x578   : > { %v10060_v11 = vpop.f32.mrf.mxu0  ;;  %v18088_v45 = vld [vmem:[%s18315_s7 + $0xa] ss:$0 sm:$0xff] }
 0x579   : > { %10121 = vst.msk [vmem:[#allocation4 + $0x21] sm:$0xff] %vm4041_vm3, %v10113_v32  ;;  %v10112_v18 = vmax.f32 %v10104_v50, 0.0  ;;  %v10107_v40 = vadd.f32 %v11744_v26, %v10092_v51  ;;  %v10091_v57 = vadd.f32 %v10060_v11, %v9937_v31 }
 0x57a   : > { %v13853_v43 = vpop.f32.mrf.mxu0 }
 0x57b   : > { %10120 = vst.msk [vmem:[#allocation4 + $0x11] sm:$0xff] %vm4041_vm3, %v10112_v18  ;;  %v10115_v56 = vmax.f32 %v10107_v40, 0.0  ;;  %v10106_v44 = vadd.f32 %v11744_v26, %v10091_v57  ;;  %v10094_v36 = vadd.f32 %v13853_v43, %v9940_v28 }
 0x57c   : > { %v10070_v35 = vpop.f32.mrf.mxu0 }
 0x57d   : > { %10123 = vst.msk [vmem:[#allocation4 + $0x41] sm:$0xff] %vm4041_vm3, %v10115_v56  ;;  %v10114_v17 = vmax.f32 %v10106_v44, 0.0  ;;  %v10109_v59 = vadd.f32 %v11744_v26, %v10094_v36  ;;  %v10093_v23 = vadd.f32 %v10070_v35, %v9939_v19 }
 0x57e   : > { %v13856_v5 = vpop.f32.mrf.mxu0 }
 0x57f   : > { %10122 = vst.msk [vmem:[#allocation4 + $0x31] sm:$0xff] %vm4041_vm3, %v10114_v17  ;;  %v10117_v2 = vmax.f32 %v10109_v59, 0.0  ;;  %v10108_v34 = vadd.f32 %v11744_v26, %v10093_v23  ;;  %v10096_v1 = vadd.f32 %v13856_v5, %v9942_v6  ;;  %v10204_v17 = vpop.xlane.xlu1 %10203 }
 0x580   : > { %v10080_v53 = vpop.f32.mrf.mxu0  ;;  %v10183_v48 = vld [vmem:[#allocation4 + $0x21] sm:$0xff] }
 0x581   : > { %v10130_v16 = vld [vmem:[#allocation4 + $0x20] sm:$0xff]  ;;  %10125 = vst.msk [vmem:[#allocation4 + $0x61] sm:$0xff] %vm4041_vm3, %v10117_v2  ;;  %v10116_v25 = vmax.f32 %v10108_v34, 0.0  ;;  %v10111_v29 = vadd.f32 %v11744_v26, %v10096_v1  ;;  %v10095_v60 = vadd.f32 %v10080_v53, %v9941_v20  ;;  %v10196_v22 = vmul.f32 %v18720_v21, %v10183_v48  ;;  %v10151_v20 = vpop.xlane.xlu0 %10150 }
 0x582   : > { %v10236_v54 = vld [vmem:[#allocation4 + $0x22] sm:$0xff]  ;;  %v10143_v8 = vmul.f32 %v18721_v15, %v10130_v16  ;;  %v10302_v27 = vmul.f32 %v18050_v62, %v10130_v16  ;;  %v10355_v49 = vmul.f32 %v18063_v12, %v10183_v48  ;;  %v10461_v42 = vmul.f32 %v18723_v61, %v10130_v16  ;;  %v10182_v0 = vld [vmem:[#allocation4 + $0x11] sm:$0xff] }
 0x583   : > { %10124 = vst.msk [vmem:[#allocation4 + $0x51] sm:$0xff] %vm4041_vm3, %v10116_v25  ;;  %v10119_v13 = vmax.f32 %v10111_v29, 0.0  ;;  %v10110_v33 = vadd.f32 %v11744_v26, %v10095_v60  ;;  %v10208_v3 = vsel %vm4041_vm3, %v10196_v22, 0.0  ;;  %v10249_v55 = vmul.f32 %v18722_v41, %v10236_v54  ;;  %v10235_v9 = vld [vmem:[#allocation4 + $0x12] sm:$0xff] }
 0x584   : > { %10209 = vadd.xlane.f32.xlu1 %v10208_v3  ;;  %v10155_v38 = vsel %vm4041_vm3, %v10143_v8, 0.0  ;;  %v10312_v26 = vsel %vm4041_vm3, %v10302_v27, 0.0  ;;  %v10365_v46 = vsel %vm4041_vm3, %v10355_v49, 0.0  ;;  %v10408_v30 = vmul.f32 %v18074_v58, %v10236_v54  ;;  %v10129_v37 = vld [vmem:[#allocation4 + $0x10] sm:$0xff]  ;;  %v10185_v18 = vld [vmem:[#allocation4 + $0x41] sm:$0xff] }
 0x585   : > { %10127 = vst.msk [vmem:[#allocation4 + $0x81] sm:$0xff] %vm4041_vm3, %v10119_v13  ;;  %v10118_v47 = vmax.f32 %v10110_v33, 0.0  ;;  %10156 = vadd.xlane.f32.xlu0 %v10155_v38  ;;  %v10261_v52 = vsel %vm4041_vm3, %v10249_v55, 0.0  ;;  %v10469_v14 = vsel %vm4041_vm3, %v10461_v42, 0.0  ;;  %v10514_v10 = vmul.f32 %v18079_v63, %v10183_v48  ;;  %v10290_v39 = vld [vmem:[#allocation4 + $0x40] sm:$0xff] }
 0x586   : > { %v10418_v31 = vsel %vm4041_vm3, %v10408_v30, 0.0  ;;  %v10195_v32 = vmul.f32 %v18720_v21, %v10182_v0  ;;  %v10567_v51 = vmul.f32 %v18088_v45, %v10236_v54  ;;  %v10248_v7 = vmul.f32 %v18722_v41, %v10235_v9  ;;  %v10397_v5 = vld [vmem:[#allocation4 + $0x42] sm:$0xff]  ;;  %v10184_v16 = vld [vmem:[#allocation4 + $0x31] sm:$0xff] }
 0x587   : > { %10126 = vst.msk [vmem:[#allocation4 + $0x71] sm:$0xff] %vm4041_vm3, %v10118_v47  ;;  %v10522_v50 = vsel %vm4041_vm3, %v10514_v10, 0.0  ;;  %v10142_v24 = vmul.f32 %v18721_v15, %v10129_v37  ;;  %v10198_v57 = vmul.f32 %v18720_v21, %v10185_v18  ;;  %v10301_v43 = vmul.f32 %v18050_v62, %v10129_v37  ;;  %v10237_v8 = vld [vmem:[#allocation4 + $0x32] sm:$0xff] }
 0x588   : > { %10313 = vadd.xlane.f32.xlu1 %v10312_v26  ;;  %v10205_v28 = vsel %vm4041_vm3, %v10195_v32, 0.0  ;;  %v10575_v11 = vsel %vm4041_vm3, %v10567_v51, 0.0  ;;  %v10258_v40 = vsel %vm4041_vm3, %v10248_v7, 0.0  ;;  %v10304_v44 = vmul.f32 %v18050_v62, %v10290_v39  ;;  %v10289_v38 = vld [vmem:[#allocation4 + $0x30] sm:$0xff]  ;;  %v10187_v37 = vld [vmem:[#allocation4 + $0x61] sm:$0xff] }
 0x589   : > { %10262 = vadd.xlane.f32.xlu0 %v10261_v52  ;;  %v10152_v19 = vsel %vm4041_vm3, %v10142_v24, 0.0  ;;  %v10214_v56 = vsel %vm4041_vm3, %v10198_v57, 0.0  ;;  %v10309_v36 = vsel %vm4041_vm3, %v10301_v43, 0.0  ;;  %v10354_v4 = vmul.f32 %v18063_v12, %v10182_v0 }
 0x58a   : > { %v10318_v35 = vsel %vm4041_vm3, %v10304_v44, 0.0  ;;  %v10357_v6 = vmul.f32 %v18063_v12, %v10185_v18  ;;  %v10407_v23 = vmul.f32 %v18074_v58, %v10235_v9  ;;  %v18110_v2 = vadd.f32 %v10204_v17, %v10151_v20 }
 0x58b   : > { %v10362_v59 = vsel %vm4041_vm3, %v10354_v4, 0.0  ;;  %v10410_v1 = vmul.f32 %v18074_v58, %v10397_v5  ;;  %v10145_v48 = vmul.f32 %v18721_v15, %v10290_v39  ;;  %v14025_v25 = vmov 0  }
 0x58c   : > { %10366 = vadd.xlane.f32.xlu1 %v10365_v46  ;;  %v10371_v34 = vsel %vm4041_vm3, %v10357_v6, 0.0  ;;  %v10415_v53 = vsel %vm4041_vm3, %v10407_v23, 0.0  ;;  %13926 = vset.pattern.permute.xlu0 %v14025_v25  ;;  %v10197_v60 = vmul.f32 %v18720_v21, %v10184_v16  ;;  %v10251_v54 = vmul.f32 %v18722_v41, %v10397_v5 }
 0x58d   : > { %10470 = vadd.xlane.f32.xlu0 %v10469_v14  ;;  %v10424_v29 = vsel %vm4041_vm3, %v10410_v1, 0.0  ;;  %v10161_v22 = vsel %vm4041_vm3, %v10145_v48, 0.0  ;;  %v10250_v33 = vmul.f32 %v18722_v41, %v10237_v8  ;;  %v10463_v27 = vmul.f32 %v18723_v61, %v10290_v39  ;;  %v18148_v39 = vld [vmem:[#allocation4 + $0x62] sm:$0xff] }
 0x58e   : > { %v10211_v13 = vsel %vm4041_vm3, %v10197_v60, 0.0  ;;  %v10267_v3 = vsel %vm4041_vm3, %v10251_v54, 0.0  ;;  %v10303_v47 = vmul.f32 %v18050_v62, %v10289_v38  ;;  %v10516_v49 = vmul.f32 %v18079_v63, %v10185_v18  ;;  %v10451_v18 = vld [vmem:[#allocation4 + $0x60] sm:$0xff]  ;;  %v10398_v60 = vld [vmem:[#allocation4 + $0x52] sm:$0xff] }
 0x58f   : > { %v10264_v55 = vsel %vm4041_vm3, %v10250_v33, 0.0  ;;  %v10475_v26 = vsel %vm4041_vm3, %v10463_v27, 0.0  ;;  %v10462_v42 = vmul.f32 %v18723_v61, %v10289_v38  ;;  %v10569_v30 = vmul.f32 %v18088_v45, %v10397_v5 }
 0x590   : > { %10419 = vadd.xlane.f32.xlu1 %v10418_v31  ;;  %v10315_v52 = vsel %vm4041_vm3, %v10303_v47, 0.0  ;;  %v10528_v46 = vsel %vm4041_vm3, %v10516_v49, 0.0  ;;  %v10515_v10 = vmul.f32 %v18079_v63, %v10184_v16  ;;  %v10144_v31 = vmul.f32 %v18721_v15, %v10289_v38 }
 0x591   : > { %10523 = vadd.xlane.f32.xlu0 %v10522_v50  ;;  %v10472_v14 = vsel %vm4041_vm3, %v10462_v42, 0.0  ;;  %v10581_v0 = vsel %vm4041_vm3, %v10569_v30, 0.0  ;;  %v10568_v50 = vmul.f32 %v18088_v45, %v10237_v8  ;;  %v10356_v9 = vmul.f32 %v18063_v12, %v10184_v16  ;;  %v10507_v42 = vld [vmem:[#allocation4 + $0x81] sm:$0xff] }
 0x592   : > { %v10525_v32 = vsel %vm4041_vm3, %v10515_v10, 0.0  ;;  %v10158_v51 = vsel %vm4041_vm3, %v10144_v31, 0.0  ;;  %v10200_v7 = vmul.f32 %v18720_v21, %v10187_v37  ;;  %v10409_v24 = vmul.f32 %v18074_v58, %v10237_v8 }
 0x593   : > { %v10465_v57 = vmul.f32 %v18723_v61, %v10451_v18  ;;  %v10147_v43 = vmul.f32 %v18721_v15, %v10451_v18  ;;  %v10518_v44 = vmul.f32 %v18079_v63, %v10187_v37  ;;  %v10253_v4 = vmul.f32 %v18722_v41, %v18148_v39 }
 0x594   : > { %10206 = vadd.xlane.f32.xlu1 %v10205_v28  ;;  %v10578_v28 = vsel %vm4041_vm3, %v10568_v50, 0.0  ;;  %v10306_v23 = vmul.f32 %v18050_v62, %v10451_v18  ;;  %v10359_v1 = vmul.f32 %v18063_v12, %v10187_v37  ;;  %v10411_v54 = vmul.f32 %v18074_v58, %v10398_v60 }
 0x595   : > { %10576 = vadd.xlane.f32.xlu0 %v10575_v11  ;;  %v10368_v11 = vsel %vm4041_vm3, %v10356_v9, 0.0  ;;  %v10534_v6 = vsel %vm4041_vm3, %v10518_v44, 0.0  ;;  %v10252_v38 = vmul.f32 %v18722_v41, %v10398_v60  ;;  %v10570_v30 = vmul.f32 %v18088_v45, %v10398_v60  ;;  %v18724_v9 = vld [vmem:[#allocation22_spill] sm:$0xff] }
 0x596   : > { %v10377_v25 = vsel %vm4041_vm3, %v10359_v1, 0.0  ;;  %v10427_v33 = vsel %vm4041_vm3, %v10411_v54, 0.0  ;;  %v10520_v10 = vmul.f32 %v18079_v63, %v10507_v42  ;;  %v10521_v37 = vmul.f32 %v18079_v63, %v18724_v9  ;;  %v18725_v1 = vld [vmem:[#allocation53_spill] sm:$0xff] }
 0x597   : > { %v10270_v49 = vsel %vm4041_vm3, %v10252_v38, 0.0  ;;  %v10584_v31 = vsel %vm4041_vm3, %v10570_v30, 0.0  ;;  %v11760_v38 = vld [vmem:[#allocation5] ss:$0 sm:$0xff] }
 0x598   : > { %10259 = vadd.xlane.f32.xlu1 %v10258_v40  ;;  %v10220_v40 = vsel %vm4041_vm3, %v10200_v7, 0.0  ;;  %v10540_v50 = vsel %vm4041_vm3, %v10520_v10, 0.0  ;;  %v10361_v7 = vmul.f32 %v18063_v12, %v10507_v42  ;;  %v10543_v18 = vsel %vm4041_vm3, %v10521_v37, 0.0 }
 0x599   : > { %10153 = vadd.xlane.f32.xlu0 %v10152_v19  ;;  %v10421_v19 = vsel %vm4041_vm3, %v10409_v24, 0.0  ;;  %v10401_v24 = vld [vmem:[#allocation4 + $0x82] sm:$0xff] }
 0x59c   : > { %10215 = vadd.xlane.f32.xlu1 %v10214_v56  ;;  %v10481_v56 = vsel %vm4041_vm3, %v10465_v57, 0.0  ;;  %v10414_v57 = vmul.f32 %v18074_v58, %v10401_v24 }
 0x59d   : > { %10310 = vadd.xlane.f32.xlu0 %v10309_v36  ;;  %v10167_v36 = vsel %vm4041_vm3, %v10147_v43, 0.0 }
 0x59e   : > { %v10436_v43 = vsel %vm4041_vm3, %v10414_v57, 0.0 }
 0x5a0   : > { %10319 = vadd.xlane.f32.xlu1 %v10318_v35  ;;  %v10133_v35 = vld [vmem:[#allocation4 + $0x50] sm:$0xff] }
 0x5a1   : > { %10363 = vadd.xlane.f32.xlu0 %v10362_v59  ;;  %v10146_v17 = vmul.f32 %v18721_v15, %v10133_v35  ;;  %v10273_v59 = vsel %vm4041_vm3, %v10253_v4, 0.0  ;;  %v10305_v20 = vmul.f32 %v18050_v62, %v10133_v35  ;;  %v10241_v4 = vld [vmem:[#allocation4 + $0x72] sm:$0xff] }
 0x5a3   : > { %v10164_v5 = vsel %vm4041_vm3, %v10146_v17, 0.0  ;;  %v10321_v48 = vsel %vm4041_vm3, %v10305_v20, 0.0 }
 0x5a4   : > { %10372 = vadd.xlane.f32.xlu1 %v10371_v34  ;;  %v10324_v34 = vsel %vm4041_vm3, %v10306_v23, 0.0 }
 0x5a5   : > { %10416 = vadd.xlane.f32.xlu0 %v10415_v53  ;;  %v10345_v53 = vld [vmem:[#allocation4 + $0x51] sm:$0xff] }
 0x5a6   : > { %v10358_v16 = vmul.f32 %v18063_v12, %v10345_v53 }
 0x5a8   : > { %10425 = vadd.xlane.f32.xlu1 %v10424_v29  ;;  %v10412_v29 = vmul.f32 %v18074_v58, %v18148_v39 }
 0x5a9   : > { %10162 = vadd.xlane.f32.xlu0 %v10161_v22  ;;  %v10374_v22 = vsel %vm4041_vm3, %v10358_v16, 0.0 }
 0x5aa   : > { %v10430_v8 = vsel %vm4041_vm3, %v10412_v29, 0.0 }
 0x5ac   : > { %10212 = vadd.xlane.f32.xlu1 %v10211_v13  ;;  %v10199_v13 = vmul.f32 %v18720_v21, %v10345_v53 }
 0x5ad   : > { %10268 = vadd.xlane.f32.xlu0 %v10267_v3  ;;  %v10464_v3 = vmul.f32 %v18723_v61, %v10133_v35 }
 0x5ae   : > { %v10217_v27 = vsel %vm4041_vm3, %v10199_v13, 0.0 }
 0x5af   : > { %v10478_v47 = vsel %vm4041_vm3, %v10464_v3, 0.0 }
 0x5b0   : > { %10265 = vadd.xlane.f32.xlu1 %v10264_v55  ;;  %v10453_v55 = vld [vmem:[#allocation4 + $0x80] sm:$0xff] }
 0x5b1   : > { %10476 = vadd.xlane.f32.xlu0 %v10475_v26  ;;  %v10517_v26 = vmul.f32 %v18079_v63, %v10345_v53  ;;  %v10574_v53 = vmul.f32 %v18088_v45, %v18725_v1 }
 0x5b3   : > { %v10596_v16 = vsel %vm4041_vm3, %v10574_v53, 0.0 }
 0x5b4   : > { %10316 = vadd.xlane.f32.xlu1 %v10315_v52  ;;  %v10467_v52 = vmul.f32 %v18723_v61, %v10453_v55 }
 0x5b5   : > { %10529 = vadd.xlane.f32.xlu0 %v10528_v46  ;;  %v10531_v46 = vsel %vm4041_vm3, %v10517_v26, 0.0 }
 0x5b8   : > { %10473 = vadd.xlane.f32.xlu1 %v10472_v14  ;;  %v10487_v14 = vsel %vm4041_vm3, %v10467_v52, 0.0 }
 0x5b9   : > { %10582 = vadd.xlane.f32.xlu0 %v10581_v0  ;;  %v10135_v0 = vld [vmem:[#allocation4 + $0x70] sm:$0xff] }
 0x5bc   : > { %10526 = vadd.xlane.f32.xlu1 %v10525_v32  ;;  %v10308_v32 = vmul.f32 %v18050_v62, %v10453_v55 }
 0x5bd   : > { %10159 = vadd.xlane.f32.xlu0 %v10158_v51  ;;  %v10148_v51 = vmul.f32 %v18721_v15, %v10135_v0  ;;  %v10573_v15 = vmul.f32 %v18088_v45, %v10401_v24 }
 0x5bf   : > { %v10593_v44 = vsel %vm4041_vm3, %v10573_v15, 0.0 }
 0x5c0   : > { %10579 = vadd.xlane.f32.xlu1 %v10578_v28  ;;  %v10330_v28 = vsel %vm4041_vm3, %v10308_v32, 0.0 }
 0x5c1   : > { %10369 = vadd.xlane.f32.xlu0 %v10368_v11  ;;  %v10170_v11 = vsel %vm4041_vm3, %v10148_v51, 0.0 }
 0x5c4   : > { %10221 = vadd.xlane.f32.xlu1 %v10220_v40  ;;  %v10383_v40 = vsel %vm4041_vm3, %v10361_v7, 0.0 }
 0x5c5   : > { %10422 = vadd.xlane.f32.xlu0 %v10421_v19  ;;  %v10188_v19 = vld [vmem:[#allocation4 + $0x71] sm:$0xff] }
 0x5c8   : > { %10482 = vadd.xlane.f32.xlu1 %v10481_v56  ;;  %v10201_v56 = vmul.f32 %v18720_v21, %v10188_v19  ;;  %v10571_v21 = vmul.f32 %v18088_v45, %v18148_v39 }
 0x5c9   : > { %10168 = vadd.xlane.f32.xlu0 %v10167_v36  ;;  %v10307_v36 = vmul.f32 %v18050_v62, %v10135_v0 }
 0x5ca   : > { %v10223_v35 = vsel %vm4041_vm3, %v10201_v56, 0.0  ;;  %v10587_v20 = vsel %vm4041_vm3, %v10571_v21, 0.0 }
 0x5cb   : > { %v10327_v17 = vsel %vm4041_vm3, %v10307_v36, 0.0 }
 0x5cc   : > { %10535 = vadd.xlane.f32.xlu1 %v10534_v6  ;;  %v10254_v6 = vmul.f32 %v18722_v41, %v10241_v4  ;;  %v10572_v41 = vmul.f32 %v18088_v45, %v10241_v4 }
 0x5cd   : > { %10274 = vadd.xlane.f32.xlu0 %v10273_v59  ;;  %v10360_v59 = vmul.f32 %v18063_v12, %v10188_v19  ;;  %v10466_v12 = vmul.f32 %v18723_v61, %v10135_v0  ;;  %v10257_v61 = vpop.xlane.xlu0 %10256 }
 0x5ce   : > { %v10276_v23 = vsel %vm4041_vm3, %v10254_v6, 0.0  ;;  %v10590_v39 = vsel %vm4041_vm3, %v10572_v41, 0.0  ;;  %v10279_v42 = vadd.f32 %v10257_v61, %v18110_v2 }
 0x5cf   : > { %v10380_v62 = vsel %vm4041_vm3, %v10360_v59, 0.0 }
 0x5d0   : > { %10165 = vadd.xlane.f32.xlu1 %v10164_v5  ;;  %v10413_v5 = vmul.f32 %v18074_v58, %v10241_v4  ;;  %v10519_v58 = vmul.f32 %v18079_v63, %v10188_v19 }
 0x5d1   : > { %10325 = vadd.xlane.f32.xlu0 %v10324_v34 }
 0x5d2   : > { %v10433_v34 = vsel %vm4041_vm3, %v10413_v5, 0.0  ;;  %v10537_v29 = vsel %vm4041_vm3, %v10519_v58, 0.0 }
 0x5d4   : > { %10322 = vadd.xlane.f32.xlu1 %v10321_v48  ;;  %v10484_v48 = vsel %vm4041_vm3, %v10466_v12, 0.0 }
 0x5d5   : > { %10378 = vadd.xlane.f32.xlu0 %v10377_v25  ;;  %v18220_v25 = vpop.xlane.xlu1 %10491 }
 0x5d8   : > { %10375 = vadd.xlane.f32.xlu1 %v10374_v22 }
 0x5d9   : > { %10431 = vadd.xlane.f32.xlu0 %v10430_v8 }
 0x5dc   : > { %10428 = vadd.xlane.f32.xlu1 %v10427_v33 }
 0x5dd   : > { %10218 = vadd.xlane.f32.xlu0 %v10217_v27 }
 0x5e0   : > { %10479 = vadd.xlane.f32.xlu1 %v10478_v47 }
 0x5e1   : > { %10271 = vadd.xlane.f32.xlu0 %v10270_v49 }
 0x5e4   : > { %10532 = vadd.xlane.f32.xlu1 %v10531_v46 }
 0x5e5   : > { %10488 = vadd.xlane.f32.xlu0 %v10487_v14 }
 0x5e8   : > { %10585 = vadd.xlane.f32.xlu1 %v10584_v31 }
 0x5e9   : > { %10541 = vadd.xlane.f32.xlu0 %v10540_v50  ;;  %v10633_v50 = vld [vmem:[%s18317_s9] sm:$0xff] }
 0x5ea   : > { %13859 = vmatprep.mubr.msk.f32.mxu1 %vm10685_vm12, %v10633_v50 }
 0x5ec   : > { %10331 = vadd.xlane.f32.xlu1 %v10330_v28 }
 0x5ed   : > { %10171 = vadd.xlane.f32.xlu0 %v10170_v11 }
 0x5f0   : > { %10384 = vadd.xlane.f32.xlu1 %v10383_v40 }
 0x5f1   : > { %10544 = vadd.xlane.f32.xlu0 %v10543_v18 }
 0x5f4   : > { %10437 = vadd.xlane.f32.xlu1 %v10436_v43 }
 0x5f5   : > { %10594 = vadd.xlane.f32.xlu0 %v10593_v44 }
 0x5f8   : > { %10224 = vadd.xlane.f32.xlu1 %v10223_v35 }
 0x5f9   : > { %10328 = vadd.xlane.f32.xlu0 %v10327_v17 }
 0x5fc   : > { %10277 = vadd.xlane.f32.xlu1 %v10276_v23 }
 0x5fd   : > { %10381 = vadd.xlane.f32.xlu0 %v10380_v62 }
 0x600   : > { %10588 = vadd.xlane.f32.xlu1 %v10587_v20 }
 0x601   : > { %10434 = vadd.xlane.f32.xlu0 %v10433_v34 }
 0x604   : > { %10591 = vadd.xlane.f32.xlu1 %v10590_v39 }
 0x605   : > { %10485 = vadd.xlane.f32.xlu0 %v10484_v48 }
 0x608   : > { %10597 = vadd.xlane.f32.xlu1 %v10596_v16 }
 0x609   : > { %10538 = vadd.xlane.f32.xlu0 %v10537_v29 }
 0x60d   : > { %v10210_v60 = vpop.xlane.xlu1 %10209 }
 0x60e   : > { %v10157_v22 = vpop.xlane.xlu0 %10156 }
 0x60f   : > { %v10228_v45 = vadd.f32 %v10210_v60, %v10157_v22 }
 0x611   : > { %v10314_v54 = vpop.xlane.xlu1 %10313 }
 0x612   : > { %v10263_v8 = vpop.xlane.xlu0 %10262 }
 0x613   : > { %v10281_v13 = vadd.f32 %v10263_v8, %v10228_v45 }
 0x615   : > { %v10367_v33 = vpop.xlane.xlu1 %10366 }
 0x616   : > { %v10471_v3 = vpop.xlane.xlu0 %10470 }
 0x619   : > { %v10420_v27 = vpop.xlane.xlu1 %10419 }
 0x61a   : > { %v10524_v63 = vpop.xlane.xlu0 %10523 }
 0x61d   : > { %v10207_v55 = vpop.xlane.xlu1 %10206 }
 0x61e   : > { %v10577_v47 = vpop.xlane.xlu0 %10576 }
 0x61f   : > { %10614 = vperm.xlu0 %13926, %v11760_v38  }
 0x621   : > { %v10260_v26 = vpop.xlane.xlu1 %10259 }
 0x622   : > { %v10154_v49 = vpop.xlane.xlu0 %10153 }
 0x623   : > { %v10227_v52 = vadd.f32 %v10207_v55, %v10154_v49 }
 0x625   : > { %v10280_v46 = vadd.f32 %v10260_v26, %v10227_v52  ;;  %v10216_v30 = vpop.xlane.xlu1 %10215 }
 0x626   : > { %v10311_v14 = vpop.xlane.xlu0 %10310 }
 0x627   : > { %v10334_v10 = vadd.f32 %v10314_v54, %v10280_v46  ;;  %v10333_v0 = vadd.f32 %v10311_v14, %v10279_v42 }
 0x629   : > { %v10320_v31 = vpop.xlane.xlu1 %10319  ;;  %v10387_v32 = vadd.f32 %v10367_v33, %v10334_v10 }
 0x62a   : > { %v10364_v51 = vpop.xlane.xlu0 %10363 }
 0x62b   : > { %v10386_v9 = vadd.f32 %v10364_v51, %v10333_v0  ;;  %v10440_v37 = vadd.f32 %v10420_v27, %v10387_v32 }
 0x62d   : > { %v10373_v28 = vpop.xlane.xlu1 %10372 }
 0x62e   : > { %v10417_v7 = vpop.xlane.xlu0 %10416 }
 0x62f   : > { %v10439_v2 = vadd.f32 %v10417_v7, %v10386_v9 }
 0x631   : > { %v10493_v11 = vadd.f32 %v10471_v3, %v10439_v2  ;;  %v10426_v24 = vpop.xlane.xlu1 %10425 }
 0x632   : > { %v10163_v18 = vpop.xlane.xlu0 %10162 }
 0x633   : > { %v10546_v40 = vadd.f32 %v10524_v63, %v10493_v11  ;;  %v10230_v57 = vadd.f32 %v10216_v30, %v10163_v18 }
 0x635   : > { %v18228_v15 = vadd.f32 %v10577_v47, %v10546_v40  ;;  %v10213_v19 = vpop.xlane.xlu1 %10212 }
 0x636   : > { %v10269_v43 = vpop.xlane.xlu0 %10268 }
 0x637   : > { %v18230_v56 = vadd.f32 %v10269_v43, %v10230_v57 }
 0x639   : > { %v10266_v44 = vpop.xlane.xlu1 %10265 }
 0x63a   : > { %v10477_v36 = vpop.xlane.xlu0 %10476 }
 0x63d   : > { %v10317_v4 = vpop.xlane.xlu1 %10316 }
 0x63e   : > { %v10335_v35 = vadd.f32 %v10317_v4, %v10281_v13  ;;  %v10530_v6 = vpop.xlane.xlu0 %10529 }
 0x641   : > { %v10474_v17 = vpop.xlane.xlu1 %10473 }
 0x642   : > { %v10494_v59 = vadd.f32 %v10474_v17, %v10440_v37  ;;  %v10583_v23 = vpop.xlane.xlu0 %10582 }
 0x645   : > { %v10527_v21 = vpop.xlane.xlu1 %10526 }
 0x646   : > { %v10547_v62 = vadd.f32 %v10527_v21, %v10494_v59  ;;  %v10160_v5 = vpop.xlane.xlu0 %10159 }
 0x647   : > { %v10229_v20 = vadd.f32 %v10213_v19, %v10160_v5 }
 0x649   : > { %v10282_v41 = vadd.f32 %v10266_v44, %v10229_v20  ;;  %v10580_v34 = vpop.xlane.xlu1 %10579 }
 0x64a   : > { %v18232_v12 = vadd.f32 %v10580_v34, %v10547_v62  ;;  %v10370_v1 = vpop.xlane.xlu0 %10369 }
 0x64b   : > { %v10336_v53 = vadd.f32 %v10320_v31, %v10282_v41  ;;  %v10388_v39 = vadd.f32 %v10370_v1, %v10335_v35 }
 0x64d   : > { %v10222_v48 = vpop.xlane.xlu1 %10221  ;;  %v10389_v58 = vadd.f32 %v10373_v28, %v10336_v53 }
 0x64e   : > { %v10423_v16 = vpop.xlane.xlu0 %10422 }
 0x64f   : > { %v10441_v29 = vadd.f32 %v10423_v16, %v10388_v39  ;;  %v10442_v61 = vadd.f32 %v10426_v24, %v10389_v58 }
 0x651   : > { %v10495_v60 = vadd.f32 %v10477_v36, %v10441_v29  ;;  %v10483_v22 = vpop.xlane.xlu1 %10482 }
 0x652   : > { %v10169_v45 = vpop.xlane.xlu0 %10168 }
 0x653   : > { %v10548_v54 = vadd.f32 %v10530_v6, %v10495_v60  ;;  %v10232_v24 = vadd.f32 %v10222_v48, %v10169_v45  ;;  %v18726_v60 = vlaneseq }
 0x655   : > { %v18234_v8 = vadd.f32 %v10583_v23, %v10548_v54  ;;  %v10536_v13 = vpop.xlane.xlu1 %10535  ;;  %v10644_v45 = vand.u32 127, %v18726_v60 }
 0x656   : > { %v10275_v33 = vpop.xlane.xlu0 %10274 }
 0x657   : > { %v10285_v19 = vadd.f32 %v10275_v33, %v10232_v24 }
 0x659   : > { %v10166_v3 = vpop.xlane.xlu1 %10165 }
 0x65a   : > { %v10326_v27 = vpop.xlane.xlu0 %10325 }
 0x65d   : > { %v10323_v63 = vpop.xlane.xlu1 %10322 }
 0x65e   : > { %v10379_v38 = vpop.xlane.xlu0 %10378  ;;  %v10337_v17 = vadd.f32 %v10323_v63, %v18230_v56 }
 0x661   : > { %v10376_v55 = vpop.xlane.xlu1 %10375 }
 0x662   : > { %v10432_v47 = vpop.xlane.xlu0 %10431  ;;  %v10390_v23 = vadd.f32 %v10376_v55, %v10337_v17  ;;  %v18727_v55 = vld [vmem:[#allocation16_spill] sm:$0xff] }
 0x663   : > { %v10767_v17 = vld [vmem:[%s18318_s10] sm:$0xff] }
 0x665   : > { %v10429_v26 = vpop.xlane.xlu1 %10428 }
 0x666   : > { %v10219_v49 = vpop.xlane.xlu0 %10218  ;;  %v10443_v41 = vadd.f32 %v10429_v26, %v10390_v23  ;;  %v10647_v26 = vsub.s32 %v10644_v45, %v18727_v55 }
 0x667   : > { %v10231_v7 = vadd.f32 %v10219_v49, %v10166_v3 }
 0x668   : > { %v10497_v58 = vadd.f32 %v10483_v22, %v10443_v41 }
 0x669   : > { %v10480_v52 = vpop.xlane.xlu1 %10479 }
 0x66a   : > { %v10272_v42 = vpop.xlane.xlu0 %10271  ;;  %v10496_v29 = vadd.f32 %v10480_v52, %v10442_v61  ;;  %v10550_v63 = vadd.f32 %v10536_v13, %v10497_v58 }
 0x66b   : > { %v10284_v18 = vadd.f32 %v10272_v42, %v10231_v7 }
 0x66d   : > { %v10533_v46 = vpop.xlane.xlu1 %10532  ;;  %v10338_v44 = vadd.f32 %v10326_v27, %v10284_v18 }
 0x66e   : > { %v10489_v30 = vpop.xlane.xlu0 %10488  ;;  %v10549_v3 = vadd.f32 %v10533_v46, %v10496_v29 }
 0x66f   : > { %v10391_v62 = vadd.f32 %v10379_v38, %v10338_v44 }
 0x671   : > { %v10586_v14 = vpop.xlane.xlu1 %10585  ;;  %v10444_v53 = vadd.f32 %v10432_v47, %v10391_v62 }
 0x672   : > { %v10542_v10 = vpop.xlane.xlu0 %10541  ;;  %v10602_v38 = vadd.f32 %v10586_v14, %v10549_v3 }
 0x675   : > { %v10332_v0 = vpop.xlane.xlu1 %10331 }
 0x676   : > { %v10172_v31 = vpop.xlane.xlu0 %10171 }
 0x679   : > { %v10385_v32 = vpop.xlane.xlu1 %10384 }
 0x67a   : > { %v10545_v50 = vpop.xlane.xlu0 %10544 }
 0x67d   : > { %v10438_v51 = vpop.xlane.xlu1 %10437 }
 0x67e   : > { %v10595_v9 = vpop.xlane.xlu0 %10594 }
 0x681   : > { %v10225_v37 = vpop.xlane.xlu1 %10224 }
 0x682   : > { %v10329_v28 = vpop.xlane.xlu0 %10328  ;;  %v10233_v2 = vadd.f32 %v10225_v37, %v10172_v31 }
 0x683   : > { %v10339_v36 = vadd.f32 %v10329_v28, %v10285_v19 }
 0x685   : > { %v10278_v11 = vpop.xlane.xlu1 %10277 }
 0x686   : > { %v10286_v40 = vadd.f32 %v10278_v11, %v10233_v2  ;;  %v10382_v57 = vpop.xlane.xlu0 %10381 }
 0x687   : > { %v10392_v59 = vadd.f32 %v10382_v57, %v10339_v36 }
 0x688   : > { %v10340_v43 = vadd.f32 %v10332_v0, %v10286_v40 }
 0x689   : > { %v10589_v6 = vpop.xlane.xlu1 %10588 }
 0x68a   : > { %v10393_v4 = vadd.f32 %v10385_v32, %v10340_v43  ;;  %v10435_v35 = vpop.xlane.xlu0 %10434  ;;  %v10603_v49 = vadd.f32 %v10589_v6, %v10550_v63  ;;  %v10634_v6 = vld [vmem:[%s18317_s9 + $0x8] sm:$0xff] }
 0x68b   : > { %v10445_v21 = vadd.f32 %v10435_v35, %v10392_v59 }
 0x68c   : > { %v10446_v20 = vadd.f32 %v10438_v51, %v10393_v4 }
 0x68d   : > { %v10592_v34 = vpop.xlane.xlu1 %10591  ;;  %v10499_v1 = vadd.f32 %v10489_v30, %v10445_v21 }
 0x68e   : > { %v10486_v5 = vpop.xlane.xlu0 %10485  ;;  %v10500_v39 = vadd.f32 %v18220_v25, %v10446_v20 }
 0x68f   : > { %v10498_v16 = vadd.f32 %v10486_v5, %v10444_v53  ;;  %v10552_v54 = vadd.f32 %v10542_v10, %v10499_v1 }
 0x690   : > { %v10553_v56 = vadd.f32 %v10545_v50, %v10500_v39 }
 0x691   : > { %v10598_v27 = vpop.xlane.xlu1 %10597  ;;  %v10605_v42 = vadd.f32 %v10595_v9, %v10552_v54 }
 0x692   : > { %v10539_v48 = vpop.xlane.xlu0 %10538  ;;  %v10606_v47 = vadd.f32 %v10598_v27, %v10553_v56 }
 0x693   : > { %v10551_v33 = vadd.f32 %v10539_v48, %v10498_v16 }
 0x695   : > { %v10604_v30 = vadd.f32 %v10592_v34, %v10551_v33 }
 0x69a   : > { %v10615_v25 = vpop.permute.xlu0 %10614 }
 0x69b   : > { %v10617_v22 = vadd.f32 %v10615_v25, %v18228_v15  ;;  %v10618_v61 = vadd.f32 %v10615_v25, %v18232_v12  ;;  %v10619_v52 = vadd.f32 %v10615_v25, %v18234_v8  ;;  %v10620_v10 = vadd.f32 %v10615_v25, %v10602_v38 }
 0x69c   : > { %v10621_v0 = vadd.f32 %v10615_v25, %v10603_v49  ;;  %v10622_v31 = vadd.f32 %v10615_v25, %v10604_v30  ;;  %v10623_v46 = vadd.f32 %v10615_v25, %v10605_v42  ;;  %v10624_v32 = vadd.f32 %v10615_v25, %v10606_v47 }
 0x69d   : > { %v10625_v13 = vmax.f32 %v10617_v22, 0.0  ;;  %v10626_v14 = vmax.f32 %v10618_v61, 0.0  ;;  %v10627_v50 = vmax.f32 %v10619_v52, 0.0  ;;  %v10628_v51 = vmax.f32 %v10620_v10, 0.0 }
 0x69e   : > { %v10629_v37 = vmax.f32 %v10621_v0, 0.0  ;;  %v10630_v7 = vmax.f32 %v10622_v31, 0.0  ;;  %v10631_v11 = vmax.f32 %v10623_v46, 0.0  ;;  %v10632_v15 = vmax.f32 %v10624_v32, 0.0 }
 0x69f   : > { %v10648_v9 = vrot.slane %v10625_v13, %v10647_v26  ;;  %v10652_v28 = vrot.slane %v10626_v14, %v10647_v26  ;;  %v10656_v2 = vrot.slane %v10627_v50, %v10647_v26  ;;  %v10660_v24 = vrot.slane %v10628_v51, %v10647_v26 }
 0x6a0   : > { %v10664_v8 = vrot.slane %v10629_v37, %v10647_v26  ;;  %v10668_v40 = vrot.slane %v10630_v7, %v10647_v26  ;;  %v10672_v19 = vrot.slane %v10631_v11, %v10647_v26  ;;  %v10676_v44 = vrot.slane %v10632_v15, %v10647_v26 }
 0x6a1   : > { %v10677_v12 = vsel %vm8647_vm5, %v10652_v28, %v10648_v9 }
 0x6a2   : > { %v10678_v18 = vsel %vm8649_vm6, %v10656_v2, %v10677_v12 }
 0x6a3   : > { %v10679_v57 = vsel %vm8651_vm7, %v10660_v24, %v10678_v18 }
 0x6a4   : > { %v10680_v43 = vsel %vm8653_vm8, %v10664_v8, %v10679_v57 }
 0x6a5   : > { %v10681_v36 = vsel %vm8655_vm9, %v10668_v40, %v10680_v43 }
 0x6a6   : > { %v10682_v4 = vsel %vm8657_vm10, %v10672_v19, %v10681_v36 }
 0x6a7   : > { %v10683_v35 = vsel %vm8659_vm11, %v10676_v44, %v10682_v4 }
 0x6a8   : > { %13857 = vmatprep.subr.mxu1 %v10683_v35 }
 0x6a9   : > { %13858 = vmatpush3.msra.mxu1 %v10683_v35 }
 0x6aa   : > { %13860 = vmatmul.mubr.msk.f32.vlgmr.msra.gmra.mxu1 %vm10685_vm12, %v10634_v6  ;;  %13862 = vmatprep.subr.mxu1 %v10767_v17 }
 0x6ab   : > { %13863 = vmatpush3.msra.mxu1 %v10767_v17 }
 0x76a   : > { %v13861_v59 = vpop.f32.mrf.mxu1 }
 0x76c   : > { %v10758_v23 = vpop.f32.mrf.mxu1 }
 0x76d   : > { %13864 = vmatprep.mubr.msk.f32.mxu1 %vm10685_vm12, %v10758_v23 }
 0x76e   : > { %13865 = vmatmul.mubr.msk.f32.vlgmr.msra.gmra.mxu1 %vm10685_vm12, %v13861_v59 }
 0x82e   : > { %v13866_v21 = vpop.f32.mrf.mxu1 }
 0x82f   : > { %10851 = vst.msk [vmem:[%s396_s30 + $0x8] sm:$0xff] %vm10849_vm13, %v13866_v21 }
 0x830   : > { %v10840_v62 = vpop.f32.mrf.mxu1 }
 0x831   : > { %10850 = vst.msk [vmem:[%s396_s30] sm:$0xff] %vm10849_vm13, %v10840_v62 }
 0x832   : > { %13967 = shalt.err (!%p13964_p0)
}
 0x833   : > { %s13968_s25 = scalar_lea.hbm %s18266_s16, 256  ;;  %s13972_s12 = scalar_lea.hbm %s18319_s11, 512 }
 0x834   : > { %p13969_p1 = scmp.ne.s32.totalorder %s18266_s16, %s13968_s25  ;;  %p13973_p4 = scmp.lt.s32.totalorder %s18266_s16, %s18319_s11 }
 0x835   : > { %p13974_p7 = scmp.lt.s32.totalorder %s13972_s12, %s13968_s25 }
 0x836   : > { %p13970_p2 = pnand %p13969_p1, %p14130_p5 }
 0x837   : > { %p13975_p6 = por %p13974_p7, %p13973_p4 }
 0x838   : > { %p13971_p3 = pneg %p13970_p2 }
 0x83a   : > { %p13976_p8 = pnand %p13975_p6, %p13971_p3 }
 0x83c   : > { %13979 = shalt.err (!%p13976_p8)
}
 0x83d   : > { %s14027_s18 = smov 128   ;;  %s14028_s23 = smov 8  }
 0x83e   : > { %13873 = dma.vmem_to_hbm [thread:$0]  (%p14130_p5), %s18261_s13, 256, %s18266_s16, %s18268_s17, %s14027_s18, %s14027_s18, %s14028_s23  }
 0x83f PF: > { %p13885_p9 = scmp.ge.s32.totalorder %s14018_s22, 2  ;;  %s10881_s26 = sand.u32 1, %s14006_s19  }
 0x840   : > { %p18728_p10 = scmp.ne.s32.totalorder %s18382_s29, 0  ;;  %s10882_s25 = scalar_lea.sflag [#allocation8], %s10881_s26 }
 0x842   : > { %p13880_p11 = pnand %p13885_p9, %p18728_p10 }
 0x844   : > { %p13881_p12 = pneg %p13880_p11 }
 0x846   : > { %14001 = dma.done.wait (%p13881_p12), %s10882_s25, 256  }
 0x847   : > { %14003 = vsyncadd (%p13881_p12), %s10882_s25, 4294967040  ;;  %p24_p13 = scmp.ge.s32.totalorder %s14117_s24, 4   ;;  %s18729_s19 = smov %s14010_s20 }
 0x848   : > { %s18730_s20 = smov %s14014_s21  ;;  %s18731_s21 = smov %s14128_s27 }
 0x849   : > { %s18732_s22 = smov %s14117_s24  ;;  %26 = sbr.rel (!%p24_p13) target bundleno = 7 (0x7), region = 136 }
 0x84e   :  { %10887 = vsyncpa [#allocation7], 1 }
 0x84f   :  { %10889 = vsyncpa [#allocation7 + $0x1], 1 }
 0x850   :  { %10890 = vsyncpa [#allocation8], 1 }
 0x851   :  { %10892 = vsyncpa [#allocation8 + $0x1], 1 }

</bundles_post_ra>
